<compile_context>
chip_gen: v6e
topology: v6e:2x2x1
jax: 0.10.0
libtpu: 0.0.40
codegen_flags: <defaults>
</compile_context>

<pallas_src>
import functools

import jax
import jax.numpy as jnp
from jax import lax
from jax.experimental import pallas as pl
from jax.experimental.pallas import tpu as pltpu

_BN_EPS = 1e-5


# ---------------------------------------------------------------------------
# Pallas kernel (one grid step per batch element)
# ---------------------------------------------------------------------------
def _inception_resnet_b_kernel(
    x_ref,                 # (C_in, Lp)
    w1_ref, b1_ref,        # branch1x1 (BN folded):      (192, C_in), (192, 1)
    w7a_ref, b7a_ref,      # branch7x7 stage 1 (1x1):    (128, C_in), (128, 1)
    w7b_ref, b7b_ref,      # branch7x7 stage 2 (k=7):    (7, 160, 128), (160, 1)
    w7c_ref, b7c_ref,      # branch7x7 stage 3 (k=7):    (7, 192, 160), (192, 1)
    wr1_ref, wr2_ref,      # reduction1x1 split at the concat: (C_out, 192) each
    wsc_ref,               # shortcut 1x1:               (C_out, C_in)
    bf_ref,                # fused bias (red, sc, final BN): (C_out, 1)
    o_ref,                 # (C_out, Lp)
    *, L, Lp):
  f32 = jnp.float32
  x = x_ref[...]                                        # (C_in, Lp)

  # Valid-length mask over lanes (positions >= L are padding of the signal).
  lane = lax.broadcasted_iota(jnp.int32, (1, Lp), 1)
  valid = jnp.where(lane < L, 1.0, 0.0).astype(f32)     # (1, Lp)

  # diff[j, l] = j - l.  Shift matrix S_d = (diff == d) gives
  #   (v @ S_d)[:, l] = v[:, l + d]   (zero outside [0, Lp) -> zero padding).
  row = lax.broadcasted_iota(jnp.int32, (Lp, Lp), 0)
  col = lax.broadcasted_iota(jnp.int32, (Lp, Lp), 1)
  diff = row - col

  def conv1x1(w_ref, b_ref, v):
    return jnp.dot(w_ref[...], v, preferred_element_type=f32) + b_ref[...]

  def conv7(w_ref, b_ref, v):
    # v: (C, Lp), already zero for lanes >= L. 7-tap conv, zero padding 3.
    acc = jnp.dot(w_ref[3], v, preferred_element_type=f32)        # center tap
    for k in range(7):
      d = k - 3
      if d == 0:
        continue
      shift = jnp.where(diff == d, 1.0, 0.0).astype(f32)          # (Lp, Lp)
      v_d = jnp.dot(v, shift, preferred_element_type=f32)         # v[:, l + d]
      acc = acc + jnp.dot(w_ref[k], v_d, preferred_element_type=f32)
    return acc + b_ref[...]

  relu = lambda v: jnp.maximum(v, 0.0)

  # branch7x7: 1x1 -> k7 -> k7 (BN + ReLU folded per stage). Mask each stage
  # that feeds a k=7 conv so the padded lanes act like PyTorch's zero padding.
  t = relu(conv1x1(w7a_ref, b7a_ref, x)) * valid        # (128, Lp)
  t = relu(conv7(w7b_ref, b7b_ref, t)) * valid          # (160, Lp)
  t = relu(conv7(w7c_ref, b7c_ref, t))                  # (192, Lp)

  # branch1x1.
  br1 = relu(conv1x1(w1_ref, b1_ref, x))                # (192, Lp)

  # reduction1x1(concat([br1, t])) * 0.1 + shortcut(x), final BN, ReLU.
  # The 0.1 scale, both conv biases and the BN affine are folded into
  # wr1 / wr2 / wsc / bf by the wrapper.
  y = (jnp.dot(wr1_ref[...], br1, preferred_element_type=f32)
       + jnp.dot(wr2_ref[...], t, preferred_element_type=f32)
       + jnp.dot(wsc_ref[...], x, preferred_element_type=f32)
       + bf_ref[...])
  o_ref[...] = relu(y).astype(o_ref.dtype)


# ---------------------------------------------------------------------------
# Wrapper: BN folding, padding, BlockSpecs
# ---------------------------------------------------------------------------
def _fold_bn_into_conv(w, gamma, beta, mean, var, eps=_BN_EPS):
  """BN(conv(x; w)) == conv(x; w * s) + (beta - mean * s), s = gamma/sqrt(var+eps)."""
  s = gamma / jnp.sqrt(var + eps)
  return w * s[:, None, None], beta - mean * s


def inception_resnet_b(x, p):
  """x: (N, C_in, L) float32; p: dict of raw (PyTorch-layout) parameters."""
  N, C_in, L = x.shape
  C_out = p["sc_w"].shape[0]
  Lp = ((L + 127) // 128) * 128            # lane-dense length
  f32 = jnp.float32

  # Fold each BasicConv1d's BatchNorm into its conv.
  w1, b1 = _fold_bn_into_conv(p["b1_w"], p["b1_gamma"], p["b1_beta"],
                              p["b1_mean"], p["b1_var"])
  w7a, b7a = _fold_bn_into_conv(p["b7a_w"], p["b7a_gamma"], p["b7a_beta"],
                                p["b7a_mean"], p["b7a_var"])
  w7b, b7b = _fold_bn_into_conv(p["b7b_w"], p["b7b_gamma"], p["b7b_beta"],
                                p["b7b_mean"], p["b7b_var"])
  w7c, b7c = _fold_bn_into_conv(p["b7c_w"], p["b7c_gamma"], p["b7c_beta"],
                                p["b7c_mean"], p["b7c_var"])

  # Fold the trailing BN and the 0.1 residual scale into reduction/shortcut.
  s_f = p["f_gamma"] / jnp.sqrt(p["f_var"] + _BN_EPS)
  wred = p["red_w"][:, :, 0]                      # (C_out, 384)
  wsc = p["sc_w"][:, :, 0]                        # (C_out, C_in)
  wr1 = (0.1 * s_f[:, None]) * wred[:, :192]      # acts on branch1x1 output
  wr2 = (0.1 * s_f[:, None]) * wred[:, 192:]      # acts on branch7x7 output
  wsc_eff = s_f[:, None] * wsc
  b_final = s_f * (0.1 * p["red_b"] + p["sc_b"] - p["f_mean"]) + p["f_beta"]

  x_p = jnp.pad(x, ((0, 0), (0, 0), (0, Lp - L))).astype(f32)
  args = (
      x_p,
      w1[:, :, 0].astype(f32), b1.reshape(-1, 1).astype(f32),
      w7a[:, :, 0].astype(f32), b7a.reshape(-1, 1).astype(f32),
      jnp.transpose(w7b, (2, 0, 1)).astype(f32), b7b.reshape(-1, 1).astype(f32),
      jnp.transpose(w7c, (2, 0, 1)).astype(f32), b7c.reshape(-1, 1).astype(f32),
      wr1.astype(f32), wr2.astype(f32), wsc_eff.astype(f32),
      b_final.reshape(-1, 1).astype(f32),
  )

  def const(shape):
    zeros = (0,) * len(shape)
    return pl.BlockSpec(shape, lambda n: zeros)

  in_specs = [
      pl.BlockSpec((pl.Squeezed(), C_in, Lp), lambda n: (n, 0, 0)),
      const((192, C_in)), const((192, 1)),
      const((128, C_in)), const((128, 1)),
      const((7, 160, 128)), const((160, 1)),
      const((7, 192, 160)), const((192, 1)),
      const((C_out, 192)), const((C_out, 192)), const((C_out, C_in)),
      const((C_out, 1)),
  ]

  y_p = pl.pallas_call(
      functools.partial(_inception_resnet_b_kernel, L=L, Lp=Lp),
      out_shape=jax.ShapeDtypeStruct((N, C_out, Lp), f32),
      grid_spec=pltpu.PrefetchScalarGridSpec(
          num_scalar_prefetch=0,
          grid=(N,),
          in_specs=in_specs,
          out_specs=pl.BlockSpec((pl.Squeezed(), C_out, Lp),
                                 lambda n: (n, 0, 0)),
      ),
      compiler_params=pltpu.CompilerParams(
          dimension_semantics=("parallel",),
          vmem_limit_bytes=32 * 1024 * 1024,
      ),
  )(*args)

  return y_p[:, :, :L]


# ---------------------------------------------------------------------------
# Pure-JAX reference (mirrors the PyTorch module, eval-mode BatchNorm)
# ---------------------------------------------------------------------------
def _conv1d_ref(x, w, padding):
  # x: (N, C, L), w: (O, C, K) — PyTorch Conv1d (cross-correlation).
  K = w.shape[-1]
  L = x.shape[-1]
  xp = jnp.pad(x, ((0, 0), (0, 0), (padding, padding)))
  cols = jnp.stack([xp[:, :, k:k + L] for k in range(K)], axis=-1)  # (N,C,L,K)
  return jnp.einsum("nclk,ock->nol", cols, w,
                    precision=jax.lax.Precision.HIGHEST)


def _bn_ref(x, gamma, beta, mean, var, eps=_BN_EPS):
  return ((x - mean[None, :, None]) / jnp.sqrt(var[None, :, None] + eps)
          * gamma[None, :, None] + beta[None, :, None])


def inception_resnet_b_reference(x, p):
  relu = lambda v: jnp.maximum(v, 0.0)

  def basic(v, w, g, b, m, s, pad):
    return relu(_bn_ref(_conv1d_ref(v, w, pad), g, b, m, s))

  br1 = basic(x, p["b1_w"], p["b1_gamma"], p["b1_beta"],
              p["b1_mean"], p["b1_var"], 0)
  t = basic(x, p["b7a_w"], p["b7a_gamma"], p["b7a_beta"],
            p["b7a_mean"], p["b7a_var"], 0)
  t = basic(t, p["b7b_w"], p["b7b_gamma"], p["b7b_beta"],
            p["b7b_mean"], p["b7b_var"], 3)
  t = basic(t, p["b7c_w"], p["b7c_gamma"], p["b7c_beta"],
            p["b7c_mean"], p["b7c_var"], 3)
  residual = jnp.concatenate([br1, t], axis=1)
  residual = (_conv1d_ref(residual, p["red_w"], 0)
              + p["red_b"][None, :, None]) * 0.1
  shortcut = _conv1d_ref(x, p["sc_w"], 0) + p["sc_b"][None, :, None]
  out = _bn_ref(residual + shortcut, p["f_gamma"], p["f_beta"],
                p["f_mean"], p["f_var"])
  return relu(out)


# ---------------------------------------------------------------------------
# Deterministic synthetic parameters
# ---------------------------------------------------------------------------
def _make_params(key, c_in, c_out):
  ks = list(jax.random.split(key, 16))

  def uconv(k, o, i, ksz):
    bound = 1.0 / float((i * ksz) ** 0.5)
    return jax.random.uniform(k, (o, i, ksz), jnp.float32, -bound, bound)

  def ubias(k, o, fan_in):
    bound = 1.0 / float(fan_in ** 0.5)
    return jax.random.uniform(k, (o,), jnp.float32, -bound, bound)

  def bn(k, c, prefix):
    k1, k2, k3, k4 = jax.random.split(k, 4)
    return {
        prefix + "_gamma": jax.random.uniform(k1, (c,), jnp.float32, 0.5, 1.5),
        prefix + "_beta": jax.random.uniform(k2, (c,), jnp.float32, -0.2, 0.2),
        prefix + "_mean": 0.1 * jax.random.normal(k3, (c,), jnp.float32),
        prefix + "_var": jax.random.uniform(k4, (c,), jnp.float32, 0.5, 1.5),
    }

  p = {}
  p["b1_w"] = uconv(ks[0], 192, c_in, 1);   p.update(bn(ks[1], 192, "b1"))
  p["b7a_w"] = uconv(ks[2], 128, c_in, 1);  p.update(bn(ks[3], 128, "b7a"))
  p["b7b_w"] = uconv(ks[4], 160, 128, 7);   p.update(bn(ks[5], 160, "b7b"))
  p["b7c_w"] = uconv(ks[6], 192, 160, 7);   p.update(bn(ks[7], 192, "b7c"))
  p["red_w"] = uconv(ks[8], c_out, 384, 1); p["red_b"] = ubias(ks[9], c_out, 384)
  p["sc_w"] = uconv(ks[10], c_out, c_in, 1); p["sc_b"] = ubias(ks[11], c_out, c_in)
  p.update(bn(ks[12], c_out, "f"))
  return p


if __name__ == "__main__":
  key = jax.random.PRNGKey(0)
  kx, kp = jax.random.split(key)

  N, C_in, C_out, L = 2, 4, 16, 16
  x = jax.random.normal(kx, (N, C_in, L), dtype=jnp.float32)
  params = _make_params(kp, C_in, C_out)

  fwd = jax.jit(inception_resnet_b)
  out = jax.block_until_ready(fwd(x, params))
  ref = inception_resnet_b_reference(x, params)

  assert out.shape == (N, C_out, L), out.shape
  assert jnp.allclose(out, ref, atol=2e-2, rtol=2e-2), (
      "max abs diff = %f" % float(jnp.max(jnp.abs(out - ref))))
  print("KERNEL_OK")
</pallas_src>

<mosaic_0001>
module attributes {stable_mosaic.version = 11 : i64} {
  func.func @_inception_resnet_b_kernel(%arg0: i32, %arg1: memref<1x4x128xf32, #tpu.memory_space<vmem>>, %arg2: memref<192x4xf32, #tpu.memory_space<vmem>>, %arg3: memref<192x1xf32, #tpu.memory_space<vmem>>, %arg4: memref<128x4xf32, #tpu.memory_space<vmem>>, %arg5: memref<128x1xf32, #tpu.memory_space<vmem>>, %arg6: memref<7x160x128xf32, #tpu.memory_space<vmem>>, %arg7: memref<160x1xf32, #tpu.memory_space<vmem>>, %arg8: memref<7x192x160xf32, #tpu.memory_space<vmem>>, %arg9: memref<192x1xf32, #tpu.memory_space<vmem>>, %arg10: memref<16x192xf32, #tpu.memory_space<vmem>>, %arg11: memref<16x192xf32, #tpu.memory_space<vmem>>, %arg12: memref<16x4xf32, #tpu.memory_space<vmem>>, %arg13: memref<16x1xf32, #tpu.memory_space<vmem>>, %arg14: memref<1x16x128xf32, #tpu.memory_space<vmem>>) attributes {dimension_semantics = [#tpu.dimension_semantics<parallel>], iteration_bounds = array<i64: 2>, scalar_prefetch = 0 : i64, scratch_operands = 0 : i64, tpu.core_type = #tpu.core_type<tc>, window_params = [{transform_indices = @transform_0, window_bounds = array<i64: 1, 4, 128>}, {pipeline_mode = #tpu.pipeline_mode<synchronous>, transform_indices = @transform_1, window_bounds = array<i64: 192, 4>}, {pipeline_mode = #tpu.pipeline_mode<synchronous>, transform_indices = @transform_2, window_bounds = array<i64: 192, 1>}, {pipeline_mode = #tpu.pipeline_mode<synchronous>, transform_indices = @transform_3, window_bounds = array<i64: 128, 4>}, {pipeline_mode = #tpu.pipeline_mode<synchronous>, transform_indices = @transform_4, window_bounds = array<i64: 128, 1>}, {pipeline_mode = #tpu.pipeline_mode<synchronous>, transform_indices = @transform_5, window_bounds = array<i64: 7, 160, 128>}, {pipeline_mode = #tpu.pipeline_mode<synchronous>, transform_indices = @transform_6, window_bounds = array<i64: 160, 1>}, {pipeline_mode = #tpu.pipeline_mode<synchronous>, transform_indices = @transform_7, window_bounds = array<i64: 7, 192, 160>}, {pipeline_mode = #tpu.pipeline_mode<synchronous>, transform_indices = @transform_8, window_bounds = array<i64: 192, 1>}, {pipeline_mode = #tpu.pipeline_mode<synchronous>, transform_indices = @transform_9, window_bounds = array<i64: 16, 192>}, {pipeline_mode = #tpu.pipeline_mode<synchronous>, transform_indices = @transform_10, window_bounds = array<i64: 16, 192>}, {pipeline_mode = #tpu.pipeline_mode<synchronous>, transform_indices = @transform_11, window_bounds = array<i64: 16, 4>}, {pipeline_mode = #tpu.pipeline_mode<synchronous>, transform_indices = @transform_12, window_bounds = array<i64: 16, 1>}, {transform_indices = @transform_13, window_bounds = array<i64: 1, 16, 128>}]} {
    %c0 = arith.constant 0 : index
    %c0_0 = arith.constant 0 : index
    %c0_1 = arith.constant 0 : index
    %0 = vector.load %arg1[%c0, %c0_0, %c0_1] : memref<1x4x128xf32, #tpu.memory_space<vmem>>, vector<1x4x128xf32>
    %1 = vector.shape_cast %0 : vector<1x4x128xf32> to vector<4x128xf32>
    %2 = tpu.iota {dimensions = array<i32: 1>} : vector<1x128xi32>
    %c16_i32 = arith.constant 16 : i32
    %3 = vector.broadcast %c16_i32 : i32 to vector<1x128xi32>
    %4 = arith.cmpi slt, %2, %3 : vector<1x128xi32>
    %cst = arith.constant 1.000000e+00 : f32
    %cst_2 = arith.constant 0.000000e+00 : f32
    %5 = vector.broadcast %cst : f32 to vector<1x128xf32>
    %6 = vector.broadcast %cst_2 : f32 to vector<1x128xf32>
    %7 = arith.select %4, %5, %6 : vector<1x128xi1>, vector<1x128xf32>
    %8 = tpu.iota {dimensions = array<i32: 0>} : vector<128x128xi32>
    %9 = tpu.iota {dimensions = array<i32: 1>} : vector<128x128xi32>
    %10 = arith.subi %8, %9 : vector<128x128xi32>
    %c0_3 = arith.constant 0 : index
    %c0_4 = arith.constant 0 : index
    %11 = vector.load %arg4[%c0_3, %c0_4] : memref<128x4xf32, #tpu.memory_space<vmem>>, vector<128x4xf32>
    %cst_5 = arith.constant dense<0.000000e+00> : vector<128x128xf32>
    %12 = tpu.matmul %11, %1, %cst_5 {dimension_numbers = #tpu.dot_dimension_numbers<[1], [0], [0], [1], [0, 0, 1, 1], [], []>} : vector<128x4xf32>, vector<4x128xf32>, vector<128x128xf32> -> vector<128x128xf32>
    %c0_6 = arith.constant 0 : index
    %c0_7 = arith.constant 0 : index
    %13 = vector.load %arg5[%c0_6, %c0_7] : memref<128x1xf32, #tpu.memory_space<vmem>>, vector<128x1xf32>
    %14 = vector.broadcast %13 : vector<128x1xf32> to vector<128x128xf32>
    %15 = arith.addf %12, %14 : vector<128x128xf32>
    %cst_8 = arith.constant 0.000000e+00 : f32
    %16 = vector.broadcast %cst_8 : f32 to vector<128x128xf32>
    %17 = arith.maximumf %15, %16 : vector<128x128xf32>
    %18 = vector.broadcast %7 : vector<1x128xf32> to vector<128x128xf32>
    %19 = arith.mulf %17, %18 : vector<128x128xf32>
    %c3 = arith.constant 3 : index
    %c0_9 = arith.constant 0 : index
    %c0_10 = arith.constant 0 : index
    %20 = vector.load %arg6[%c3, %c0_9, %c0_10] : memref<7x160x128xf32, #tpu.memory_space<vmem>>, vector<1x160x128xf32>
    %21 = vector.shape_cast %20 : vector<1x160x128xf32> to vector<160x128xf32>
    %cst_11 = arith.constant dense<0.000000e+00> : vector<160x128xf32>
    %22 = tpu.matmul %21, %19, %cst_11 {dimension_numbers = #tpu.dot_dimension_numbers<[1], [0], [0], [1], [0, 0, 1, 1], [], []>} : vector<160x128xf32>, vector<128x128xf32>, vector<160x128xf32> -> vector<160x128xf32>
    %c-3_i32 = arith.constant -3 : i32
    %23 = vector.broadcast %c-3_i32 : i32 to vector<128x128xi32>
    %24 = arith.cmpi eq, %10, %23 : vector<128x128xi32>
    %cst_12 = arith.constant 1.000000e+00 : f32
    %cst_13 = arith.constant 0.000000e+00 : f32
    %25 = vector.broadcast %cst_12 : f32 to vector<128x128xf32>
    %26 = vector.broadcast %cst_13 : f32 to vector<128x128xf32>
    %27 = arith.select %24, %25, %26 : vector<128x128xi1>, vector<128x128xf32>
    %cst_14 = arith.constant dense<0.000000e+00> : vector<128x128xf32>
    %28 = tpu.matmul %19, %27, %cst_14 {dimension_numbers = #tpu.dot_dimension_numbers<[1], [0], [0], [1], [0, 0, 1, 1], [], []>} : vector<128x128xf32>, vector<128x128xf32>, vector<128x128xf32> -> vector<128x128xf32>
    %c0_15 = arith.constant 0 : index
    %c0_16 = arith.constant 0 : index
    %c0_17 = arith.constant 0 : index
    %29 = vector.load %arg6[%c0_15, %c0_16, %c0_17] : memref<7x160x128xf32, #tpu.memory_space<vmem>>, vector<1x160x128xf32>
    %30 = vector.shape_cast %29 : vector<1x160x128xf32> to vector<160x128xf32>
    %cst_18 = arith.constant dense<0.000000e+00> : vector<160x128xf32>
    %31 = tpu.matmul %30, %28, %cst_18 {dimension_numbers = #tpu.dot_dimension_numbers<[1], [0], [0], [1], [0, 0, 1, 1], [], []>} : vector<160x128xf32>, vector<128x128xf32>, vector<160x128xf32> -> vector<160x128xf32>
    %32 = arith.addf %22, %31 : vector<160x128xf32>
    %c-2_i32 = arith.constant -2 : i32
    %33 = vector.broadcast %c-2_i32 : i32 to vector<128x128xi32>
    %34 = arith.cmpi eq, %10, %33 : vector<128x128xi32>
    %cst_19 = arith.constant 1.000000e+00 : f32
    %cst_20 = arith.constant 0.000000e+00 : f32
    %35 = vector.broadcast %cst_19 : f32 to vector<128x128xf32>
    %36 = vector.broadcast %cst_20 : f32 to vector<128x128xf32>
    %37 = arith.select %34, %35, %36 : vector<128x128xi1>, vector<128x128xf32>
    %cst_21 = arith.constant dense<0.000000e+00> : vector<128x128xf32>
    %38 = tpu.matmul %19, %37, %cst_21 {dimension_numbers = #tpu.dot_dimension_numbers<[1], [0], [0], [1], [0, 0, 1, 1], [], []>} : vector<128x128xf32>, vector<128x128xf32>, vector<128x128xf32> -> vector<128x128xf32>
    %c1 = arith.constant 1 : index
    %c0_22 = arith.constant 0 : index
    %c0_23 = arith.constant 0 : index
    %39 = vector.load %arg6[%c1, %c0_22, %c0_23] : memref<7x160x128xf32, #tpu.memory_space<vmem>>, vector<1x160x128xf32>
    %40 = vector.shape_cast %39 : vector<1x160x128xf32> to vector<160x128xf32>
    %cst_24 = arith.constant dense<0.000000e+00> : vector<160x128xf32>
    %41 = tpu.matmul %40, %38, %cst_24 {dimension_numbers = #tpu.dot_dimension_numbers<[1], [0], [0], [1], [0, 0, 1, 1], [], []>} : vector<160x128xf32>, vector<128x128xf32>, vector<160x128xf32> -> vector<160x128xf32>
    %42 = arith.addf %32, %41 : vector<160x128xf32>
    %c-1_i32 = arith.constant -1 : i32
    %43 = vector.broadcast %c-1_i32 : i32 to vector<128x128xi32>
    %44 = arith.cmpi eq, %10, %43 : vector<128x128xi32>
    %cst_25 = arith.constant 1.000000e+00 : f32
    %cst_26 = arith.constant 0.000000e+00 : f32
    %45 = vector.broadcast %cst_25 : f32 to vector<128x128xf32>
    %46 = vector.broadcast %cst_26 : f32 to vector<128x128xf32>
    %47 = arith.select %44, %45, %46 : vector<128x128xi1>, vector<128x128xf32>
    %cst_27 = arith.constant dense<0.000000e+00> : vector<128x128xf32>
    %48 = tpu.matmul %19, %47, %cst_27 {dimension_numbers = #tpu.dot_dimension_numbers<[1], [0], [0], [1], [0, 0, 1, 1], [], []>} : vector<128x128xf32>, vector<128x128xf32>, vector<128x128xf32> -> vector<128x128xf32>
    %c2 = arith.constant 2 : index
    %c0_28 = arith.constant 0 : index
    %c0_29 = arith.constant 0 : index
    %49 = vector.load %arg6[%c2, %c0_28, %c0_29] : memref<7x160x128xf32, #tpu.memory_space<vmem>>, vector<1x160x128xf32>
    %50 = vector.shape_cast %49 : vector<1x160x128xf32> to vector<160x128xf32>
    %cst_30 = arith.constant dense<0.000000e+00> : vector<160x128xf32>
    %51 = tpu.matmul %50, %48, %cst_30 {dimension_numbers = #tpu.dot_dimension_numbers<[1], [0], [0], [1], [0, 0, 1, 1], [], []>} : vector<160x128xf32>, vector<128x128xf32>, vector<160x128xf32> -> vector<160x128xf32>
    %52 = arith.addf %42, %51 : vector<160x128xf32>
    %c1_i32 = arith.constant 1 : i32
    %53 = vector.broadcast %c1_i32 : i32 to vector<128x128xi32>
    %54 = arith.cmpi eq, %10, %53 : vector<128x128xi32>
    %cst_31 = arith.constant 1.000000e+00 : f32
    %cst_32 = arith.constant 0.000000e+00 : f32
    %55 = vector.broadcast %cst_31 : f32 to vector<128x128xf32>
    %56 = vector.broadcast %cst_32 : f32 to vector<128x128xf32>
    %57 = arith.select %54, %55, %56 : vector<128x128xi1>, vector<128x128xf32>
    %cst_33 = arith.constant dense<0.000000e+00> : vector<128x128xf32>
    %58 = tpu.matmul %19, %57, %cst_33 {dimension_numbers = #tpu.dot_dimension_numbers<[1], [0], [0], [1], [0, 0, 1, 1], [], []>} : vector<128x128xf32>, vector<128x128xf32>, vector<128x128xf32> -> vector<128x128xf32>
    %c4 = arith.constant 4 : index
    %c0_34 = arith.constant 0 : index
    %c0_35 = arith.constant 0 : index
    %59 = vector.load %arg6[%c4, %c0_34, %c0_35] : memref<7x160x128xf32, #tpu.memory_space<vmem>>, vector<1x160x128xf32>
    %60 = vector.shape_cast %59 : vector<1x160x128xf32> to vector<160x128xf32>
    %cst_36 = arith.constant dense<0.000000e+00> : vector<160x128xf32>
    %61 = tpu.matmul %60, %58, %cst_36 {dimension_numbers = #tpu.dot_dimension_numbers<[1], [0], [0], [1], [0, 0, 1, 1], [], []>} : vector<160x128xf32>, vector<128x128xf32>, vector<160x128xf32> -> vector<160x128xf32>
    %62 = arith.addf %52, %61 : vector<160x128xf32>
    %c2_i32 = arith.constant 2 : i32
    %63 = vector.broadcast %c2_i32 : i32 to vector<128x128xi32>
    %64 = arith.cmpi eq, %10, %63 : vector<128x128xi32>
    %cst_37 = arith.constant 1.000000e+00 : f32
    %cst_38 = arith.constant 0.000000e+00 : f32
    %65 = vector.broadcast %cst_37 : f32 to vector<128x128xf32>
    %66 = vector.broadcast %cst_38 : f32 to vector<128x128xf32>
    %67 = arith.select %64, %65, %66 : vector<128x128xi1>, vector<128x128xf32>
    %cst_39 = arith.constant dense<0.000000e+00> : vector<128x128xf32>
    %68 = tpu.matmul %19, %67, %cst_39 {dimension_numbers = #tpu.dot_dimension_numbers<[1], [0], [0], [1], [0, 0, 1, 1], [], []>} : vector<128x128xf32>, vector<128x128xf32>, vector<128x128xf32> -> vector<128x128xf32>
    %c5 = arith.constant 5 : index
    %c0_40 = arith.constant 0 : index
    %c0_41 = arith.constant 0 : index
    %69 = vector.load %arg6[%c5, %c0_40, %c0_41] : memref<7x160x128xf32, #tpu.memory_space<vmem>>, vector<1x160x128xf32>
    %70 = vector.shape_cast %69 : vector<1x160x128xf32> to vector<160x128xf32>
    %cst_42 = arith.constant dense<0.000000e+00> : vector<160x128xf32>
    %71 = tpu.matmul %70, %68, %cst_42 {dimension_numbers = #tpu.dot_dimension_numbers<[1], [0], [0], [1], [0, 0, 1, 1], [], []>} : vector<160x128xf32>, vector<128x128xf32>, vector<160x128xf32> -> vector<160x128xf32>
    %72 = arith.addf %62, %71 : vector<160x128xf32>
    %c3_i32 = arith.constant 3 : i32
    %73 = vector.broadcast %c3_i32 : i32 to vector<128x128xi32>
    %74 = arith.cmpi eq, %10, %73 : vector<128x128xi32>
    %cst_43 = arith.constant 1.000000e+00 : f32
    %cst_44 = arith.constant 0.000000e+00 : f32
    %75 = vector.broadcast %cst_43 : f32 to vector<128x128xf32>
    %76 = vector.broadcast %cst_44 : f32 to vector<128x128xf32>
    %77 = arith.select %74, %75, %76 : vector<128x128xi1>, vector<128x128xf32>
    %cst_45 = arith.constant dense<0.000000e+00> : vector<128x128xf32>
    %78 = tpu.matmul %19, %77, %cst_45 {dimension_numbers = #tpu.dot_dimension_numbers<[1], [0], [0], [1], [0, 0, 1, 1], [], []>} : vector<128x128xf32>, vector<128x128xf32>, vector<128x128xf32> -> vector<128x128xf32>
    %c6 = arith.constant 6 : index
    %c0_46 = arith.constant 0 : index
    %c0_47 = arith.constant 0 : index
    %79 = vector.load %arg6[%c6, %c0_46, %c0_47] : memref<7x160x128xf32, #tpu.memory_space<vmem>>, vector<1x160x128xf32>
    %80 = vector.shape_cast %79 : vector<1x160x128xf32> to vector<160x128xf32>
    %cst_48 = arith.constant dense<0.000000e+00> : vector<160x128xf32>
    %81 = tpu.matmul %80, %78, %cst_48 {dimension_numbers = #tpu.dot_dimension_numbers<[1], [0], [0], [1], [0, 0, 1, 1], [], []>} : vector<160x128xf32>, vector<128x128xf32>, vector<160x128xf32> -> vector<160x128xf32>
    %82 = arith.addf %72, %81 : vector<160x128xf32>
    %c0_49 = arith.constant 0 : index
    %c0_50 = arith.constant 0 : index
    %83 = vector.load %arg7[%c0_49, %c0_50] : memref<160x1xf32, #tpu.memory_space<vmem>>, vector<160x1xf32>
    %84 = vector.broadcast %83 : vector<160x1xf32> to vector<160x128xf32>
    %85 = arith.addf %82, %84 : vector<160x128xf32>
    %cst_51 = arith.constant 0.000000e+00 : f32
    %86 = vector.broadcast %cst_51 : f32 to vector<160x128xf32>
    %87 = arith.maximumf %85, %86 : vector<160x128xf32>
    %88 = vector.broadcast %7 : vector<1x128xf32> to vector<160x128xf32>
    %89 = arith.mulf %87, %88 : vector<160x128xf32>
    %c3_52 = arith.constant 3 : index
    %c0_53 = arith.constant 0 : index
    %c0_54 = arith.constant 0 : index
    %90 = vector.load %arg8[%c3_52, %c0_53, %c0_54] : memref<7x192x160xf32, #tpu.memory_space<vmem>>, vector<1x192x160xf32>
    %91 = vector.shape_cast %90 : vector<1x192x160xf32> to vector<192x160xf32>
    %cst_55 = arith.constant dense<0.000000e+00> : vector<192x128xf32>
    %92 = tpu.matmul %91, %89, %cst_55 {dimension_numbers = #tpu.dot_dimension_numbers<[1], [0], [0], [1], [0, 0, 1, 1], [], []>} : vector<192x160xf32>, vector<160x128xf32>, vector<192x128xf32> -> vector<192x128xf32>
    %c-3_i32_56 = arith.constant -3 : i32
    %93 = vector.broadcast %c-3_i32_56 : i32 to vector<128x128xi32>
    %94 = arith.cmpi eq, %10, %93 : vector<128x128xi32>
    %cst_57 = arith.constant 1.000000e+00 : f32
    %cst_58 = arith.constant 0.000000e+00 : f32
    %95 = vector.broadcast %cst_57 : f32 to vector<128x128xf32>
    %96 = vector.broadcast %cst_58 : f32 to vector<128x128xf32>
    %97 = arith.select %94, %95, %96 : vector<128x128xi1>, vector<128x128xf32>
    %cst_59 = arith.constant dense<0.000000e+00> : vector<160x128xf32>
    %98 = tpu.matmul %89, %97, %cst_59 {dimension_numbers = #tpu.dot_dimension_numbers<[1], [0], [0], [1], [0, 0, 1, 1], [], []>} : vector<160x128xf32>, vector<128x128xf32>, vector<160x128xf32> -> vector<160x128xf32>
    %c0_60 = arith.constant 0 : index
    %c0_61 = arith.constant 0 : index
    %c0_62 = arith.constant 0 : index
    %99 = vector.load %arg8[%c0_60, %c0_61, %c0_62] : memref<7x192x160xf32, #tpu.memory_space<vmem>>, vector<1x192x160xf32>
    %100 = vector.shape_cast %99 : vector<1x192x160xf32> to vector<192x160xf32>
    %cst_63 = arith.constant dense<0.000000e+00> : vector<192x128xf32>
    %101 = tpu.matmul %100, %98, %cst_63 {dimension_numbers = #tpu.dot_dimension_numbers<[1], [0], [0], [1], [0, 0, 1, 1], [], []>} : vector<192x160xf32>, vector<160x128xf32>, vector<192x128xf32> -> vector<192x128xf32>
    %102 = arith.addf %92, %101 : vector<192x128xf32>
    %c-2_i32_64 = arith.constant -2 : i32
    %103 = vector.broadcast %c-2_i32_64 : i32 to vector<128x128xi32>
    %104 = arith.cmpi eq, %10, %103 : vector<128x128xi32>
    %cst_65 = arith.constant 1.000000e+00 : f32
    %cst_66 = arith.constant 0.000000e+00 : f32
    %105 = vector.broadcast %cst_65 : f32 to vector<128x128xf32>
    %106 = vector.broadcast %cst_66 : f32 to vector<128x128xf32>
    %107 = arith.select %104, %105, %106 : vector<128x128xi1>, vector<128x128xf32>
    %cst_67 = arith.constant dense<0.000000e+00> : vector<160x128xf32>
    %108 = tpu.matmul %89, %107, %cst_67 {dimension_numbers = #tpu.dot_dimension_numbers<[1], [0], [0], [1], [0, 0, 1, 1], [], []>} : vector<160x128xf32>, vector<128x128xf32>, vector<160x128xf32> -> vector<160x128xf32>
    %c1_68 = arith.constant 1 : index
    %c0_69 = arith.constant 0 : index
    %c0_70 = arith.constant 0 : index
    %109 = vector.load %arg8[%c1_68, %c0_69, %c0_70] : memref<7x192x160xf32, #tpu.memory_space<vmem>>, vector<1x192x160xf32>
    %110 = vector.shape_cast %109 : vector<1x192x160xf32> to vector<192x160xf32>
    %cst_71 = arith.constant dense<0.000000e+00> : vector<192x128xf32>
    %111 = tpu.matmul %110, %108, %cst_71 {dimension_numbers = #tpu.dot_dimension_numbers<[1], [0], [0], [1], [0, 0, 1, 1], [], []>} : vector<192x160xf32>, vector<160x128xf32>, vector<192x128xf32> -> vector<192x128xf32>
    %112 = arith.addf %102, %111 : vector<192x128xf32>
    %c-1_i32_72 = arith.constant -1 : i32
    %113 = vector.broadcast %c-1_i32_72 : i32 to vector<128x128xi32>
    %114 = arith.cmpi eq, %10, %113 : vector<128x128xi32>
    %cst_73 = arith.constant 1.000000e+00 : f32
    %cst_74 = arith.constant 0.000000e+00 : f32
    %115 = vector.broadcast %cst_73 : f32 to vector<128x128xf32>
    %116 = vector.broadcast %cst_74 : f32 to vector<128x128xf32>
    %117 = arith.select %114, %115, %116 : vector<128x128xi1>, vector<128x128xf32>
    %cst_75 = arith.constant dense<0.000000e+00> : vector<160x128xf32>
    %118 = tpu.matmul %89, %117, %cst_75 {dimension_numbers = #tpu.dot_dimension_numbers<[1], [0], [0], [1], [0, 0, 1, 1], [], []>} : vector<160x128xf32>, vector<128x128xf32>, vector<160x128xf32> -> vector<160x128xf32>
    %c2_76 = arith.constant 2 : index
    %c0_77 = arith.constant 0 : index
    %c0_78 = arith.constant 0 : index
    %119 = vector.load %arg8[%c2_76, %c0_77, %c0_78] : memref<7x192x160xf32, #tpu.memory_space<vmem>>, vector<1x192x160xf32>
    %120 = vector.shape_cast %119 : vector<1x192x160xf32> to vector<192x160xf32>
    %cst_79 = arith.constant dense<0.000000e+00> : vector<192x128xf32>
    %121 = tpu.matmul %120, %118, %cst_79 {dimension_numbers = #tpu.dot_dimension_numbers<[1], [0], [0], [1], [0, 0, 1, 1], [], []>} : vector<192x160xf32>, vector<160x128xf32>, vector<192x128xf32> -> vector<192x128xf32>
    %122 = arith.addf %112, %121 : vector<192x128xf32>
    %c1_i32_80 = arith.constant 1 : i32
    %123 = vector.broadcast %c1_i32_80 : i32 to vector<128x128xi32>
    %124 = arith.cmpi eq, %10, %123 : vector<128x128xi32>
    %cst_81 = arith.constant 1.000000e+00 : f32
    %cst_82 = arith.constant 0.000000e+00 : f32
    %125 = vector.broadcast %cst_81 : f32 to vector<128x128xf32>
    %126 = vector.broadcast %cst_82 : f32 to vector<128x128xf32>
    %127 = arith.select %124, %125, %126 : vector<128x128xi1>, vector<128x128xf32>
    %cst_83 = arith.constant dense<0.000000e+00> : vector<160x128xf32>
    %128 = tpu.matmul %89, %127, %cst_83 {dimension_numbers = #tpu.dot_dimension_numbers<[1], [0], [0], [1], [0, 0, 1, 1], [], []>} : vector<160x128xf32>, vector<128x128xf32>, vector<160x128xf32> -> vector<160x128xf32>
    %c4_84 = arith.constant 4 : index
    %c0_85 = arith.constant 0 : index
    %c0_86 = arith.constant 0 : index
    %129 = vector.load %arg8[%c4_84, %c0_85, %c0_86] : memref<7x192x160xf32, #tpu.memory_space<vmem>>, vector<1x192x160xf32>
    %130 = vector.shape_cast %129 : vector<1x192x160xf32> to vector<192x160xf32>
    %cst_87 = arith.constant dense<0.000000e+00> : vector<192x128xf32>
    %131 = tpu.matmul %130, %128, %cst_87 {dimension_numbers = #tpu.dot_dimension_numbers<[1], [0], [0], [1], [0, 0, 1, 1], [], []>} : vector<192x160xf32>, vector<160x128xf32>, vector<192x128xf32> -> vector<192x128xf32>
    %132 = arith.addf %122, %131 : vector<192x128xf32>
    %c2_i32_88 = arith.constant 2 : i32
    %133 = vector.broadcast %c2_i32_88 : i32 to vector<128x128xi32>
    %134 = arith.cmpi eq, %10, %133 : vector<128x128xi32>
    %cst_89 = arith.constant 1.000000e+00 : f32
    %cst_90 = arith.constant 0.000000e+00 : f32
    %135 = vector.broadcast %cst_89 : f32 to vector<128x128xf32>
    %136 = vector.broadcast %cst_90 : f32 to vector<128x128xf32>
    %137 = arith.select %134, %135, %136 : vector<128x128xi1>, vector<128x128xf32>
    %cst_91 = arith.constant dense<0.000000e+00> : vector<160x128xf32>
    %138 = tpu.matmul %89, %137, %cst_91 {dimension_numbers = #tpu.dot_dimension_numbers<[1], [0], [0], [1], [0, 0, 1, 1], [], []>} : vector<160x128xf32>, vector<128x128xf32>, vector<160x128xf32> -> vector<160x128xf32>
    %c5_92 = arith.constant 5 : index
    %c0_93 = arith.constant 0 : index
    %c0_94 = arith.constant 0 : index
    %139 = vector.load %arg8[%c5_92, %c0_93, %c0_94] : memref<7x192x160xf32, #tpu.memory_space<vmem>>, vector<1x192x160xf32>
    %140 = vector.shape_cast %139 : vector<1x192x160xf32> to vector<192x160xf32>
    %cst_95 = arith.constant dense<0.000000e+00> : vector<192x128xf32>
    %141 = tpu.matmul %140, %138, %cst_95 {dimension_numbers = #tpu.dot_dimension_numbers<[1], [0], [0], [1], [0, 0, 1, 1], [], []>} : vector<192x160xf32>, vector<160x128xf32>, vector<192x128xf32> -> vector<192x128xf32>
    %142 = arith.addf %132, %141 : vector<192x128xf32>
    %c3_i32_96 = arith.constant 3 : i32
    %143 = vector.broadcast %c3_i32_96 : i32 to vector<128x128xi32>
    %144 = arith.cmpi eq, %10, %143 : vector<128x128xi32>
    %cst_97 = arith.constant 1.000000e+00 : f32
    %cst_98 = arith.constant 0.000000e+00 : f32
    %145 = vector.broadcast %cst_97 : f32 to vector<128x128xf32>
    %146 = vector.broadcast %cst_98 : f32 to vector<128x128xf32>
    %147 = arith.select %144, %145, %146 : vector<128x128xi1>, vector<128x128xf32>
    %cst_99 = arith.constant dense<0.000000e+00> : vector<160x128xf32>
    %148 = tpu.matmul %89, %147, %cst_99 {dimension_numbers = #tpu.dot_dimension_numbers<[1], [0], [0], [1], [0, 0, 1, 1], [], []>} : vector<160x128xf32>, vector<128x128xf32>, vector<160x128xf32> -> vector<160x128xf32>
    %c6_100 = arith.constant 6 : index
    %c0_101 = arith.constant 0 : index
    %c0_102 = arith.constant 0 : index
    %149 = vector.load %arg8[%c6_100, %c0_101, %c0_102] : memref<7x192x160xf32, #tpu.memory_space<vmem>>, vector<1x192x160xf32>
    %150 = vector.shape_cast %149 : vector<1x192x160xf32> to vector<192x160xf32>
    %cst_103 = arith.constant dense<0.000000e+00> : vector<192x128xf32>
    %151 = tpu.matmul %150, %148, %cst_103 {dimension_numbers = #tpu.dot_dimension_numbers<[1], [0], [0], [1], [0, 0, 1, 1], [], []>} : vector<192x160xf32>, vector<160x128xf32>, vector<192x128xf32> -> vector<192x128xf32>
    %152 = arith.addf %142, %151 : vector<192x128xf32>
    %c0_104 = arith.constant 0 : index
    %c0_105 = arith.constant 0 : index
    %153 = vector.load %arg9[%c0_104, %c0_105] : memref<192x1xf32, #tpu.memory_space<vmem>>, vector<192x1xf32>
    %154 = vector.broadcast %153 : vector<192x1xf32> to vector<192x128xf32>
    %155 = arith.addf %152, %154 : vector<192x128xf32>
    %cst_106 = arith.constant 0.000000e+00 : f32
    %156 = vector.broadcast %cst_106 : f32 to vector<192x128xf32>
    %157 = arith.maximumf %155, %156 : vector<192x128xf32>
    %c0_107 = arith.constant 0 : index
    %c0_108 = arith.constant 0 : index
    %158 = vector.load %arg2[%c0_107, %c0_108] : memref<192x4xf32, #tpu.memory_space<vmem>>, vector<192x4xf32>
    %cst_109 = arith.constant dense<0.000000e+00> : vector<192x128xf32>
    %159 = tpu.matmul %158, %1, %cst_109 {dimension_numbers = #tpu.dot_dimension_numbers<[1], [0], [0], [1], [0, 0, 1, 1], [], []>} : vector<192x4xf32>, vector<4x128xf32>, vector<192x128xf32> -> vector<192x128xf32>
    %c0_110 = arith.constant 0 : index
    %c0_111 = arith.constant 0 : index
    %160 = vector.load %arg3[%c0_110, %c0_111] : memref<192x1xf32, #tpu.memory_space<vmem>>, vector<192x1xf32>
    %161 = vector.broadcast %160 : vector<192x1xf32> to vector<192x128xf32>
    %162 = arith.addf %159, %161 : vector<192x128xf32>
    %cst_112 = arith.constant 0.000000e+00 : f32
    %163 = vector.broadcast %cst_112 : f32 to vector<192x128xf32>
    %164 = arith.maximumf %162, %163 : vector<192x128xf32>
    %c0_113 = arith.constant 0 : index
    %c0_114 = arith.constant 0 : index
    %165 = vector.load %arg10[%c0_113, %c0_114] : memref<16x192xf32, #tpu.memory_space<vmem>>, vector<16x192xf32>
    %cst_115 = arith.constant dense<0.000000e+00> : vector<16x128xf32>
    %166 = tpu.matmul %165, %164, %cst_115 {dimension_numbers = #tpu.dot_dimension_numbers<[1], [0], [0], [1], [0, 0, 1, 1], [], []>} : vector<16x192xf32>, vector<192x128xf32>, vector<16x128xf32> -> vector<16x128xf32>
    %c0_116 = arith.constant 0 : index
    %c0_117 = arith.constant 0 : index
    %167 = vector.load %arg11[%c0_116, %c0_117] : memref<16x192xf32, #tpu.memory_space<vmem>>, vector<16x192xf32>
    %cst_118 = arith.constant dense<0.000000e+00> : vector<16x128xf32>
    %168 = tpu.matmul %167, %157, %cst_118 {dimension_numbers = #tpu.dot_dimension_numbers<[1], [0], [0], [1], [0, 0, 1, 1], [], []>} : vector<16x192xf32>, vector<192x128xf32>, vector<16x128xf32> -> vector<16x128xf32>
    %169 = arith.addf %166, %168 : vector<16x128xf32>
    %c0_119 = arith.constant 0 : index
    %c0_120 = arith.constant 0 : index
    %170 = vector.load %arg12[%c0_119, %c0_120] : memref<16x4xf32, #tpu.memory_space<vmem>>, vector<16x4xf32>
    %cst_121 = arith.constant dense<0.000000e+00> : vector<16x128xf32>
    %171 = tpu.matmul %170, %1, %cst_121 {dimension_numbers = #tpu.dot_dimension_numbers<[1], [0], [0], [1], [0, 0, 1, 1], [], []>} : vector<16x4xf32>, vector<4x128xf32>, vector<16x128xf32> -> vector<16x128xf32>
    %172 = arith.addf %169, %171 : vector<16x128xf32>
    %c0_122 = arith.constant 0 : index
    %c0_123 = arith.constant 0 : index
    %173 = vector.load %arg13[%c0_122, %c0_123] : memref<16x1xf32, #tpu.memory_space<vmem>>, vector<16x1xf32>
    %174 = vector.broadcast %173 : vector<16x1xf32> to vector<16x128xf32>
    %175 = arith.addf %172, %174 : vector<16x128xf32>
    %cst_124 = arith.constant 0.000000e+00 : f32
    %176 = vector.broadcast %cst_124 : f32 to vector<16x128xf32>
    %177 = arith.maximumf %175, %176 : vector<16x128xf32>
    %c0_125 = arith.constant 0 : index
    %c0_126 = arith.constant 0 : index
    %c0_127 = arith.constant 0 : index
    %178 = vector.load %arg14[%c0_125, %c0_126, %c0_127] : memref<1x16x128xf32, #tpu.memory_space<vmem>>, vector<1x16x128xf32>
    %179 = vector.shape_cast %178 : vector<1x16x128xf32> to vector<16x128xf32>
    %180 = vector.shape_cast %177 : vector<16x128xf32> to vector<1x16x128xf32>
    tpu.vector_store %arg14[%c0_125, %c0_126, %c0_127], %180 {strides = array<i32>} : memref<1x16x128xf32, #tpu.memory_space<vmem>>, vector<1x16x128xf32>,
    return
  }
  func.func @transform_0(%arg0: i32) -> (i32, i32, i32) {
    %c0_i32 = arith.constant 0 : i32
    %c0_i32_0 = arith.constant 0 : i32
    %c0_i32_1 = arith.constant 0 : i32
    return %arg0, %c0_i32, %c0_i32_0 : i32, i32, i32
  }
  func.func @transform_1(%arg0: i32) -> (i32, i32) {
    %c0_i32 = arith.constant 0 : i32
    %c0_i32_0 = arith.constant 0 : i32
    %c0_i32_1 = arith.constant 0 : i32
    return %c0_i32, %c0_i32_0 : i32, i32
  }
  func.func @transform_2(%arg0: i32) -> (i32, i32) {
    %c0_i32 = arith.constant 0 : i32
    %c0_i32_0 = arith.constant 0 : i32
    %c0_i32_1 = arith.constant 0 : i32
    return %c0_i32, %c0_i32_0 : i32, i32
  }
  func.func @transform_3(%arg0: i32) -> (i32, i32) {
    %c0_i32 = arith.constant 0 : i32
    %c0_i32_0 = arith.constant 0 : i32
    %c0_i32_1 = arith.constant 0 : i32
    return %c0_i32, %c0_i32_0 : i32, i32
  }
  func.func @transform_4(%arg0: i32) -> (i32, i32) {
    %c0_i32 = arith.constant 0 : i32
    %c0_i32_0 = arith.constant 0 : i32
    %c0_i32_1 = arith.constant 0 : i32
    return %c0_i32, %c0_i32_0 : i32, i32
  }
  func.func @transform_5(%arg0: i32) -> (i32, i32, i32) {
    %c0_i32 = arith.constant 0 : i32
    %c0_i32_0 = arith.constant 0 : i32
    %c0_i32_1 = arith.constant 0 : i32
    %c0_i32_2 = arith.constant 0 : i32
    return %c0_i32, %c0_i32_0, %c0_i32_1 : i32, i32, i32
  }
  func.func @transform_6(%arg0: i32) -> (i32, i32) {
    %c0_i32 = arith.constant 0 : i32
    %c0_i32_0 = arith.constant 0 : i32
    %c0_i32_1 = arith.constant 0 : i32
    return %c0_i32, %c0_i32_0 : i32, i32
  }
  func.func @transform_7(%arg0: i32) -> (i32, i32, i32) {
    %c0_i32 = arith.constant 0 : i32
    %c0_i32_0 = arith.constant 0 : i32
    %c0_i32_1 = arith.constant 0 : i32
    %c0_i32_2 = arith.constant 0 : i32
    return %c0_i32, %c0_i32_0, %c0_i32_1 : i32, i32, i32
  }
  func.func @transform_8(%arg0: i32) -> (i32, i32) {
    %c0_i32 = arith.constant 0 : i32
    %c0_i32_0 = arith.constant 0 : i32
    %c0_i32_1 = arith.constant 0 : i32
    return %c0_i32, %c0_i32_0 : i32, i32
  }
  func.func @transform_9(%arg0: i32) -> (i32, i32) {
    %c0_i32 = arith.constant 0 : i32
    %c0_i32_0 = arith.constant 0 : i32
    %c0_i32_1 = arith.constant 0 : i32
    return %c0_i32, %c0_i32_0 : i32, i32
  }
  func.func @transform_10(%arg0: i32) -> (i32, i32) {
    %c0_i32 = arith.constant 0 : i32
    %c0_i32_0 = arith.constant 0 : i32
    %c0_i32_1 = arith.constant 0 : i32
    return %c0_i32, %c0_i32_0 : i32, i32
  }
  func.func @transform_11(%arg0: i32) -> (i32, i32) {
    %c0_i32 = arith.constant 0 : i32
    %c0_i32_0 = arith.constant 0 : i32
    %c0_i32_1 = arith.constant 0 : i32
    return %c0_i32, %c0_i32_0 : i32, i32
  }
  func.func @transform_12(%arg0: i32) -> (i32, i32) {
    %c0_i32 = arith.constant 0 : i32
    %c0_i32_0 = arith.constant 0 : i32
    %c0_i32_1 = arith.constant 0 : i32
    return %c0_i32, %c0_i32_0 : i32, i32
  }
  func.func @transform_13(%arg0: i32) -> (i32, i32, i32) {
    %c0_i32 = arith.constant 0 : i32
    %c0_i32_0 = arith.constant 0 : i32
    %c0_i32_1 = arith.constant 0 : i32
    return %arg0, %c0_i32, %c0_i32_0 : i32, i32, i32
  }
}

</mosaic_0001>

<bundles_post_ra>
// kernel: inception_resnet_b.1
= control target key start
LH: loop header
LB: loop body
LE: loop exit
PB: predicated region body
PF: predicated region fallthrough
CT: control target
= control target key end

     0   :  { %s15687_s0 = inlined_call_operand.vmem [shape: f32[2,4,128], index: 0, kind: input, shape index: {}]   ;;  %s15688_s1 = inlined_call_operand.vmem [shape: f32[192,4], index: 1, kind: input, shape index: {}]   ;;  %s15689_s2 = inlined_call_operand.vmem [shape: f32[192,1], index: 2, kind: input, shape index: {}]   ;;  %s15690_s3 = inlined_call_operand.vmem [shape: f32[128,4], index: 3, kind: input, shape index: {}]   ;;  %s15691_s4 = inlined_call_operand.vmem [shape: f32[128,1], index: 4, kind: input, shape index: {}]   ;;  %s15692_s5 = inlined_call_operand.vmem [shape: f32[7,160,128], index: 5, kind: input, shape index: {}]   ;;  %s15693_s6 = inlined_call_operand.vmem [shape: f32[160,1], index: 6, kind: input, shape index: {}]   ;;  %s15694_s7 = inlined_call_operand.vmem [shape: f32[7,192,160], index: 7, kind: input, shape index: {}]   ;;  %s15695_s8 = inlined_call_operand.vmem [shape: f32[192,1], index: 8, kind: input, shape index: {}]   ;;  %s15696_s9 = inlined_call_operand.vmem [shape: f32[16,192], index: 9, kind: input, shape index: {}]   ;;  %s15697_s10 = inlined_call_operand.vmem [shape: f32[16,192], index: 10, kind: input, shape index: {}]   ;;  %s15698_s11 = inlined_call_operand.vmem [shape: f32[16,4], index: 11, kind: input, shape index: {}]   ;;  %s15699_s12 = inlined_call_operand.vmem [shape: f32[16,1], index: 12, kind: input, shape index: {}]   ;;  %s15700_s13 = inlined_call_operand.hbm [shape: f32[2,16,128], index: 13, kind: output, shape index: {}]  }
   0x1   :  { %15828 = sst [smem:[#allocation63_spill]] %s15687_s0 }
   0x2   :  { %18 = vsyncpa [#allocation3], 0 }
   0x3   :  { %20 = vsyncpa [#allocation3 + $0x1], 0  ;;  %s10633_s25 = smov 0   ;;  %s10635_s26 = smov 0  }
   0x4   :  { %s10637_s27 = smov 0   ;;  %s10639_s28 = smov 0  }
   0x5 LB: > { %15829 = sst [smem:[#allocation5_spill]] %s10551_s27  ;;  %s10654_s29 = sadd.s32 4294967295, %s10555_s28   ;;  %s10555_s28 = sphi %s10639_s28, %s16315_s28   ;;  %s10551_s27 = sphi %s10637_s27, %s16312_s27   ;;  %s10547_s26 = sphi %s10635_s26, %s16314_s26   ;;  %s10543_s25 = sphi %s10633_s25, %s16313_s25  }
   0x6   : > { %s7702_s30 = sadd.s32 4294967294, %s10555_s28   ;;  %s10658_s14 = sadd.s32 1, %s10555_s28  }
   0x7   : > { %s311_s15 = sadd.s32 1, %s10551_s27  ;;  %s308_s16 = ssub.s32 %s10555_s28, %s10658_s14 }
   0x8   : > { %p321_p0 = scmp.ne.s32.totalorder %s10551_s27, %s10547_s26  ;;  %p309_p1 = scmp.eq.s32.totalorder %s308_s16, 0 }
   0x9   : > { %p322_p2 = scmp.eq.s32.totalorder %s10654_s29, 1  ;;  %p327_p3 = scmp.ne.s32.totalorder %s10547_s26, %s10543_s25 }
   0xa   : > { %p328_p4 = scmp.eq.s32.totalorder %s7702_s30, 1  ;;  %p7705_p7 = scmp.ge.s32.totalorder %s10555_s28, 1 }
   0xb   : > { %s10669_s17 = scalar_select %p309_p1, %s10551_s27, %s311_s15  }
   0xc   : > { %p10671_p5 = por %p322_p2, %p321_p0  ;;  %p10675_p6 = por %p328_p4, %p327_p3 }
   0xd   : > { %15830 = sst [smem:[#allocation6_spill]] %s10669_s17  ;;  %p389_p8 = scmp.lt.s32.totalorder %s10555_s28, 3 }
   0xf   : > { %p390_p9 = pnand %p7705_p7, %p389_p8 }
  0x11   : > { %393 = sbr.rel (%p390_p9) target bundleno = 3437 (0xd6d), region = 72 }
  0x16   : > { %v492_v0 = vld [vmem:[%s15691_s4 + $0x10] sm:$0xff]  ;;  %v490_v1 = vld [vmem:[%s15691_s4] sm:$0xff]  ;;  %p432_p10 = scmp.lt.s32.totalorder %s10654_s29, 1  ;;  %v10557_v2 = vmov 0   ;;  %vm15702_vm0 = vcmask 31744   ;;  %v493_v4 = vld [vmem:[%s15691_s4 + $0x18] sm:$0xff]  ;;  %v437_v40 = vlaneseq }
  0x17   : > { %10492 = vset.pattern.permute.xlu1 %v10557_v2  ;;  %10491 = vset.pattern.permute.xlu0 %v10557_v2  ;;  %v474_v3 = vld [vmem:[%s15690_s3] sm:$0xff]  ;;  %v491_v5 = vld [vmem:[%s15691_s4 + $0x8] sm:$0xff]  ;;  %vm15703_vm1 = vcmask 1043456   ;;  %s15833_s0 = sld [smem:[#allocation63_spill]]  ;;  %v476_v10 = vld [vmem:[%s15690_s3 + $0x10] sm:$0xff]  ;;  %v15738_v54 = vmov 1.0  }
  0x18   : > { %518 = vperm.xlu1 %10492, %v492_v0   ;;  %508 = vperm.xlu0 %10491, %v490_v1   ;;  %s433_s15 = scalar_select %p432_p10, %s10654_s29, 1  ;;  %v475_v7 = vld [vmem:[%s15690_s3 + $0x8] sm:$0xff]  ;;  %v494_v9 = vld [vmem:[%s15691_s4 + $0x20] sm:$0xff]  ;;  %v477_v11 = vld [vmem:[%s15690_s3 + $0x18] sm:$0xff]  ;;  %v10827_v43 = vshrl.u32 %v437_v40, 7  ;;  %v10829_v44 = vand.u32 127, %v437_v40 }
  0x19   : > { %9238 = vmatprep.mubr.msk.f32.mxu1 %vm15702_vm0, %v474_v3  ;;  %v495_v8 = vld [vmem:[%s15691_s4 + $0x28] sm:$0xff]  ;;  %v497_v12 = vld [vmem:[%s15691_s4 + $0x38] sm:$0xff]  ;;  %v496_v13 = vld [vmem:[%s15691_s4 + $0x30] sm:$0xff]  ;;  %s429_s27 = sand.u32 1, %s10547_s26   ;;  %s8530_s30 = sshll.u32 %s10654_s29, 8 }
  0x1a   : > { %s7707_s22 = sshll.u32 %s433_s15, 2  ;;  %v478_v14 = vld [vmem:[%s15690_s3 + $0x20] sm:$0xff]  ;;  %v479_v15 = vld [vmem:[%s15690_s3 + $0x28] sm:$0xff]  ;;  %v480_v18 = vld [vmem:[%s15690_s3 + $0x30] sm:$0xff]  ;;  %v457_v45 = vadd.s32 120, %v10827_v43  ;;  %v456_v49 = vadd.s32 112, %v10827_v43  ;;  %s15645_s20 = scalar_lea.hbm %s15700_s13, %s8530_s30 }
  0x1b   : > { %v499_v16 = vld [vmem:[%s15691_s4 + $0x48] sm:$0xff]  ;;  %v498_v17 = vld [vmem:[%s15691_s4 + $0x40] sm:$0xff]  ;;  %v481_v19 = vld [vmem:[%s15690_s3 + $0x38] sm:$0xff]  ;;  %v455_v51 = vadd.s32 104, %v10827_v43  ;;  %v454_v56 = vadd.s32 96, %v10827_v43  ;;  %v453_v58 = vadd.s32 88, %v10827_v43 }
  0x1c   : > { %523 = vperm.xlu1 %10492, %v493_v4   ;;  %513 = vperm.xlu0 %10491, %v491_v5   ;;  %v501_v20 = vld [vmem:[%s15691_s4 + $0x58] sm:$0xff]  ;;  %v500_v21 = vld [vmem:[%s15691_s4 + $0x50] sm:$0xff]  ;;  %v482_v22 = vld [vmem:[%s15690_s3 + $0x40] sm:$0xff]  ;;  %v10839_v48 = vsub.s32 %v457_v45, %v10829_v44  ;;  %v10844_v50 = vsub.s32 %v456_v49, %v10829_v44  ;;  %v452_v62 = vadd.s32 80, %v10827_v43  ;;  %v451_v0 = vadd.s32 72, %v10827_v43  ;;  %s15647_s15 = scalar_lea.sflag [#allocation3], %s429_s27 }
  0x1d   : > { %s10702_s24 = scalar_lea.vmem %s15833_s0, %s7707_s22  ;;  %v483_v23 = vld [vmem:[%s15690_s3 + $0x48] sm:$0xff]  ;;  %v502_v25 = vld [vmem:[%s15691_s4 + $0x60] sm:$0xff]  ;;  %v484_v26 = vld [vmem:[%s15690_s3 + $0x50] sm:$0xff]  ;;  %v10861_v55 = vsub.s32 %v455_v51, %v10829_v44  ;;  %v10869_v57 = vsub.s32 %v454_v56, %v10829_v44  ;;  %v10886_v61 = vsub.s32 %v453_v58, %v10829_v44  ;;  %v450_v4 = vadd.s32 64, %v10827_v43  ;;  %s7706_s22 = sshll.u32 %s429_s27, 4 }
  0x1e   : > { %v436_v6 = vld [vmem:[%s10702_s24] sm:$0xf]  ;;  %v503_v24 = vld [vmem:[%s15691_s4 + $0x68] sm:$0xff]  ;;  %v485_v27 = vld [vmem:[%s15690_s3 + $0x58] sm:$0xff]  ;;  %vm852_vm2 = vcmp.eq.s32.totalorder %v10839_v48, 4294967293  ;;  %15834 = vst [vmem:[#allocation7_spill] sm:$0xff] %v10844_v50  ;;  %v10894_v63 = vsub.s32 %v452_v62, %v10829_v44  ;;  %v10910_v3 = vsub.s32 %v451_v0, %v10829_v44 }
  0x1f   : > { %9236 = vmatprep.subr.msk.mxu1 %vm15703_vm1, %v436_v6  ;;  %v505_v28 = vld [vmem:[%s15691_s4 + $0x78] sm:$0xff]  ;;  %v504_v29 = vld [vmem:[%s15691_s4 + $0x70] sm:$0xff]  ;;  %v486_v30 = vld [vmem:[%s15690_s3 + $0x60] sm:$0xff]  ;;  %vm851_vm3 = vcmp.eq.s32.totalorder %v10844_v50, 4294967293  ;;  %15835 = vst [vmem:[#allocation8_spill] sm:$0xff] %v10861_v55  ;;  %vm850_vm4 = vcmp.eq.s32.totalorder %v10861_v55, 4294967293  ;;  %v10918_v5 = vsub.s32 %v450_v4, %v10829_v44 }
  0x20   : > { %9237 = vmatpush3.msk.msra.mxu1 %vm15703_vm1, %v436_v6  ;;  %533 = vperm.xlu1 %10492, %v495_v8   ;;  %v487_v31 = vld [vmem:[%s15690_s3 + $0x68] sm:$0xff]  ;;  %v3279_v33 = vld [vmem:[%s15693_s6] sm:$0xff]  ;;  %v488_v34 = vld [vmem:[%s15690_s3 + $0x70] sm:$0xff]  ;;  %15836 = vst [vmem:[#allocation9_spill] sm:$0xff] %v10869_v57  ;;  %vm849_vm5 = vcmp.eq.s32.totalorder %v10869_v57, 4294967293  ;;  %vm848_vm6 = vcmp.eq.s32.totalorder %v10886_v61, 4294967293 }
  0x21   : > { %9239 = vmatmul.mubr.msk.f32.vlgmr.msra.gmra.mxu1 %vm15702_vm0, %v475_v7  ;;  %528 = vperm.xlu0 %10491, %v494_v9   ;;  %v3280_v32 = vld [vmem:[%s15693_s6 + $0x8] sm:$0xff]  ;;  %v489_v35 = vld [vmem:[%s15690_s3 + $0x78] sm:$0xff]  ;;  %v3281_v37 = vld [vmem:[%s15693_s6 + $0x10] sm:$0xff]  ;;  %15837 = vst [vmem:[#allocation10_spill] sm:$0xff] %v10886_v61  ;;  %vm847_vm7 = vcmp.eq.s32.totalorder %v10894_v63, 4294967293  ;;  %v449_v6 = vadd.s32 56, %v10827_v43 }
  0x22   : > { %9241 = vmatprep.mubr.msk.f32.mxu1 %vm15702_vm0, %v476_v10  ;;  %v3282_v36 = vld [vmem:[%s15693_s6 + $0x18] sm:$0xff]  ;;  %v3284_v38 = vld [vmem:[%s15693_s6 + $0x28] sm:$0xff]  ;;  %v3283_v39 = vld [vmem:[%s15693_s6 + $0x20] sm:$0xff]  ;;  %9262 = vmatprep.subr.msk.mxu1 %vm852_vm2, %v15738_v54  ;;  %15838 = vst [vmem:[#allocation11_spill] sm:$0xff] %v10894_v63  ;;  %vm846_vm8 = vcmp.eq.s32.totalorder %v10910_v3, 4294967293  ;;  %v448_v9 = vadd.s32 48, %v10827_v43 }
  0x23   : > { %v3286_v41 = vld [vmem:[%s15693_s6 + $0x38] sm:$0xff]  ;;  %v3285_v42 = vld [vmem:[%s15693_s6 + $0x30] sm:$0xff]  ;;  %v3288_v46 = vld [vmem:[%s15693_s6 + $0x48] sm:$0xff]  ;;  %9263 = vmatpush3.msk.msra.mxu1 %vm852_vm2, %v15738_v54  ;;  %15839 = vst [vmem:[#allocation12_spill] sm:$0xff] %v10910_v3  ;;  %v10939_v10 = vsub.s32 %v449_v6, %v10829_v44  ;;  %vm845_vm9 = vcmp.eq.s32.totalorder %v10918_v5, 4294967293  ;;  %s431_s23 = scalar_lea.vmem [#allocation2], %s7706_s22 }
  0x24   : > { %543 = vperm.xlu1 %10492, %v497_v12   ;;  %v3287_v47 = vld [vmem:[%s15693_s6 + $0x40] sm:$0xff]  ;;  %v3290_v52 = vld [vmem:[%s15693_s6 + $0x58] sm:$0xff]  ;;  %v3289_v53 = vld [vmem:[%s15693_s6 + $0x50] sm:$0xff]  ;;  %9264 = vmatprep.subr.msk.mxu1 %vm851_vm3, %v15738_v54  ;;  %15840 = vst [vmem:[#allocation13_spill] sm:$0xff] %v10918_v5  ;;  %s7640_s0 = sshll.u32 %s431_s23, 4  ;;  %s10560_s29 = smov [#allocation2]   ;;  %s15640_s0 = int_to_ptr.vmem [resolvable:$true] %s7640_s0 }
  0x25   : > { %9242 = vmatmul.mubr.msk.f32.gmra.mxu1 %vm15702_vm0, %v477_v11  ;;  %538 = vperm.xlu0 %10491, %v496_v13   ;;  %v3292_v59 = vld [vmem:[%s15693_s6 + $0x68] sm:$0xff]  ;;  %v3291_v60 = vld [vmem:[%s15693_s6 + $0x60] sm:$0xff]  ;;  %v3294_v1 = vld [vmem:[%s15693_s6 + $0x78] sm:$0xff]  ;;  %15841 = vst [vmem:[#allocation14_spill] sm:$0xff] %v10939_v10  ;;  %v447_v11 = vadd.s32 40, %v10827_v43  ;;  %vm844_vm10 = vcmp.eq.s32.totalorder %v10939_v10, 4294967293 }
  0x26   : > { %9244 = vmatprep.mubr.msk.f32.mxu1 %vm15702_vm0, %v478_v14  ;;  %9265 = vmatpush3.msk.msra.mxu1 %vm851_vm3, %v15738_v54  ;;  %v3293_v2 = vld [vmem:[%s15693_s6 + $0x70] sm:$0xff]  ;;  %v3296_v7 = vld [vmem:[%s15693_s6 + $0x88] sm:$0xff]  ;;  %v3295_v8 = vld [vmem:[%s15693_s6 + $0x80] sm:$0xff]  ;;  %v10956_v14 = vsub.s32 %v448_v9, %v10829_v44  ;;  %s10495_s21 = scalar_lea.vmem %s15640_s0, 256 }
  0x27   : > { %9266 = vmatprep.subr.msk.mxu1 %vm850_vm4, %v15738_v54  ;;  %v3298_v12 = vld [vmem:[%s15693_s6 + $0x98] sm:$0xff]  ;;  %v3297_v13 = vld [vmem:[%s15693_s6 + $0x90] sm:$0xff]  ;;  %v6716_v45 = vld [vmem:[%s15695_s8 + $0x28] sm:$0xff]  ;;  %p10496_p11 = scmp.ne.s32.totalorder %s15640_s0, %s10495_s21 }
  0x28   : > { %553 = vperm.xlu1 %10492, %v499_v16   ;;  %9267 = vmatpush3.msk.msra.mxu1 %vm850_vm4, %v15738_v54  ;;  %15842 = vst [vmem:[#allocation15_spill] sm:$0xff] %v10956_v14  ;;  %v10964_v16 = vsub.s32 %v447_v11, %v10829_v44  ;;  %vm843_vm11 = vcmp.eq.s32.totalorder %v10956_v14, 4294967293  ;;  %v6718_v40 = vld [vmem:[%s15695_s8 + $0x38] sm:$0xff]  ;;  %v6932_v49 = vld [vmem:[%s15689_s2 + $0x28] sm:$0xff] }
  0x29   : > { %9245 = vmatmul.mubr.msk.f32.gmra.mxu1 %vm15702_vm0, %v479_v15  ;;  %548 = vperm.xlu0 %10491, %v498_v17   ;;  %v446_v15 = vadd.s32 32, %v10827_v43  ;;  %v6725_v17 = vld [vmem:[%s15695_s8 + $0x70] sm:$0xff]  ;;  %v6714_v51 = vld [vmem:[%s15695_s8 + $0x18] sm:$0xff]  ;;  %v6712_v58 = vld [vmem:[%s15695_s8 + $0x8] sm:$0xff]  ;;  %p10497_p12 = pnand %p10496_p11, %p10671_p5 }
  0x2a   : > { %9247 = vmatprep.mubr.msk.f32.mxu1 %vm15702_vm0, %v480_v18  ;;  %9268 = vmatprep.subr.msk.mxu1 %vm849_vm5, %v15738_v54  ;;  %15843 = vst [vmem:[#allocation16_spill] sm:$0xff] %v10964_v16  ;;  %v6726_v18 = vld [vmem:[%s15695_s8 + $0x78] sm:$0xff]  ;;  %vm842_vm12 = vcmp.eq.s32.totalorder %v10964_v16, 4294967293  ;;  %v6928_v62 = vld [vmem:[%s15689_s2 + $0x8] sm:$0xff] }
  0x2b   : > { %9269 = vmatpush3.msk.msra.mxu1 %vm849_vm5, %v15738_v54  ;;  %v6930_v56 = vld [vmem:[%s15689_s2 + $0x18] sm:$0xff]  ;;  %v6732_v6 = vld [vmem:[%s15695_s8 + $0xa8] sm:$0xff]  ;;  %p10498_p13 = pneg %p10497_p12 }
  0x2c   : > { %563 = vperm.xlu1 %10492, %v501_v20   ;;  %9270 = vmatprep.subr.msk.mxu1 %vm848_vm6, %v15738_v54  ;;  %v10984_v20 = vsub.s32 %v446_v15, %v10829_v44  ;;  %v6734_v0 = vld [vmem:[%s15695_s8 + $0xb8] sm:$0xff]  ;;  %v6948_v9 = vld [vmem:[%s15689_s2 + $0xa8] sm:$0xff] }
  0x2d   : > { %9248 = vmatmul.mubr.msk.f32.gmra.mxu1 %vm15702_vm0, %v481_v19  ;;  %558 = vperm.xlu0 %10491, %v500_v21   ;;  %v445_v19 = vadd.s32 24, %v10827_v43  ;;  %v444_v21 = vadd.s32 16, %v10827_v43  ;;  %v6950_v4 = vld [vmem:[%s15689_s2 + $0xb8] sm:$0xff] }
  0x2e   : > { %9250 = vmatprep.mubr.msk.f32.mxu1 %vm15702_vm0, %v482_v22  ;;  %9271 = vmatpush3.msk.msra.mxu1 %vm848_vm6, %v15738_v54  ;;  %15844 = vst [vmem:[#allocation17_spill] sm:$0xff] %v10984_v20  ;;  %v6942_v22 = vld [vmem:[%s15689_s2 + $0x78] sm:$0xff]  ;;  %vm841_vm13 = vcmp.eq.s32.totalorder %v10984_v20, 4294967293 }
  0x2f   : > { %9272 = vmatprep.subr.msk.mxu1 %vm847_vm7, %v15738_v54  ;;  %v6730_v11 = vld [vmem:[%s15695_s8 + $0x98] sm:$0xff] }
  0x30   : > { %573 = vperm.xlu1 %10492, %v503_v24   ;;  %9273 = vmatpush3.msk.msra.mxu1 %vm847_vm7, %v15738_v54  ;;  %v11001_v24 = vsub.s32 %v445_v19, %v10829_v44  ;;  %v6946_v15 = vld [vmem:[%s15689_s2 + $0x98] sm:$0xff]  ;;  %v6727_v19 = vld [vmem:[%s15695_s8 + $0x80] sm:$0xff] }
  0x31   : > { %9251 = vmatmul.mubr.msk.f32.gmra.mxu1 %vm15702_vm0, %v483_v23  ;;  %568 = vperm.xlu0 %10491, %v502_v25   ;;  %v6724_v23 = vld [vmem:[%s15695_s8 + $0x68] sm:$0xff]  ;;  %v443_v25 = vadd.s32 8, %v10827_v43 }
  0x32   : > { %9253 = vmatprep.mubr.msk.f32.mxu1 %vm15702_vm0, %v484_v26  ;;  %9274 = vmatprep.subr.msk.mxu1 %vm846_vm8, %v15738_v54  ;;  %15845 = vst [vmem:[#allocation18_spill] sm:$0xff] %v11001_v24  ;;  %v11009_v26 = vsub.s32 %v444_v21, %v10829_v44  ;;  %vm15707_vm14 = vcmp.eq.s32.totalorder %v11001_v24, 4294967293  ;;  %v6943_v21 = vld [vmem:[%s15689_s2 + $0x80] sm:$0xff] }
  0x33   : > { %9275 = vmatpush3.msk.msra.mxu1 %vm846_vm8, %v15738_v54 }
  0x34   : > { %583 = vperm.xlu1 %10492, %v505_v28   ;;  %9276 = vmatprep.subr.msk.mxu1 %vm845_vm9, %v15738_v54  ;;  %15846 = vst [vmem:[#allocation19_spill] sm:$0xff] %v11009_v26  ;;  %v6723_v28 = vld [vmem:[%s15695_s8 + $0x60] sm:$0xff]  ;;  %vm15706_vm15 = vcmp.eq.s32.totalorder %v11009_v26, 4294967293 }
  0x35   : > { %9254 = vmatmul.mubr.msk.f32.gmra.mxu1 %vm15702_vm0, %v485_v27  ;;  %578 = vperm.xlu0 %10491, %v504_v29   ;;  %v6941_v27 = vld [vmem:[%s15689_s2 + $0x70] sm:$0xff]  ;;  %v11028_v29 = vsub.s32 %v443_v25, %v10829_v44  ;;  %v7608_v25 = vld [vmem:[%s15699_s12] sm:$0xff] }
  0x36   : > { %9256 = vmatprep.mubr.msk.f32.mxu1 %vm15702_vm0, %v486_v30  ;;  %9277 = vmatpush3.msk.msra.mxu1 %vm845_vm9, %v15738_v54  ;;  %v6940_v30 = vld [vmem:[%s15689_s2 + $0x68] sm:$0xff] }
  0x37   : > { %9278 = vmatprep.subr.msk.mxu1 %vm844_vm10, %v15738_v54  ;;  %15847 = vst [vmem:[#allocation20_spill] sm:$0xff] %v11028_v29 }
  0x38   : > { %3306 = vperm.xlu1 %10492, %v3280_v32   ;;  %9279 = vmatpush3.msk.msra.mxu1 %vm844_vm10, %v15738_v54  ;;  %v11045_v32 = vsub.s32 %v10827_v43, %v10829_v44  ;;  %v6934_v43 = vld [vmem:[%s15689_s2 + $0x38] sm:$0xff] }
  0x39   : > { %9257 = vmatmul.mubr.msk.f32.gmra.mxu1 %vm15702_vm0, %v487_v31  ;;  %3301 = vperm.xlu0 %10491, %v3279_v33   ;;  %v6722_v31 = vld [vmem:[%s15695_s8 + $0x58] sm:$0xff]  ;;  %v6939_v33 = vld [vmem:[%s15689_s2 + $0x60] sm:$0xff] }
  0x3a   : > { %9259 = vmatprep.mubr.msk.f32.mxu1 %vm15702_vm0, %v488_v34  ;;  %9280 = vmatprep.subr.msk.mxu1 %vm843_vm11, %v15738_v54  ;;  %15848 = vst [vmem:[#allocation21_spill] sm:$0xff] %v11045_v32  ;;  %v6721_v34 = vld [vmem:[%s15695_s8 + $0x50] sm:$0xff]  ;;  %vm15704_vm1 = vcmp.eq.s32.totalorder %v11045_v32, 4294967293 }
  0x3b   : > { %9281 = vmatpush3.msk.msra.mxu1 %vm843_vm11, %v15738_v54 }
  0x3c   : > { %3316 = vperm.xlu1 %10492, %v3282_v36   ;;  %9282 = vmatprep.subr.msk.mxu1 %vm842_vm12, %v15738_v54  ;;  %v6720_v36 = vld [vmem:[%s15695_s8 + $0x48] sm:$0xff] }
  0x3d   : > { %9260 = vmatmul.mubr.msk.f32.gmra.mxu1 %vm15702_vm0, %v489_v35  ;;  %3311 = vperm.xlu0 %10491, %v3281_v37   ;;  %vm15705_vm0 = vcmp.eq.s32.totalorder %v11028_v29, 4294967293  ;;  %v6938_v35 = vld [vmem:[%s15689_s2 + $0x58] sm:$0xff]  ;;  %v6937_v37 = vld [vmem:[%s15689_s2 + $0x50] sm:$0xff] }
  0x3e   : > { %9283 = vmatpush3.msk.msra.mxu1 %vm842_vm12, %v15738_v54 }
  0x3f   : > { %9284 = vmatprep.subr.msk.mxu1 %vm841_vm13, %v15738_v54 }
  0x40   : > { %3326 = vperm.xlu1 %10492, %v3284_v38   ;;  %9285 = vmatpush3.msk.msra.mxu1 %vm841_vm13, %v15738_v54  ;;  %v6719_v38 = vld [vmem:[%s15695_s8 + $0x40] sm:$0xff] }
  0x41   : > { %3321 = vperm.xlu0 %10491, %v3283_v39   ;;  %9286 = vmatprep.subr.msk.mxu1 %vm15707_vm14, %v15738_v54  ;;  %v6936_v39 = vld [vmem:[%s15689_s2 + $0x48] sm:$0xff] }
  0x42   : > { %9287 = vmatpush3.msk.msra.mxu1 %vm15707_vm14, %v15738_v54  ;;  %vm15711_vm14 = vcmp.eq.s32.totalorder %v10869_v57, 4294967294 }
  0x43   : > { %9288 = vmatprep.subr.msk.mxu1 %vm15706_vm15, %v15738_v54 }
  0x44   : > { %3336 = vperm.xlu1 %10492, %v3286_v41   ;;  %9289 = vmatpush3.msk.msra.mxu1 %vm15706_vm15, %v15738_v54  ;;  %v6935_v41 = vld [vmem:[%s15689_s2 + $0x40] sm:$0xff]  ;;  %vm15710_vm15 = vcmp.eq.s32.totalorder %v10861_v55, 4294967294 }
  0x45   : > { %3331 = vperm.xlu0 %10491, %v3285_v42   ;;  %9290 = vmatprep.subr.msk.mxu1 %vm15705_vm0, %v15738_v54  ;;  %v6717_v42 = vld [vmem:[%s15695_s8 + $0x30] sm:$0xff] }
  0x46   : > { %9291 = vmatpush3.msk.msra.mxu1 %vm15705_vm0, %v15738_v54  ;;  %vm15709_vm0 = vcmp.eq.s32.totalorder %v10844_v50, 4294967294 }
  0x47   : > { %9292 = vmatprep.subr.msk.mxu1 %vm15704_vm1, %v15738_v54 }
  0x48   : > { %3346 = vperm.xlu1 %10492, %v3288_v46   ;;  %9293 = vmatpush3.msk.msra.mxu1 %vm15704_vm1, %v15738_v54  ;;  %v6933_v46 = vld [vmem:[%s15689_s2 + $0x30] sm:$0xff]  ;;  %vm439_vm1 = vcmp.lt.s32.totalorder %v10829_v44, 16 }
  0x49   : > { %3341 = vperm.xlu0 %10491, %v3287_v47   ;;  %v6715_v47 = vld [vmem:[%s15695_s8 + $0x20] sm:$0xff] }
  0x4c   : > { %3356 = vperm.xlu1 %10492, %v3290_v52   ;;  %v6931_v52 = vld [vmem:[%s15689_s2 + $0x20] sm:$0xff] }
  0x4d   : > { %3351 = vperm.xlu0 %10491, %v3289_v53   ;;  %v6713_v53 = vld [vmem:[%s15695_s8 + $0x10] sm:$0xff] }
  0x50   : > { %3366 = vperm.xlu1 %10492, %v3292_v59   ;;  %v6929_v59 = vld [vmem:[%s15689_s2 + $0x10] sm:$0xff] }
  0x51   : > { %3361 = vperm.xlu0 %10491, %v3291_v60   ;;  %v6711_v60 = vld [vmem:[%s15695_s8] sm:$0xff] }
  0x54   : > { %3376 = vperm.xlu1 %10492, %v3294_v1   ;;  %v6927_v1 = vld [vmem:[%s15689_s2] sm:$0xff] }
  0x55   : > { %3371 = vperm.xlu0 %10491, %v3293_v2   ;;  %v6733_v2 = vld [vmem:[%s15695_s8 + $0xb0] sm:$0xff] }
  0x58   : > { %3386 = vperm.xlu1 %10492, %v3296_v7   ;;  %v6949_v7 = vld [vmem:[%s15689_s2 + $0xb0] sm:$0xff] }
  0x59   : > { %3381 = vperm.xlu0 %10491, %v3295_v8   ;;  %v6731_v8 = vld [vmem:[%s15695_s8 + $0xa0] sm:$0xff] }
  0x5c   : > { %3396 = vperm.xlu1 %10492, %v3298_v12   ;;  %v6947_v12 = vld [vmem:[%s15689_s2 + $0xa0] sm:$0xff] }
  0x5d   : > { %3391 = vperm.xlu0 %10491, %v3297_v13   ;;  %v6729_v13 = vld [vmem:[%s15695_s8 + $0x90] sm:$0xff] }
  0x60   : > { %6807 = vperm.xlu1 %10492, %v6725_v17   ;;  %v6728_v17 = vld [vmem:[%s15695_s8 + $0x88] sm:$0xff] }
  0x61   : > { %6812 = vperm.xlu0 %10491, %v6726_v18   ;;  %v6945_v18 = vld [vmem:[%s15689_s2 + $0x90] sm:$0xff] }
  0x64   : > { %7028 = vperm.xlu1 %10492, %v6942_v22   ;;  %v6944_v22 = vld [vmem:[%s15689_s2 + $0x88] sm:$0xff] }
  0x65   : > { %6802 = vperm.xlu0 %10491, %v6724_v23   ;;  %v7609_v23 = vld [vmem:[%s15699_s12 + $0x8] sm:$0xff] }
  0x68   : > { %7023 = vperm.xlu1 %10492, %v6941_v27  }
  0x69   : > { %6797 = vperm.xlu0 %10491, %v6723_v28  }
  0x6c   : > { %7018 = vperm.xlu1 %10492, %v6940_v30  }
  0x6d   : > { %6792 = vperm.xlu0 %10491, %v6722_v31  }
  0x70   : > { %7013 = vperm.xlu1 %10492, %v6939_v33  }
  0x71   : > { %6787 = vperm.xlu0 %10491, %v6721_v34  }
  0x74   : > { %7008 = vperm.xlu1 %10492, %v6938_v35  }
  0x75   : > { %6782 = vperm.xlu0 %10491, %v6720_v36  }
  0x78   : > { %7003 = vperm.xlu1 %10492, %v6937_v37  }
  0x79   : > { %6777 = vperm.xlu0 %10491, %v6719_v38  }
  0x7c   : > { %6998 = vperm.xlu1 %10492, %v6936_v39  }
  0x7d   : > { %6772 = vperm.xlu0 %10491, %v6718_v40  }
  0x80   : > { %6993 = vperm.xlu1 %10492, %v6935_v41  }
  0x81   : > { %6767 = vperm.xlu0 %10491, %v6717_v42   ;;  %v15736_v42 = vmov 0.0  }
  0x84   : > { %6988 = vperm.xlu1 %10492, %v6934_v43   ;;  %v11195_v43 = vsel %vm439_vm1, 1.0, %v15736_v42  ;;  %vm15708_vm1 = vcmp.eq.s32.totalorder %v10839_v48, 4294967294 }
  0x85   : > { %6762 = vperm.xlu0 %10491, %v6716_v45   ;;  %15849 = vst [vmem:[#allocation22_spill] sm:$0xff] %v11195_v43 }
  0x88   : > { %6983 = vperm.xlu1 %10492, %v6933_v46  }
  0x89   : > { %6757 = vperm.xlu0 %10491, %v6715_v47  }
  0x8c   : > { %6978 = vperm.xlu1 %10492, %v6932_v49  }
  0x8d   : > { %6752 = vperm.xlu0 %10491, %v6714_v51  }
  0x90   : > { %6973 = vperm.xlu1 %10492, %v6931_v52  }
  0x91   : > { %6747 = vperm.xlu0 %10491, %v6713_v53  }
  0x93   : > { %v519_v27 = vpop.permute.xlu1 %518  ;;  %v509_v28 = vpop.permute.xlu0 %508 }
  0x94   : > { %6968 = vperm.xlu1 %10492, %v6930_v56  }
  0x95   : > { %6742 = vperm.xlu0 %10491, %v6712_v58  }
  0x97   : > { %v524_v30 = vpop.permute.xlu1 %523  ;;  %v514_v31 = vpop.permute.xlu0 %513 }
  0x98   : > { %6963 = vperm.xlu1 %10492, %v6929_v59  }
  0x99   : > { %6737 = vperm.xlu0 %10491, %v6711_v60  }
  0x9b   : > { %v534_v33 = vpop.permute.xlu1 %533 }
  0x9c   : > { %6958 = vperm.xlu1 %10492, %v6928_v62   ;;  %v529_v34 = vpop.permute.xlu0 %528 }
  0x9d   : > { %6852 = vperm.xlu0 %10491, %v6734_v0  }
  0x9f   : > { %v544_v39 = vpop.permute.xlu1 %543 }
  0xa0   : > { %6953 = vperm.xlu1 %10492, %v6927_v1   ;;  %v539_v47 = vpop.permute.xlu0 %538 }
  0xa1   : > { %6847 = vperm.xlu0 %10491, %v6733_v2  }
  0xa3   : > { %v554_v60 = vpop.permute.xlu1 %553 }
  0xa4   : > { %7068 = vperm.xlu1 %10492, %v6950_v4   ;;  %v549_v2 = vpop.permute.xlu0 %548 }
  0xa5   : > { %6842 = vperm.xlu0 %10491, %v6732_v6  }
  0xa8   : > { %7063 = vperm.xlu1 %10492, %v6949_v7  }
  0xa9   : > { %6837 = vperm.xlu0 %10491, %v6731_v8  }
  0xac   : > { %7058 = vperm.xlu1 %10492, %v6948_v9  }
  0xad   : > { %6832 = vperm.xlu0 %10491, %v6730_v11  }
  0xb0   : > { %7053 = vperm.xlu1 %10492, %v6947_v12  }
  0xb1   : > { %6827 = vperm.xlu0 %10491, %v6729_v13  }
  0xb4   : > { %7048 = vperm.xlu1 %10492, %v6946_v15   ;;  %v564_v15 = vpop.permute.xlu1 %563 }
  0xb5   : > { %6822 = vperm.xlu0 %10491, %v6728_v17  }
  0xb8   : > { %7043 = vperm.xlu1 %10492, %v6945_v18  }
  0xb9   : > { %6817 = vperm.xlu0 %10491, %v6727_v19  }
  0xbc   : > { %7033 = vperm.xlu1 %10492, %v6943_v21  }
  0xbd   : > { %7038 = vperm.xlu0 %10491, %v6944_v22  }
  0xc0   : > { %7617 = vperm.xlu1 %10492, %v7609_v23   ;;  %v559_v23 = vpop.permute.xlu0 %558 }
  0xc1   : > { %7612 = vperm.xlu0 %10491, %v7608_v25  }
  0xe1   : > { %v9240_v35 = vpop.f32.mrf.mxu1 }
  0xe2   : > { %v711_v36 = vadd.f32 %v9240_v35, %v514_v31 }
  0xe3   : > { %v705_v37 = vpop.f32.mrf.mxu1 }
  0xe4   : > { %v706_v38 = vadd.f32 %v705_v37, %v509_v28  ;;  %v785_v40 = vmax.f32 %v711_v36, 0.0  ;;  %v574_v36 = vpop.permute.xlu1 %573 }
  0xe5   : > { %v9243_v41 = vpop.f32.mrf.mxu1 }
  0xe6   : > { %v784_v45 = vmax.f32 %v706_v38, 0.0  ;;  %v721_v46 = vadd.f32 %v9243_v41, %v524_v30  ;;  %v11201_v53 = vmul.f32 %v785_v40, %v11195_v43  ;;  %v569_v40 = vpop.permute.xlu0 %568 }
  0xe7   : > { %v715_v49 = vpop.f32.mrf.mxu1 }
  0xe8   : > { %v11198_v51 = vmul.f32 %v784_v45, %v11195_v43  ;;  %v716_v52 = vadd.f32 %v715_v49, %v519_v27  ;;  %v787_v44 = vmax.f32 %v721_v46, 0.0 }
  0xe9   : > { %v9246_v56 = vpop.f32.mrf.mxu1 }
  0xea   : > { %v786_v58 = vmax.f32 %v716_v52, 0.0  ;;  %v731_v59 = vadd.f32 %v9246_v56, %v534_v33  ;;  %9294 = vmatprep.mubr.f32.mxu1 %v11198_v51  ;;  %v11209_v4 = vmul.f32 %v787_v44, %v11195_v43 }
  0xeb   : > { %v725_v62 = vpop.f32.mrf.mxu1  ;;  %9295 = vmatmul.mubr.f32.vlgmr.msra.gmra.mxu1 %v11201_v53 }
  0xec   : > { %v11206_v0 = vmul.f32 %v786_v58, %v11195_v43  ;;  %v726_v1 = vadd.f32 %v725_v62, %v529_v34  ;;  %v789_v6 = vmax.f32 %v731_v59, 0.0  ;;  %v584_v58 = vpop.permute.xlu1 %583 }
  0xed   : > { %v9249_v7 = vpop.f32.mrf.mxu1 }
  0xee   : > { %v788_v8 = vmax.f32 %v726_v1, 0.0  ;;  %v741_v9 = vadd.f32 %v9249_v7, %v544_v39  ;;  %9297 = vmatprep.mubr.f32.mxu1 %v11206_v0  ;;  %v11217_v17 = vmul.f32 %v789_v6, %v11195_v43  ;;  %v579_v6 = vpop.permute.xlu0 %578 }
  0xef   : > { %v735_v11 = vpop.f32.mrf.mxu1  ;;  %9298 = vmatmul.mubr.f32.gmra.mxu1 %v11209_v4 }
  0xf0   : > { %v11214_v12 = vmul.f32 %v788_v8, %v11195_v43  ;;  %v736_v13 = vadd.f32 %v735_v11, %v539_v47  ;;  %v791_v18 = vmax.f32 %v741_v9, 0.0 }
  0xf1   : > { %v9252_v19 = vpop.f32.mrf.mxu1 }
  0xf2   : > { %v790_v21 = vmax.f32 %v736_v13, 0.0  ;;  %v751_v22 = vadd.f32 %v9252_v19, %v554_v60  ;;  %9300 = vmatprep.mubr.f32.mxu1 %v11214_v12  ;;  %v11225_v30 = vmul.f32 %v791_v18, %v11195_v43 }
  0xf3   : > { %v745_v25 = vpop.f32.mrf.mxu1  ;;  %9301 = vmatmul.mubr.f32.gmra.mxu1 %v11217_v17 }
  0xf4   : > { %v11222_v27 = vmul.f32 %v790_v21, %v11195_v43  ;;  %v746_v28 = vadd.f32 %v745_v25, %v549_v2  ;;  %v793_v31 = vmax.f32 %v751_v22, 0.0  ;;  %v1014_v21 = vld [vmem:[%s15692_s5] sm:$0xff]  ;;  %v7727_v25 = vld [vmem:[%s15692_s5 + $0x1f0] sm:$0xff] }
  0xf5   : > { %v9255_v33 = vpop.f32.mrf.mxu1  ;;  %v7725_v22 = vld [vmem:[%s15692_s5 + $0x1e0] sm:$0xff]  ;;  %9350 = vmatprep.mubr.f32.mxu0 %v1014_v21 }
  0xf6   : > { %v792_v34 = vmax.f32 %v746_v28, 0.0  ;;  %v761_v35 = vadd.f32 %v9255_v33, %v564_v15  ;;  %9303 = vmatprep.mubr.f32.mxu1 %v11222_v27  ;;  %v11233_v41 = vmul.f32 %v793_v31, %v11195_v43  ;;  %v7728_v28 = vld [vmem:[%s15692_s5 + $0x1f8] sm:$0xff]  ;;  %v7729_v31 = vld [vmem:[%s15692_s5 + $0x200] sm:$0xff]  ;;  %v7730_v33 = vld [vmem:[%s15692_s5 + $0x208] sm:$0xff] }
  0xf7   : > { %v755_v37 = vpop.f32.mrf.mxu1  ;;  %9304 = vmatmul.mubr.f32.gmra.mxu1 %v11225_v30 }
  0xf8   : > { %v11230_v38 = vmul.f32 %v792_v34, %v11195_v43  ;;  %v756_v39 = vadd.f32 %v755_v37, %v559_v23  ;;  %v795_v45 = vmax.f32 %v761_v35, 0.0  ;;  %v7726_v23 = vld [vmem:[%s15692_s5 + $0x1e8] sm:$0xff]  ;;  %v7731_v34 = vld [vmem:[%s15692_s5 + $0x210] sm:$0xff]  ;;  %v7732_v35 = vld [vmem:[%s15692_s5 + $0x218] sm:$0xff] }
  0xf9   : > { %v9258_v46 = vpop.f32.mrf.mxu1  ;;  %v7734_v37 = vld [vmem:[%s15692_s5 + $0x228] sm:$0xff] }
  0xfa   : > { %v794_v47 = vmax.f32 %v756_v39, 0.0  ;;  %v771_v49 = vadd.f32 %v9258_v46, %v574_v36  ;;  %9306 = vmatprep.mubr.f32.mxu1 %v11230_v38  ;;  %v11241_v59 = vmul.f32 %v795_v45, %v11195_v43  ;;  %v7733_v36 = vld [vmem:[%s15692_s5 + $0x220] sm:$0xff]  ;;  %v7735_v39 = vld [vmem:[%s15692_s5 + $0x230] sm:$0xff]  ;;  %v7738_v46 = vld [vmem:[%s15692_s5 + $0x248] sm:$0xff] }
  0xfb   : > { %v765_v52 = vpop.f32.mrf.mxu1  ;;  %9307 = vmatmul.mubr.f32.gmra.mxu1 %v11233_v41  ;;  %v7737_v45 = vld [vmem:[%s15692_s5 + $0x240] sm:$0xff] }
  0xfc   : > { %v11238_v44 = vmul.f32 %v794_v47, %v11195_v43  ;;  %v766_v56 = vadd.f32 %v765_v52, %v569_v40  ;;  %v797_v60 = vmax.f32 %v771_v49, 0.0  ;;  %v7736_v40 = vld [vmem:[%s15692_s5 + $0x238] sm:$0xff]  ;;  %v7739_v47 = vld [vmem:[%s15692_s5 + $0x250] sm:$0xff]  ;;  %v7741_v52 = vld [vmem:[%s15692_s5 + $0x260] sm:$0xff] }
  0xfd   : > { %v9261_v62 = vpop.f32.mrf.mxu1  ;;  %v7740_v49 = vld [vmem:[%s15692_s5 + $0x258] sm:$0xff] }
  0xfe   : > { %v796_v1 = vmax.f32 %v766_v56, 0.0  ;;  %v781_v2 = vadd.f32 %v9261_v62, %v584_v58  ;;  %9309 = vmatprep.mubr.f32.mxu1 %v11238_v44  ;;  %v11249_v13 = vmul.f32 %v797_v60, %v11195_v43  ;;  %v7742_v56 = vld [vmem:[%s15692_s5 + $0x268] sm:$0xff]  ;;  %v7743_v58 = vld [vmem:[%s15692_s5 + $0x270] sm:$0xff]  ;;  %v7744_v60 = vld [vmem:[%s15692_s5 + $0x278] sm:$0xff] }
  0xff   : > { %v775_v7 = vpop.f32.mrf.mxu1  ;;  %9310 = vmatmul.mubr.f32.gmra.mxu1 %v11241_v59 }
 0x100   : > { %v11246_v8 = vmul.f32 %v796_v1, %v11195_v43  ;;  %v799_v9 = vmax.f32 %v781_v2, 0.0  ;;  %v776_v11 = vadd.f32 %v775_v7, %v579_v6 }
 0x102   : > { %v11252_v15 = vmul.f32 %v799_v9, %v11195_v43  ;;  %v798_v18 = vmax.f32 %v776_v11, 0.0  ;;  %9312 = vmatprep.mubr.f32.mxu1 %v11246_v8 }
 0x103   : > { %9313 = vmatmul.mubr.f32.gmra.mxu1 %v11249_v13 }
 0x104   : > { %15850 = vst [vmem:[#allocation23_spill] sm:$0xff] %v11252_v15  ;;  %v11257_v19 = vmul.f32 %v798_v18, %v11195_v43  ;;  %9380 = vmatprep.subr.mxu1 %v11252_v15 }
 0x105   : > { %9381 = vmatpush3.msra.mxu1 %v11252_v15 }
 0x106   : > { %15851 = vst [vmem:[#allocation24_spill] sm:$0xff] %v11257_v19  ;;  %9315 = vmatprep.mubr.f32.mxu1 %v11257_v19  ;;  %9382 = vmatprep.subr.mxu1 %v11257_v19 }
 0x107   : > { %9316 = vmatmul.mubr.f32.gmra.mxu1 %v11252_v15 }
 0x108   : > { %9383 = vmatpush3.msra.mxu1 %v11257_v19  ;;  %9412 = vmatprep.mubr.f32.mxu1 %v7725_v22 }
 0x109   : > { %9384 = vmatprep.subr.mxu1 %v11249_v13 }
 0x10a   : > { %9385 = vmatpush3.msra.mxu1 %v11249_v13 }
 0x10b   : > { %9386 = vmatprep.subr.mxu1 %v11246_v8 }
 0x10c   : > { %9387 = vmatpush3.msra.mxu1 %v11246_v8 }
 0x10d   : > { %9388 = vmatprep.subr.mxu1 %v11241_v59 }
 0x10e   : > { %9389 = vmatpush3.msra.mxu1 %v11241_v59 }
 0x10f   : > { %9390 = vmatprep.subr.mxu1 %v11238_v44 }
 0x110   : > { %9391 = vmatpush3.msra.mxu1 %v11238_v44 }
 0x111   : > { %9392 = vmatprep.subr.mxu1 %v11233_v41 }
 0x112   : > { %9393 = vmatpush3.msra.mxu1 %v11233_v41 }
 0x113   : > { %9394 = vmatprep.subr.mxu1 %v11230_v38 }
 0x114   : > { %9395 = vmatpush3.msra.mxu1 %v11230_v38 }
 0x115   : > { %9396 = vmatprep.subr.mxu1 %v11225_v30 }
 0x116   : > { %9397 = vmatpush3.msra.mxu1 %v11225_v30 }
 0x117   : > { %9398 = vmatprep.subr.mxu1 %v11222_v27 }
 0x118   : > { %9399 = vmatpush3.msra.mxu1 %v11222_v27 }
 0x119   : > { %9400 = vmatprep.subr.mxu1 %v11217_v17 }
 0x11a   : > { %9401 = vmatpush3.msra.mxu1 %v11217_v17 }
 0x11b   : > { %9402 = vmatprep.subr.mxu1 %v11214_v12 }
 0x11c   : > { %9403 = vmatpush3.msra.mxu1 %v11214_v12 }
 0x11d   : > { %9404 = vmatprep.subr.mxu1 %v11209_v4 }
 0x11e   : > { %9405 = vmatpush3.msra.mxu1 %v11209_v4 }
 0x11f   : > { %9406 = vmatprep.subr.mxu1 %v11206_v0 }
 0x120   : > { %9407 = vmatpush3.msra.mxu1 %v11206_v0 }
 0x121   : > { %9408 = vmatprep.subr.mxu1 %v11201_v53 }
 0x122   : > { %9409 = vmatpush3.msra.mxu1 %v11201_v53 }
 0x123   : > { %9410 = vmatprep.subr.mxu1 %v11198_v51 }
 0x124   : > { %9411 = vmatpush3.msra.mxu1 %v11198_v51 }
 0x125   : > { %9413 = vmatmul.mubr.f32.vlgmr.msra.gmra.mxu1 %v7726_v23 }
 0x126   : > { %9415 = vmatprep.mubr.f32.mxu1 %v7727_v25 }
 0x129   : > { %9416 = vmatmul.mubr.f32.gmra.mxu1 %v7728_v28 }
 0x12a   : > { %9418 = vmatprep.mubr.f32.mxu1 %v7729_v31 }
 0x12d   : > { %9419 = vmatmul.mubr.f32.gmra.mxu1 %v7730_v33 }
 0x12e   : > { %9421 = vmatprep.mubr.f32.mxu1 %v7731_v34 }
 0x131   : > { %9422 = vmatmul.mubr.f32.gmra.mxu1 %v7732_v35  ;;  %v1015_v35 = vld [vmem:[%s15692_s5 + $0x8] sm:$0xff] }
 0x132   : > { %9424 = vmatprep.mubr.f32.mxu1 %v7733_v36  ;;  %v1016_v36 = vld [vmem:[%s15692_s5 + $0x10] sm:$0xff] }
 0x135   : > { %9425 = vmatmul.mubr.f32.gmra.mxu1 %v7734_v37  ;;  %v1017_v37 = vld [vmem:[%s15692_s5 + $0x18] sm:$0xff] }
 0x136   : > { %9427 = vmatprep.mubr.f32.mxu1 %v7735_v39  ;;  %v1018_v39 = vld [vmem:[%s15692_s5 + $0x20] sm:$0xff] }
 0x139   : > { %9428 = vmatmul.mubr.f32.gmra.mxu1 %v7736_v40  ;;  %v1019_v40 = vld [vmem:[%s15692_s5 + $0x28] sm:$0xff] }
 0x13a   : > { %9430 = vmatprep.mubr.f32.mxu1 %v7737_v45  ;;  %v1020_v45 = vld [vmem:[%s15692_s5 + $0x30] sm:$0xff] }
 0x13d   : > { %9431 = vmatmul.mubr.f32.gmra.mxu1 %v7738_v46  ;;  %v1021_v46 = vld [vmem:[%s15692_s5 + $0x38] sm:$0xff] }
 0x13e   : > { %9433 = vmatprep.mubr.f32.mxu1 %v7739_v47  ;;  %v1022_v47 = vld [vmem:[%s15692_s5 + $0x40] sm:$0xff] }
 0x141   : > { %9434 = vmatmul.mubr.f32.gmra.mxu1 %v7740_v49  ;;  %v1023_v49 = vld [vmem:[%s15692_s5 + $0x48] sm:$0xff] }
 0x142   : > { %9436 = vmatprep.mubr.f32.mxu1 %v7741_v52  ;;  %v1024_v52 = vld [vmem:[%s15692_s5 + $0x50] sm:$0xff] }
 0x145   : > { %9437 = vmatmul.mubr.f32.gmra.mxu1 %v7742_v56  ;;  %v1025_v56 = vld [vmem:[%s15692_s5 + $0x58] sm:$0xff] }
 0x146   : > { %9439 = vmatprep.mubr.f32.mxu1 %v7743_v58  ;;  %v1026_v58 = vld [vmem:[%s15692_s5 + $0x60] sm:$0xff] }
 0x149   : > { %9440 = vmatmul.mubr.f32.gmra.mxu1 %v7744_v60  ;;  %v1027_v60 = vld [vmem:[%s15692_s5 + $0x68] sm:$0xff] }
 0x1ab   : > { %v9296_v62 = vpop.f32.mrf.mxu1 }
 0x1ad   : > { %v935_v1 = vpop.f32.mrf.mxu1 }
 0x1af   : > { %v9299_v2 = vpop.f32.mrf.mxu1 }
 0x1b1   : > { %v945_v6 = vpop.f32.mrf.mxu1 }
 0x1b3   : > { %v9302_v7 = vpop.f32.mrf.mxu1 }
 0x1b5   : > { %v955_v9 = vpop.f32.mrf.mxu1 }
 0x1b7   : > { %v9305_v11 = vpop.f32.mrf.mxu1 }
 0x1b9   : > { %v965_v18 = vpop.f32.mrf.mxu1 }
 0x1bb   : > { %v9308_v21 = vpop.f32.mrf.mxu1 }
 0x1bd   : > { %v975_v22 = vpop.f32.mrf.mxu1 }
 0x1bf   : > { %v9311_v23 = vpop.f32.mrf.mxu1 }
 0x1c1   : > { %v985_v25 = vpop.f32.mrf.mxu1 }
 0x1c3   : > { %v9314_v28 = vpop.f32.mrf.mxu1 }
 0x1c5   : > { %v995_v31 = vpop.f32.mrf.mxu1 }
 0x1c7   : > { %v9317_v33 = vpop.f32.mrf.mxu1 }
 0x1c8   : > { %9318 = vmatprep.subr.mxu0 %v9317_v33 }
 0x1c9   : > { %v1005_v34 = vpop.f32.mrf.mxu1  ;;  %9319 = vmatpush3.msra.mxu0 %v9317_v33 }
 0x1ca   : > { %9320 = vmatprep.subr.mxu0 %v1005_v34 }
 0x1cb   : > { %9321 = vmatpush3.msra.mxu0 %v1005_v34 }
 0x1cc   : > { %9322 = vmatprep.subr.mxu0 %v9314_v28 }
 0x1cd   : > { %9323 = vmatpush3.msra.mxu0 %v9314_v28 }
 0x1ce   : > { %9324 = vmatprep.subr.mxu0 %v995_v31 }
 0x1cf   : > { %9325 = vmatpush3.msra.mxu0 %v995_v31 }
 0x1d0   : > { %9326 = vmatprep.subr.mxu0 %v9311_v23 }
 0x1d1   : > { %9327 = vmatpush3.msra.mxu0 %v9311_v23 }
 0x1d2   : > { %9328 = vmatprep.subr.mxu0 %v985_v25 }
 0x1d3   : > { %9329 = vmatpush3.msra.mxu0 %v985_v25  ;;  %v7813_v25 = vld [vmem:[%s15692_s5 + $0x140] sm:$0xff] }
 0x1d4   : > { %9330 = vmatprep.subr.mxu0 %v9308_v21 }
 0x1d5   : > { %9331 = vmatpush3.msra.mxu0 %v9308_v21 }
 0x1d6   : > { %9332 = vmatprep.subr.mxu0 %v975_v22 }
 0x1d7   : > { %9333 = vmatpush3.msra.mxu0 %v975_v22 }
 0x1d8   : > { %9334 = vmatprep.subr.mxu0 %v9305_v11 }
 0x1d9   : > { %9335 = vmatpush3.msra.mxu0 %v9305_v11  ;;  %v7777_v11 = vld [vmem:[%s15692_s5 + $0xa0] sm:$0xff] }
 0x1da   : > { %9336 = vmatprep.subr.mxu0 %v965_v18  ;;  %9530 = vmatprep.mubr.f32.mxu1 %v7777_v11 }
 0x1db   : > { %9337 = vmatpush3.msra.mxu0 %v965_v18 }
 0x1dc   : > { %9338 = vmatprep.subr.mxu0 %v9302_v7 }
 0x1dd   : > { %9339 = vmatpush3.msra.mxu0 %v9302_v7  ;;  %v1032_v7 = vld [vmem:[%s15692_s5 + $0x90] sm:$0xff] }
 0x1de   : > { %9340 = vmatprep.subr.mxu0 %v955_v9 }
 0x1df   : > { %9341 = vmatpush3.msra.mxu0 %v955_v9  ;;  %v1033_v9 = vld [vmem:[%s15692_s5 + $0x98] sm:$0xff] }
 0x1e0   : > { %9342 = vmatprep.subr.mxu0 %v9299_v2 }
 0x1e1   : > { %9343 = vmatpush3.msra.mxu0 %v9299_v2  ;;  %v1030_v2 = vld [vmem:[%s15692_s5 + $0x80] sm:$0xff] }
 0x1e2   : > { %9344 = vmatprep.subr.mxu0 %v945_v6 }
 0x1e3   : > { %9345 = vmatpush3.msra.mxu0 %v945_v6  ;;  %v1031_v6 = vld [vmem:[%s15692_s5 + $0x88] sm:$0xff] }
 0x1e4   : > { %9346 = vmatprep.subr.mxu0 %v9296_v62 }
 0x1e5   : > { %9347 = vmatpush3.msra.mxu0 %v9296_v62  ;;  %v1028_v62 = vld [vmem:[%s15692_s5 + $0x70] sm:$0xff] }
 0x1e6   : > { %9348 = vmatprep.subr.mxu0 %v935_v1 }
 0x1e7   : > { %9349 = vmatpush3.msra.mxu0 %v935_v1  ;;  %v1029_v1 = vld [vmem:[%s15692_s5 + $0x78] sm:$0xff] }
 0x1e8   : > { %9351 = vmatmul.mubr.f32.vlgmr.msra.gmra.mxu0 %v1015_v35  ;;  %9442 = vmatprep.subr.msk.mxu0 %vm15708_vm1, %v15738_v54 }
 0x1e9   : > { %9353 = vmatprep.mubr.f32.mxu0 %v1016_v36  ;;  %9443 = vmatpush3.msk.msra.mxu0 %vm15708_vm1, %v15738_v54  ;;  %vm15712_vm1 = vcmp.eq.s32.totalorder %v10886_v61, 4294967294 }
 0x1ea   : > { %9444 = vmatprep.subr.msk.mxu0 %vm15709_vm0, %v15738_v54 }
 0x1eb   : > { %9445 = vmatpush3.msk.msra.mxu0 %vm15709_vm0, %v15738_v54  ;;  %vm15713_vm0 = vcmp.eq.s32.totalorder %v10894_v63, 4294967294 }
 0x1ec   : > { %9354 = vmatmul.mubr.f32.gmra.mxu0 %v1017_v37  ;;  %9446 = vmatprep.subr.msk.mxu0 %vm15710_vm15, %v15738_v54 }
 0x1ed   : > { %9356 = vmatprep.mubr.f32.mxu0 %v1018_v39  ;;  %9447 = vmatpush3.msk.msra.mxu0 %vm15710_vm15, %v15738_v54  ;;  %vm15714_vm15 = vcmp.eq.s32.totalorder %v10910_v3, 4294967294 }
 0x1ee   : > { %9448 = vmatprep.subr.msk.mxu0 %vm15711_vm14, %v15738_v54 }
 0x1ef   : > { %9449 = vmatpush3.msk.msra.mxu0 %vm15711_vm14, %v15738_v54  ;;  %vm15715_vm14 = vcmp.eq.s32.totalorder %v10918_v5, 4294967294 }
 0x1f0   : > { %9357 = vmatmul.mubr.f32.gmra.mxu0 %v1019_v40  ;;  %9450 = vmatprep.subr.msk.mxu0 %vm15712_vm1, %v15738_v54 }
 0x1f1   : > { %9359 = vmatprep.mubr.f32.mxu0 %v1020_v45  ;;  %9451 = vmatpush3.msk.msra.mxu0 %vm15712_vm1, %v15738_v54  ;;  %vm15716_vm1 = vcmp.eq.s32.totalorder %v10939_v10, 4294967294 }
 0x1f2   : > { %9452 = vmatprep.subr.msk.mxu0 %vm15713_vm0, %v15738_v54 }
 0x1f3   : > { %9453 = vmatpush3.msk.msra.mxu0 %vm15713_vm0, %v15738_v54  ;;  %vm15717_vm0 = vcmp.eq.s32.totalorder %v10956_v14, 4294967294 }
 0x1f4   : > { %9360 = vmatmul.mubr.f32.gmra.mxu0 %v1021_v46  ;;  %9454 = vmatprep.subr.msk.mxu0 %vm15714_vm15, %v15738_v54 }
 0x1f5   : > { %9362 = vmatprep.mubr.f32.mxu0 %v1022_v47  ;;  %9455 = vmatpush3.msk.msra.mxu0 %vm15714_vm15, %v15738_v54  ;;  %vm15718_vm15 = vcmp.eq.s32.totalorder %v10964_v16, 4294967294 }
 0x1f6   : > { %9456 = vmatprep.subr.msk.mxu0 %vm15715_vm14, %v15738_v54 }
 0x1f7   : > { %9457 = vmatpush3.msk.msra.mxu0 %vm15715_vm14, %v15738_v54  ;;  %vm15719_vm14 = vcmp.eq.s32.totalorder %v10984_v20, 4294967294 }
 0x1f8   : > { %9363 = vmatmul.mubr.f32.gmra.mxu0 %v1023_v49  ;;  %9458 = vmatprep.subr.msk.mxu0 %vm15716_vm1, %v15738_v54 }
 0x1f9   : > { %9365 = vmatprep.mubr.f32.mxu0 %v1024_v52  ;;  %9459 = vmatpush3.msk.msra.mxu0 %vm15716_vm1, %v15738_v54  ;;  %vm15720_vm1 = vcmp.eq.s32.totalorder %v11001_v24, 4294967294 }
 0x1fa   : > { %9460 = vmatprep.subr.msk.mxu0 %vm15717_vm0, %v15738_v54 }
 0x1fb   : > { %9461 = vmatpush3.msk.msra.mxu0 %vm15717_vm0, %v15738_v54  ;;  %vm15723_vm0 = vcmp.eq.s32.totalorder %v11009_v26, 4294967294 }
 0x1fc   : > { %9366 = vmatmul.mubr.f32.gmra.mxu0 %v1025_v56  ;;  %9462 = vmatprep.subr.msk.mxu0 %vm15718_vm15, %v15738_v54 }
 0x1fd   : > { %9368 = vmatprep.mubr.f32.mxu0 %v1026_v58  ;;  %9463 = vmatpush3.msk.msra.mxu0 %vm15718_vm15, %v15738_v54  ;;  %vm15721_vm15 = vcmp.eq.s32.totalorder %v11028_v29, 4294967294 }
 0x1fe   : > { %9464 = vmatprep.subr.msk.mxu0 %vm15719_vm14, %v15738_v54 }
 0x1ff   : > { %9465 = vmatpush3.msk.msra.mxu0 %vm15719_vm14, %v15738_v54  ;;  %vm15722_vm14 = vcmp.eq.s32.totalorder %v11045_v32, 4294967294 }
 0x200   : > { %9369 = vmatmul.mubr.f32.gmra.mxu0 %v1027_v60  ;;  %9466 = vmatprep.subr.msk.mxu0 %vm15720_vm1, %v15738_v54 }
 0x201   : > { %9371 = vmatprep.mubr.f32.mxu0 %v1028_v62  ;;  %9467 = vmatpush3.msk.msra.mxu0 %vm15720_vm1, %v15738_v54  ;;  %vm15724_vm1 = vcmp.eq.s32.totalorder %v10839_v48, 4294967295 }
 0x202   : > { %9468 = vmatprep.subr.msk.mxu0 %vm15723_vm0, %v15738_v54 }
 0x203   : > { %9469 = vmatpush3.msk.msra.mxu0 %vm15723_vm0, %v15738_v54  ;;  %vm15727_vm0 = vcmp.eq.s32.totalorder %v10869_v57, 4294967295 }
 0x204   : > { %9372 = vmatmul.mubr.f32.gmra.mxu0 %v1029_v1  ;;  %9470 = vmatprep.subr.msk.mxu0 %vm15721_vm15, %v15738_v54 }
 0x205   : > { %9374 = vmatprep.mubr.f32.mxu0 %v1030_v2  ;;  %9471 = vmatpush3.msk.msra.mxu0 %vm15721_vm15, %v15738_v54  ;;  %vm15725_vm15 = vcmp.eq.s32.totalorder %v10844_v50, 4294967295 }
 0x206   : > { %9472 = vmatprep.subr.msk.mxu0 %vm15722_vm14, %v15738_v54 }
 0x207   : > { %9473 = vmatpush3.msk.msra.mxu0 %vm15722_vm14, %v15738_v54  ;;  %vm15726_vm14 = vcmp.eq.s32.totalorder %v10861_v55, 4294967295 }
 0x208   : > { %9375 = vmatmul.mubr.f32.gmra.mxu0 %v1031_v6  ;;  %9560 = vmatprep.subr.msk.mxu0 %vm15724_vm1, %v15738_v54 }
 0x209   : > { %9377 = vmatprep.mubr.f32.mxu0 %v1032_v7 }
 0x20c   : > { %9378 = vmatmul.mubr.f32.gmra.mxu0 %v1033_v9 }
 0x20d   : > { %9474 = vmatprep.mubr.f32.mxu0 %v11198_v51 }
 0x210   : > { %9475 = vmatmul.mubr.f32.vlgmr.msra.gmra.mxu0 %v11201_v53 }
 0x211   : > { %9477 = vmatprep.mubr.f32.mxu0 %v11206_v0  ;;  %9561 = vmatpush3.msk.msra.mxu0 %vm15724_vm1, %v15738_v54  ;;  %vm15728_vm1 = vcmp.eq.s32.totalorder %v10886_v61, 4294967295 }
 0x212   : > { %9562 = vmatprep.subr.msk.mxu0 %vm15725_vm15, %v15738_v54 }
 0x213   : > { %9563 = vmatpush3.msk.msra.mxu0 %vm15725_vm15, %v15738_v54  ;;  %vm15729_vm15 = vcmp.eq.s32.totalorder %v10894_v63, 4294967295 }
 0x214   : > { %9478 = vmatmul.mubr.f32.gmra.mxu0 %v11209_v4  ;;  %9564 = vmatprep.subr.msk.mxu0 %vm15726_vm14, %v15738_v54 }
 0x215   : > { %9480 = vmatprep.mubr.f32.mxu0 %v11214_v12  ;;  %9565 = vmatpush3.msk.msra.mxu0 %vm15726_vm14, %v15738_v54  ;;  %vm15730_vm14 = vcmp.eq.s32.totalorder %v10910_v3, 4294967295 }
 0x216   : > { %9566 = vmatprep.subr.msk.mxu0 %vm15727_vm0, %v15738_v54 }
 0x217   : > { %9567 = vmatpush3.msk.msra.mxu0 %vm15727_vm0, %v15738_v54  ;;  %vm15731_vm0 = vcmp.eq.s32.totalorder %v10918_v5, 4294967295 }
 0x218   : > { %9481 = vmatmul.mubr.f32.gmra.mxu0 %v11217_v17  ;;  %9568 = vmatprep.subr.msk.mxu0 %vm15728_vm1, %v15738_v54 }
 0x219   : > { %9483 = vmatprep.mubr.f32.mxu0 %v11222_v27  ;;  %9569 = vmatpush3.msk.msra.mxu0 %vm15728_vm1, %v15738_v54  ;;  %vm15732_vm1 = vcmp.eq.s32.totalorder %v10939_v10, 4294967295 }
 0x21a   : > { %9570 = vmatprep.subr.msk.mxu0 %vm15729_vm15, %v15738_v54 }
 0x21b   : > { %9571 = vmatpush3.msk.msra.mxu0 %vm15729_vm15, %v15738_v54  ;;  %vm15733_vm15 = vcmp.eq.s32.totalorder %v10956_v14, 4294967295 }
 0x21c   : > { %9484 = vmatmul.mubr.f32.gmra.mxu0 %v11225_v30  ;;  %9572 = vmatprep.subr.msk.mxu0 %vm15730_vm14, %v15738_v54 }
 0x21d   : > { %9486 = vmatprep.mubr.f32.mxu0 %v11230_v38  ;;  %9573 = vmatpush3.msk.msra.mxu0 %vm15730_vm14, %v15738_v54  ;;  %vm15734_vm14 = vcmp.eq.s32.totalorder %v10964_v16, 4294967295 }
 0x21e   : > { %9574 = vmatprep.subr.msk.mxu0 %vm15731_vm0, %v15738_v54 }
 0x21f   : > { %9575 = vmatpush3.msk.msra.mxu0 %vm15731_vm0, %v15738_v54  ;;  %vm15735_vm0 = vcmp.eq.s32.totalorder %v10984_v20, 4294967295 }
 0x220   : > { %9487 = vmatmul.mubr.f32.gmra.mxu0 %v11233_v41  ;;  %9576 = vmatprep.subr.msk.mxu0 %vm15732_vm1, %v15738_v54 }
 0x221   : > { %9489 = vmatprep.mubr.f32.mxu0 %v11238_v44  ;;  %9577 = vmatpush3.msk.msra.mxu0 %vm15732_vm1, %v15738_v54  ;;  %vm15756_vm1 = vcmp.eq.s32.totalorder %v11001_v24, 4294967295 }
 0x222   : > { %9578 = vmatprep.subr.msk.mxu0 %vm15733_vm15, %v15738_v54 }
 0x223   : > { %9579 = vmatpush3.msk.msra.mxu0 %vm15733_vm15, %v15738_v54  ;;  %vm15745_vm15 = vcmp.eq.s32.totalorder %v11009_v26, 4294967295 }
 0x224   : > { %9490 = vmatmul.mubr.f32.gmra.mxu0 %v11241_v59  ;;  %9580 = vmatprep.subr.msk.mxu0 %vm15734_vm14, %v15738_v54 }
 0x225   : > { %9492 = vmatprep.mubr.f32.mxu0 %v11246_v8  ;;  %9581 = vmatpush3.msk.msra.mxu0 %vm15734_vm14, %v15738_v54  ;;  %vm15743_vm14 = vcmp.eq.s32.totalorder %v11028_v29, 4294967295 }
 0x226   : > { %9582 = vmatprep.subr.msk.mxu0 %vm15735_vm0, %v15738_v54 }
 0x227   : > { %9583 = vmatpush3.msk.msra.mxu0 %vm15735_vm0, %v15738_v54  ;;  %vm15742_vm0 = vcmp.eq.s32.totalorder %v11045_v32, 4294967295 }
 0x228   : > { %9493 = vmatmul.mubr.f32.gmra.mxu0 %v11249_v13  ;;  %9584 = vmatprep.subr.msk.mxu0 %vm15756_vm1, %v15738_v54 }
 0x229   : > { %9495 = vmatprep.mubr.f32.mxu0 %v11257_v19  ;;  %9585 = vmatpush3.msk.msra.mxu0 %vm15756_vm1, %v15738_v54  ;;  %vm15763_vm1 = vcmp.eq.s32.totalorder %v10839_v48, 2 }
 0x22a   : > { %9586 = vmatprep.subr.msk.mxu0 %vm15745_vm15, %v15738_v54 }
 0x22b   : > { %9587 = vmatpush3.msk.msra.mxu0 %vm15745_vm15, %v15738_v54  ;;  %vm15748_vm15 = vcmp.eq.s32.totalorder %v10869_v57, 1 }
 0x22c   : > { %9496 = vmatmul.mubr.f32.gmra.mxu0 %v11252_v15  ;;  %9588 = vmatprep.subr.msk.mxu0 %vm15743_vm14, %v15738_v54 }
 0x22d   : > { %9589 = vmatpush3.msk.msra.mxu0 %vm15743_vm14, %v15738_v54  ;;  %9592 = vmatprep.mubr.f32.mxu0 %v11198_v51  ;;  %vm15746_vm14 = vcmp.eq.s32.totalorder %v10844_v50, 1 }
 0x22e   : > { %9590 = vmatprep.subr.msk.mxu0 %vm15742_vm0, %v15738_v54 }
 0x22f   : > { %9591 = vmatpush3.msk.msra.mxu0 %vm15742_vm0, %v15738_v54  ;;  %vm15744_vm0 = vcmp.eq.s32.totalorder %v10839_v48, 1 }
 0x230   : > { %9593 = vmatmul.mubr.f32.vlgmr.msra.gmra.mxu0 %v11201_v53 }
 0x231   : > { %9595 = vmatprep.mubr.f32.mxu0 %v11206_v0 }
 0x234   : > { %9596 = vmatmul.mubr.f32.gmra.mxu0 %v11209_v4 }
 0x235   : > { %9598 = vmatprep.mubr.f32.mxu0 %v11214_v12 }
 0x238   : > { %9599 = vmatmul.mubr.f32.gmra.mxu0 %v11217_v17 }
 0x239   : > { %9601 = vmatprep.mubr.f32.mxu0 %v11222_v27 }
 0x23c   : > { %9602 = vmatmul.mubr.f32.gmra.mxu0 %v11225_v30 }
 0x23d   : > { %9604 = vmatprep.mubr.f32.mxu0 %v11230_v38 }
 0x240   : > { %9605 = vmatmul.mubr.f32.gmra.mxu0 %v11233_v41 }
 0x241   : > { %9607 = vmatprep.mubr.f32.mxu0 %v11238_v44 }
 0x244   : > { %9608 = vmatmul.mubr.f32.gmra.mxu0 %v11241_v59 }
 0x245   : > { %9610 = vmatprep.mubr.f32.mxu0 %v11246_v8 }
 0x248   : > { %9611 = vmatmul.mubr.f32.gmra.mxu0 %v11249_v13 }
 0x249   : > { %9613 = vmatprep.mubr.f32.mxu0 %v11257_v19 }
 0x24c   : > { %9614 = vmatmul.mubr.f32.gmra.mxu0 %v11252_v15 }
 0x24d   : > { %9648 = vmatprep.mubr.f32.mxu0 %v7813_v25 }
 0x2a8   : > { %v11672_v18 = vpop.f32.mrf.mxu0 }
 0x2aa   : > { %v11674_v21 = vpop.f32.mrf.mxu0 }
 0x2ab   : > { %15852 = vst [vmem:[#allocation25_spill] sm:$0xff] %v11674_v21  ;;  %v15862_v21 = vmov 1.0  }
 0x2ac   : > { %v11676_v22 = vpop.f32.mrf.mxu0 }
 0x2ae   : > { %v11678_v23 = vpop.f32.mrf.mxu0 }
 0x2af   : > { %15853 = vst [vmem:[#allocation26_spill] sm:$0xff] %v11678_v23 }
 0x2b0   : > { %v11683_v28 = vpop.f32.mrf.mxu0 }
 0x2b2   : > { %v11685_v31 = vpop.f32.mrf.mxu0 }
 0x2b3   : > { %15854 = vst [vmem:[#allocation27_spill] sm:$0xff] %v11685_v31 }
 0x2b4   : > { %v11687_v33 = vpop.f32.mrf.mxu0 }
 0x2b6   : > { %v11689_v34 = vpop.f32.mrf.mxu0 }
 0x2b7   : > { %15855 = vst [vmem:[#allocation28_spill] sm:$0xff] %v11689_v34 }
 0x2b8   : > { %v11691_v35 = vpop.f32.mrf.mxu0 }
 0x2ba   : > { %v11693_v36 = vpop.f32.mrf.mxu0 }
 0x2bb   : > { %15856 = vst [vmem:[#allocation29_spill] sm:$0xff] %v11693_v36 }
 0x2bc   : > { %v11695_v37 = vpop.f32.mrf.mxu0 }
 0x2be   : > { %v11697_v39 = vpop.f32.mrf.mxu0 }
 0x2bf   : > { %15857 = vst [vmem:[#allocation30_spill] sm:$0xff] %v11697_v39 }
 0x2c0   : > { %v11699_v40 = vpop.f32.mrf.mxu0 }
 0x2c2   : > { %v11701_v45 = vpop.f32.mrf.mxu0 }
 0x2c3   : > { %15858 = vst [vmem:[#allocation31_spill] sm:$0xff] %v11701_v45 }
 0x2c4   : > { %v11703_v46 = vpop.f32.mrf.mxu0 }
 0x2c6   : > { %v11705_v47 = vpop.f32.mrf.mxu0 }
 0x2c7   : > { %15859 = vst [vmem:[#allocation32_spill] sm:$0xff] %v11705_v47 }
 0x2c8   : > { %v11707_v49 = vpop.f32.mrf.mxu0 }
 0x2ca   : > { %v11709_v52 = vpop.f32.mrf.mxu0 }
 0x2cb   : > { %15860 = vst [vmem:[#allocation33_spill] sm:$0xff] %v11709_v52 }
 0x2cc   : > { %v11711_v56 = vpop.f32.mrf.mxu0 }
 0x2ce   : > { %v11713_v58 = vpop.f32.mrf.mxu0 }
 0x2cf   : > { %15861 = vst [vmem:[#allocation34_spill] sm:$0xff] %v11713_v58 }
 0x2d0   : > { %v9476_v60 = vpop.f32.mrf.mxu0 }
 0x2d2   : > { %v1462_v62 = vpop.f32.mrf.mxu0 }
 0x2d4   : > { %v9479_v1 = vpop.f32.mrf.mxu0 }
 0x2d6   : > { %v1472_v2 = vpop.f32.mrf.mxu0 }
 0x2d8   : > { %v9482_v6 = vpop.f32.mrf.mxu0 }
 0x2da   : > { %v1482_v7 = vpop.f32.mrf.mxu0 }
 0x2dc   : > { %v9485_v9 = vpop.f32.mrf.mxu0 }
 0x2de   : > { %v1492_v11 = vpop.f32.mrf.mxu0 }
 0x2e0   : > { %v9488_v25 = vpop.f32.mrf.mxu0 }
 0x2e2   : > { %v1502_v42 = vpop.f32.mrf.mxu0 }
 0x2e4   : > { %v9491_v54 = vpop.f32.mrf.mxu0 }
 0x2e6   : > { %v1512_v47 = vpop.f32.mrf.mxu0 }
 0x2e8   : > { %v9494_v45 = vpop.f32.mrf.mxu0 }
 0x2ea   : > { %v1522_v39 = vpop.f32.mrf.mxu0 }
 0x2ec   : > { %v9497_v43 = vpop.f32.mrf.mxu0 }
 0x2ed   : > { %9498 = vmatprep.subr.mxu1 %v9497_v43 }
 0x2ee   : > { %v1532_v52 = vpop.f32.mrf.mxu0  ;;  %9499 = vmatpush3.msra.mxu1 %v9497_v43 }
 0x2ef   : > { %9500 = vmatprep.subr.mxu1 %v1532_v52 }
 0x2f0   : > { %9501 = vmatpush3.msra.mxu1 %v1532_v52  ;;  %v11715_v58 = vpop.f32.mrf.mxu0 }
 0x2f1   : > { %9502 = vmatprep.subr.mxu1 %v9494_v45 }
 0x2f2   : > { %9503 = vmatpush3.msra.mxu1 %v9494_v45  ;;  %v11717_v36 = vpop.f32.mrf.mxu0 }
 0x2f3   : > { %9504 = vmatprep.subr.mxu1 %v1522_v39 }
 0x2f4   : > { %9505 = vmatpush3.msra.mxu1 %v1522_v39  ;;  %v11719_v34 = vpop.f32.mrf.mxu0 }
 0x2f5   : > { %9506 = vmatprep.subr.mxu1 %v9491_v54 }
 0x2f6   : > { %9507 = vmatpush3.msra.mxu1 %v9491_v54  ;;  %v11721_v31 = vpop.f32.mrf.mxu0 }
 0x2f7   : > { %9508 = vmatprep.subr.mxu1 %v1512_v47 }
 0x2f8   : > { %9509 = vmatpush3.msra.mxu1 %v1512_v47  ;;  %v11723_v23 = vpop.f32.mrf.mxu0 }
 0x2f9   : > { %9510 = vmatprep.subr.mxu1 %v9488_v25 }
 0x2fa   : > { %9511 = vmatpush3.msra.mxu1 %v9488_v25  ;;  %v11725_v43 = vpop.f32.mrf.mxu0 }
 0x2fb   : > { %9512 = vmatprep.subr.mxu1 %v1502_v42 }
 0x2fc   : > { %9513 = vmatpush3.msra.mxu1 %v1502_v42  ;;  %v11727_v45 = vpop.f32.mrf.mxu0 }
 0x2fd   : > { %9514 = vmatprep.subr.mxu1 %v9485_v9 }
 0x2fe   : > { %9515 = vmatpush3.msra.mxu1 %v9485_v9  ;;  %v11729_v39 = vpop.f32.mrf.mxu0 }
 0x2ff   : > { %9516 = vmatprep.subr.mxu1 %v1492_v11 }
 0x300   : > { %9517 = vmatpush3.msra.mxu1 %v1492_v11  ;;  %v9606_v54 = vpop.f32.mrf.mxu0  ;;  %v7778_v11 = vld [vmem:[%s15692_s5 + $0xa8] sm:$0xff] }
 0x301   : > { %9518 = vmatprep.subr.mxu1 %v9482_v6 }
 0x302   : > { %9519 = vmatpush3.msra.mxu1 %v9482_v6  ;;  %v1885_v47 = vpop.f32.mrf.mxu0  ;;  %v7779_v6 = vld [vmem:[%s15692_s5 + $0xb0] sm:$0xff] }
 0x303   : > { %9520 = vmatprep.subr.mxu1 %v1482_v7 }
 0x304   : > { %9521 = vmatpush3.msra.mxu1 %v1482_v7  ;;  %v9609_v52 = vpop.f32.mrf.mxu0 }
 0x305   : > { %9522 = vmatprep.subr.mxu1 %v9479_v1 }
 0x306   : > { %9523 = vmatpush3.msra.mxu1 %v9479_v1  ;;  %v1895_v25 = vpop.f32.mrf.mxu0 }
 0x307   : > { %9524 = vmatprep.subr.mxu1 %v1472_v2 }
 0x308   : > { %9525 = vmatpush3.msra.mxu1 %v1472_v2  ;;  %v9612_v42 = vpop.f32.mrf.mxu0  ;;  %v7781_v2 = vld [vmem:[%s15692_s5 + $0xc0] sm:$0xff] }
 0x309   : > { %9526 = vmatprep.subr.mxu1 %v9476_v60 }
 0x30a   : > { %9527 = vmatpush3.msra.mxu1 %v9476_v60  ;;  %v1905_v9 = vpop.f32.mrf.mxu0  ;;  %v7780_v60 = vld [vmem:[%s15692_s5 + $0xb8] sm:$0xff] }
 0x30b   : > { %9528 = vmatprep.subr.mxu1 %v1462_v62 }
 0x30c   : > { %9529 = vmatpush3.msra.mxu1 %v1462_v62  ;;  %v9615_v7 = vpop.f32.mrf.mxu0  ;;  %v7782_v62 = vld [vmem:[%s15692_s5 + $0xc8] sm:$0xff] }
 0x30d   : > { %9531 = vmatmul.mubr.f32.vlgmr.msra.gmra.mxu1 %v7778_v11  ;;  %9616 = vmatprep.subr.mxu0 %v9615_v7  ;;  %v7783_v11 = vld [vmem:[%s15692_s5 + $0xd0] sm:$0xff] }
 0x30e   : > { %v1915_v1 = vpop.f32.mrf.mxu0  ;;  %9617 = vmatpush3.msra.mxu0 %v9615_v7  ;;  %9533 = vmatprep.mubr.f32.mxu1 %v7779_v6  ;;  %v7815_v6 = vld [vmem:[%s15692_s5 + $0x150] sm:$0xff]  ;;  %v7796_v7 = vld [vmem:[%s15692_s5 + $0x138] sm:$0xff] }
 0x30f   : > { %9618 = vmatprep.subr.mxu0 %v1915_v1  ;;  %9678 = vmatprep.subr.msk.mxu1 %vm15744_vm0, %v15862_v21 }
 0x310   : > { %9619 = vmatpush3.msra.mxu0 %v1915_v1  ;;  %9679 = vmatpush3.msk.msra.mxu1 %vm15744_vm0, %v15862_v21  ;;  %vm15747_vm0 = vcmp.eq.s32.totalorder %v10861_v55, 1  ;;  %v7817_v1 = vld [vmem:[%s15692_s5 + $0x160] sm:$0xff] }
 0x311   : > { %9534 = vmatmul.mubr.f32.gmra.mxu1 %v7780_v60  ;;  %9620 = vmatprep.subr.mxu0 %v9612_v42  ;;  %v7818_v60 = vld [vmem:[%s15692_s5 + $0x168] sm:$0xff] }
 0x312   : > { %9621 = vmatpush3.msra.mxu0 %v9612_v42  ;;  %9536 = vmatprep.mubr.f32.mxu1 %v7781_v2  ;;  %v7784_v42 = vld [vmem:[%s15692_s5 + $0xd8] sm:$0xff]  ;;  %v7819_v2 = vld [vmem:[%s15692_s5 + $0x170] sm:$0xff] }
 0x313   : > { %9622 = vmatprep.subr.mxu0 %v1905_v9  ;;  %9680 = vmatprep.subr.msk.mxu1 %vm15746_vm14, %v15862_v21 }
 0x314   : > { %9623 = vmatpush3.msra.mxu0 %v1905_v9  ;;  %9681 = vmatpush3.msk.msra.mxu1 %vm15746_vm14, %v15862_v21  ;;  %v7786_v9 = vld [vmem:[%s15692_s5 + $0xe8] sm:$0xff]  ;;  %vm15749_vm14 = vcmp.eq.s32.totalorder %v10886_v61, 1 }
 0x315   : > { %9537 = vmatmul.mubr.f32.gmra.mxu1 %v7782_v62  ;;  %9624 = vmatprep.subr.mxu0 %v9609_v52  ;;  %v7820_v62 = vld [vmem:[%s15692_s5 + $0x178] sm:$0xff] }
 0x316   : > { %9625 = vmatpush3.msra.mxu0 %v9609_v52  ;;  %9539 = vmatprep.mubr.f32.mxu1 %v7783_v11  ;;  %v7785_v52 = vld [vmem:[%s15692_s5 + $0xe0] sm:$0xff] }
 0x317   : > { %9626 = vmatprep.subr.mxu0 %v1895_v25  ;;  %9682 = vmatprep.subr.msk.mxu1 %vm15747_vm0, %v15862_v21  ;;  %v7821_v11 = vld [vmem:[%s15692_s5 + $0x180] sm:$0xff] }
 0x318   : > { %9627 = vmatpush3.msra.mxu0 %v1895_v25  ;;  %9683 = vmatpush3.msk.msra.mxu1 %vm15747_vm0, %v15862_v21  ;;  %vm15750_vm0 = vcmp.eq.s32.totalorder %v10894_v63, 1  ;;  %v7814_v25 = vld [vmem:[%s15692_s5 + $0x148] sm:$0xff] }
 0x319   : > { %9540 = vmatmul.mubr.f32.gmra.mxu1 %v7784_v42  ;;  %9628 = vmatprep.subr.mxu0 %v9606_v54  ;;  %v7822_v42 = vld [vmem:[%s15692_s5 + $0x188] sm:$0xff] }
 0x31a   : > { %9629 = vmatpush3.msra.mxu0 %v9606_v54  ;;  %9684 = vmatprep.subr.msk.mxu1 %vm15748_vm15, %v15862_v21  ;;  %v7787_v54 = vld [vmem:[%s15692_s5 + $0xf0] sm:$0xff] }
 0x31b   : > { %9630 = vmatprep.subr.mxu0 %v1885_v47  ;;  %9542 = vmatprep.mubr.f32.mxu1 %v7785_v52  ;;  %v7823_v52 = vld [vmem:[%s15692_s5 + $0x190] sm:$0xff] }
 0x31c   : > { %9631 = vmatpush3.msra.mxu0 %v1885_v47  ;;  %9685 = vmatpush3.msk.msra.mxu1 %vm15748_vm15, %v15862_v21  ;;  %v7788_v47 = vld [vmem:[%s15692_s5 + $0xf8] sm:$0xff]  ;;  %vm15751_vm15 = vcmp.eq.s32.totalorder %v10910_v3, 1 }
 0x31d   : > { %9543 = vmatmul.mubr.f32.gmra.mxu1 %v7786_v9  ;;  %9632 = vmatprep.subr.mxu0 %v11727_v45  ;;  %v7824_v9 = vld [vmem:[%s15692_s5 + $0x198] sm:$0xff] }
 0x31e   : > { %9686 = vmatprep.subr.msk.mxu1 %vm15749_vm14, %v15862_v21  ;;  %9633 = vmatpush3.msra.mxu0 %v11727_v45  ;;  %v7789_v45 = vld [vmem:[%s15692_s5 + $0x100] sm:$0xff] }
 0x31f   : > { %9687 = vmatpush3.msk.msra.mxu1 %vm15749_vm14, %v15862_v21  ;;  %9634 = vmatprep.subr.mxu0 %v11729_v39  ;;  %vm15752_vm14 = vcmp.eq.s32.totalorder %v10918_v5, 1 }
 0x320   : > { %9688 = vmatprep.subr.msk.mxu1 %vm15750_vm0, %v15862_v21  ;;  %9545 = vmatprep.mubr.f32.mxu1 %v7787_v54  ;;  %v7825_v54 = vld [vmem:[%s15692_s5 + $0x1a0] sm:$0xff] }
 0x321   : > { %9635 = vmatpush3.msra.mxu0 %v11729_v39  ;;  %9689 = vmatpush3.msk.msra.mxu1 %vm15750_vm0, %v15862_v21  ;;  %v7790_v39 = vld [vmem:[%s15692_s5 + $0x108] sm:$0xff]  ;;  %vm15753_vm0 = vcmp.eq.s32.totalorder %v10939_v10, 1 }
 0x322   : > { %9546 = vmatmul.mubr.f32.gmra.mxu1 %v7788_v47  ;;  %9636 = vmatprep.subr.mxu0 %v11723_v23  ;;  %v7826_v47 = vld [vmem:[%s15692_s5 + $0x1a8] sm:$0xff] }
 0x323   : > { %9690 = vmatprep.subr.msk.mxu1 %vm15751_vm15, %v15862_v21  ;;  %9637 = vmatpush3.msra.mxu0 %v11723_v23  ;;  %v7791_v23 = vld [vmem:[%s15692_s5 + $0x110] sm:$0xff] }
 0x324   : > { %9691 = vmatpush3.msk.msra.mxu1 %vm15751_vm15, %v15862_v21  ;;  %9638 = vmatprep.subr.mxu0 %v11725_v43  ;;  %vm15754_vm15 = vcmp.eq.s32.totalorder %v10956_v14, 1 }
 0x325   : > { %9692 = vmatprep.subr.msk.mxu1 %vm15752_vm14, %v15862_v21  ;;  %9548 = vmatprep.mubr.f32.mxu1 %v7789_v45  ;;  %v7827_v45 = vld [vmem:[%s15692_s5 + $0x1b0] sm:$0xff] }
 0x326   : > { %9639 = vmatpush3.msra.mxu0 %v11725_v43  ;;  %9693 = vmatpush3.msk.msra.mxu1 %vm15752_vm14, %v15862_v21  ;;  %v7792_v43 = vld [vmem:[%s15692_s5 + $0x118] sm:$0xff]  ;;  %vm15755_vm14 = vcmp.eq.s32.totalorder %v10964_v16, 1 }
 0x327   : > { %9549 = vmatmul.mubr.f32.gmra.mxu1 %v7790_v39  ;;  %9640 = vmatprep.subr.mxu0 %v11719_v34  ;;  %v7828_v39 = vld [vmem:[%s15692_s5 + $0x1b8] sm:$0xff] }
 0x328   : > { %9694 = vmatprep.subr.msk.mxu1 %vm15753_vm0, %v15862_v21  ;;  %9641 = vmatpush3.msra.mxu0 %v11719_v34  ;;  %v7793_v34 = vld [vmem:[%s15692_s5 + $0x120] sm:$0xff] }
 0x329   : > { %9695 = vmatpush3.msk.msra.mxu1 %vm15753_vm0, %v15862_v21  ;;  %9642 = vmatprep.subr.mxu0 %v11721_v31  ;;  %vm15757_vm0 = vcmp.eq.s32.totalorder %v10984_v20, 1 }
 0x32a   : > { %9696 = vmatprep.subr.msk.mxu1 %vm15754_vm15, %v15862_v21  ;;  %9551 = vmatprep.mubr.f32.mxu1 %v7791_v23  ;;  %v7829_v23 = vld [vmem:[%s15692_s5 + $0x1c0] sm:$0xff] }
 0x32b   : > { %9643 = vmatpush3.msra.mxu0 %v11721_v31  ;;  %9697 = vmatpush3.msk.msra.mxu1 %vm15754_vm15, %v15862_v21  ;;  %v7794_v31 = vld [vmem:[%s15692_s5 + $0x128] sm:$0xff]  ;;  %vm15758_vm15 = vcmp.eq.s32.totalorder %v11001_v24, 1 }
 0x32c   : > { %9552 = vmatmul.mubr.f32.gmra.mxu1 %v7792_v43  ;;  %9644 = vmatprep.subr.mxu0 %v11715_v58  ;;  %v7830_v43 = vld [vmem:[%s15692_s5 + $0x1c8] sm:$0xff] }
 0x32d   : > { %9698 = vmatprep.subr.msk.mxu1 %vm15755_vm14, %v15862_v21  ;;  %9645 = vmatpush3.msra.mxu0 %v11715_v58  ;;  %v7795_v58 = vld [vmem:[%s15692_s5 + $0x130] sm:$0xff] }
 0x32e   : > { %9699 = vmatpush3.msk.msra.mxu1 %vm15755_vm14, %v15862_v21  ;;  %9646 = vmatprep.subr.mxu0 %v11717_v36  ;;  %vm15759_vm14 = vcmp.eq.s32.totalorder %v11009_v26, 1 }
 0x32f   : > { %9700 = vmatprep.subr.msk.mxu1 %vm15757_vm0, %v15862_v21  ;;  %9554 = vmatprep.mubr.f32.mxu1 %v7793_v34  ;;  %v7831_v34 = vld [vmem:[%s15692_s5 + $0x1d0] sm:$0xff] }
 0x330   : > { %9647 = vmatpush3.msra.mxu0 %v11717_v36  ;;  %9701 = vmatpush3.msk.msra.mxu1 %vm15757_vm0, %v15862_v21  ;;  %v7816_v36 = vld [vmem:[%s15692_s5 + $0x158] sm:$0xff]  ;;  %vm15760_vm0 = vcmp.eq.s32.totalorder %v11028_v29, 1 }
 0x331   : > { %9555 = vmatmul.mubr.f32.gmra.mxu1 %v7794_v31  ;;  %9649 = vmatmul.mubr.f32.vlgmr.msra.gmra.mxu0 %v7814_v25  ;;  %v7832_v31 = vld [vmem:[%s15692_s5 + $0x1d8] sm:$0xff]  ;;  %v9414_v25 = vpop.f32.mrf.mxu1 }
 0x332   : > { %9702 = vmatprep.subr.msk.mxu1 %vm15758_vm15, %v15862_v21  ;;  %9557 = vmatprep.mubr.f32.mxu1 %v7795_v58 }
 0x333   : > { %9703 = vmatpush3.msk.msra.mxu1 %vm15758_vm15, %v15862_v21  ;;  %9651 = vmatprep.mubr.f32.mxu0 %v7815_v6  ;;  %vm15761_vm15 = vcmp.eq.s32.totalorder %v11045_v32, 1  ;;  %v12117_v58 = vpop.f32.mrf.mxu1 }
 0x334   : > { %9704 = vmatprep.subr.msk.mxu1 %vm15759_vm14, %v15862_v21  ;;  %9796 = vmatprep.subr.msk.mxu0 %vm15763_vm1, %v15862_v21  ;;  %15863 = vst [vmem:[#allocation35_spill] sm:$0xff] %v12117_v58 }
 0x335   : > { %9705 = vmatpush3.msk.msra.mxu1 %vm15759_vm14, %v15862_v21  ;;  %9652 = vmatmul.mubr.f32.gmra.mxu0 %v7816_v36  ;;  %vm15762_vm14 = vcmp.eq.s32.totalorder %v10844_v50, 2  ;;  %v9417_v6 = vpop.f32.mrf.mxu1 }
 0x336   : > { %9558 = vmatmul.mubr.f32.gmra.mxu1 %v7796_v7  ;;  %9706 = vmatprep.subr.msk.mxu1 %vm15760_vm0, %v15862_v21 }
 0x337   : > { %9707 = vmatpush3.msk.msra.mxu1 %vm15760_vm0, %v15862_v21  ;;  %9710 = vmatprep.mubr.f32.mxu1 %v11198_v51  ;;  %vm15765_vm0 = vcmp.eq.s32.totalorder %v10861_v55, 2  ;;  %v12119_v36 = vpop.f32.mrf.mxu1 }
 0x338   : > { %9708 = vmatprep.subr.msk.mxu1 %vm15761_vm15, %v15862_v21  ;;  %9654 = vmatprep.mubr.f32.mxu0 %v7817_v1  ;;  %15864 = vst [vmem:[#allocation36_spill] sm:$0xff] %v12119_v36 }
 0x339   : > { %9709 = vmatpush3.msk.msra.mxu1 %vm15761_vm15, %v15862_v21  ;;  %9655 = vmatmul.mubr.f32.gmra.mxu0 %v7818_v60  ;;  %vm15764_vm15 = vcmp.eq.s32.totalorder %v10869_v57, 2  ;;  %v9420_v7 = vpop.f32.mrf.mxu1 }
 0x33a   : > { %9711 = vmatmul.mubr.f32.vlgmr.msra.gmra.mxu1 %v11201_v53  ;;  %9797 = vmatpush3.msk.msra.mxu0 %vm15763_vm1, %v15862_v21  ;;  %vm15766_vm1 = vcmp.eq.s32.totalorder %v10894_v63, 2 }
 0x33b   : > { %9713 = vmatprep.mubr.f32.mxu1 %v11206_v0  ;;  %9798 = vmatprep.subr.msk.mxu0 %vm15762_vm14, %v15862_v21  ;;  %v12121_v1 = vpop.f32.mrf.mxu1 }
 0x33c   : > { %9657 = vmatprep.mubr.f32.mxu0 %v7819_v2  ;;  %9799 = vmatpush3.msk.msra.mxu0 %vm15762_vm14, %v15862_v21  ;;  %vm15767_vm14 = vcmp.eq.s32.totalorder %v10886_v61, 2  ;;  %15865 = vst [vmem:[#allocation37_spill] sm:$0xff] %v12121_v1 }
 0x33d   : > { %9658 = vmatmul.mubr.f32.gmra.mxu0 %v7820_v62  ;;  %9800 = vmatprep.subr.msk.mxu0 %vm15765_vm0, %v15862_v21  ;;  %v9423_v60 = vpop.f32.mrf.mxu1 }
 0x33e   : > { %9714 = vmatmul.mubr.f32.gmra.mxu1 %v11209_v4  ;;  %9801 = vmatpush3.msk.msra.mxu0 %vm15765_vm0, %v15862_v21  ;;  %vm15768_vm0 = vcmp.eq.s32.totalorder %v10918_v5, 2 }
 0x33f   : > { %9716 = vmatprep.mubr.f32.mxu1 %v11214_v12  ;;  %9802 = vmatprep.subr.msk.mxu0 %vm15764_vm15, %v15862_v21  ;;  %v12123_v2 = vpop.f32.mrf.mxu1 }
 0x340   : > { %9660 = vmatprep.mubr.f32.mxu0 %v7821_v11  ;;  %9803 = vmatpush3.msk.msra.mxu0 %vm15764_vm15, %v15862_v21  ;;  %vm15769_vm15 = vcmp.eq.s32.totalorder %v10910_v3, 2  ;;  %15866 = vst [vmem:[#allocation38_spill] sm:$0xff] %v12123_v2 }
 0x341   : > { %9661 = vmatmul.mubr.f32.gmra.mxu0 %v7822_v42  ;;  %9804 = vmatprep.subr.msk.mxu0 %vm15767_vm14, %v15862_v21  ;;  %v9426_v62 = vpop.f32.mrf.mxu1 }
 0x342   : > { %9717 = vmatmul.mubr.f32.gmra.mxu1 %v11217_v17  ;;  %9805 = vmatpush3.msk.msra.mxu0 %vm15767_vm14, %v15862_v21  ;;  %vm15770_vm14 = vcmp.eq.s32.totalorder %v10956_v14, 2 }
 0x343   : > { %9719 = vmatprep.mubr.f32.mxu1 %v11222_v27  ;;  %9806 = vmatprep.subr.msk.mxu0 %vm15766_vm1, %v15862_v21  ;;  %v12125_v11 = vpop.f32.mrf.mxu1 }
 0x344   : > { %9663 = vmatprep.mubr.f32.mxu0 %v7823_v52  ;;  %9807 = vmatpush3.msk.msra.mxu0 %vm15766_vm1, %v15862_v21  ;;  %vm15771_vm1 = vcmp.eq.s32.totalorder %v10939_v10, 2  ;;  %15867 = vst [vmem:[#allocation39_spill] sm:$0xff] %v12125_v11  ;;  %v1271_v11 = vadd.f32 %v9414_v25, %v11672_v18  ;;  %v7885_v18 = vld [vmem:[%s15692_s5 + $0x320] sm:$0xff] }
 0x345   : > { %9664 = vmatmul.mubr.f32.gmra.mxu0 %v7824_v9  ;;  %9808 = vmatprep.subr.msk.mxu0 %vm15769_vm15, %v15862_v21  ;;  %v9429_v42 = vpop.f32.mrf.mxu1 }
 0x346   : > { %9720 = vmatmul.mubr.f32.gmra.mxu1 %v11225_v30  ;;  %9809 = vmatpush3.msk.msra.mxu0 %vm15769_vm15, %v15862_v21  ;;  %vm15772_vm15 = vcmp.eq.s32.totalorder %v10984_v20, 2 }
 0x347   : > { %9722 = vmatprep.mubr.f32.mxu1 %v11230_v38  ;;  %9810 = vmatprep.subr.msk.mxu0 %vm15768_vm0, %v15862_v21  ;;  %v12127_v52 = vpop.f32.mrf.mxu1 }
 0x348   : > { %9666 = vmatprep.mubr.f32.mxu0 %v7825_v54  ;;  %9811 = vmatpush3.msk.msra.mxu0 %vm15768_vm0, %v15862_v21  ;;  %vm15773_vm0 = vcmp.eq.s32.totalorder %v10964_v16, 2  ;;  %15868 = vst [vmem:[#allocation40_spill] sm:$0xff] %v12127_v52 }
 0x349   : > { %9667 = vmatmul.mubr.f32.gmra.mxu0 %v7826_v47  ;;  %9812 = vmatprep.subr.msk.mxu0 %vm15771_vm1, %v15862_v21  ;;  %v9432_v9 = vpop.f32.mrf.mxu1  ;;  %v7849_v47 = vld [vmem:[%s15692_s5 + $0x280] sm:$0xff] }
 0x34a   : > { %9723 = vmatmul.mubr.f32.gmra.mxu1 %v11233_v41  ;;  %9813 = vmatpush3.msk.msra.mxu0 %vm15771_vm1, %v15862_v21  ;;  %vm15779_vm1 = vcmp.eq.s32.totalorder %v11009_v26, 2 }
 0x34b   : > { %9725 = vmatprep.mubr.f32.mxu1 %v11238_v44  ;;  %9814 = vmatprep.subr.msk.mxu0 %vm15770_vm14, %v15862_v21  ;;  %v12129_v54 = vpop.f32.mrf.mxu1 }
 0x34c   : > { %9669 = vmatprep.mubr.f32.mxu0 %v7827_v45  ;;  %9815 = vmatpush3.msk.msra.mxu0 %vm15770_vm14, %v15862_v21  ;;  %vm15791_vm14 = vcmp.eq.s32.totalorder %v11001_v24, 2  ;;  %15869 = vst [vmem:[#allocation41_spill] sm:$0xff] %v12129_v54  ;;  %v1281_v54 = vadd.f32 %v9417_v6, %v11676_v22  ;;  %v1311_v6 = vadd.f32 %v9426_v62, %v11691_v35 }
 0x34d   : > { %9670 = vmatmul.mubr.f32.gmra.mxu0 %v7828_v39  ;;  %9816 = vmatprep.subr.msk.mxu0 %vm15773_vm0, %v15862_v21  ;;  %v9435_v45 = vpop.f32.mrf.mxu1 }
 0x34e   : > { %9726 = vmatmul.mubr.f32.gmra.mxu1 %v11241_v59  ;;  %9817 = vmatpush3.msk.msra.mxu0 %vm15773_vm0, %v15862_v21  ;;  %vm15776_vm0 = vcmp.eq.s32.totalorder %v11045_v32, 2 }
 0x34f   : > { %9728 = vmatprep.mubr.f32.mxu1 %v11246_v8  ;;  %9818 = vmatprep.subr.msk.mxu0 %vm15772_vm15, %v15862_v21  ;;  %v12134_v39 = vpop.f32.mrf.mxu1 }
 0x350   : > { %9672 = vmatprep.mubr.f32.mxu0 %v7829_v23  ;;  %9819 = vmatpush3.msk.msra.mxu0 %vm15772_vm15, %v15862_v21  ;;  %vm15777_vm15 = vcmp.eq.s32.totalorder %v11028_v29, 2  ;;  %15870 = vst [vmem:[#allocation42_spill] sm:$0xff] %v12134_v39  ;;  %v1291_v39 = vadd.f32 %v9420_v7, %v11683_v28 }
 0x351   : > { %9673 = vmatmul.mubr.f32.gmra.mxu0 %v7830_v43  ;;  %9820 = vmatprep.subr.msk.mxu0 %vm15791_vm14, %v15862_v21  ;;  %v9438_v23 = vpop.f32.mrf.mxu1 }
 0x352   : > { %9729 = vmatmul.mubr.f32.gmra.mxu1 %v11249_v13  ;;  %9821 = vmatpush3.msk.msra.mxu0 %vm15791_vm14, %v15862_v21  ;;  %vm2896_vm14 = vcmp.eq.s32.totalorder %v11045_v32, 3 }
 0x353   : > { %9731 = vmatprep.mubr.f32.mxu1 %v11257_v19  ;;  %9822 = vmatprep.subr.msk.mxu0 %vm15779_vm1, %v15862_v21  ;;  %v12136_v43 = vpop.f32.mrf.mxu1 }
 0x354   : > { %9675 = vmatprep.mubr.f32.mxu0 %v7831_v34  ;;  %9823 = vmatpush3.msk.msra.mxu0 %vm15779_vm1, %v15862_v21  ;;  %15871 = vst [vmem:[#allocation43_spill] sm:$0xff] %v12136_v43  ;;  %vm15782_vm1 = vcmp.eq.s32.totalorder %v10869_v57, 3 }
 0x355   : > { %9676 = vmatmul.mubr.f32.gmra.mxu0 %v7832_v31  ;;  %9824 = vmatprep.subr.msk.mxu0 %vm15777_vm15, %v15862_v21  ;;  %v9441_v34 = vpop.f32.mrf.mxu1 }
 0x356   : > { %9732 = vmatmul.mubr.f32.gmra.mxu1 %v11252_v15  ;;  %9825 = vmatpush3.msk.msra.mxu0 %vm15777_vm15, %v15862_v21  ;;  %vm15780_vm15 = vcmp.eq.s32.totalorder %v10844_v50, 3 }
 0x357   : > { %9828 = vmatprep.mubr.f32.mxu0 %v11198_v51  ;;  %9826 = vmatprep.subr.msk.mxu0 %vm15776_vm0, %v15862_v21  ;;  %v12138_v31 = vpop.f32.mrf.mxu1 }
 0x358   : > { %9827 = vmatpush3.msk.msra.mxu0 %vm15776_vm0, %v15862_v21  ;;  %9766 = vmatprep.mubr.f32.mxu1 %v7849_v47  ;;  %15872 = vst [vmem:[#allocation44_spill] sm:$0xff] %v12138_v31  ;;  %v1301_v31 = vadd.f32 %v9423_v60, %v11687_v33  ;;  %v1331_v60 = vadd.f32 %v9432_v9, %v11699_v40  ;;  %vm15778_vm0 = vcmp.eq.s32.totalorder %v10839_v48, 3 }
 0x359   : > { %9829 = vmatmul.mubr.f32.vlgmr.msra.gmra.mxu0 %v11201_v53  ;;  %v1361_v9 = vadd.f32 %v9441_v34, %v11711_v56 }
 0x35a   : > { %9831 = vmatprep.mubr.f32.mxu0 %v11206_v0 }
 0x35d   : > { %9832 = vmatmul.mubr.f32.gmra.mxu0 %v11209_v4 }
 0x35e   : > { %9834 = vmatprep.mubr.f32.mxu0 %v11214_v12 }
 0x361   : > { %9835 = vmatmul.mubr.f32.gmra.mxu0 %v11217_v17 }
 0x362   : > { %9837 = vmatprep.mubr.f32.mxu0 %v11222_v27 }
 0x365   : > { %9838 = vmatmul.mubr.f32.gmra.mxu0 %v11225_v30 }
 0x366   : > { %9840 = vmatprep.mubr.f32.mxu0 %v11230_v38 }
 0x369   : > { %9841 = vmatmul.mubr.f32.gmra.mxu0 %v11233_v41 }
 0x36a   : > { %9843 = vmatprep.mubr.f32.mxu0 %v11238_v44 }
 0x36d   : > { %9844 = vmatmul.mubr.f32.gmra.mxu0 %v11241_v59 }
 0x36e   : > { %9846 = vmatprep.mubr.f32.mxu0 %v11246_v8 }
 0x371   : > { %9847 = vmatmul.mubr.f32.gmra.mxu0 %v11249_v13 }
 0x372   : > { %9849 = vmatprep.mubr.f32.mxu0 %v11257_v19 }
 0x375   : > { %9850 = vmatmul.mubr.f32.gmra.mxu0 %v11252_v15 }
 0x376   : > { %9884 = vmatprep.mubr.f32.mxu0 %v7885_v18 }
 0x3cd   : > { %v9532_v52 = vpop.f32.mrf.mxu1 }
 0x3ce   : > { %v1728_v2 = vadd.f32 %v9532_v52, %v1271_v11 }
 0x3cf   : > { %v12141_v1 = vpop.f32.mrf.mxu1 }
 0x3d0   : > { %15873 = vst [vmem:[#allocation45_spill] sm:$0xff] %v12141_v1 }
 0x3d1   : > { %v9535_v36 = vpop.f32.mrf.mxu1 }
 0x3d2   : > { %v1730_v58 = vadd.f32 %v9535_v36, %v1281_v54 }
 0x3d3   : > { %v12144_v47 = vpop.f32.mrf.mxu1 }
 0x3d4   : > { %15874 = vst [vmem:[#allocation46_spill] sm:$0xff] %v12144_v47 }
 0x3d5   : > { %v9538_v15 = vpop.f32.mrf.mxu1 }
 0x3d6   : > { %v1732_v19 = vadd.f32 %v9538_v15, %v1291_v39  ;;  %v1321_v15 = vadd.f32 %v9429_v42, %v11695_v37 }
 0x3d7   : > { %v12147_v43 = vpop.f32.mrf.mxu1 }
 0x3d8   : > { %15875 = vst [vmem:[#allocation47_spill] sm:$0xff] %v12147_v43 }
 0x3d9   : > { %v9541_v25 = vpop.f32.mrf.mxu1 }
 0x3da   : > { %v1734_v11 = vadd.f32 %v9541_v25, %v1301_v31  ;;  %v1341_v31 = vadd.f32 %v9435_v45, %v11703_v46 }
 0x3db   : > { %v12153_v22 = vpop.f32.mrf.mxu1 }
 0x3dc   : > { %15876 = vst [vmem:[#allocation48_spill] sm:$0xff] %v12153_v22 }
 0x3dd   : > { %v9544_v36 = vpop.f32.mrf.mxu1 }
 0x3de   : > { %v1736_v52 = vadd.f32 %v9544_v36, %v1311_v6  ;;  %v1351_v6 = vadd.f32 %v9438_v23, %v11707_v49 }
 0x3df   : > { %v12156_v28 = vpop.f32.mrf.mxu1 }
 0x3e0   : > { %15877 = vst [vmem:[#allocation49_spill] sm:$0xff] %v12156_v28 }
 0x3e2   : > { %v9547_v7 = vpop.f32.mrf.mxu1 }
 0x3e3   : > { %v1738_v54 = vadd.f32 %v9547_v7, %v1321_v15 }
 0x3e4   : > { %v12159_v33 = vpop.f32.mrf.mxu1 }
 0x3e5   : > { %15878 = vst [vmem:[#allocation50_spill] sm:$0xff] %v12159_v33 }
 0x3e7   : > { %v9550_v39 = vpop.f32.mrf.mxu1 }
 0x3e8   : > { %v1740_v43 = vadd.f32 %v9550_v39, %v1331_v60 }
 0x3e9   : > { %v12162_v18 = vpop.f32.mrf.mxu1 }
 0x3ea   : > { %15879 = vst [vmem:[#allocation51_spill] sm:$0xff] %v12162_v18 }
 0x3ec   : > { %v9553_v25 = vpop.f32.mrf.mxu1 }
 0x3ed   : > { %v1742_v35 = vadd.f32 %v9553_v25, %v1341_v31 }
 0x3ee   : > { %v12165_v62 = vpop.f32.mrf.mxu1 }
 0x3ef   : > { %15880 = vst [vmem:[#allocation52_spill] sm:$0xff] %v12165_v62 }
 0x3f1   : > { %v9556_v36 = vpop.f32.mrf.mxu1  ;;  %v9650_v37 = vpop.f32.mrf.mxu0 }
 0x3f2   : > { %v1744_v42 = vadd.f32 %v9556_v36, %v1351_v6  ;;  %v12168_v15 = vadd.f32 %v9650_v37, %v1728_v2 }
 0x3f3   : > { %v12170_v7 = vpop.f32.mrf.mxu1  ;;  %v12172_v40 = vpop.f32.mrf.mxu0 }
 0x3f4   : > { %15881 = vst [vmem:[#allocation53_spill] sm:$0xff] %v12170_v7  ;;  %15882 = vst [vmem:[#allocation54_spill] sm:$0xff] %v12172_v40 }
 0x3f5   : > { %v9653_v60 = vpop.f32.mrf.mxu0 }
 0x3f6   : > { %v9559_v39 = vpop.f32.mrf.mxu1  ;;  %v12175_v46 = vadd.f32 %v9653_v60, %v1730_v58 }
 0x3f7   : > { %v1746_v45 = vadd.f32 %v9559_v39, %v1361_v9  ;;  %v12177_v31 = vpop.f32.mrf.mxu0 }
 0x3f8   : > { %15883 = vst [vmem:[#allocation55_spill] sm:$0xff] %v12177_v31  ;;  %v12179_v25 = vpop.f32.mrf.mxu1 }
 0x3f9   : > { %15884 = vst [vmem:[#allocation56_spill] sm:$0xff] %v12179_v25  ;;  %v9656_v49 = vpop.f32.mrf.mxu0 }
 0x3fa   : > { %v12181_v23 = vadd.f32 %v9656_v49, %v1732_v19  ;;  %v12183_v2 = vpop.f32.mrf.mxu1 }
 0x3fb   : > { %v12185_v6 = vpop.f32.mrf.mxu0 }
 0x3fc   : > { %15885 = vst [vmem:[#allocation57_spill] sm:$0xff] %v12185_v6  ;;  %v12187_v36 = vpop.f32.mrf.mxu1 }
 0x3fd   : > { %v9659_v37 = vpop.f32.mrf.mxu0 }
 0x3fe   : > { %v12189_v56 = vadd.f32 %v9659_v37, %v1734_v11  ;;  %v12191_v34 = vpop.f32.mrf.mxu1 }
 0x3ff   : > { %v12193_v58 = vpop.f32.mrf.mxu0 }
 0x400   : > { %15886 = vst [vmem:[#allocation58_spill] sm:$0xff] %v12193_v58  ;;  %v12195_v9 = vpop.f32.mrf.mxu1 }
 0x401   : > { %v9662_v60 = vpop.f32.mrf.mxu0 }
 0x402   : > { %v12197_v39 = vadd.f32 %v9662_v60, %v1736_v52  ;;  %v9718_v19 = vpop.f32.mrf.mxu1 }
 0x403   : > { %v12199_v49 = vpop.f32.mrf.mxu0 }
 0x404   : > { %15887 = vst [vmem:[#allocation59_spill] sm:$0xff] %v12199_v49  ;;  %v2248_v25 = vpop.f32.mrf.mxu1 }
 0x405   : > { %v9665_v7 = vpop.f32.mrf.mxu0 }
 0x406   : > { %v12201_v62 = vadd.f32 %v9665_v7, %v1738_v54  ;;  %v9721_v18 = vpop.f32.mrf.mxu1 }
 0x407   : > { %v12203_v33 = vpop.f32.mrf.mxu0 }
 0x408   : > { %15888 = vst [vmem:[#allocation60_spill] sm:$0xff] %v12203_v33  ;;  %v2258_v11 = vpop.f32.mrf.mxu1 }
 0x409   : > { %v9668_v37 = vpop.f32.mrf.mxu0 }
 0x40a   : > { %v12205_v28 = vadd.f32 %v9668_v37, %v1740_v43  ;;  %v9724_v58 = vpop.f32.mrf.mxu1 }
 0x40b   : > { %v12207_v22 = vpop.f32.mrf.mxu0 }
 0x40c   : > { %15889 = vst [vmem:[#allocation61_spill] sm:$0xff] %v12205_v28  ;;  %15890 = vst [vmem:[#allocation62_spill] sm:$0xff] %v12207_v22  ;;  %v2268_v6 = vpop.f32.mrf.mxu1 }
 0x40d   : > { %v9671_v52 = vpop.f32.mrf.mxu0 }
 0x40e   : > { %v12209_v60 = vadd.f32 %v9671_v52, %v1742_v35  ;;  %v9727_v31 = vpop.f32.mrf.mxu1 }
 0x40f   : > { %v12211_v49 = vpop.f32.mrf.mxu0 }
 0x410   : > { %v2278_v47 = vpop.f32.mrf.mxu1 }
 0x411   : > { %v9674_v54 = vpop.f32.mrf.mxu0 }
 0x412   : > { %v12213_v7 = vadd.f32 %v9674_v54, %v1744_v42  ;;  %v9730_v40 = vpop.f32.mrf.mxu1 }
 0x413   : > { %v12215_v33 = vpop.f32.mrf.mxu0 }
 0x414   : > { %v2288_v1 = vpop.f32.mrf.mxu1 }
 0x415   : > { %v9677_v43 = vpop.f32.mrf.mxu0 }
 0x416   : > { %v12217_v37 = vadd.f32 %v9677_v43, %v1746_v45  ;;  %v9733_v28 = vpop.f32.mrf.mxu1 }
 0x417   : > { %9734 = vmatprep.subr.mxu1 %v9733_v28  ;;  %v12219_v22 = vpop.f32.mrf.mxu0 }
 0x418   : > { %v2298_v35 = vpop.f32.mrf.mxu1  ;;  %9735 = vmatpush3.msra.mxu1 %v9733_v28 }
 0x419   : > { %9736 = vmatprep.subr.mxu1 %v2298_v35  ;;  %v12221_v52 = vpop.f32.mrf.mxu0 }
 0x41a   : > { %9737 = vmatpush3.msra.mxu1 %v2298_v35 }
 0x41b   : > { %9738 = vmatprep.subr.mxu1 %v9730_v40  ;;  %v12223_v42 = vpop.f32.mrf.mxu0 }
 0x41c   : > { %9739 = vmatpush3.msra.mxu1 %v9730_v40 }
 0x41d   : > { %9740 = vmatprep.subr.mxu1 %v2288_v1  ;;  %v12225_v54 = vpop.f32.mrf.mxu0 }
 0x41e   : > { %9741 = vmatpush3.msra.mxu1 %v2288_v1 }
 0x41f   : > { %9742 = vmatprep.subr.mxu1 %v9727_v31  ;;  %v12227_v45 = vpop.f32.mrf.mxu0 }
 0x420   : > { %9743 = vmatpush3.msra.mxu1 %v9727_v31 }
 0x421   : > { %9744 = vmatprep.subr.mxu1 %v2278_v47  ;;  %v12229_v43 = vpop.f32.mrf.mxu0 }
 0x422   : > { %9745 = vmatpush3.msra.mxu1 %v2278_v47 }
 0x423   : > { %9746 = vmatprep.subr.mxu1 %v9724_v58  ;;  %v12231_v28 = vpop.f32.mrf.mxu0 }
 0x424   : > { %9747 = vmatpush3.msra.mxu1 %v9724_v58 }
 0x425   : > { %9748 = vmatprep.subr.mxu1 %v2268_v6  ;;  %v12233_v35 = vpop.f32.mrf.mxu0 }
 0x426   : > { %9749 = vmatpush3.msra.mxu1 %v2268_v6 }
 0x427   : > { %9750 = vmatprep.subr.mxu1 %v9721_v18  ;;  %v12235_v40 = vpop.f32.mrf.mxu0 }
 0x428   : > { %9751 = vmatpush3.msra.mxu1 %v9721_v18 }
 0x429   : > { %9752 = vmatprep.subr.mxu1 %v2258_v11  ;;  %v9842_v1 = vpop.f32.mrf.mxu0 }
 0x42a   : > { %9753 = vmatpush3.msra.mxu1 %v2258_v11  ;;  %v7853_v11 = vld [vmem:[%s15692_s5 + $0x2a0] sm:$0xff] }
 0x42b   : > { %9754 = vmatprep.subr.mxu1 %v9718_v19  ;;  %v2651_v31 = vpop.f32.mrf.mxu0 }
 0x42c   : > { %9755 = vmatpush3.msra.mxu1 %v9718_v19  ;;  %v7850_v19 = vld [vmem:[%s15692_s5 + $0x288] sm:$0xff] }
 0x42d   : > { %9756 = vmatprep.subr.mxu1 %v2248_v25  ;;  %v9845_v47 = vpop.f32.mrf.mxu0 }
 0x42e   : > { %9757 = vmatpush3.msra.mxu1 %v2248_v25 }
 0x42f   : > { %9758 = vmatprep.subr.mxu1 %v12191_v34  ;;  %v2661_v58 = vpop.f32.mrf.mxu0 }
 0x430   : > { %9759 = vmatpush3.msra.mxu1 %v12191_v34  ;;  %v7851_v34 = vld [vmem:[%s15692_s5 + $0x290] sm:$0xff] }
 0x431   : > { %9760 = vmatprep.subr.mxu1 %v12195_v9  ;;  %v9848_v6 = vpop.f32.mrf.mxu0 }
 0x432   : > { %9761 = vmatpush3.msra.mxu1 %v12195_v9 }
 0x433   : > { %9762 = vmatprep.subr.mxu1 %v12183_v2  ;;  %v2671_v18 = vpop.f32.mrf.mxu0 }
 0x434   : > { %9763 = vmatpush3.msra.mxu1 %v12183_v2  ;;  %v7852_v2 = vld [vmem:[%s15692_s5 + $0x298] sm:$0xff] }
 0x435   : > { %9764 = vmatprep.subr.mxu1 %v12187_v36  ;;  %v9851_v25 = vpop.f32.mrf.mxu0 }
 0x436   : > { %9765 = vmatpush3.msra.mxu1 %v12187_v36  ;;  %9852 = vmatprep.subr.mxu0 %v9851_v25  ;;  %v7854_v36 = vld [vmem:[%s15692_s5 + $0x2a8] sm:$0xff] }
 0x437   : > { %9767 = vmatmul.mubr.f32.vlgmr.msra.gmra.mxu1 %v7850_v19  ;;  %v2681_v9 = vpop.f32.mrf.mxu0  ;;  %9853 = vmatpush3.msra.mxu0 %v9851_v25  ;;  %v7855_v19 = vld [vmem:[%s15692_s5 + $0x2b0] sm:$0xff] }
 0x438   : > { %9854 = vmatprep.subr.mxu0 %v2681_v9  ;;  %9769 = vmatprep.mubr.f32.mxu1 %v7851_v34  ;;  %v7887_v25 = vld [vmem:[%s15692_s5 + $0x330] sm:$0xff]  ;;  %v7868_v34 = vld [vmem:[%s15692_s5 + $0x318] sm:$0xff] }
 0x439   : > { %9855 = vmatpush3.msra.mxu0 %v2681_v9  ;;  %9914 = vmatprep.subr.msk.mxu1 %vm15778_vm0, %v15862_v21  ;;  %v7889_v9 = vld [vmem:[%s15692_s5 + $0x340] sm:$0xff] }
 0x43a   : > { %9856 = vmatprep.subr.mxu0 %v9848_v6  ;;  %9915 = vmatpush3.msk.msra.mxu1 %vm15778_vm0, %v15862_v21  ;;  %vm15781_vm0 = vcmp.eq.s32.totalorder %v10861_v55, 3  ;;  %v15916_v55 = vld [vmem:[#allocation57_spill] sm:$0xff] }
 0x43b   : > { %9770 = vmatmul.mubr.f32.gmra.mxu1 %v7852_v2  ;;  %9857 = vmatpush3.msra.mxu0 %v9848_v6  ;;  %v7856_v6 = vld [vmem:[%s15692_s5 + $0x2b8] sm:$0xff]  ;;  %v7890_v2 = vld [vmem:[%s15692_s5 + $0x348] sm:$0xff] }
 0x43c   : > { %9858 = vmatprep.subr.mxu0 %v2671_v18  ;;  %9772 = vmatprep.mubr.f32.mxu1 %v7853_v11  ;;  %v7891_v11 = vld [vmem:[%s15692_s5 + $0x350] sm:$0xff] }
 0x43d   : > { %9859 = vmatpush3.msra.mxu0 %v2671_v18  ;;  %9916 = vmatprep.subr.msk.mxu1 %vm15780_vm15, %v15862_v21  ;;  %v7866_v18 = vld [vmem:[%s15692_s5 + $0x308] sm:$0xff] }
 0x43e   : > { %9860 = vmatprep.subr.mxu0 %v9845_v47  ;;  %9917 = vmatpush3.msk.msra.mxu1 %vm15780_vm15, %v15862_v21  ;;  %vm15783_vm15 = vcmp.eq.s32.totalorder %v10886_v61, 3 }
 0x43f   : > { %9773 = vmatmul.mubr.f32.gmra.mxu1 %v7854_v36  ;;  %9861 = vmatpush3.msra.mxu0 %v9845_v47  ;;  %v7857_v47 = vld [vmem:[%s15692_s5 + $0x2c0] sm:$0xff] }
 0x440   : > { %9862 = vmatprep.subr.mxu0 %v2661_v58  ;;  %9775 = vmatprep.mubr.f32.mxu1 %v7855_v19  ;;  %v7893_v36 = vld [vmem:[%s15692_s5 + $0x360] sm:$0xff] }
 0x441   : > { %9863 = vmatpush3.msra.mxu0 %v2661_v58  ;;  %9918 = vmatprep.subr.msk.mxu1 %vm15781_vm0, %v15862_v21  ;;  %v7858_v58 = vld [vmem:[%s15692_s5 + $0x2c8] sm:$0xff]  ;;  %v15892_v19 = vld [vmem:[#allocation23_spill] sm:$0xff] }
 0x442   : > { %9864 = vmatprep.subr.mxu0 %v9842_v1  ;;  %9919 = vmatpush3.msk.msra.mxu1 %vm15781_vm0, %v15862_v21  ;;  %vm15784_vm0 = vcmp.eq.s32.totalorder %v10894_v63, 3 }
 0x443   : > { %9776 = vmatmul.mubr.f32.gmra.mxu1 %v7856_v6  ;;  %9865 = vmatpush3.msra.mxu0 %v9842_v1  ;;  %v7859_v1 = vld [vmem:[%s15692_s5 + $0x2d0] sm:$0xff]  ;;  %v7921_v6 = vld [vmem:[%s15692_s5 + $0x3c0] sm:$0xff] }
 0x444   : > { %9866 = vmatprep.subr.mxu0 %v2651_v31  ;;  %9920 = vmatprep.subr.msk.mxu1 %vm15782_vm1, %v15862_v21 }
 0x445   : > { %9778 = vmatprep.mubr.f32.mxu1 %v7857_v47  ;;  %9867 = vmatpush3.msra.mxu0 %v2651_v31  ;;  %v7860_v31 = vld [vmem:[%s15692_s5 + $0x2d8] sm:$0xff] }
 0x446   : > { %9921 = vmatpush3.msk.msra.mxu1 %vm15782_vm1, %v15862_v21  ;;  %9868 = vmatprep.subr.mxu0 %v12233_v35  ;;  %vm15785_vm1 = vcmp.eq.s32.totalorder %v10910_v3, 3 }
 0x447   : > { %9779 = vmatmul.mubr.f32.gmra.mxu1 %v7858_v58  ;;  %9922 = vmatprep.subr.msk.mxu1 %vm15783_vm15, %v15862_v21 }
 0x448   : > { %9869 = vmatpush3.msra.mxu0 %v12233_v35  ;;  %9923 = vmatpush3.msk.msra.mxu1 %vm15783_vm15, %v15862_v21  ;;  %vm15786_vm15 = vcmp.eq.s32.totalorder %v10918_v5, 3  ;;  %v7861_v35 = vld [vmem:[%s15692_s5 + $0x2e0] sm:$0xff] }
 0x449   : > { %9870 = vmatprep.subr.mxu0 %v12235_v40  ;;  %9924 = vmatprep.subr.msk.mxu1 %vm15784_vm0, %v15862_v21 }
 0x44a   : > { %9781 = vmatprep.mubr.f32.mxu1 %v7859_v1  ;;  %9871 = vmatpush3.msra.mxu0 %v12235_v40  ;;  %v7862_v40 = vld [vmem:[%s15692_s5 + $0x2e8] sm:$0xff] }
 0x44b   : > { %9925 = vmatpush3.msk.msra.mxu1 %vm15784_vm0, %v15862_v21  ;;  %9872 = vmatprep.subr.mxu0 %v12229_v43  ;;  %vm15787_vm0 = vcmp.eq.s32.totalorder %v10939_v10, 3  ;;  %v15911_v10 = vld [vmem:[#allocation37_spill] sm:$0xff] }
 0x44c   : > { %9782 = vmatmul.mubr.f32.gmra.mxu1 %v7860_v31  ;;  %9926 = vmatprep.subr.msk.mxu1 %vm15785_vm1, %v15862_v21 }
 0x44d   : > { %9873 = vmatpush3.msra.mxu0 %v12229_v43  ;;  %9927 = vmatpush3.msk.msra.mxu1 %vm15785_vm1, %v15862_v21  ;;  %vm15788_vm1 = vcmp.eq.s32.totalorder %v10956_v14, 3  ;;  %v7863_v43 = vld [vmem:[%s15692_s5 + $0x2f0] sm:$0xff] }
 0x44e   : > { %9874 = vmatprep.subr.mxu0 %v12231_v28  ;;  %9928 = vmatprep.subr.msk.mxu1 %vm15786_vm15, %v15862_v21 }
 0x44f   : > { %9784 = vmatprep.mubr.f32.mxu1 %v7861_v35  ;;  %9875 = vmatpush3.msra.mxu0 %v12231_v28  ;;  %v7864_v28 = vld [vmem:[%s15692_s5 + $0x2f8] sm:$0xff] }
 0x450   : > { %9929 = vmatpush3.msk.msra.mxu1 %vm15786_vm15, %v15862_v21  ;;  %9876 = vmatprep.subr.mxu0 %v12225_v54  ;;  %vm15789_vm15 = vcmp.eq.s32.totalorder %v10964_v16, 3 }
 0x451   : > { %9785 = vmatmul.mubr.f32.gmra.mxu1 %v7862_v40  ;;  %9930 = vmatprep.subr.msk.mxu1 %vm15787_vm0, %v15862_v21 }
 0x452   : > { %9877 = vmatpush3.msra.mxu0 %v12225_v54  ;;  %9931 = vmatpush3.msk.msra.mxu1 %vm15787_vm0, %v15862_v21  ;;  %vm15790_vm0 = vcmp.eq.s32.totalorder %v10984_v20, 3  ;;  %v7865_v54 = vld [vmem:[%s15692_s5 + $0x300] sm:$0xff]  ;;  %v15909_v20 = vld [vmem:[#allocation46_spill] sm:$0xff] }
 0x453   : > { %9878 = vmatprep.subr.mxu0 %v12227_v45  ;;  %9932 = vmatprep.subr.msk.mxu1 %vm15788_vm1, %v15862_v21 }
 0x454   : > { %9787 = vmatprep.mubr.f32.mxu1 %v7863_v43  ;;  %9879 = vmatpush3.msra.mxu0 %v12227_v45  ;;  %v7886_v45 = vld [vmem:[%s15692_s5 + $0x328] sm:$0xff] }
 0x455   : > { %9933 = vmatpush3.msk.msra.mxu1 %vm15788_vm1, %v15862_v21  ;;  %9880 = vmatprep.subr.mxu0 %v12221_v52  ;;  %vm2899_vm1 = vcmp.eq.s32.totalorder %v11001_v24, 3 }
 0x456   : > { %9788 = vmatmul.mubr.f32.gmra.mxu1 %v7864_v28  ;;  %9934 = vmatprep.subr.msk.mxu1 %vm15789_vm15, %v15862_v21 }
 0x457   : > { %9881 = vmatpush3.msra.mxu0 %v12221_v52  ;;  %9935 = vmatpush3.msk.msra.mxu1 %vm15789_vm15, %v15862_v21  ;;  %v7867_v52 = vld [vmem:[%s15692_s5 + $0x310] sm:$0xff]  ;;  %vm2898_vm15 = vcmp.eq.s32.totalorder %v11009_v26, 3 }
 0x458   : > { %9882 = vmatprep.subr.mxu0 %v12223_v42  ;;  %9936 = vmatprep.subr.msk.mxu1 %vm15790_vm0, %v15862_v21 }
 0x459   : > { %9790 = vmatprep.mubr.f32.mxu1 %v7865_v54  ;;  %9883 = vmatpush3.msra.mxu0 %v12223_v42  ;;  %v7888_v42 = vld [vmem:[%s15692_s5 + $0x338] sm:$0xff] }
 0x45a   : > { %9937 = vmatpush3.msk.msra.mxu1 %vm15790_vm0, %v15862_v21  ;;  %9885 = vmatmul.mubr.f32.vlgmr.msra.gmra.mxu0 %v7886_v45  ;;  %vm2897_vm0 = vcmp.eq.s32.totalorder %v11028_v29, 3 }
 0x45b   : > { %9791 = vmatmul.mubr.f32.gmra.mxu1 %v7866_v18  ;;  %9938 = vmatprep.subr.msk.mxu1 %vm2899_vm1, %v15862_v21 }
 0x45c   : > { %9939 = vmatpush3.msk.msra.mxu1 %vm2899_vm1, %v15862_v21  ;;  %9793 = vmatprep.mubr.f32.mxu1 %v7867_v52 }
 0x45d   : > { %9940 = vmatprep.subr.msk.mxu1 %vm2898_vm15, %v15862_v21  ;;  %9887 = vmatprep.mubr.f32.mxu0 %v7887_v25 }
 0x45e   : > { %9941 = vmatpush3.msk.msra.mxu1 %vm2898_vm15, %v15862_v21  ;;  %9888 = vmatmul.mubr.f32.gmra.mxu0 %v7888_v42 }
 0x45f   : > { %9794 = vmatmul.mubr.f32.gmra.mxu1 %v7868_v34  ;;  %9942 = vmatprep.subr.msk.mxu1 %vm2897_vm0, %v15862_v21 }
 0x460   : > { %9943 = vmatpush3.msk.msra.mxu1 %vm2897_vm0, %v15862_v21  ;;  %9946 = vmatprep.mubr.f32.mxu1 %v11198_v51  ;;  %v7892_v51 = vld [vmem:[%s15692_s5 + $0x358] sm:$0xff] }
 0x461   : > { %9944 = vmatprep.subr.msk.mxu1 %vm2896_vm14, %v15862_v21  ;;  %9890 = vmatprep.mubr.f32.mxu0 %v7889_v9 }
 0x462   : > { %9945 = vmatpush3.msk.msra.mxu1 %vm2896_vm14, %v15862_v21  ;;  %9891 = vmatmul.mubr.f32.gmra.mxu0 %v7890_v2  ;;  %v15902_v2 = vld [vmem:[#allocation61_spill] sm:$0xff] }
 0x463   : > { %9947 = vmatmul.mubr.f32.vlgmr.msra.gmra.mxu1 %v11201_v53  ;;  %9893 = vmatprep.mubr.f32.mxu0 %v7891_v11  ;;  %v7894_v53 = vld [vmem:[%s15692_s5 + $0x368] sm:$0xff] }
 0x464   : > { %9949 = vmatprep.mubr.f32.mxu1 %v11206_v0  ;;  %10032 = vmatprep.subr.msk.mxu0 %vm852_vm2, %v15862_v21  ;;  %v7895_v0 = vld [vmem:[%s15692_s5 + $0x370] sm:$0xff] }
 0x465   : > { %10033 = vmatpush3.msk.msra.mxu0 %vm852_vm2, %v15862_v21  ;;  %vm15893_vm2 = vcmp.eq.s32.totalorder %v11001_v24, 4294967293 }
 0x466   : > { %9894 = vmatmul.mubr.f32.gmra.mxu0 %v7892_v51  ;;  %10034 = vmatprep.subr.msk.mxu0 %vm851_vm3, %v15862_v21 }
 0x467   : > { %9950 = vmatmul.mubr.f32.gmra.mxu1 %v11209_v4  ;;  %9896 = vmatprep.mubr.f32.mxu0 %v7893_v36  ;;  %v7896_v4 = vld [vmem:[%s15692_s5 + $0x378] sm:$0xff] }
 0x468   : > { %9952 = vmatprep.mubr.f32.mxu1 %v11214_v12  ;;  %10035 = vmatpush3.msk.msra.mxu0 %vm851_vm3, %v15862_v21  ;;  %v7897_v12 = vld [vmem:[%s15692_s5 + $0x380] sm:$0xff]  ;;  %vm15894_vm3 = vmmov %vm15893_vm2 }
 0x469   : > { %10036 = vmatprep.subr.msk.mxu0 %vm850_vm4, %v15862_v21 }
 0x46a   : > { %9897 = vmatmul.mubr.f32.gmra.mxu0 %v7894_v53 }
 0x46b   : > { %9953 = vmatmul.mubr.f32.gmra.mxu1 %v11217_v17  ;;  %9899 = vmatprep.mubr.f32.mxu0 %v7895_v0  ;;  %v7898_v17 = vld [vmem:[%s15692_s5 + $0x388] sm:$0xff] }
 0x46c   : > { %9955 = vmatprep.mubr.f32.mxu1 %v11222_v27  ;;  %10037 = vmatpush3.msk.msra.mxu0 %vm850_vm4, %v15862_v21  ;;  %v7899_v27 = vld [vmem:[%s15692_s5 + $0x390] sm:$0xff]  ;;  %vm15895_vm4 = vcmp.eq.s32.totalorder %v11009_v26, 4294967293 }
 0x46d   : > { %10038 = vmatprep.subr.msk.mxu0 %vm849_vm5, %v15862_v21 }
 0x46e   : > { %9900 = vmatmul.mubr.f32.gmra.mxu0 %v7896_v4 }
 0x46f   : > { %9956 = vmatmul.mubr.f32.gmra.mxu1 %v11225_v30  ;;  %9902 = vmatprep.mubr.f32.mxu0 %v7897_v12  ;;  %v7900_v30 = vld [vmem:[%s15692_s5 + $0x398] sm:$0xff] }
 0x470   : > { %9958 = vmatprep.mubr.f32.mxu1 %v11230_v38  ;;  %10039 = vmatpush3.msk.msra.mxu0 %vm849_vm5, %v15862_v21  ;;  %v7901_v38 = vld [vmem:[%s15692_s5 + $0x3a0] sm:$0xff]  ;;  %vm15896_vm5 = vmmov %vm15895_vm4 }
 0x471   : > { %10040 = vmatprep.subr.msk.mxu0 %vm848_vm6, %v15862_v21 }
 0x472   : > { %9903 = vmatmul.mubr.f32.gmra.mxu0 %v7898_v17 }
 0x473   : > { %9959 = vmatmul.mubr.f32.gmra.mxu1 %v11233_v41  ;;  %9905 = vmatprep.mubr.f32.mxu0 %v7899_v27  ;;  %v7902_v41 = vld [vmem:[%s15692_s5 + $0x3a8] sm:$0xff] }
 0x474   : > { %9961 = vmatprep.mubr.f32.mxu1 %v11238_v44  ;;  %10041 = vmatpush3.msk.msra.mxu0 %vm848_vm6, %v15862_v21  ;;  %v7903_v44 = vld [vmem:[%s15692_s5 + $0x3b0] sm:$0xff]  ;;  %vm15897_vm6 = vcmp.eq.s32.totalorder %v11028_v29, 4294967293  ;;  %v15908_v29 = vld [vmem:[#allocation54_spill] sm:$0xff] }
 0x475   : > { %10042 = vmatprep.subr.msk.mxu0 %vm847_vm7, %v15862_v21 }
 0x476   : > { %9906 = vmatmul.mubr.f32.gmra.mxu0 %v7900_v30 }
 0x477   : > { %9962 = vmatmul.mubr.f32.gmra.mxu1 %v11241_v59  ;;  %9908 = vmatprep.mubr.f32.mxu0 %v7901_v38  ;;  %v7904_v59 = vld [vmem:[%s15692_s5 + $0x3b8] sm:$0xff] }
 0x478   : > { %9964 = vmatprep.mubr.f32.mxu1 %v11246_v8  ;;  %10043 = vmatpush3.msk.msra.mxu0 %vm847_vm7, %v15862_v21  ;;  %v15891_v8 = vld [vmem:[#allocation24_spill] sm:$0xff]  ;;  %vm15898_vm7 = vmmov %vm15897_vm6 }
 0x479   : > { %10044 = vmatprep.subr.msk.mxu0 %vm846_vm8, %v15862_v21 }
 0x47a   : > { %9909 = vmatmul.mubr.f32.gmra.mxu0 %v7902_v41 }
 0x47b   : > { %9965 = vmatmul.mubr.f32.gmra.mxu1 %v11249_v13  ;;  %9911 = vmatprep.mubr.f32.mxu0 %v7903_v44  ;;  %v15901_v13 = vmov 0.0  }
 0x47c   : > { %9967 = vmatprep.mubr.f32.mxu1 %v15891_v8  ;;  %10045 = vmatpush3.msk.msra.mxu0 %vm846_vm8, %v15862_v21  ;;  %vm15899_vm8 = vcmp.eq.s32.totalorder %v11045_v32, 4294967293 }
 0x47d   : > { %10046 = vmatprep.subr.msk.mxu0 %vm845_vm9, %v15862_v21 }
 0x47e   : > { %9912 = vmatmul.mubr.f32.gmra.mxu0 %v7904_v59 }
 0x47f   : > { %9968 = vmatmul.mubr.f32.gmra.mxu1 %v15892_v19  ;;  %10047 = vmatpush3.msk.msra.mxu0 %vm845_vm9, %v15862_v21  ;;  %vm15900_vm9 = vmmov %vm15899_vm8 }
 0x480   : > { %10048 = vmatprep.subr.msk.mxu0 %vm844_vm10, %v15862_v21  ;;  %10002 = vmatprep.mubr.f32.mxu1 %v7921_v6 }
 0x481   : > { %10049 = vmatpush3.msk.msra.mxu0 %vm844_vm10, %v15862_v21  ;;  %vm3721_vm10 = vcmask 261120  }
 0x482   : > { %10050 = vmatprep.subr.msk.mxu0 %vm843_vm11, %v15862_v21 }
 0x483   : > { %10051 = vmatpush3.msk.msra.mxu0 %vm843_vm11, %v15862_v21  ;;  %vm15947_vm11 = vcmp.eq.s32.totalorder %v10839_v48, 4294967294 }
 0x484   : > { %10052 = vmatprep.subr.msk.mxu0 %vm842_vm12, %v15862_v21 }
 0x485   : > { %10053 = vmatpush3.msk.msra.mxu0 %vm842_vm12, %v15862_v21  ;;  %vm15948_vm12 = vmmov %vm15947_vm11 }
 0x486   : > { %10054 = vmatprep.subr.msk.mxu0 %vm841_vm13, %v15862_v21 }
 0x487   : > { %10055 = vmatpush3.msk.msra.mxu0 %vm841_vm13, %v15862_v21 }
 0x488   : > { %10056 = vmatprep.subr.msk.mxu0 %vm15893_vm2, %v15862_v21 }
 0x489   : > { %10057 = vmatpush3.msk.msra.mxu0 %vm15894_vm3, %v15862_v21 }
 0x48a   : > { %10058 = vmatprep.subr.msk.mxu0 %vm15895_vm4, %v15862_v21 }
 0x48b   : > { %10059 = vmatpush3.msk.msra.mxu0 %vm15896_vm5, %v15862_v21 }
 0x48c   : > { %10060 = vmatprep.subr.msk.mxu0 %vm15897_vm6, %v15862_v21 }
 0x48d   : > { %10061 = vmatpush3.msk.msra.mxu0 %vm15898_vm7, %v15862_v21 }
 0x48e   : > { %10062 = vmatprep.subr.msk.mxu0 %vm15899_vm8, %v15862_v21 }
 0x48f   : > { %10063 = vmatpush3.msk.msra.mxu0 %vm15900_vm9, %v15862_v21 }
 0x490   : > { %4051 = vmatprep.subr.mxu0 %v15901_v13 }
 0x4f7   : > { %v9768_v47 = vpop.f32.mrf.mxu1 }
 0x4f8   : > { %v12604_v58 = vadd.f32 %v9768_v47, %v12168_v15 }
 0x4f9   : > { %v12606_v1 = vpop.f32.mrf.mxu1 }
 0x4fb   : > { %v9771_v31 = vpop.f32.mrf.mxu1 }
 0x4fc   : > { %v12609_v35 = vadd.f32 %v9771_v31, %v12175_v46 }
 0x4fd   : > { %v12611_v40 = vpop.f32.mrf.mxu1 }
 0x4ff   : > { %v9774_v43 = vpop.f32.mrf.mxu1 }
 0x500   : > { %v12614_v28 = vadd.f32 %v9774_v43, %v12181_v23 }
 0x501   : > { %v12616_v54 = vpop.f32.mrf.mxu1 }
 0x503   : > { %v9777_v45 = vpop.f32.mrf.mxu1 }
 0x504   : > { %v12619_v18 = vadd.f32 %v9777_v45, %v12189_v56 }
 0x505   : > { %v12621_v15 = vpop.f32.mrf.mxu1 }
 0x507   : > { %v9780_v52 = vpop.f32.mrf.mxu1 }
 0x508   : > { %v12624_v25 = vadd.f32 %v9780_v52, %v12197_v39  ;;  %v7922_v52 = vld [vmem:[%s15692_s5 + $0x3c8] sm:$0xff] }
 0x509   : > { %v12626_v46 = vpop.f32.mrf.mxu1 }
 0x50c   : > { %v9783_v42 = vpop.f32.mrf.mxu1 }
 0x50d   : > { %v12629_v34 = vadd.f32 %v9783_v42, %v12201_v62  ;;  %v7923_v42 = vld [vmem:[%s15692_s5 + $0x3d0] sm:$0xff] }
 0x50e   : > { %v12631_v23 = vpop.f32.mrf.mxu1 }
 0x511   : > { %v9786_v9 = vpop.f32.mrf.mxu1 }
 0x512   : > { %v12634_v11 = vadd.f32 %v9786_v9, %v15902_v2  ;;  %v7924_v9 = vld [vmem:[%s15692_s5 + $0x3d8] sm:$0xff]  ;;  %v7925_v2 = vld [vmem:[%s15692_s5 + $0x3e0] sm:$0xff] }
 0x513   : > { %v12636_v56 = vpop.f32.mrf.mxu1 }
 0x516   : > { %v9789_v51 = vpop.f32.mrf.mxu1 }
 0x517   : > { %v12639_v36 = vadd.f32 %v9789_v51, %v12209_v60  ;;  %v7926_v51 = vld [vmem:[%s15692_s5 + $0x3e8] sm:$0xff] }
 0x518   : > { %v12641_v39 = vpop.f32.mrf.mxu1 }
 0x51b   : > { %v9792_v53 = vpop.f32.mrf.mxu1 }
 0x51c   : > { %v12644_v0 = vadd.f32 %v9792_v53, %v12213_v7  ;;  %v7927_v53 = vld [vmem:[%s15692_s5 + $0x3f0] sm:$0xff] }
 0x51d   : > { %v12646_v62 = vpop.f32.mrf.mxu1 }
 0x51f   : > { %v9795_v4 = vpop.f32.mrf.mxu1 }
 0x520   : > { %v12649_v12 = vadd.f32 %v9795_v4, %v12217_v37  ;;  %v7928_v4 = vld [vmem:[%s15692_s5 + $0x3f8] sm:$0xff] }
 0x521   : > { %v12651_v17 = vpop.f32.mrf.mxu1 }
 0x523   : > { %v9948_v27 = vpop.f32.mrf.mxu1 }
 0x525   : > { %v2994_v30 = vpop.f32.mrf.mxu1 }
 0x527   : > { %v9951_v38 = vpop.f32.mrf.mxu1 }
 0x529   : > { %v3004_v41 = vpop.f32.mrf.mxu1 }
 0x52b   : > { %v9954_v60 = vpop.f32.mrf.mxu1 }
 0x52d   : > { %v3014_v44 = vpop.f32.mrf.mxu1 }
 0x52f   : > { %v9957_v59 = vpop.f32.mrf.mxu1 }
 0x531   : > { %v3024_v8 = vpop.f32.mrf.mxu1 }
 0x533   : > { %v9960_v19 = vpop.f32.mrf.mxu1 }
 0x535   : > { %v3034_v6 = vpop.f32.mrf.mxu1 }
 0x537   : > { %v9963_v7 = vpop.f32.mrf.mxu1 }
 0x539   : > { %v3044_v47 = vpop.f32.mrf.mxu1 }
 0x53b   : > { %v9966_v31 = vpop.f32.mrf.mxu1 }
 0x53d   : > { %v3054_v43 = vpop.f32.mrf.mxu1 }
 0x53f   : > { %v9969_v45 = vpop.f32.mrf.mxu1 }
 0x540   : > { %9970 = vmatprep.subr.mxu1 %v9969_v45 }
 0x541   : > { %v3064_v37 = vpop.f32.mrf.mxu1  ;;  %9971 = vmatpush3.msra.mxu1 %v9969_v45 }
 0x542   : > { %9972 = vmatprep.subr.mxu1 %v3064_v37 }
 0x543   : > { %9973 = vmatpush3.msra.mxu1 %v3064_v37 }
 0x544   : > { %9974 = vmatprep.subr.mxu1 %v9966_v31 }
 0x545   : > { %9975 = vmatpush3.msra.mxu1 %v9966_v31  ;;  %v9886_v31 = vpop.f32.mrf.mxu0 }
 0x546   : > { %9976 = vmatprep.subr.mxu1 %v3054_v43 }
 0x547   : > { %9977 = vmatpush3.msra.mxu1 %v3054_v43  ;;  %v2777_v43 = vpop.f32.mrf.mxu0 }
 0x548   : > { %9978 = vmatprep.subr.mxu1 %v9963_v7 }
 0x549   : > { %9979 = vmatpush3.msra.mxu1 %v9963_v7  ;;  %v7939_v7 = vld [vmem:[%s15692_s5 + $0x450] sm:$0xff]  ;;  %v9889_v45 = vpop.f32.mrf.mxu0 }
 0x54a   : > { %9980 = vmatprep.subr.mxu1 %v3044_v47 }
 0x54b   : > { %9981 = vmatpush3.msra.mxu1 %v3044_v47  ;;  %v7940_v47 = vld [vmem:[%s15692_s5 + $0x458] sm:$0xff]  ;;  %v2787_v37 = vpop.f32.mrf.mxu0 }
 0x54c   : > { %9982 = vmatprep.subr.mxu1 %v9960_v19 }
 0x54d   : > { %9983 = vmatpush3.msra.mxu1 %v9960_v19  ;;  %v7937_v19 = vld [vmem:[%s15692_s5 + $0x440] sm:$0xff] }
 0x54e   : > { %9984 = vmatprep.subr.mxu1 %v3034_v6 }
 0x54f   : > { %9985 = vmatpush3.msra.mxu1 %v3034_v6  ;;  %v7938_v6 = vld [vmem:[%s15692_s5 + $0x448] sm:$0xff] }
 0x550   : > { %9986 = vmatprep.subr.mxu1 %v9957_v59 }
 0x551   : > { %9987 = vmatpush3.msra.mxu1 %v9957_v59  ;;  %v7935_v59 = vld [vmem:[%s15692_s5 + $0x430] sm:$0xff] }
 0x552   : > { %9988 = vmatprep.subr.mxu1 %v3024_v8 }
 0x553   : > { %9989 = vmatpush3.msra.mxu1 %v3024_v8  ;;  %v7936_v8 = vld [vmem:[%s15692_s5 + $0x438] sm:$0xff] }
 0x554   : > { %9990 = vmatprep.subr.mxu1 %v9954_v60 }
 0x555   : > { %9991 = vmatpush3.msra.mxu1 %v9954_v60  ;;  %v7933_v60 = vld [vmem:[%s15692_s5 + $0x420] sm:$0xff] }
 0x556   : > { %9992 = vmatprep.subr.mxu1 %v3014_v44 }
 0x557   : > { %9993 = vmatpush3.msra.mxu1 %v3014_v44  ;;  %v7934_v44 = vld [vmem:[%s15692_s5 + $0x428] sm:$0xff] }
 0x558   : > { %9994 = vmatprep.subr.mxu1 %v9951_v38 }
 0x559   : > { %9995 = vmatpush3.msra.mxu1 %v9951_v38  ;;  %v7931_v38 = vld [vmem:[%s15692_s5 + $0x410] sm:$0xff] }
 0x55a   : > { %9996 = vmatprep.subr.mxu1 %v3004_v41 }
 0x55b   : > { %9997 = vmatpush3.msra.mxu1 %v3004_v41  ;;  %v7932_v41 = vld [vmem:[%s15692_s5 + $0x418] sm:$0xff] }
 0x55c   : > { %9998 = vmatprep.subr.mxu1 %v9948_v27 }
 0x55d   : > { %9999 = vmatpush3.msra.mxu1 %v9948_v27  ;;  %v7929_v27 = vld [vmem:[%s15692_s5 + $0x400] sm:$0xff] }
 0x55e   : > { %10000 = vmatprep.subr.mxu1 %v2994_v30 }
 0x55f   : > { %10001 = vmatpush3.msra.mxu1 %v2994_v30  ;;  %v7930_v30 = vld [vmem:[%s15692_s5 + $0x408] sm:$0xff] }
 0x560   : > { %10003 = vmatmul.mubr.f32.vlgmr.msra.gmra.mxu1 %v7922_v52  ;;  %3794 = vmatprep.subr.mxu1 %v15901_v13  ;;  %v9892_v52 = vpop.f32.mrf.mxu0 }
 0x561   : > { %10005 = vmatprep.mubr.f32.mxu1 %v7923_v42 }
 0x562   : > { %v2797_v42 = vpop.f32.mrf.mxu0 }
 0x564   : > { %10006 = vmatmul.mubr.f32.gmra.mxu1 %v7924_v9  ;;  %v9895_v9 = vpop.f32.mrf.mxu0 }
 0x565   : > { %10008 = vmatprep.mubr.f32.mxu1 %v7925_v2  ;;  %v3307_v2 = vpop.permute.xlu1 %3306 }
 0x568   : > { %10009 = vmatmul.mubr.f32.gmra.mxu1 %v7926_v51  ;;  %v3302_v51 = vpop.permute.xlu0 %3301 }
 0x569   : > { %10011 = vmatprep.mubr.f32.mxu1 %v7927_v53  ;;  %v12711_v53 = vpop.f32.mrf.mxu0 }
 0x56c   : > { %10012 = vmatmul.mubr.f32.gmra.mxu1 %v7928_v4  ;;  %v3317_v4 = vpop.permute.xlu1 %3316 }
 0x56d   : > { %10014 = vmatprep.mubr.f32.mxu1 %v7929_v27  ;;  %v12713_v27 = vpop.f32.mrf.mxu0 }
 0x570   : > { %10015 = vmatmul.mubr.f32.gmra.mxu1 %v7930_v30  ;;  %v3312_v30 = vpop.permute.xlu0 %3311 }
 0x571   : > { %10017 = vmatprep.mubr.f32.mxu1 %v7931_v38  ;;  %v15903_v38 = vld [vmem:[#allocation25_spill] sm:$0xff] }
 0x574   : > { %10018 = vmatmul.mubr.f32.gmra.mxu1 %v7932_v41  ;;  %v15904_v41 = vld [vmem:[#allocation35_spill] sm:$0xff] }
 0x575   : > { %10020 = vmatprep.mubr.f32.mxu1 %v7933_v60  ;;  %v1266_v60 = vadd.f32 %v15904_v41, %v15903_v38  ;;  %v2877_v38 = vadd.f32 %v9886_v31, %v12604_v58  ;;  %v15910_v41 = vld [vmem:[#allocation27_spill] sm:$0xff]  ;;  %v15915_v31 = vld [vmem:[#allocation38_spill] sm:$0xff] }
 0x576   : > { %v1286_v5 = vadd.f32 %v15911_v10, %v15910_v41 }
 0x578   : > { %10021 = vmatmul.mubr.f32.gmra.mxu1 %v7934_v44  ;;  %v12717_v44 = vpop.f32.mrf.mxu0 }
 0x579   : > { %10023 = vmatprep.mubr.f32.mxu1 %v7935_v59  ;;  %v3327_v59 = vpop.permute.xlu1 %3326 }
 0x57a   : > { %v12725_v24 = vpop.f32.mrf.mxu0 }
 0x57c   : > { %10024 = vmatmul.mubr.f32.gmra.mxu1 %v7936_v8  ;;  %v15905_v8 = vld [vmem:[#allocation45_spill] sm:$0xff] }
 0x57d   : > { %10026 = vmatprep.mubr.f32.mxu1 %v7937_v19  ;;  %v1727_v19 = vadd.f32 %v15905_v8, %v1266_v60  ;;  %v12732_v60 = vpop.permute.xlu1 %3336  ;;  %v15912_v8 = vld [vmem:[#allocation55_spill] sm:$0xff] }
 0x57f   : > { %v2110_v26 = vadd.f32 %v15908_v29, %v1727_v19  ;;  %v12736_v19 = vpop.f32.mrf.mxu0 }
 0x580   : > { %10027 = vmatmul.mubr.f32.gmra.mxu1 %v7938_v6  ;;  %v12720_v6 = vpop.permute.xlu0 %3321 }
 0x581   : > { %10029 = vmatprep.mubr.f32.mxu1 %v7939_v7  ;;  %v15906_v7 = vld [vmem:[#allocation26_spill] sm:$0xff]  ;;  %v2493_v14 = vadd.f32 %v12606_v1, %v2110_v26  ;;  %v15914_v1 = vld [vmem:[#allocation28_spill] sm:$0xff]  ;;  %v12747_v50 = vpop.f32.mrf.mxu0 }
 0x582   : > { %v1296_v41 = vadd.f32 %v15915_v31, %v15914_v1 }
 0x583   : > { %v2876_v61 = vadd.f32 %v2777_v43, %v2493_v14 }
 0x584   : > { %10030 = vmatmul.mubr.f32.gmra.mxu1 %v7940_v47  ;;  %v15907_v47 = vld [vmem:[#allocation36_spill] sm:$0xff] }
 0x585   : > { %v1276_v32 = vadd.f32 %v15907_v47, %v15906_v7  ;;  %v15913_v47 = vld [vmem:[#allocation47_spill] sm:$0xff] }
 0x586   : > { %v1731_v29 = vadd.f32 %v15913_v47, %v1286_v5 }
 0x587   : > { %v1729_v16 = vadd.f32 %v15909_v20, %v1276_v32  ;;  %v12738_v20 = vpop.permute.xlu0 %3331  ;;  %v2879_v32 = vadd.f32 %v9889_v45, %v12609_v35  ;;  %v3347_v35 = vpop.permute.xlu1 %3346 }
 0x589   : > { %v2112_v63 = vadd.f32 %v15912_v8, %v1729_v16  ;;  %v2114_v16 = vadd.f32 %v15916_v55, %v1731_v29  ;;  %v15919_v55 = vld [vmem:[#allocation39_spill] sm:$0xff] }
 0x58b   : > { %v2495_v26 = vadd.f32 %v12611_v40, %v2112_v63  ;;  %v2497_v47 = vadd.f32 %v12616_v54, %v2114_v16  ;;  %v15921_v54 = vld [vmem:[#allocation22_spill] sm:$0xff] }
 0x620   : > { %v10004_v3 = vpop.f32.mrf.mxu1 }
 0x621   : > { %v3260_v7 = vadd.f32 %v10004_v3, %v2877_v38  ;;  %v2878_v3 = vadd.f32 %v2787_v37, %v2495_v26  ;;  %v15917_v38 = vld [vmem:[#allocation48_spill] sm:$0xff]  ;;  %v15920_v37 = vld [vmem:[#allocation58_spill] sm:$0xff] }
 0x622   : > { %v3160_v57 = vpop.f32.mrf.mxu1  ;;  %v1733_v8 = vadd.f32 %v15917_v38, %v1296_v41  ;;  %v15922_v41 = vld [vmem:[#allocation49_spill] sm:$0xff] }
 0x623   : > { %v3400_v58 = vadd.f32 %v3307_v2, %v3260_v7  ;;  %v3259_v10 = vadd.f32 %v3160_v57, %v2876_v61  ;;  %v2881_v57 = vadd.f32 %v9892_v52, %v12614_v28  ;;  %v15918_v7 = vld [vmem:[#allocation29_spill] sm:$0xff]  ;;  %v12760_v52 = vpop.f32.mrf.mxu0 }
 0x624   : > { %v10007_v14 = vpop.f32.mrf.mxu1  ;;  %v1306_v29 = vadd.f32 %v15919_v55, %v15918_v7 }
 0x625   : > { %v3399_v43 = vadd.f32 %v3302_v51, %v3259_v10  ;;  %v3262_v5 = vadd.f32 %v10007_v14, %v2879_v32  ;;  %v3420_v63 = vmax.f32 %v3400_v58, 0.0  ;;  %v2116_v51 = vadd.f32 %v15920_v37, %v1733_v8  ;;  %v12753_v32 = vpop.permute.xlu0 %3341  ;;  %v15924_v8 = vld [vmem:[#allocation40_spill] sm:$0xff]  ;;  %v12778_v55 = vpop.f32.mrf.mxu0 }
 0x626   : > { %v3170_v40 = vpop.f32.mrf.mxu1  ;;  %v2880_v10 = vadd.f32 %v2797_v42, %v2497_v47  ;;  %v1735_v16 = vadd.f32 %v15922_v41, %v1306_v29  ;;  %v15928_v41 = vld [vmem:[#allocation41_spill] sm:$0xff] }
 0x627   : > { %v3419_v61 = vmax.f32 %v3399_v43, 0.0  ;;  %v3402_v45 = vadd.f32 %v3317_v4, %v3262_v5  ;;  %v3261_v2 = vadd.f32 %v3170_v40, %v2878_v3  ;;  %v2499_v28 = vadd.f32 %v12621_v15, %v2116_v51  ;;  %v15925_v40 = vld [vmem:[#allocation59_spill] sm:$0xff] }
 0x628   : > { %v10010_v26 = vpop.f32.mrf.mxu1  ;;  %v12763_v4 = vmul.f32 %v3420_v63, %v15921_v54  ;;  %v2883_v43 = vadd.f32 %v9895_v9, %v12619_v18 }
 0x629   : > { %v12756_v1 = vmul.f32 %v3419_v61, %v15921_v54  ;;  %v3401_v58 = vadd.f32 %v3312_v30, %v3261_v2  ;;  %v3264_v31 = vadd.f32 %v10010_v26, %v2881_v57  ;;  %v3422_v14 = vmax.f32 %v3402_v45, 0.0  ;;  %v15923_v30 = vld [vmem:[#allocation30_spill] sm:$0xff]  ;;  %v3357_v61 = vpop.permute.xlu1 %3356  ;;  %v3352_v26 = vpop.permute.xlu0 %3351 }
 0x62a   : > { %v3180_v3 = vpop.f32.mrf.mxu1  ;;  %v1316_v47 = vadd.f32 %v15924_v8, %v15923_v30  ;;  %v2118_v57 = vadd.f32 %v15925_v40, %v1735_v16  ;;  %v2882_v63 = vadd.f32 %v12711_v53, %v2499_v28  ;;  %v2885_v53 = vadd.f32 %v12713_v27, %v12624_v25  ;;  %v15929_v16 = vld [vmem:[#allocation60_spill] sm:$0xff] }
 0x62b   : > { %v3421_v5 = vmax.f32 %v3401_v58, 0.0  ;;  %v3404_v42 = vadd.f32 %v3327_v59, %v3264_v31  ;;  %v3263_v38 = vadd.f32 %v3180_v3, %v2880_v10  ;;  %10064 = vmatprep.mubr.f32.mxu0 %v12756_v1  ;;  %v15926_v59 = vld [vmem:[#allocation50_spill] sm:$0xff]  ;;  %v12781_v29 = vmul.f32 %v3422_v14, %v15921_v54  ;;  %v15927_v31 = vld [vmem:[#allocation31_spill] sm:$0xff] }
 0x62c   : > { %v10013_v15 = vpop.f32.mrf.mxu1  ;;  %10065 = vmatmul.mubr.f32.vlgmr.msra.gmra.mxu0 %v12763_v4  ;;  %v1737_v2 = vadd.f32 %v15926_v59, %v1316_v47  ;;  %v2501_v7 = vadd.f32 %v12626_v46, %v2118_v57  ;;  %v1326_v46 = vadd.f32 %v15928_v41, %v15927_v31  ;;  %v15933_v59 = vld [vmem:[#allocation62_spill] sm:$0xff] }
 0x62d   : > { %v12773_v45 = vmul.f32 %v3421_v5, %v15921_v54  ;;  %v3403_v18 = vadd.f32 %v12720_v6, %v3263_v38  ;;  %v3266_v9 = vadd.f32 %v10013_v15, %v2883_v43  ;;  %v3424_v37 = vmax.f32 %v3404_v42, 0.0  ;;  %v2847_v38 = vpop.f32.mrf.mxu0  ;;  %v3367_v40 = vpop.permute.xlu1 %3366 }
 0x62e   : > { %v3190_v51 = vpop.f32.mrf.mxu1  ;;  %v2120_v28 = vadd.f32 %v15929_v16, %v1737_v2  ;;  %v2884_v14 = vadd.f32 %v12717_v44, %v2501_v7  ;;  %v2887_v44 = vadd.f32 %v12725_v24, %v12629_v34  ;;  %v3362_v7 = vpop.permute.xlu0 %3361 }
 0x62f   : > { %v3423_v10 = vmax.f32 %v3403_v18, 0.0  ;;  %v3406_v58 = vadd.f32 %v12732_v60, %v3266_v9  ;;  %v3265_v6 = vadd.f32 %v3190_v51, %v2882_v63  ;;  %10067 = vmatprep.mubr.f32.mxu0 %v12773_v45  ;;  %v15930_v60 = vld [vmem:[#allocation51_spill] sm:$0xff]  ;;  %v12799_v30 = vmul.f32 %v3424_v37, %v15921_v54  ;;  %v15932_v18 = vld [vmem:[#allocation42_spill] sm:$0xff] }
 0x630   : > { %v10016_v3 = vpop.f32.mrf.mxu1  ;;  %10068 = vmatmul.mubr.f32.gmra.mxu0 %v12781_v29  ;;  %v1739_v5 = vadd.f32 %v15930_v60, %v1326_v46  ;;  %v2503_v42 = vadd.f32 %v12631_v23, %v2120_v28  ;;  %v2889_v46 = vadd.f32 %v12747_v50, %v12634_v11 }
 0x631   : > { %v12793_v43 = vmul.f32 %v3423_v10, %v15921_v54  ;;  %v3405_v25 = vadd.f32 %v12738_v20, %v3265_v6  ;;  %v3268_v27 = vadd.f32 %v10016_v3, %v2885_v53  ;;  %v3426_v8 = vmax.f32 %v3406_v58, 0.0  ;;  %v15931_v20 = vld [vmem:[#allocation32_spill] sm:$0xff]  ;;  %v9910_v58 = vpop.f32.mrf.mxu0  ;;  %v15936_v3 = vld [vmem:[#allocation43_spill] sm:$0xff] }
 0x632   : > { %v3200_v47 = vpop.f32.mrf.mxu1  ;;  %v1336_v9 = vadd.f32 %v15932_v18, %v15931_v20  ;;  %v2122_v23 = vadd.f32 %v15933_v59, %v1739_v5  ;;  %v2886_v37 = vadd.f32 %v12736_v19, %v2503_v42 }
 0x633   : > { %v3425_v57 = vmax.f32 %v3405_v25, 0.0  ;;  %v3408_v15 = vadd.f32 %v3347_v35, %v3268_v27  ;;  %v3267_v63 = vadd.f32 %v3200_v47, %v2884_v14  ;;  %10070 = vmatprep.mubr.f32.mxu0 %v12793_v43  ;;  %v15934_v35 = vld [vmem:[#allocation52_spill] sm:$0xff]  ;;  %v12816_v6 = vmul.f32 %v3426_v8, %v15921_v54  ;;  %v3377_v27 = vpop.permute.xlu1 %3376  ;;  %v2857_v47 = vpop.f32.mrf.mxu0 }
 0x634   : > { %v10019_v2 = vpop.f32.mrf.mxu1  ;;  %10071 = vmatmul.mubr.f32.gmra.mxu0 %v12799_v30  ;;  %v1741_v53 = vadd.f32 %v15934_v35, %v1336_v9  ;;  %v2505_v10 = vadd.f32 %v12636_v56, %v2122_v23  ;;  %v15939_v9 = vld [vmem:[#allocation44_spill] sm:$0xff] }
 0x635   : > { %v12810_v51 = vmul.f32 %v3425_v57, %v15921_v54  ;;  %v3407_v24 = vadd.f32 %v12753_v32, %v3267_v63  ;;  %v3270_v34 = vadd.f32 %v10019_v2, %v2887_v44  ;;  %v3428_v31 = vmax.f32 %v3408_v15, 0.0  ;;  %v15935_v32 = vld [vmem:[#allocation33_spill] sm:$0xff]  ;;  %v3372_v15 = vpop.permute.xlu0 %3371  ;;  %v9913_v35 = vpop.f32.mrf.mxu0 }
 0x636   : > { %v3210_v41 = vpop.f32.mrf.mxu1  ;;  %v1346_v14 = vadd.f32 %v15936_v3, %v15935_v32  ;;  %v2124_v25 = vadd.f32 %v12211_v49, %v1741_v53  ;;  %v2888_v60 = vadd.f32 %v12760_v52, %v2505_v10  ;;  %v2891_v63 = vadd.f32 %v12778_v55, %v12639_v36  ;;  %v15940_v36 = vld [vmem:[#allocation56_spill] sm:$0xff] }
 0x637   : > { %v3427_v19 = vmax.f32 %v3407_v24, 0.0  ;;  %v3410_v16 = vadd.f32 %v3357_v61, %v3270_v34  ;;  %v3269_v28 = vadd.f32 %v3210_v41, %v2886_v37  ;;  %10073 = vmatprep.mubr.f32.mxu0 %v12810_v51  ;;  %v15937_v61 = vld [vmem:[#allocation53_spill] sm:$0xff]  ;;  %v12832_v44 = vmul.f32 %v3428_v31, %v15921_v54 }
 0x638   : > { %v10022_v56 = vpop.f32.mrf.mxu1  ;;  %10074 = vmatmul.mubr.f32.gmra.mxu0 %v12816_v6  ;;  %v1743_v42 = vadd.f32 %v15937_v61, %v1346_v14  ;;  %v2507_v8 = vadd.f32 %v12641_v39, %v2124_v25 }
 0x639   : > { %v12827_v5 = vmul.f32 %v3427_v19, %v15921_v54  ;;  %v3409_v50 = vadd.f32 %v3352_v26, %v3269_v28  ;;  %v3272_v11 = vadd.f32 %v10022_v56, %v2889_v46  ;;  %v3430_v49 = vmax.f32 %v3410_v16, 0.0  ;;  %v15938_v26 = vld [vmem:[#allocation34_spill] sm:$0xff]  ;;  %v3387_v19 = vpop.permute.xlu1 %3386  ;;  %v2867_v56 = vpop.f32.mrf.mxu0 }
 0x63a   : > { %v3220_v57 = vpop.f32.mrf.mxu1  ;;  %v1356_v59 = vadd.f32 %v15939_v9, %v15938_v26  ;;  %v2126_v39 = vadd.f32 %v12215_v33, %v1743_v42  ;;  %v2890_v2 = vadd.f32 %v2847_v38, %v2507_v8  ;;  %v2893_v33 = vadd.f32 %v9910_v58, %v12644_v0 }
 0x63b   : > { %v3429_v52 = vmax.f32 %v3409_v50, 0.0  ;;  %v3412_v20 = vadd.f32 %v3367_v40, %v3272_v11  ;;  %v3271_v18 = vadd.f32 %v3220_v57, %v2888_v60  ;;  %10076 = vmatprep.mubr.f32.mxu0 %v12827_v5  ;;  %v12847_v53 = vmul.f32 %v3430_v49, %v15921_v54 }
 0x63c   : > { %v10025_v23 = vpop.f32.mrf.mxu1  ;;  %10077 = vmatmul.mubr.f32.gmra.mxu0 %v12832_v44  ;;  %v1745_v55 = vadd.f32 %v15940_v36, %v1356_v59  ;;  %v2509_v40 = vadd.f32 %v12646_v62, %v2126_v39  ;;  %v3382_v62 = vpop.permute.xlu0 %3381  ;;  %v2895_v58 = vadd.f32 %v9913_v35, %v12649_v12  ;;  %v7941_v36 = vld [vmem:[%s15694_s7 + $0x480] sm:$0xff]  ;;  %v7946_v35 = vld [vmem:[%s15694_s7 + $0x4a8] sm:$0xff] }
 0x63d   : > { %v12842_v37 = vmul.f32 %v3429_v52, %v15921_v54  ;;  %v3411_v24 = vadd.f32 %v3362_v7, %v3271_v18  ;;  %v3274_v34 = vadd.f32 %v10025_v23, %v2891_v63  ;;  %v3432_v10 = vmax.f32 %v3412_v20, 0.0  ;;  %v3397_v49 = vpop.permute.xlu1 %3396 }
 0x63e   : > { %v3230_v31 = vpop.f32.mrf.mxu1  ;;  %v2128_v7 = vadd.f32 %v12219_v22, %v1745_v55  ;;  %v2892_v16 = vadd.f32 %v2857_v47, %v2509_v40  ;;  %v7944_v55 = vld [vmem:[%s15694_s7 + $0x498] sm:$0xff]  ;;  %v7943_v40 = vld [vmem:[%s15694_s7 + $0x490] sm:$0xff] }
 0x63f   : > { %v3431_v41 = vmax.f32 %v3411_v24, 0.0  ;;  %v3414_v46 = vadd.f32 %v3377_v27, %v3274_v34  ;;  %v3273_v38 = vadd.f32 %v3230_v31, %v2890_v2  ;;  %10079 = vmatprep.mubr.f32.mxu0 %v12842_v37  ;;  %v12859_v27 = vmul.f32 %v3432_v10, %v15921_v54  ;;  %v7942_v34 = vld [vmem:[%s15694_s7 + $0x488] sm:$0xff]  ;;  %v7945_v10 = vld [vmem:[%s15694_s7 + $0x4a0] sm:$0xff]  ;;  %v7948_v31 = vld [vmem:[%s15694_s7 + $0x4b8] sm:$0xff] }
 0x640   : > { %v10028_v28 = vpop.f32.mrf.mxu1  ;;  %10080 = vmatmul.mubr.f32.gmra.mxu0 %v12847_v53  ;;  %v2511_v0 = vadd.f32 %v12651_v17, %v2128_v7  ;;  %v3392_v18 = vpop.permute.xlu0 %3391  ;;  %v7954_v7 = vld [vmem:[%s15694_s7 + $0x4e8] sm:$0xff] }
 0x641   : > { %v12854_v32 = vmul.f32 %v3431_v41, %v15921_v54  ;;  %v3434_v3 = vmax.f32 %v3414_v46, 0.0  ;;  %v3413_v14 = vadd.f32 %v3372_v15, %v3273_v38  ;;  %v3276_v25 = vadd.f32 %v10028_v28, %v2893_v33  ;;  %v7947_v33 = vld [vmem:[%s15694_s7 + $0x4b0] sm:$0xff]  ;;  %v7950_v41 = vld [vmem:[%s15694_s7 + $0x4c8] sm:$0xff]  ;;  %v7949_v46 = vld [vmem:[%s15694_s7 + $0x4c0] sm:$0xff] }
 0x642   : > { %v3240_v22 = vpop.f32.mrf.mxu1  ;;  %v2894_v8 = vadd.f32 %v2867_v56, %v2511_v0  ;;  %v7952_v38 = vld [vmem:[%s15694_s7 + $0x4d8] sm:$0xff]  ;;  %v7959_v0 = vld [vmem:[%s15694_s7 + $0x510] sm:$0xff]  ;;  %v7961_v56 = vld [vmem:[%s15694_s7 + $0x520] sm:$0xff] }
 0x643   : > { %v12862_v60 = vmul.f32 %v3434_v3, %v15921_v54  ;;  %v3433_v50 = vmax.f32 %v3413_v14, 0.0  ;;  %v3416_v11 = vadd.f32 %v3387_v19, %v3276_v25  ;;  %v3275_v61 = vadd.f32 %v3240_v22, %v2892_v16  ;;  %10082 = vmatprep.mubr.f32.mxu0 %v12854_v32  ;;  %v7951_v19 = vld [vmem:[%s15694_s7 + $0x4d0] sm:$0xff]  ;;  %v7953_v16 = vld [vmem:[%s15694_s7 + $0x4e0] sm:$0xff]  ;;  %v7956_v28 = vld [vmem:[%s15694_s7 + $0x4f8] sm:$0xff] }
 0x644   : > { %v10031_v42 = vpop.f32.mrf.mxu1  ;;  %10083 = vmatmul.mubr.f32.gmra.mxu0 %v12859_v27  ;;  %v7958_v3 = vld [vmem:[%s15694_s7 + $0x508] sm:$0xff]  ;;  %v7957_v14 = vld [vmem:[%s15694_s7 + $0x500] sm:$0xff]  ;;  %v7960_v25 = vld [vmem:[%s15694_s7 + $0x518] sm:$0xff] }
 0x645   : > { %15941 = vst [vmem:[#allocation24_spill] sm:$0xff] %v12862_v60  ;;  %v12867_v17 = vmul.f32 %v3433_v50, %v15921_v54  ;;  %v3415_v12 = vadd.f32 %v3382_v62, %v3275_v61  ;;  %v3278_v47 = vadd.f32 %v10031_v42, %v2895_v58  ;;  %4052 = vmatpush1.msra.mxu0 %v12862_v60  ;;  %v3436_v57 = vmax.f32 %v3416_v11, 0.0  ;;  %v7955_v62 = vld [vmem:[%s15694_s7 + $0x4f0] sm:$0xff]  ;;  %v7962_v58 = vld [vmem:[%s15694_s7 + $0x528] sm:$0xff]  ;;  %v7964_v22 = vld [vmem:[%s15694_s7 + $0x538] sm:$0xff] }
 0x646   : > { %v3250_v15 = vpop.f32.mrf.mxu1  ;;  %4053 = vmatprep.subr.mxu0 %v15901_v13  ;;  %v7963_v50 = vld [vmem:[%s15694_s7 + $0x530] sm:$0xff]  ;;  %v7966_v11 = vld [vmem:[%s15694_s7 + $0x548] sm:$0xff]  ;;  %v7965_v61 = vld [vmem:[%s15694_s7 + $0x540] sm:$0xff] }
 0x647   : > { %15942 = vst [vmem:[#allocation23_spill] sm:$0xff] %v12867_v17  ;;  %v3435_v63 = vmax.f32 %v3415_v12, 0.0  ;;  %v3418_v52 = vadd.f32 %v3397_v49, %v3278_v47  ;;  %v3277_v20 = vadd.f32 %v3250_v15, %v2894_v8  ;;  %10085 = vmatprep.mubr.f32.mxu0 %v12867_v17  ;;  %4054 = vmatpush1.msra.mxu0 %v12867_v17  ;;  %v7968_v42 = vld [vmem:[%s15694_s7 + $0x558] sm:$0xff]  ;;  %v7967_v8 = vld [vmem:[%s15694_s7 + $0x550] sm:$0xff]  ;;  %v7970_v12 = vld [vmem:[%s15694_s7 + $0x568] sm:$0xff] }
 0x648   : > { %10086 = vmatmul.mubr.f32.gmra.mxu0 %v12862_v60  ;;  %4055 = vmatprep.subr.mxu0 %v15901_v13  ;;  %v12880_v59 = vmul.f32 %v3436_v57, %v15921_v54  ;;  %v7969_v47 = vld [vmem:[%s15694_s7 + $0x560] sm:$0xff]  ;;  %v7972_v49 = vld [vmem:[%s15694_s7 + $0x578] sm:$0xff]  ;;  %v7971_v57 = vld [vmem:[%s15694_s7 + $0x570] sm:$0xff] }
 0x649   : > { %v12876_v26 = vmul.f32 %v3435_v63, %v15921_v54  ;;  %v3417_v9 = vadd.f32 %v3392_v18, %v3277_v20  ;;  %4056 = vmatpush1.msra.mxu0 %v12859_v27  ;;  %v3438_v39 = vmax.f32 %v3418_v52, 0.0  ;;  %v7974_v63 = vld [vmem:[%s15694_s7 + $0x588] sm:$0xff]  ;;  %v7973_v20 = vld [vmem:[%s15694_s7 + $0x580] sm:$0xff] }
 0x64a   : > { %15944 = vst [vmem:[#allocation25_spill] sm:$0xff] %v12880_v59  ;;  %4057 = vmatprep.subr.mxu0 %v15901_v13 }
 0x64b   : > { %15943 = vst [vmem:[#allocation61_spill] sm:$0xff] %v12876_v26  ;;  %v3437_v23 = vmax.f32 %v3417_v9, 0.0  ;;  %10088 = vmatprep.mubr.f32.mxu0 %v12876_v26  ;;  %4058 = vmatpush1.msra.mxu0 %v12854_v32  ;;  %v12892_v24 = vmul.f32 %v3438_v39, %v15921_v54  ;;  %v7976_v9 = vld [vmem:[%s15694_s7 + $0x598] sm:$0xff] }
 0x64c   : > { %10089 = vmatmul.mubr.f32.gmra.mxu0 %v12880_v59  ;;  %4059 = vmatprep.subr.mxu0 %v15901_v13 }
 0x64d   : > { %v12888_v2 = vmul.f32 %v3437_v23, %v15921_v54  ;;  %4060 = vmatpush1.msra.mxu0 %v12847_v53  ;;  %15946 = vst [vmem:[#allocation45_spill] sm:$0xff] %v12892_v24  ;;  %v3674_v54 = vld [vmem:[%s15694_s7 + $0x8] sm:$0xff]  ;;  %v7975_v23 = vld [vmem:[%s15694_s7 + $0x590] sm:$0xff] }
 0x64e   : > { %4061 = vmatprep.subr.mxu0 %v15901_v13  ;;  %8005 = vmatprep.mubr.msk.f32.mxu1 %vm3721_vm10, %v3674_v54 }
 0x64f   : > { %15945 = vst [vmem:[#allocation35_spill] sm:$0xff] %v12888_v2  ;;  %10091 = vmatprep.mubr.f32.mxu0 %v12888_v2  ;;  %4062 = vmatpush1.msra.mxu0 %v12842_v37 }
 0x650   : > { %10092 = vmatmul.mubr.f32.gmra.mxu0 %v12892_v24  ;;  %4063 = vmatprep.subr.mxu0 %v15901_v13 }
 0x651   : > { %4064 = vmatpush1.msra.mxu0 %v12832_v44  ;;  %8029 = vmatprep.mubr.msk.f32.mxu0 %vm3721_vm10, %v7942_v34  ;;  %v7978_v34 = vld [vmem:[%s15694_s7 + $0x5a8] sm:$0xff] }
 0x652   : > { %4065 = vmatprep.subr.mxu0 %v15901_v13 }
 0x653   : > { %4066 = vmatpush1.msra.mxu0 %v12827_v5 }
 0x654   : > { %4067 = vmatprep.subr.mxu0 %v15901_v13 }
 0x655   : > { %4068 = vmatpush1.msra.mxu0 %v12816_v6 }
 0x656   : > { %4069 = vmatprep.subr.mxu0 %v15901_v13 }
 0x657   : > { %4070 = vmatpush1.msra.mxu0 %v12810_v51 }
 0x658   : > { %4071 = vmatprep.subr.mxu0 %v15901_v13 }
 0x659   : > { %4072 = vmatpush1.msra.mxu0 %v12799_v30 }
 0x65a   : > { %4073 = vmatprep.subr.mxu0 %v15901_v13 }
 0x65b   : > { %4074 = vmatpush1.msra.mxu0 %v12793_v43 }
 0x65c   : > { %4075 = vmatprep.subr.mxu0 %v15901_v13 }
 0x65d   : > { %4076 = vmatpush1.msra.mxu0 %v12781_v29 }
 0x65e   : > { %4077 = vmatprep.subr.mxu0 %v15901_v13 }
 0x65f   : > { %4078 = vmatpush1.msra.mxu0 %v12773_v45 }
 0x660   : > { %4079 = vmatprep.subr.mxu0 %v15901_v13 }
 0x661   : > { %4080 = vmatpush1.msra.mxu0 %v12763_v4 }
 0x662   : > { %4081 = vmatprep.subr.mxu0 %v15901_v13 }
 0x663   : > { %4082 = vmatpush1.msra.mxu0 %v12756_v1 }
 0x664   : > { %4107 = vmatprep.subr.mxu0 %v15901_v13 }
 0x665   : > { %4108 = vmatpush2.msra.mxu0 %v12892_v24 }
 0x666   : > { %4109 = vmatprep.subr.mxu0 %v15901_v13 }
 0x667   : > { %4110 = vmatpush2.msra.mxu0 %v12888_v2 }
 0x668   : > { %4111 = vmatprep.subr.mxu0 %v15901_v13 }
 0x669   : > { %4112 = vmatpush2.msra.mxu0 %v12880_v59 }
 0x66a   : > { %4113 = vmatprep.subr.mxu0 %v15901_v13 }
 0x66b   : > { %4114 = vmatpush2.msra.mxu0 %v12876_v26 }
 0x66c   : > { %4522 = vmatprep.subr.mxu0 %v15901_v13  ;;  %4116 = vmatmul.mubr.f32.vlgmr.msra.gmra.mxu0 %v7941_v36 }
 0x66d   : > { %8030 = vmatprep.mubr.msk.f32.mxu0 %vm3721_vm10, %v7944_v55  ;;  %v7977_v55 = vld [vmem:[%s15694_s7 + $0x5a0] sm:$0xff] }
 0x670   : > { %4121 = vmatmul.mubr.f32.gmra.mxu0 %v7943_v40 }
 0x671   : > { %8031 = vmatprep.mubr.msk.f32.mxu0 %vm3721_vm10, %v7946_v35  ;;  %v7980_v35 = vld [vmem:[%s15694_s7 + $0x5b8] sm:$0xff] }
 0x674   : > { %4126 = vmatmul.mubr.f32.gmra.mxu0 %v7945_v10 }
 0x675   : > { %8032 = vmatprep.mubr.msk.f32.mxu0 %vm3721_vm10, %v7948_v31  ;;  %v7979_v31 = vld [vmem:[%s15694_s7 + $0x5b0] sm:$0xff] }
 0x678   : > { %4131 = vmatmul.mubr.f32.gmra.mxu0 %v7947_v33 }
 0x679   : > { %8033 = vmatprep.mubr.msk.f32.mxu0 %vm3721_vm10, %v7950_v41  ;;  %v7982_v41 = vld [vmem:[%s15694_s7 + $0x5c8] sm:$0xff] }
 0x67c   : > { %4136 = vmatmul.mubr.f32.gmra.mxu0 %v7949_v46 }
 0x67d   : > { %8034 = vmatprep.mubr.msk.f32.mxu0 %vm3721_vm10, %v7952_v38  ;;  %v7981_v38 = vld [vmem:[%s15694_s7 + $0x5c0] sm:$0xff] }
 0x680   : > { %4141 = vmatmul.mubr.f32.gmra.mxu0 %v7951_v19 }
 0x681   : > { %8035 = vmatprep.mubr.msk.f32.mxu0 %vm3721_vm10, %v7954_v7  ;;  %v7984_v7 = vld [vmem:[%s15694_s7 + $0x5d8] sm:$0xff] }
 0x684   : > { %4146 = vmatmul.mubr.f32.gmra.mxu0 %v7953_v16 }
 0x685   : > { %8036 = vmatprep.mubr.msk.f32.mxu0 %vm3721_vm10, %v7956_v28  ;;  %v7983_v28 = vld [vmem:[%s15694_s7 + $0x5d0] sm:$0xff] }
 0x688   : > { %4151 = vmatmul.mubr.f32.gmra.mxu0 %v7955_v62 }
 0x689   : > { %8037 = vmatprep.mubr.msk.f32.mxu0 %vm3721_vm10, %v7958_v3  ;;  %v7986_v3 = vld [vmem:[%s15694_s7 + $0x5e8] sm:$0xff] }
 0x68c   : > { %4156 = vmatmul.mubr.f32.gmra.mxu0 %v7957_v14 }
 0x68d   : > { %8038 = vmatprep.mubr.msk.f32.mxu0 %vm3721_vm10, %v7960_v25  ;;  %v7985_v25 = vld [vmem:[%s15694_s7 + $0x5e0] sm:$0xff] }
 0x690   : > { %4161 = vmatmul.mubr.f32.gmra.mxu0 %v7959_v0 }
 0x691   : > { %8039 = vmatprep.mubr.msk.f32.mxu0 %vm3721_vm10, %v7962_v58  ;;  %v7988_v58 = vld [vmem:[%s15694_s7 + $0x5f8] sm:$0xff] }
 0x694   : > { %4166 = vmatmul.mubr.f32.gmra.mxu0 %v7961_v56 }
 0x695   : > { %8040 = vmatprep.mubr.msk.f32.mxu0 %vm3721_vm10, %v7964_v22  ;;  %v7987_v22 = vld [vmem:[%s15694_s7 + $0x5f0] sm:$0xff] }
 0x698   : > { %4171 = vmatmul.mubr.f32.gmra.mxu0 %v7963_v50 }
 0x699   : > { %8041 = vmatprep.mubr.msk.f32.mxu0 %vm3721_vm10, %v7966_v11 }
 0x69c   : > { %4176 = vmatmul.mubr.f32.gmra.mxu0 %v7965_v61 }
 0x69d   : > { %8042 = vmatprep.mubr.msk.f32.mxu0 %vm3721_vm10, %v7968_v42 }
 0x6a0   : > { %4181 = vmatmul.mubr.f32.gmra.mxu0 %v7967_v8  ;;  %v3673_v8 = vld [vmem:[%s15694_s7] sm:$0xff] }
 0x6a1   : > { %8043 = vmatprep.mubr.msk.f32.mxu0 %vm3721_vm10, %v7970_v12  ;;  %v3676_v12 = vld [vmem:[%s15694_s7 + $0x18] sm:$0xff] }
 0x6a4   : > { %4186 = vmatmul.mubr.f32.gmra.mxu0 %v7969_v47  ;;  %v3675_v47 = vld [vmem:[%s15694_s7 + $0x10] sm:$0xff] }
 0x6a5   : > { %8044 = vmatprep.mubr.msk.f32.mxu0 %vm3721_vm10, %v7972_v49  ;;  %v3678_v49 = vld [vmem:[%s15694_s7 + $0x28] sm:$0xff] }
 0x6a8   : > { %4191 = vmatmul.mubr.f32.gmra.mxu0 %v7971_v57  ;;  %v15949_v57 = vld [vmem:[#allocation7_spill] sm:$0xff] }
 0x6a9   : > { %8045 = vmatprep.mubr.msk.f32.mxu0 %vm3721_vm10, %v7974_v63  ;;  %vm15950_vm13 = vcmp.eq.s32.totalorder %v15949_v57, 4294967294  ;;  %v3677_v63 = vld [vmem:[%s15694_s7 + $0x20] sm:$0xff] }
 0x6aa   : > { %vm15951_vm2 = vmmov %vm15950_vm13 }
 0x6ac   : > { %4196 = vmatmul.mubr.f32.gmra.mxu0 %v7973_v20  ;;  %v15955_v20 = vld [vmem:[#allocation9_spill] sm:$0xff] }
 0x6ad   : > { %8046 = vmatprep.mubr.msk.f32.mxu0 %vm3721_vm10, %v7976_v9  ;;  %vm15956_vm5 = vcmp.eq.s32.totalorder %v15955_v20, 4294967294  ;;  %v3679_v9 = vld [vmem:[%s15694_s7 + $0x30] sm:$0xff] }
 0x6ae   : > { %vm15957_vm6 = vmmov %vm15956_vm5 }
 0x6b0   : > { %4201 = vmatmul.mubr.f32.gmra.mxu0 %v7975_v23  ;;  %v15961_v23 = vld [vmem:[#allocation11_spill] sm:$0xff] }
 0x6b1   : > { %8047 = vmatprep.mubr.msk.f32.mxu0 %vm3721_vm10, %v7978_v34  ;;  %vm15962_vm9 = vcmp.eq.s32.totalorder %v15961_v23, 4294967294  ;;  %v3681_v34 = vld [vmem:[%s15694_s7 + $0x40] sm:$0xff] }
 0x6b4   : > { %4206 = vmatmul.mubr.f32.gmra.mxu0 %v7977_v55  ;;  %v15967_v55 = vld [vmem:[#allocation13_spill] sm:$0xff] }
 0x6b5   : > { %8048 = vmatprep.mubr.msk.f32.mxu0 %vm3721_vm10, %v7980_v35  ;;  %v3683_v35 = vld [vmem:[%s15694_s7 + $0x50] sm:$0xff] }
 0x6b8   : > { %4211 = vmatmul.mubr.f32.gmra.mxu0 %v7979_v31  ;;  %v15973_v31 = vld [vmem:[#allocation15_spill] sm:$0xff] }
 0x6b9   : > { %8049 = vmatprep.mubr.msk.f32.mxu0 %vm3721_vm10, %v7982_v41  ;;  %v3685_v41 = vld [vmem:[%s15694_s7 + $0x60] sm:$0xff] }
 0x6bc   : > { %4216 = vmatmul.mubr.f32.gmra.mxu0 %v7981_v38  ;;  %v15979_v38 = vld [vmem:[#allocation17_spill] sm:$0xff] }
 0x6bd   : > { %8050 = vmatprep.mubr.msk.f32.mxu0 %vm3721_vm10, %v7984_v7  ;;  %v3687_v7 = vld [vmem:[%s15694_s7 + $0x70] sm:$0xff] }
 0x6c0   : > { %4221 = vmatmul.mubr.f32.gmra.mxu0 %v7983_v28  ;;  %v15985_v28 = vld [vmem:[#allocation19_spill] sm:$0xff] }
 0x6c1   : > { %8051 = vmatprep.mubr.msk.f32.mxu0 %vm3721_vm10, %v7986_v3  ;;  %v3689_v3 = vld [vmem:[%s15694_s7 + $0x80] sm:$0xff] }
 0x6c4   : > { %4226 = vmatmul.mubr.f32.gmra.mxu0 %v7985_v25  ;;  %v15991_v25 = vld [vmem:[#allocation21_spill] sm:$0xff] }
 0x6c5   : > { %8052 = vmatprep.mubr.msk.f32.mxu0 %vm3721_vm10, %v7988_v58  ;;  %v3694_v58 = vld [vmem:[%s15694_s7 + $0xa8] sm:$0xff] }
 0x6c8   : > { %4231 = vmatmul.mubr.f32.gmra.mxu0 %v7987_v22  ;;  %v3696_v22 = vld [vmem:[%s15694_s7 + $0xb8] sm:$0xff] }
 0x6ec   : > { %v13043_v15 = vpop.f32.mrf.mxu0 }
 0x6ee   : > { %v13048_v52 = vpop.f32.mrf.mxu0 }
 0x6f0   : > { %v13054_v18 = vpop.f32.mrf.mxu0 }
 0x6f2   : > { %v13059_v39 = vpop.f32.mrf.mxu0 }
 0x6f4   : > { %v10072_v54 = vpop.f32.mrf.mxu0 }
 0x6f6   : > { %v3594_v36 = vpop.f32.mrf.mxu0 }
 0x6f8   : > { %v10075_v40 = vpop.f32.mrf.mxu0 }
 0x6fa   : > { %v3604_v10 = vpop.f32.mrf.mxu0 }
 0x6fc   : > { %v10078_v33 = vpop.f32.mrf.mxu0 }
 0x6fe   : > { %v3614_v46 = vpop.f32.mrf.mxu0 }
 0x700   : > { %v10081_v19 = vpop.f32.mrf.mxu0 }
 0x702   : > { %v3624_v16 = vpop.f32.mrf.mxu0 }
 0x704   : > { %v10084_v62 = vpop.f32.mrf.mxu0 }
 0x706   : > { %v3634_v14 = vpop.f32.mrf.mxu0 }
 0x708   : > { %v10087_v0 = vpop.f32.mrf.mxu0 }
 0x709   : > { %3795 = vmatpush1.msra.mxu1 %v10087_v0  ;;  %v3691_v0 = vld [vmem:[%s15694_s7 + $0x90] sm:$0xff] }
 0x70a   : > { %v3644_v56 = vpop.f32.mrf.mxu0  ;;  %3796 = vmatprep.subr.mxu1 %v15901_v13 }
 0x70b   : > { %3797 = vmatpush1.msra.mxu1 %v3644_v56  ;;  %v3693_v56 = vld [vmem:[%s15694_s7 + $0xa0] sm:$0xff] }
 0x70c   : > { %3798 = vmatprep.subr.mxu1 %v15901_v13  ;;  %v10090_v50 = vpop.f32.mrf.mxu0 }
 0x70d   : > { %3799 = vmatpush1.msra.mxu1 %v10084_v62  ;;  %v15988_v62 = vld [vmem:[#allocation20_spill] sm:$0xff] }
 0x70e   : > { %3800 = vmatprep.subr.mxu1 %v15901_v13  ;;  %v3654_v11 = vpop.f32.mrf.mxu0 }
 0x70f   : > { %3801 = vmatpush1.msra.mxu1 %v3634_v14  ;;  %v3692_v14 = vld [vmem:[%s15694_s7 + $0x98] sm:$0xff] }
 0x710   : > { %3802 = vmatprep.subr.mxu1 %v15901_v13  ;;  %v10093_v61 = vpop.f32.mrf.mxu0 }
 0x711   : > { %3803 = vmatpush1.msra.mxu1 %v10081_v19  ;;  %v15982_v19 = vld [vmem:[#allocation18_spill] sm:$0xff] }
 0x712   : > { %3804 = vmatprep.subr.mxu1 %v15901_v13  ;;  %v3664_v42 = vpop.f32.mrf.mxu0 }
 0x713   : > { %3805 = vmatpush1.msra.mxu1 %v3624_v16  ;;  %v3690_v16 = vld [vmem:[%s15694_s7 + $0x88] sm:$0xff] }
 0x714   : > { %3806 = vmatprep.subr.mxu1 %v15901_v13 }
 0x715   : > { %3807 = vmatpush1.msra.mxu1 %v10078_v33  ;;  %v15976_v33 = vld [vmem:[#allocation16_spill] sm:$0xff] }
 0x716   : > { %3808 = vmatprep.subr.mxu1 %v15901_v13 }
 0x717   : > { %3809 = vmatpush1.msra.mxu1 %v3614_v46  ;;  %v3688_v46 = vld [vmem:[%s15694_s7 + $0x78] sm:$0xff] }
 0x718   : > { %3810 = vmatprep.subr.mxu1 %v15901_v13 }
 0x719   : > { %3811 = vmatpush1.msra.mxu1 %v10075_v40  ;;  %v15970_v40 = vld [vmem:[#allocation14_spill] sm:$0xff] }
 0x71a   : > { %3812 = vmatprep.subr.mxu1 %v15901_v13 }
 0x71b   : > { %3813 = vmatpush1.msra.mxu1 %v3604_v10  ;;  %v3686_v10 = vld [vmem:[%s15694_s7 + $0x68] sm:$0xff] }
 0x71c   : > { %3814 = vmatprep.subr.mxu1 %v15901_v13 }
 0x71d   : > { %3815 = vmatpush1.msra.mxu1 %v10072_v54  ;;  %v15964_v54 = vld [vmem:[#allocation12_spill] sm:$0xff] }
 0x71e   : > { %3816 = vmatprep.subr.mxu1 %v15901_v13 }
 0x71f   : > { %3817 = vmatpush1.msra.mxu1 %v3594_v36  ;;  %v3684_v36 = vld [vmem:[%s15694_s7 + $0x58] sm:$0xff] }
 0x720   : > { %3818 = vmatprep.subr.mxu1 %v15901_v13 }
 0x721   : > { %3819 = vmatpush1.msra.mxu1 %v13054_v18  ;;  %v15958_v18 = vld [vmem:[#allocation10_spill] sm:$0xff] }
 0x722   : > { %3820 = vmatprep.subr.mxu1 %v15901_v13  ;;  %vm15959_vm7 = vcmp.eq.s32.totalorder %v15958_v18, 4294967294 }
 0x723   : > { %3821 = vmatpush1.msra.mxu1 %v13059_v39  ;;  %vm15960_vm8 = vmmov %vm15959_vm7  ;;  %v3682_v39 = vld [vmem:[%s15694_s7 + $0x48] sm:$0xff] }
 0x724   : > { %3822 = vmatprep.subr.mxu1 %v15901_v13 }
 0x725   : > { %3823 = vmatpush1.msra.mxu1 %v13043_v15  ;;  %v15952_v15 = vld [vmem:[#allocation8_spill] sm:$0xff] }
 0x726   : > { %3824 = vmatprep.subr.mxu1 %v15901_v13  ;;  %vm15953_vm3 = vcmp.eq.s32.totalorder %v15952_v15, 4294967294 }
 0x727   : > { %3825 = vmatpush1.msra.mxu1 %v13048_v52  ;;  %vm15954_vm4 = vmmov %vm15953_vm3  ;;  %v3680_v52 = vld [vmem:[%s15694_s7 + $0x38] sm:$0xff] }
 0x728   : > { %3850 = vmatprep.subr.mxu1 %v15901_v13 }
 0x729   : > { %3851 = vmatpush2.msra.mxu1 %v10093_v61  ;;  %v3697_v61 = vld [vmem:[%s15694_s7 + $0xc0] sm:$0xff] }
 0x72a   : > { %3852 = vmatprep.subr.mxu1 %v15901_v13 }
 0x72b   : > { %3853 = vmatpush2.msra.mxu1 %v3664_v42  ;;  %v3700_v42 = vld [vmem:[%s15694_s7 + $0xd8] sm:$0xff] }
 0x72c   : > { %3854 = vmatprep.subr.mxu1 %v15901_v13 }
 0x72d   : > { %3855 = vmatpush2.msra.mxu1 %v10090_v50  ;;  %v3695_v50 = vld [vmem:[%s15694_s7 + $0xb0] sm:$0xff] }
 0x72e   : > { %3856 = vmatprep.subr.mxu1 %v15901_v13 }
 0x72f   : > { %3857 = vmatpush2.msra.mxu1 %v3654_v11  ;;  %v3698_v11 = vld [vmem:[%s15694_s7 + $0xc8] sm:$0xff] }
 0x730   : > { %3859 = vmatmul.mubr.f32.vlgmr.msra.gmra.mxu1 %v3673_v8  ;;  %10094 = vmatprep.subr.msk.mxu1 %vm15947_vm11, %v15862_v21  ;;  %vm15963_vm11 = vmmov %vm15962_vm9  ;;  %v3699_v8 = vld [vmem:[%s15694_s7 + $0xd0] sm:$0xff] }
 0x731   : > { %8006 = vmatprep.mubr.msk.f32.mxu1 %vm3721_vm10, %v3676_v12  ;;  %10095 = vmatpush3.msk.msra.mxu1 %vm15948_vm12, %v15862_v21  ;;  %vm15965_vm12 = vcmp.eq.s32.totalorder %v15964_v54, 4294967294  ;;  %v3702_v12 = vld [vmem:[%s15694_s7 + $0xe8] sm:$0xff] }
 0x732   : > { %10096 = vmatprep.subr.msk.mxu1 %vm15950_vm13, %v15862_v21  ;;  %vm15966_vm13 = vmmov %vm15965_vm12 }
 0x733   : > { %10097 = vmatpush3.msk.msra.mxu1 %vm15951_vm2, %v15862_v21  ;;  %vm15968_vm2 = vcmp.eq.s32.totalorder %v15967_v55, 4294967294 }
 0x734   : > { %3864 = vmatmul.mubr.f32.gmra.mxu1 %v3675_v47  ;;  %10098 = vmatprep.subr.msk.mxu1 %vm15953_vm3, %v15862_v21  ;;  %vm15969_vm3 = vmmov %vm15968_vm2  ;;  %v3701_v47 = vld [vmem:[%s15694_s7 + $0xe0] sm:$0xff] }
 0x735   : > { %8007 = vmatprep.mubr.msk.f32.mxu1 %vm3721_vm10, %v3678_v49  ;;  %10099 = vmatpush3.msk.msra.mxu1 %vm15954_vm4, %v15862_v21  ;;  %vm15971_vm4 = vcmp.eq.s32.totalorder %v15970_v40, 4294967294  ;;  %v3704_v49 = vld [vmem:[%s15694_s7 + $0xf8] sm:$0xff] }
 0x736   : > { %10100 = vmatprep.subr.msk.mxu1 %vm15956_vm5, %v15862_v21  ;;  %vm15972_vm5 = vmmov %vm15971_vm4 }
 0x737   : > { %10101 = vmatpush3.msk.msra.mxu1 %vm15957_vm6, %v15862_v21  ;;  %vm15974_vm6 = vcmp.eq.s32.totalorder %v15973_v31, 4294967294 }
 0x738   : > { %3869 = vmatmul.mubr.f32.gmra.mxu1 %v3677_v63  ;;  %10102 = vmatprep.subr.msk.mxu1 %vm15959_vm7, %v15862_v21  ;;  %vm15975_vm7 = vmmov %vm15974_vm6  ;;  %v3703_v63 = vld [vmem:[%s15694_s7 + $0xf0] sm:$0xff] }
 0x739   : > { %8008 = vmatprep.mubr.msk.f32.mxu1 %vm3721_vm10, %v3680_v52  ;;  %10103 = vmatpush3.msk.msra.mxu1 %vm15960_vm8, %v15862_v21  ;;  %vm15977_vm8 = vcmp.eq.s32.totalorder %v15976_v33, 4294967294  ;;  %v3706_v52 = vld [vmem:[%s15694_s7 + $0x108] sm:$0xff] }
 0x73a   : > { %10104 = vmatprep.subr.msk.mxu1 %vm15962_vm9, %v15862_v21  ;;  %vm15978_vm9 = vmmov %vm15977_vm8 }
 0x73b   : > { %10105 = vmatpush3.msk.msra.mxu1 %vm15963_vm11, %v15862_v21  ;;  %vm15980_vm11 = vcmp.eq.s32.totalorder %v15979_v38, 4294967294 }
 0x73c   : > { %3874 = vmatmul.mubr.f32.gmra.mxu1 %v3679_v9  ;;  %10106 = vmatprep.subr.msk.mxu1 %vm15965_vm12, %v15862_v21  ;;  %vm15981_vm12 = vmmov %vm15980_vm11  ;;  %v3705_v9 = vld [vmem:[%s15694_s7 + $0x100] sm:$0xff] }
 0x73d   : > { %8009 = vmatprep.mubr.msk.f32.mxu1 %vm3721_vm10, %v3682_v39  ;;  %10107 = vmatpush3.msk.msra.mxu1 %vm15966_vm13, %v15862_v21  ;;  %vm15983_vm13 = vcmp.eq.s32.totalorder %v15982_v19, 4294967294  ;;  %v3708_v39 = vld [vmem:[%s15694_s7 + $0x118] sm:$0xff] }
 0x73e   : > { %10108 = vmatprep.subr.msk.mxu1 %vm15968_vm2, %v15862_v21  ;;  %vm15984_vm2 = vmmov %vm15983_vm13 }
 0x73f   : > { %10109 = vmatpush3.msk.msra.mxu1 %vm15969_vm3, %v15862_v21  ;;  %vm15986_vm3 = vcmp.eq.s32.totalorder %v15985_v28, 4294967294 }
 0x740   : > { %3879 = vmatmul.mubr.f32.gmra.mxu1 %v3681_v34  ;;  %10110 = vmatprep.subr.msk.mxu1 %vm15971_vm4, %v15862_v21  ;;  %vm15987_vm4 = vmmov %vm15986_vm3  ;;  %v13347_v34 = vpop.f32.mrf.mxu0 }
 0x741   : > { %8010 = vmatprep.mubr.msk.f32.mxu1 %vm3721_vm10, %v3684_v36  ;;  %10111 = vmatpush3.msk.msra.mxu1 %vm15972_vm5, %v15862_v21  ;;  %vm15989_vm5 = vcmp.eq.s32.totalorder %v15988_v62, 4294967294  ;;  %v3707_v36 = vld [vmem:[%s15694_s7 + $0x110] sm:$0xff] }
 0x742   : > { %10112 = vmatprep.subr.msk.mxu1 %vm15974_vm6, %v15862_v21  ;;  %vm15990_vm6 = vmmov %vm15989_vm5 }
 0x743   : > { %10113 = vmatpush3.msk.msra.mxu1 %vm15975_vm7, %v15862_v21  ;;  %vm15992_vm7 = vcmp.eq.s32.totalorder %v15991_v25, 4294967294 }
 0x744   : > { %3884 = vmatmul.mubr.f32.gmra.mxu1 %v3683_v35  ;;  %10114 = vmatprep.subr.msk.mxu1 %vm15977_vm8, %v15862_v21  ;;  %vm15993_vm8 = vmmov %vm15992_vm7  ;;  %v3710_v35 = vld [vmem:[%s15694_s7 + $0x128] sm:$0xff] }
 0x745   : > { %8011 = vmatprep.mubr.msk.f32.mxu1 %vm3721_vm10, %v3686_v10  ;;  %10115 = vmatpush3.msk.msra.mxu1 %vm15978_vm9, %v15862_v21  ;;  %vm15994_vm9 = vcmp.eq.s32.totalorder %v10839_v48, 4294967295  ;;  %v4119_v10 = vpop.f32.mrf.mxu0 }
 0x746   : > { %10116 = vmatprep.subr.msk.mxu1 %vm15980_vm11, %v15862_v21  ;;  %vm16001_vm11 = vmmov %vm15994_vm9 }
 0x747   : > { %10117 = vmatpush3.msk.msra.mxu1 %vm15981_vm12, %v15862_v21  ;;  %vm16002_vm12 = vcmp.eq.s32.totalorder %v15949_v57, 4294967295 }
 0x748   : > { %3889 = vmatmul.mubr.f32.gmra.mxu1 %v3685_v41  ;;  %10118 = vmatprep.subr.msk.mxu1 %vm15983_vm13, %v15862_v21  ;;  %v13356_v41 = vpop.f32.mrf.mxu0  ;;  %vm16003_vm13 = vmmov %vm16002_vm12 }
 0x749   : > { %8012 = vmatprep.mubr.msk.f32.mxu1 %vm3721_vm10, %v3688_v46  ;;  %10119 = vmatpush3.msk.msra.mxu1 %vm15984_vm2, %v15862_v21  ;;  %v3709_v46 = vld [vmem:[%s15694_s7 + $0x120] sm:$0xff]  ;;  %vm16004_vm2 = vcmp.eq.s32.totalorder %v15952_v15, 4294967295 }
 0x74a   : > { %10120 = vmatprep.subr.msk.mxu1 %vm15986_vm3, %v15862_v21  ;;  %vm16006_vm3 = vmmov %vm16004_vm2 }
 0x74b   : > { %10121 = vmatpush3.msk.msra.mxu1 %vm15987_vm4, %v15862_v21  ;;  %vm16007_vm4 = vcmp.eq.s32.totalorder %v15955_v20, 4294967295 }
 0x74c   : > { %3894 = vmatmul.mubr.f32.gmra.mxu1 %v3687_v7  ;;  %10122 = vmatprep.subr.msk.mxu1 %vm15989_vm5, %v15862_v21  ;;  %v3712_v7 = vld [vmem:[%s15694_s7 + $0x138] sm:$0xff]  ;;  %vm16008_vm5 = vmmov %vm16007_vm4 }
 0x74d   : > { %8013 = vmatprep.mubr.msk.f32.mxu1 %vm3721_vm10, %v3690_v16  ;;  %10123 = vmatpush3.msk.msra.mxu1 %vm15990_vm6, %v15862_v21  ;;  %v4124_v16 = vpop.f32.mrf.mxu0  ;;  %vm16009_vm6 = vcmp.eq.s32.totalorder %v15958_v18, 4294967295 }
 0x74e   : > { %10124 = vmatprep.subr.msk.mxu1 %vm15992_vm7, %v15862_v21  ;;  %vm16011_vm7 = vmmov %vm16009_vm6 }
 0x74f   : > { %10125 = vmatpush3.msk.msra.mxu1 %vm15993_vm8, %v15862_v21  ;;  %vm16012_vm8 = vcmp.eq.s32.totalorder %v15961_v23, 4294967295 }
 0x750   : > { %3899 = vmatmul.mubr.f32.gmra.mxu1 %v3689_v3  ;;  %10156 = vmatprep.subr.msk.mxu1 %vm15994_vm9, %v15862_v21  ;;  %v13365_v3 = vpop.f32.mrf.mxu0  ;;  %vm16013_vm9 = vmmov %vm16012_vm8 }
 0x751   : > { %8014 = vmatprep.mubr.msk.f32.mxu1 %vm3721_vm10, %v3692_v14  ;;  %v3711_v14 = vld [vmem:[%s15694_s7 + $0x130] sm:$0xff] }
 0x754   : > { %3904 = vmatmul.mubr.f32.gmra.mxu1 %v3691_v0  ;;  %v3714_v0 = vld [vmem:[%s15694_s7 + $0x148] sm:$0xff] }
 0x755   : > { %8015 = vmatprep.mubr.msk.f32.mxu1 %vm3721_vm10, %v3694_v58  ;;  %v4129_v58 = vpop.f32.mrf.mxu0 }
 0x758   : > { %3909 = vmatmul.mubr.f32.gmra.mxu1 %v3693_v56  ;;  %v13374_v56 = vpop.f32.mrf.mxu0 }
 0x759   : > { %8016 = vmatprep.mubr.msk.f32.mxu1 %vm3721_vm10, %v3696_v22  ;;  %15995 = vst [vmem:[#allocation26_spill] sm:$0xff] %v13374_v56  ;;  %v3713_v22 = vld [vmem:[%s15694_s7 + $0x140] sm:$0xff] }
 0x75c   : > { %3914 = vmatmul.mubr.f32.gmra.mxu1 %v3695_v50  ;;  %v3716_v50 = vld [vmem:[%s15694_s7 + $0x158] sm:$0xff] }
 0x75d   : > { %8017 = vmatprep.mubr.msk.f32.mxu1 %vm3721_vm10, %v3698_v11  ;;  %v4134_v11 = vpop.f32.mrf.mxu0 }
 0x760   : > { %3919 = vmatmul.mubr.f32.gmra.mxu1 %v3697_v61  ;;  %v13383_v61 = vpop.f32.mrf.mxu0 }
 0x761   : > { %8018 = vmatprep.mubr.msk.f32.mxu1 %vm3721_vm10, %v3700_v42  ;;  %15996 = vst [vmem:[#allocation36_spill] sm:$0xff] %v13383_v61  ;;  %v3715_v42 = vld [vmem:[%s15694_s7 + $0x150] sm:$0xff] }
 0x764   : > { %3924 = vmatmul.mubr.f32.gmra.mxu1 %v3699_v8  ;;  %v3718_v8 = vld [vmem:[%s15694_s7 + $0x168] sm:$0xff] }
 0x765   : > { %8019 = vmatprep.mubr.msk.f32.mxu1 %vm3721_vm10, %v3702_v12  ;;  %v4139_v12 = vpop.f32.mrf.mxu0 }
 0x768   : > { %3929 = vmatmul.mubr.f32.gmra.mxu1 %v3701_v47  ;;  %v13392_v47 = vpop.f32.mrf.mxu0 }
 0x769   : > { %8020 = vmatprep.mubr.msk.f32.mxu1 %vm3721_vm10, %v3704_v49  ;;  %15997 = vst [vmem:[#allocation54_spill] sm:$0xff] %v13392_v47  ;;  %v3717_v49 = vld [vmem:[%s15694_s7 + $0x160] sm:$0xff] }
 0x76c   : > { %3934 = vmatmul.mubr.f32.gmra.mxu1 %v3703_v63  ;;  %v3720_v63 = vld [vmem:[%s15694_s7 + $0x178] sm:$0xff] }
 0x76d   : > { %8021 = vmatprep.mubr.msk.f32.mxu1 %vm3721_vm10, %v3706_v52  ;;  %v4144_v52 = vpop.f32.mrf.mxu0 }
 0x770   : > { %3939 = vmatmul.mubr.f32.gmra.mxu1 %v3705_v9  ;;  %v13401_v9 = vpop.f32.mrf.mxu0 }
 0x771   : > { %8022 = vmatprep.mubr.msk.f32.mxu1 %vm3721_vm10, %v3708_v39  ;;  %15998 = vst [vmem:[#allocation46_spill] sm:$0xff] %v13401_v9  ;;  %v3719_v39 = vld [vmem:[%s15694_s7 + $0x170] sm:$0xff] }
 0x774   : > { %3944 = vmatmul.mubr.f32.gmra.mxu1 %v3707_v36  ;;  %v4149_v36 = vpop.f32.mrf.mxu0 }
 0x775   : > { %8023 = vmatprep.mubr.msk.f32.mxu1 %vm3721_vm10, %v3710_v35 }
 0x776   : > { %v13407_v35 = vpop.f32.mrf.mxu0 }
 0x777   : > { %15999 = vst [vmem:[#allocation27_spill] sm:$0xff] %v13407_v35 }
 0x778   : > { %3949 = vmatmul.mubr.f32.gmra.mxu1 %v3709_v46  ;;  %v4154_v10 = vpop.f32.mrf.mxu0 }
 0x779   : > { %8024 = vmatprep.mubr.msk.f32.mxu1 %vm3721_vm10, %v3712_v7 }
 0x77a   : > { %v13411_v46 = vpop.f32.mrf.mxu0 }
 0x77b   : > { %16000 = vst [vmem:[#allocation37_spill] sm:$0xff] %v13411_v46 }
 0x77c   : > { %3954 = vmatmul.mubr.f32.gmra.mxu1 %v3711_v14  ;;  %v4159_v7 = vpop.f32.mrf.mxu0 }
 0x77d   : > { %8025 = vmatprep.mubr.msk.f32.mxu1 %vm3721_vm10, %v3714_v0 }
 0x77e   : > { %v13427_v16 = vpop.f32.mrf.mxu0 }
 0x77f   : > { %16005 = vst [vmem:[#allocation55_spill] sm:$0xff] %v13427_v16 }
 0x780   : > { %3959 = vmatmul.mubr.f32.gmra.mxu1 %v3713_v22  ;;  %v4164_v14 = vpop.f32.mrf.mxu0 }
 0x781   : > { %8026 = vmatprep.mubr.msk.f32.mxu1 %vm3721_vm10, %v3716_v50 }
 0x782   : > { %v13443_v0 = vpop.f32.mrf.mxu0 }
 0x783   : > { %16010 = vst [vmem:[#allocation47_spill] sm:$0xff] %v13443_v0 }
 0x784   : > { %3964 = vmatmul.mubr.f32.gmra.mxu1 %v3715_v42  ;;  %v4169_v58 = vpop.f32.mrf.mxu0 }
 0x785   : > { %8027 = vmatprep.mubr.msk.f32.mxu1 %vm3721_vm10, %v3718_v8 }
 0x786   : > { %v13459_v22 = vpop.f32.mrf.mxu0 }
 0x787   : > { %16015 = vst [vmem:[#allocation28_spill] sm:$0xff] %v13459_v22 }
 0x788   : > { %3969 = vmatmul.mubr.f32.gmra.mxu1 %v3717_v49  ;;  %v4174_v50 = vpop.f32.mrf.mxu0 }
 0x789   : > { %8028 = vmatprep.mubr.msk.f32.mxu1 %vm3721_vm10, %v3720_v63 }
 0x78a   : > { %v13475_v11 = vpop.f32.mrf.mxu0 }
 0x78b   : > { %16020 = vst [vmem:[#allocation38_spill] sm:$0xff] %v13475_v11 }
 0x78c   : > { %3974 = vmatmul.mubr.f32.gmra.mxu1 %v3719_v39  ;;  %v4179_v42 = vpop.f32.mrf.mxu0 }
 0x78d   : > { %10126 = vmatprep.mubr.f32.mxu1 %v12756_v1 }
 0x78e   : > { %v13491_v8 = vpop.f32.mrf.mxu0 }
 0x78f   : > { %16025 = vst [vmem:[#allocation57_spill] sm:$0xff] %v13491_v8 }
 0x790   : > { %10127 = vmatmul.mubr.f32.vlgmr.msra.gmra.mxu1 %v12763_v4  ;;  %v4184_v12 = vpop.f32.mrf.mxu0 }
 0x791   : > { %10129 = vmatprep.mubr.f32.mxu1 %v12773_v45  ;;  %10157 = vmatpush3.msk.msra.mxu1 %vm16001_vm11, %v15862_v21  ;;  %vm16014_vm11 = vcmp.eq.s32.totalorder %v15964_v54, 4294967295 }
 0x792   : > { %10158 = vmatprep.subr.msk.mxu1 %vm16002_vm12, %v15862_v21  ;;  %vm16016_vm12 = vmmov %vm16014_vm11  ;;  %v13507_v49 = vpop.f32.mrf.mxu0 }
 0x793   : > { %10159 = vmatpush3.msk.msra.mxu1 %vm16003_vm13, %v15862_v21  ;;  %vm16017_vm13 = vcmp.eq.s32.totalorder %v15967_v55, 4294967295  ;;  %16030 = vst [vmem:[#allocation48_spill] sm:$0xff] %v13507_v49 }
 0x794   : > { %10130 = vmatmul.mubr.f32.gmra.mxu1 %v12781_v29  ;;  %10160 = vmatprep.subr.msk.mxu1 %vm16004_vm2, %v15862_v21  ;;  %vm16018_vm2 = vmmov %vm16017_vm13  ;;  %v4189_v63 = vpop.f32.mrf.mxu0 }
 0x795   : > { %10132 = vmatprep.mubr.f32.mxu1 %v12793_v43  ;;  %10161 = vmatpush3.msk.msra.mxu1 %vm16006_vm3, %v15862_v21  ;;  %vm16019_vm3 = vcmp.eq.s32.totalorder %v15970_v40, 4294967295 }
 0x796   : > { %10162 = vmatprep.subr.msk.mxu1 %vm16007_vm4, %v15862_v21  ;;  %vm16021_vm4 = vmmov %vm16019_vm3  ;;  %v13523_v52 = vpop.f32.mrf.mxu0 }
 0x797   : > { %10163 = vmatpush3.msk.msra.mxu1 %vm16008_vm5, %v15862_v21  ;;  %vm16022_vm5 = vcmp.eq.s32.totalorder %v15973_v31, 4294967295  ;;  %16035 = vst [vmem:[#allocation29_spill] sm:$0xff] %v13523_v52 }
 0x798   : > { %10133 = vmatmul.mubr.f32.gmra.mxu1 %v12799_v30  ;;  %10164 = vmatprep.subr.msk.mxu1 %vm16009_vm6, %v15862_v21  ;;  %vm16023_vm6 = vmmov %vm16022_vm5  ;;  %v4194_v39 = vpop.f32.mrf.mxu0 }
 0x799   : > { %10135 = vmatprep.mubr.f32.mxu1 %v12810_v51  ;;  %10165 = vmatpush3.msk.msra.mxu1 %vm16011_vm7, %v15862_v21  ;;  %vm16024_vm7 = vcmp.eq.s32.totalorder %v15976_v33, 4294967295 }
 0x79a   : > { %10166 = vmatprep.subr.msk.mxu1 %vm16012_vm8, %v15862_v21  ;;  %vm16026_vm8 = vmmov %vm16024_vm7  ;;  %v13536_v36 = vpop.f32.mrf.mxu0 }
 0x79b   : > { %10167 = vmatpush3.msk.msra.mxu1 %vm16013_vm9, %v15862_v21  ;;  %vm16027_vm9 = vcmp.eq.s32.totalorder %v15979_v38, 4294967295  ;;  %16039 = vst [vmem:[#allocation39_spill] sm:$0xff] %v13536_v36 }
 0x79c   : > { %10136 = vmatmul.mubr.f32.gmra.mxu1 %v12816_v6  ;;  %10168 = vmatprep.subr.msk.mxu1 %vm16014_vm11, %v15862_v21  ;;  %vm16028_vm11 = vmmov %vm16027_vm9  ;;  %v4199_v10 = vpop.f32.mrf.mxu0 }
 0x79d   : > { %10138 = vmatprep.mubr.f32.mxu1 %v12827_v5  ;;  %10169 = vmatpush3.msk.msra.mxu1 %vm16016_vm12, %v15862_v21  ;;  %vm16029_vm12 = vcmp.eq.s32.totalorder %v15982_v19, 4294967295 }
 0x79e   : > { %10170 = vmatprep.subr.msk.mxu1 %vm16017_vm13, %v15862_v21  ;;  %vm16031_vm13 = vmmov %vm16029_vm12  ;;  %v13541_v7 = vpop.f32.mrf.mxu0 }
 0x79f   : > { %10171 = vmatpush3.msk.msra.mxu1 %vm16018_vm2, %v15862_v21  ;;  %vm16032_vm2 = vcmp.eq.s32.totalorder %v15985_v28, 4294967295  ;;  %16040 = vst [vmem:[#allocation58_spill] sm:$0xff] %v13541_v7 }
 0x7a0   : > { %10139 = vmatmul.mubr.f32.gmra.mxu1 %v12832_v44  ;;  %10172 = vmatprep.subr.msk.mxu1 %vm16019_vm3, %v15862_v21  ;;  %vm16033_vm3 = vmmov %vm16032_vm2  ;;  %v4204_v14 = vpop.f32.mrf.mxu0 }
 0x7a1   : > { %10141 = vmatprep.mubr.f32.mxu1 %v12842_v37  ;;  %10173 = vmatpush3.msk.msra.mxu1 %vm16021_vm4, %v15862_v21  ;;  %vm16034_vm4 = vcmp.eq.s32.totalorder %v15988_v62, 4294967295 }
 0x7a2   : > { %10174 = vmatprep.subr.msk.mxu1 %vm16022_vm5, %v15862_v21  ;;  %vm16036_vm5 = vmmov %vm16034_vm4  ;;  %v13545_v58 = vpop.f32.mrf.mxu0 }
 0x7a3   : > { %10175 = vmatpush3.msk.msra.mxu1 %vm16023_vm6, %v15862_v21  ;;  %vm16037_vm6 = vcmp.eq.s32.totalorder %v15991_v25, 4294967295  ;;  %16041 = vst [vmem:[#allocation22_spill] sm:$0xff] %v13545_v58 }
 0x7a4   : > { %10142 = vmatmul.mubr.f32.gmra.mxu1 %v12847_v53  ;;  %10176 = vmatprep.subr.msk.mxu1 %vm16024_vm7, %v15862_v21  ;;  %vm16038_vm7 = vmmov %vm16037_vm6  ;;  %v4209_v50 = vpop.f32.mrf.mxu0 }
 0x7a5   : > { %10144 = vmatprep.mubr.f32.mxu1 %v12854_v32  ;;  %10177 = vmatpush3.msk.msra.mxu1 %vm16026_vm8, %v15862_v21  ;;  %vm16068_vm8 = vcmp.eq.s32.totalorder %v10839_v48, 1 }
 0x7a6   : > { %10178 = vmatprep.subr.msk.mxu1 %vm16027_vm9, %v15862_v21  ;;  %v13549_v42 = vpop.f32.mrf.mxu0  ;;  %vm16069_vm9 = vmmov %vm16068_vm8 }
 0x7a7   : > { %10179 = vmatpush3.msk.msra.mxu1 %vm16028_vm11, %v15862_v21  ;;  %16042 = vst [vmem:[#allocation49_spill] sm:$0xff] %v13549_v42  ;;  %vm16070_vm11 = vcmp.eq.s32.totalorder %v15949_v57, 1 }
 0x7a8   : > { %10145 = vmatmul.mubr.f32.gmra.mxu1 %v12859_v27  ;;  %10180 = vmatprep.subr.msk.mxu1 %vm16029_vm12, %v15862_v21  ;;  %v4214_v12 = vpop.f32.mrf.mxu0  ;;  %vm16071_vm12 = vmmov %vm16070_vm11 }
 0x7a9   : > { %10147 = vmatprep.mubr.f32.mxu1 %v12867_v17  ;;  %10181 = vmatpush3.msk.msra.mxu1 %vm16031_vm13, %v15862_v21  ;;  %vm16072_vm13 = vcmp.eq.s32.totalorder %v15952_v15, 1 }
 0x7aa   : > { %10182 = vmatprep.subr.msk.mxu1 %vm16032_vm2, %v15862_v21  ;;  %v13553_v63 = vpop.f32.mrf.mxu0  ;;  %vm16073_vm2 = vmmov %vm16072_vm13 }
 0x7ab   : > { %10183 = vmatpush3.msk.msra.mxu1 %vm16033_vm3, %v15862_v21  ;;  %16043 = vst [vmem:[#allocation30_spill] sm:$0xff] %v13553_v63  ;;  %vm16074_vm3 = vcmp.eq.s32.totalorder %v15955_v20, 1 }
 0x7ac   : > { %10148 = vmatmul.mubr.f32.gmra.mxu1 %v12862_v60  ;;  %10184 = vmatprep.subr.msk.mxu1 %vm16034_vm4, %v15862_v21  ;;  %v4219_v39 = vpop.f32.mrf.mxu0  ;;  %vm16075_vm4 = vmmov %vm16074_vm3 }
 0x7ad   : > { %10150 = vmatprep.mubr.f32.mxu1 %v12876_v26  ;;  %10185 = vmatpush3.msk.msra.mxu1 %vm16036_vm5, %v15862_v21  ;;  %vm16076_vm5 = vcmp.eq.s32.totalorder %v15958_v18, 1 }
 0x7ae   : > { %10186 = vmatprep.subr.msk.mxu1 %vm16037_vm6, %v15862_v21  ;;  %v13557_v10 = vpop.f32.mrf.mxu0  ;;  %vm16077_vm6 = vmmov %vm16076_vm5 }
 0x7af   : > { %10187 = vmatpush3.msk.msra.mxu1 %vm16038_vm7, %v15862_v21  ;;  %16044 = vst [vmem:[#allocation40_spill] sm:$0xff] %v13557_v10  ;;  %vm16078_vm7 = vcmp.eq.s32.totalorder %v15961_v23, 1 }
 0x7b0   : > { %10151 = vmatmul.mubr.f32.gmra.mxu1 %v12880_v59  ;;  %5017 = vmatprep.subr.mxu1 %v15901_v13  ;;  %v4224_v14 = vpop.f32.mrf.mxu0 }
 0x7b1   : > { %10153 = vmatprep.mubr.f32.mxu1 %v12888_v2 }
 0x7b2   : > { %v13561_v50 = vpop.f32.mrf.mxu0 }
 0x7b3   : > { %16045 = vst [vmem:[#allocation59_spill] sm:$0xff] %v13561_v50 }
 0x7b4   : > { %10154 = vmatmul.mubr.f32.gmra.mxu1 %v12892_v24  ;;  %v4229_v12 = vpop.f32.mrf.mxu0 }
 0x7b5   : > { %10188 = vmatprep.mubr.f32.mxu1 %v12756_v1 }
 0x7b6   : > { %v13565_v63 = vpop.f32.mrf.mxu0 }
 0x7b7   : > { %16046 = vst [vmem:[#allocation50_spill] sm:$0xff] %v13565_v63 }
 0x7b8   : > { %10189 = vmatmul.mubr.f32.vlgmr.msra.gmra.mxu1 %v12763_v4  ;;  %v4234_v39 = vpop.f32.mrf.mxu0 }
 0x7b9   : > { %10191 = vmatprep.mubr.f32.mxu1 %v12773_v45 }
 0x7bc   : > { %10192 = vmatmul.mubr.f32.gmra.mxu1 %v12781_v29 }
 0x7bd   : > { %10194 = vmatprep.mubr.f32.mxu1 %v12793_v43 }
 0x7c0   : > { %10195 = vmatmul.mubr.f32.gmra.mxu1 %v12799_v30 }
 0x7c1   : > { %10197 = vmatprep.mubr.f32.mxu1 %v12810_v51 }
 0x7c4   : > { %10198 = vmatmul.mubr.f32.gmra.mxu1 %v12816_v6 }
 0x7c5   : > { %10200 = vmatprep.mubr.f32.mxu1 %v12827_v5 }
 0x7c8   : > { %10201 = vmatmul.mubr.f32.gmra.mxu1 %v12832_v44 }
 0x7c9   : > { %10203 = vmatprep.mubr.f32.mxu1 %v12842_v37 }
 0x7cc   : > { %10204 = vmatmul.mubr.f32.gmra.mxu1 %v12847_v53 }
 0x7cd   : > { %10206 = vmatprep.mubr.f32.mxu1 %v12854_v32 }
 0x7d0   : > { %10207 = vmatmul.mubr.f32.gmra.mxu1 %v12859_v27 }
 0x7d1   : > { %10209 = vmatprep.mubr.f32.mxu1 %v12867_v17 }
 0x7d4   : > { %10210 = vmatmul.mubr.f32.gmra.mxu1 %v12862_v60 }
 0x7d5   : > { %10212 = vmatprep.mubr.f32.mxu1 %v12876_v26 }
 0x7d8   : > { %10213 = vmatmul.mubr.f32.gmra.mxu1 %v12880_v59 }
 0x7d9   : > { %10215 = vmatprep.mubr.f32.mxu1 %v12888_v2 }
 0x7dc   : > { %10216 = vmatmul.mubr.f32.gmra.mxu1 %v12892_v24 }
 0x7f0   : > { %v13575_v14 = vpop.f32.mrf.mxu1 }
 0x7f2   : > { %v3862_v12 = vpop.f32.mrf.mxu1 }
 0x7f4   : > { %v13577_v63 = vpop.f32.mrf.mxu1 }
 0x7f6   : > { %v3867_v39 = vpop.f32.mrf.mxu1 }
 0x7f8   : > { %v13579_v50 = vpop.f32.mrf.mxu1 }
 0x7fa   : > { %v3872_v10 = vpop.f32.mrf.mxu1 }
 0x7fb   : > { %v8070_v10 = vld [vmem:[%s15694_s7 + $0x188] sm:$0xff] }
 0x7fc   : > { %v13581_v42 = vpop.f32.mrf.mxu1  ;;  %8117 = vmatprep.mubr.msk.f32.mxu0 %vm3721_vm10, %v8070_v10 }
 0x7fd   : > { %16047 = vst [vmem:[#allocation31_spill] sm:$0xff] %v13581_v42 }
 0x7fe   : > { %v3877_v58 = vpop.f32.mrf.mxu1 }
 0x800   : > { %v13583_v7 = vpop.f32.mrf.mxu1 }
 0x801   : > { %16048 = vst [vmem:[#allocation41_spill] sm:$0xff] %v13583_v7 }
 0x802   : > { %v3882_v36 = vpop.f32.mrf.mxu1 }
 0x804   : > { %v13585_v52 = vpop.f32.mrf.mxu1 }
 0x805   : > { %16049 = vst [vmem:[#allocation60_spill] sm:$0xff] %v13585_v52 }
 0x806   : > { %v3887_v49 = vpop.f32.mrf.mxu1 }
 0x808   : > { %v13587_v8 = vpop.f32.mrf.mxu1 }
 0x809   : > { %16050 = vst [vmem:[#allocation51_spill] sm:$0xff] %v13587_v8 }
 0x80a   : > { %v3892_v11 = vpop.f32.mrf.mxu1 }
 0x80c   : > { %v13589_v22 = vpop.f32.mrf.mxu1 }
 0x80d   : > { %16051 = vst [vmem:[#allocation32_spill] sm:$0xff] %v13589_v22 }
 0x80e   : > { %v3897_v12 = vpop.f32.mrf.mxu1 }
 0x810   : > { %v13591_v0 = vpop.f32.mrf.mxu1 }
 0x811   : > { %16052 = vst [vmem:[#allocation42_spill] sm:$0xff] %v13591_v0 }
 0x812   : > { %v3902_v39 = vpop.f32.mrf.mxu1 }
 0x814   : > { %v13597_v58 = vpop.f32.mrf.mxu1 }
 0x815   : > { %16053 = vst [vmem:[#allocation62_spill] sm:$0xff] %v13597_v58 }
 0x816   : > { %v3907_v36 = vpop.f32.mrf.mxu1 }
 0x818   : > { %v13599_v16 = vpop.f32.mrf.mxu1 }
 0x819   : > { %16054 = vst [vmem:[#allocation52_spill] sm:$0xff] %v13599_v16 }
 0x81a   : > { %v3912_v49 = vpop.f32.mrf.mxu1 }
 0x81c   : > { %v13601_v46 = vpop.f32.mrf.mxu1 }
 0x81d   : > { %16055 = vst [vmem:[#allocation33_spill] sm:$0xff] %v13601_v46 }
 0x81e   : > { %v3917_v11 = vpop.f32.mrf.mxu1 }
 0x820   : > { %v13603_v35 = vpop.f32.mrf.mxu1 }
 0x821   : > { %16056 = vst [vmem:[#allocation43_spill] sm:$0xff] %v13603_v35 }
 0x822   : > { %v3922_v12 = vpop.f32.mrf.mxu1 }
 0x823   : > { %v8158_v12 = vld [vmem:[%s15694_s7 + $0x308] sm:$0xff] }
 0x824   : > { %v13605_v0 = vpop.f32.mrf.mxu1  ;;  %8205 = vmatprep.mubr.msk.f32.mxu1 %vm3721_vm10, %v8158_v12 }
 0x825   : > { %16057 = vst [vmem:[#allocation53_spill] sm:$0xff] %v13605_v0 }
 0x826   : > { %v3927_v39 = vpop.f32.mrf.mxu1 }
 0x828   : > { %v13607_v22 = vpop.f32.mrf.mxu1 }
 0x829   : > { %16058 = vst [vmem:[#allocation34_spill] sm:$0xff] %v13607_v22 }
 0x82a   : > { %v3932_v9 = vpop.f32.mrf.mxu1 }
 0x82c   : > { %v13609_v8 = vpop.f32.mrf.mxu1 }
 0x82d   : > { %16059 = vst [vmem:[#allocation44_spill] sm:$0xff] %v13609_v8 }
 0x82e   : > { %v3937_v10 = vpop.f32.mrf.mxu1 }
 0x830   : > { %v13611_v58 = vpop.f32.mrf.mxu1 }
 0x831   : > { %16060 = vst [vmem:[#allocation56_spill] sm:$0xff] %v13611_v58 }
 0x832   : > { %v3942_v36 = vpop.f32.mrf.mxu1 }
 0x834   : > { %v13613_v16 = vpop.f32.mrf.mxu1 }
 0x835   : > { %16061 = vst [vmem:[#allocation7_spill] sm:$0xff] %v13613_v16 }
 0x836   : > { %v3947_v49 = vpop.f32.mrf.mxu1 }
 0x838   : > { %v13615_v46 = vpop.f32.mrf.mxu1 }
 0x839   : > { %16062 = vst [vmem:[#allocation8_spill] sm:$0xff] %v13615_v46 }
 0x83a   : > { %v3952_v11 = vpop.f32.mrf.mxu1 }
 0x83c   : > { %v13621_v39 = vpop.f32.mrf.mxu1 }
 0x83d   : > { %16063 = vst [vmem:[#allocation9_spill] sm:$0xff] %v13621_v39 }
 0x83e   : > { %v3957_v9 = vpop.f32.mrf.mxu1 }
 0x840   : > { %v13623_v8 = vpop.f32.mrf.mxu1 }
 0x841   : > { %16064 = vst [vmem:[#allocation10_spill] sm:$0xff] %v13623_v8 }
 0x842   : > { %v3962_v10 = vpop.f32.mrf.mxu1 }
 0x844   : > { %v13625_v58 = vpop.f32.mrf.mxu1 }
 0x845   : > { %16065 = vst [vmem:[#allocation11_spill] sm:$0xff] %v13625_v58 }
 0x846   : > { %v3967_v36 = vpop.f32.mrf.mxu1 }
 0x848   : > { %v13627_v16 = vpop.f32.mrf.mxu1 }
 0x849   : > { %16066 = vst [vmem:[#allocation12_spill] sm:$0xff] %v13627_v16 }
 0x84a   : > { %v3972_v49 = vpop.f32.mrf.mxu1 }
 0x84c   : > { %v13629_v46 = vpop.f32.mrf.mxu1 }
 0x84d   : > { %16067 = vst [vmem:[#allocation13_spill] sm:$0xff] %v13629_v46 }
 0x84e   : > { %v3977_v11 = vpop.f32.mrf.mxu1 }
 0x850   : > { %v10128_v22 = vpop.f32.mrf.mxu1 }
 0x852   : > { %v4302_v0 = vpop.f32.mrf.mxu1 }
 0x854   : > { %v10131_v35 = vpop.f32.mrf.mxu1 }
 0x856   : > { %v4312_v47 = vpop.f32.mrf.mxu1 }
 0x858   : > { %v10134_v12 = vpop.f32.mrf.mxu1 }
 0x85a   : > { %v4322_v52 = vpop.f32.mrf.mxu1 }
 0x85c   : > { %v10137_v39 = vpop.f32.mrf.mxu1 }
 0x85e   : > { %v4332_v9 = vpop.f32.mrf.mxu1 }
 0x860   : > { %v10140_v61 = vpop.f32.mrf.mxu1 }
 0x862   : > { %v4342_v8 = vpop.f32.mrf.mxu1 }
 0x864   : > { %v10143_v10 = vpop.f32.mrf.mxu1 }
 0x866   : > { %v4352_v7 = vpop.f32.mrf.mxu1 }
 0x868   : > { %v10146_v58 = vpop.f32.mrf.mxu1 }
 0x86a   : > { %v4362_v36 = vpop.f32.mrf.mxu1 }
 0x86c   : > { %v10149_v56 = vpop.f32.mrf.mxu1 }
 0x86d   : > { %4523 = vmatpush1.msra.mxu0 %v10149_v56 }
 0x86e   : > { %v4372_v49 = vpop.f32.mrf.mxu1  ;;  %4524 = vmatprep.subr.mxu0 %v15901_v13 }
 0x86f   : > { %4525 = vmatpush1.msra.mxu0 %v4372_v49 }
 0x870   : > { %v10152_v11 = vpop.f32.mrf.mxu1  ;;  %4526 = vmatprep.subr.mxu0 %v15901_v13 }
 0x871   : > { %4527 = vmatpush1.msra.mxu0 %v10146_v58 }
 0x872   : > { %v4382_v46 = vpop.f32.mrf.mxu1  ;;  %4528 = vmatprep.subr.mxu0 %v15901_v13 }
 0x873   : > { %4529 = vmatpush1.msra.mxu0 %v4362_v36 }
 0x874   : > { %v10155_v16 = vpop.f32.mrf.mxu1  ;;  %4530 = vmatprep.subr.mxu0 %v15901_v13 }
 0x875   : > { %4531 = vmatpush1.msra.mxu0 %v10143_v10 }
 0x876   : > { %v4392_v42 = vpop.f32.mrf.mxu1  ;;  %4532 = vmatprep.subr.mxu0 %v15901_v13 }
 0x877   : > { %4533 = vmatpush1.msra.mxu0 %v4352_v7 }
 0x878   : > { %4534 = vmatprep.subr.mxu0 %v15901_v13  ;;  %v13637_v56 = vpop.f32.mrf.mxu1 }
 0x879   : > { %4535 = vmatpush1.msra.mxu0 %v10140_v61 }
 0x87a   : > { %4536 = vmatprep.subr.mxu0 %v15901_v13  ;;  %v13640_v58 = vpop.f32.mrf.mxu1 }
 0x87b   : > { %4537 = vmatpush1.msra.mxu0 %v4342_v8 }
 0x87c   : > { %4538 = vmatprep.subr.mxu0 %v15901_v13  ;;  %v13643_v36 = vpop.f32.mrf.mxu1 }
 0x87d   : > { %4539 = vmatpush1.msra.mxu0 %v10137_v39 }
 0x87e   : > { %4540 = vmatprep.subr.mxu0 %v15901_v13  ;;  %v13646_v10 = vpop.f32.mrf.mxu1 }
 0x87f   : > { %4541 = vmatpush1.msra.mxu0 %v4332_v9 }
 0x880   : > { %4542 = vmatprep.subr.mxu0 %v15901_v13  ;;  %v13649_v7 = vpop.f32.mrf.mxu1 }
 0x881   : > { %4543 = vmatpush1.msra.mxu0 %v10134_v12 }
 0x882   : > { %4544 = vmatprep.subr.mxu0 %v15901_v13  ;;  %v13652_v61 = vpop.f32.mrf.mxu1 }
 0x883   : > { %4545 = vmatpush1.msra.mxu0 %v4322_v52 }
 0x884   : > { %4546 = vmatprep.subr.mxu0 %v15901_v13  ;;  %v13655_v8 = vpop.f32.mrf.mxu1 }
 0x885   : > { %4547 = vmatpush1.msra.mxu0 %v10131_v35 }
 0x886   : > { %4548 = vmatprep.subr.mxu0 %v15901_v13  ;;  %v13658_v39 = vpop.f32.mrf.mxu1 }
 0x887   : > { %4549 = vmatpush1.msra.mxu0 %v4312_v47  ;;  %v8069_v47 = vld [vmem:[%s15694_s7 + $0x180] sm:$0xff] }
 0x888   : > { %4550 = vmatprep.subr.mxu0 %v15901_v13  ;;  %v10202_v9 = vpop.f32.mrf.mxu1 }
 0x889   : > { %4551 = vmatpush1.msra.mxu0 %v10128_v22 }
 0x88a   : > { %4552 = vmatprep.subr.mxu0 %v15901_v13  ;;  %v4837_v12 = vpop.f32.mrf.mxu1 }
 0x88b   : > { %4553 = vmatpush1.msra.mxu0 %v4302_v0  ;;  %v8072_v0 = vld [vmem:[%s15694_s7 + $0x198] sm:$0xff] }
 0x88c   : > { %4578 = vmatprep.subr.mxu0 %v15901_v13  ;;  %v10205_v52 = vpop.f32.mrf.mxu1 }
 0x88d   : > { %4579 = vmatpush2.msra.mxu0 %v10155_v16 }
 0x88e   : > { %4580 = vmatprep.subr.mxu0 %v15901_v13  ;;  %v4847_v35 = vpop.f32.mrf.mxu1 }
 0x88f   : > { %4581 = vmatpush2.msra.mxu0 %v4392_v42  ;;  %v8071_v42 = vld [vmem:[%s15694_s7 + $0x190] sm:$0xff] }
 0x890   : > { %4582 = vmatprep.subr.mxu0 %v15901_v13  ;;  %v10208_v49 = vpop.f32.mrf.mxu1 }
 0x891   : > { %4583 = vmatpush2.msra.mxu0 %v10152_v11 }
 0x892   : > { %4584 = vmatprep.subr.mxu0 %v15901_v13  ;;  %v4857_v22 = vpop.f32.mrf.mxu1 }
 0x893   : > { %4585 = vmatpush2.msra.mxu0 %v4382_v46  ;;  %v8074_v46 = vld [vmem:[%s15694_s7 + $0x1a8] sm:$0xff] }
 0x894   : > { %4587 = vmatmul.mubr.f32.vlgmr.msra.gmra.mxu0 %v8069_v47  ;;  %v10211_v16 = vpop.f32.mrf.mxu1  ;;  %10218 = vmatprep.subr.msk.mxu0 %vm16068_vm8, %v15862_v21  ;;  %v8073_v47 = vld [vmem:[%s15694_s7 + $0x1a0] sm:$0xff]  ;;  %vm16079_vm8 = vmmov %vm16078_vm7 }
 0x895   : > { %5018 = vmatpush1.msra.mxu1 %v10211_v16  ;;  %8118 = vmatprep.mubr.msk.f32.mxu0 %vm3721_vm10, %v8072_v0  ;;  %v8076_v0 = vld [vmem:[%s15694_s7 + $0x1b8] sm:$0xff] }
 0x896   : > { %v4867_v11 = vpop.f32.mrf.mxu1  ;;  %5019 = vmatprep.subr.mxu1 %v15901_v13  ;;  %10219 = vmatpush3.msk.msra.mxu0 %vm16069_vm9, %v15862_v21  ;;  %vm16080_vm9 = vcmp.eq.s32.totalorder %v15964_v54, 1 }
 0x897   : > { %5020 = vmatpush1.msra.mxu1 %v4867_v11  ;;  %10220 = vmatprep.subr.msk.mxu0 %vm16070_vm11, %v15862_v21  ;;  %vm16081_vm11 = vmmov %vm16080_vm9 }
 0x898   : > { %4592 = vmatmul.mubr.f32.gmra.mxu0 %v8071_v42  ;;  %5021 = vmatprep.subr.mxu1 %v15901_v13  ;;  %v10214_v16 = vpop.f32.mrf.mxu1 }
 0x899   : > { %5022 = vmatpush1.msra.mxu1 %v10208_v49  ;;  %8119 = vmatprep.mubr.msk.f32.mxu0 %vm3721_vm10, %v8074_v46  ;;  %v8075_v49 = vld [vmem:[%s15694_s7 + $0x1b0] sm:$0xff] }
 0x89a   : > { %5023 = vmatprep.subr.mxu1 %v15901_v13  ;;  %10221 = vmatpush3.msk.msra.mxu0 %vm16071_vm12, %v15862_v21  ;;  %v4877_v42 = vpop.f32.mrf.mxu1  ;;  %vm16082_vm12 = vcmp.eq.s32.totalorder %v15967_v55, 1 }
 0x89b   : > { %5024 = vmatpush1.msra.mxu1 %v4857_v22  ;;  %10222 = vmatprep.subr.msk.mxu0 %vm16072_vm13, %v15862_v21  ;;  %v8078_v22 = vld [vmem:[%s15694_s7 + $0x1c8] sm:$0xff]  ;;  %vm16083_vm13 = vmmov %vm16082_vm12 }
 0x89c   : > { %4597 = vmatmul.mubr.f32.gmra.mxu0 %v8073_v47  ;;  %5025 = vmatprep.subr.mxu1 %v15901_v13  ;;  %v10217_v11 = vpop.f32.mrf.mxu1  ;;  %v8089_v47 = vld [vmem:[%s15694_s7 + $0x220] sm:$0xff] }
 0x89d   : > { %5026 = vmatpush1.msra.mxu1 %v10205_v52  ;;  %8120 = vmatprep.mubr.msk.f32.mxu0 %vm3721_vm10, %v8076_v0  ;;  %v8077_v52 = vld [vmem:[%s15694_s7 + $0x1c0] sm:$0xff] }
 0x89e   : > { %5027 = vmatprep.subr.mxu1 %v15901_v13  ;;  %10223 = vmatpush3.msk.msra.mxu0 %vm16073_vm2, %v15862_v21  ;;  %vm16084_vm2 = vcmp.eq.s32.totalorder %v15970_v40, 1  ;;  %v4887_v46 = vpop.f32.mrf.mxu1  ;;  %v8157_v0 = vld [vmem:[%s15694_s7 + $0x300] sm:$0xff] }
 0x89f   : > { %5028 = vmatpush1.msra.mxu1 %v4847_v35  ;;  %10224 = vmatprep.subr.msk.mxu0 %vm16074_vm3, %v15862_v21  ;;  %v8080_v35 = vld [vmem:[%s15694_s7 + $0x1d8] sm:$0xff]  ;;  %vm16085_vm3 = vmmov %vm16084_vm2 }
 0x8a0   : > { %4602 = vmatmul.mubr.f32.gmra.mxu0 %v8075_v49  ;;  %5029 = vmatprep.subr.mxu1 %v15901_v13  ;;  %v8092_v49 = vld [vmem:[%s15694_s7 + $0x238] sm:$0xff] }
 0x8a1   : > { %5030 = vmatpush1.msra.mxu1 %v10202_v9  ;;  %8121 = vmatprep.mubr.msk.f32.mxu0 %vm3721_vm10, %v8078_v22  ;;  %v8079_v9 = vld [vmem:[%s15694_s7 + $0x1d0] sm:$0xff]  ;;  %v8160_v22 = vld [vmem:[%s15694_s7 + $0x318] sm:$0xff] }
 0x8a2   : > { %5031 = vmatprep.subr.mxu1 %v15901_v13  ;;  %10225 = vmatpush3.msk.msra.mxu0 %vm16075_vm4, %v15862_v21  ;;  %vm16086_vm4 = vcmp.eq.s32.totalorder %v15973_v31, 1 }
 0x8a3   : > { %5032 = vmatpush1.msra.mxu1 %v4837_v12  ;;  %10226 = vmatprep.subr.msk.mxu0 %vm16076_vm5, %v15862_v21  ;;  %v8082_v12 = vld [vmem:[%s15694_s7 + $0x1e8] sm:$0xff]  ;;  %vm16087_vm5 = vmmov %vm16086_vm4 }
 0x8a4   : > { %4607 = vmatmul.mubr.f32.gmra.mxu0 %v8077_v52  ;;  %5033 = vmatprep.subr.mxu1 %v15901_v13  ;;  %v8091_v52 = vld [vmem:[%s15694_s7 + $0x230] sm:$0xff] }
 0x8a5   : > { %5034 = vmatpush1.msra.mxu1 %v13655_v8  ;;  %8122 = vmatprep.mubr.msk.f32.mxu0 %vm3721_vm10, %v8080_v35  ;;  %v8081_v8 = vld [vmem:[%s15694_s7 + $0x1e0] sm:$0xff]  ;;  %v8159_v35 = vld [vmem:[%s15694_s7 + $0x310] sm:$0xff] }
 0x8a6   : > { %5035 = vmatprep.subr.mxu1 %v15901_v13  ;;  %10227 = vmatpush3.msk.msra.mxu0 %vm16077_vm6, %v15862_v21  ;;  %vm16088_vm6 = vcmp.eq.s32.totalorder %v15976_v33, 1 }
 0x8a7   : > { %5036 = vmatpush1.msra.mxu1 %v13658_v39  ;;  %10228 = vmatprep.subr.msk.mxu0 %vm16078_vm7, %v15862_v21  ;;  %v8084_v39 = vld [vmem:[%s15694_s7 + $0x1f8] sm:$0xff]  ;;  %vm16089_vm7 = vmmov %vm16088_vm6 }
 0x8a8   : > { %4612 = vmatmul.mubr.f32.gmra.mxu0 %v8079_v9  ;;  %5037 = vmatprep.subr.mxu1 %v15901_v13  ;;  %v8094_v9 = vld [vmem:[%s15694_s7 + $0x248] sm:$0xff] }
 0x8a9   : > { %5038 = vmatpush1.msra.mxu1 %v13649_v7  ;;  %8123 = vmatprep.mubr.msk.f32.mxu0 %vm3721_vm10, %v8082_v12  ;;  %v8083_v7 = vld [vmem:[%s15694_s7 + $0x1f0] sm:$0xff]  ;;  %v8162_v12 = vld [vmem:[%s15694_s7 + $0x328] sm:$0xff] }
 0x8aa   : > { %5039 = vmatprep.subr.mxu1 %v15901_v13  ;;  %10229 = vmatpush3.msk.msra.mxu0 %vm16079_vm8, %v15862_v21  ;;  %vm16090_vm8 = vcmp.eq.s32.totalorder %v10839_v48, 2 }
 0x8ab   : > { %5040 = vmatpush1.msra.mxu1 %v13652_v61  ;;  %10230 = vmatprep.subr.msk.mxu0 %vm16080_vm9, %v15862_v21  ;;  %v8086_v61 = vld [vmem:[%s15694_s7 + $0x208] sm:$0xff]  ;;  %vm16091_vm9 = vcmp.eq.s32.totalorder %v15979_v38, 1 }
 0x8ac   : > { %4617 = vmatmul.mubr.f32.gmra.mxu0 %v8081_v8  ;;  %5041 = vmatprep.subr.mxu1 %v15901_v13  ;;  %v8093_v8 = vld [vmem:[%s15694_s7 + $0x240] sm:$0xff] }
 0x8ad   : > { %5042 = vmatpush1.msra.mxu1 %v13643_v36  ;;  %8124 = vmatprep.mubr.msk.f32.mxu0 %vm3721_vm10, %v8084_v39  ;;  %v8085_v36 = vld [vmem:[%s15694_s7 + $0x200] sm:$0xff]  ;;  %v8096_v39 = vld [vmem:[%s15694_s7 + $0x258] sm:$0xff] }
 0x8ae   : > { %5043 = vmatprep.subr.mxu1 %v15901_v13  ;;  %10231 = vmatpush3.msk.msra.mxu0 %vm16081_vm11, %v15862_v21  ;;  %vm16092_vm11 = vmmov %vm16090_vm8 }
 0x8af   : > { %5044 = vmatpush1.msra.mxu1 %v13646_v10  ;;  %10232 = vmatprep.subr.msk.mxu0 %vm16082_vm12, %v15862_v21  ;;  %v8088_v10 = vld [vmem:[%s15694_s7 + $0x218] sm:$0xff]  ;;  %vm16093_vm12 = vmmov %vm16091_vm9 }
 0x8b0   : > { %4622 = vmatmul.mubr.f32.gmra.mxu0 %v8083_v7  ;;  %5045 = vmatprep.subr.mxu1 %v15901_v13  ;;  %v8164_v7 = vld [vmem:[%s15694_s7 + $0x338] sm:$0xff] }
 0x8b1   : > { %5046 = vmatpush1.msra.mxu1 %v13637_v56  ;;  %8125 = vmatprep.mubr.msk.f32.mxu0 %vm3721_vm10, %v8086_v61  ;;  %v8087_v56 = vld [vmem:[%s15694_s7 + $0x210] sm:$0xff] }
 0x8b2   : > { %5047 = vmatprep.subr.mxu1 %v15901_v13  ;;  %10233 = vmatpush3.msk.msra.mxu0 %vm16083_vm13, %v15862_v21  ;;  %vm16094_vm13 = vcmp.eq.s32.totalorder %v15949_v57, 2  ;;  %v8163_v61 = vld [vmem:[%s15694_s7 + $0x330] sm:$0xff] }
 0x8b3   : > { %5048 = vmatpush1.msra.mxu1 %v13640_v58  ;;  %10234 = vmatprep.subr.msk.mxu0 %vm16084_vm2, %v15862_v21  ;;  %v8090_v58 = vld [vmem:[%s15694_s7 + $0x228] sm:$0xff]  ;;  %vm16095_vm2 = vcmp.eq.s32.totalorder %v15982_v19, 1 }
 0x8b4   : > { %4627 = vmatmul.mubr.f32.gmra.mxu0 %v8085_v36  ;;  %5073 = vmatprep.subr.mxu1 %v15901_v13  ;;  %v8098_v36 = vld [vmem:[%s15694_s7 + $0x268] sm:$0xff] }
 0x8b5   : > { %5074 = vmatpush2.msra.mxu1 %v10217_v11  ;;  %8126 = vmatprep.mubr.msk.f32.mxu0 %vm3721_vm10, %v8088_v10  ;;  %v8166_v11 = vld [vmem:[%s15694_s7 + $0x348] sm:$0xff]  ;;  %v8097_v10 = vld [vmem:[%s15694_s7 + $0x260] sm:$0xff] }
 0x8b6   : > { %5075 = vmatprep.subr.mxu1 %v15901_v13  ;;  %10235 = vmatpush3.msk.msra.mxu0 %vm16085_vm3, %v15862_v21  ;;  %vm16096_vm3 = vmmov %vm16094_vm13 }
 0x8b7   : > { %5076 = vmatpush2.msra.mxu1 %v4887_v46  ;;  %10236 = vmatprep.subr.msk.mxu0 %vm16086_vm4, %v15862_v21  ;;  %vm16097_vm4 = vmmov %vm16095_vm2  ;;  %v8100_v46 = vld [vmem:[%s15694_s7 + $0x278] sm:$0xff] }
 0x8b8   : > { %4632 = vmatmul.mubr.f32.gmra.mxu0 %v8087_v56  ;;  %5077 = vmatprep.subr.mxu1 %v15901_v13  ;;  %v8165_v56 = vld [vmem:[%s15694_s7 + $0x340] sm:$0xff] }
 0x8b9   : > { %5078 = vmatpush2.msra.mxu1 %v10214_v16  ;;  %8127 = vmatprep.mubr.msk.f32.mxu0 %vm3721_vm10, %v8090_v58  ;;  %v8161_v16 = vld [vmem:[%s15694_s7 + $0x320] sm:$0xff]  ;;  %v8168_v58 = vld [vmem:[%s15694_s7 + $0x358] sm:$0xff] }
 0x8ba   : > { %5079 = vmatprep.subr.mxu1 %v15901_v13  ;;  %10237 = vmatpush3.msk.msra.mxu0 %vm16087_vm5, %v15862_v21  ;;  %vm16098_vm5 = vcmp.eq.s32.totalorder %v15952_v15, 2 }
 0x8bb   : > { %5080 = vmatpush2.msra.mxu1 %v4877_v42  ;;  %10238 = vmatprep.subr.msk.mxu0 %vm16088_vm6, %v15862_v21  ;;  %v8095_v42 = vld [vmem:[%s15694_s7 + $0x250] sm:$0xff]  ;;  %vm16099_vm6 = vcmp.eq.s32.totalorder %v15985_v28, 1 }
 0x8bc   : > { %4637 = vmatmul.mubr.f32.gmra.mxu0 %v8089_v47  ;;  %5082 = vmatmul.mubr.f32.vlgmr.msra.gmra.mxu1 %v8157_v0  ;;  %v8099_v47 = vld [vmem:[%s15694_s7 + $0x270] sm:$0xff] }
 0x8bd   : > { %8128 = vmatprep.mubr.msk.f32.mxu0 %vm3721_vm10, %v8092_v49  ;;  %8206 = vmatprep.mubr.msk.f32.mxu1 %vm3721_vm10, %v8160_v22  ;;  %v8167_v0 = vld [vmem:[%s15694_s7 + $0x350] sm:$0xff]  ;;  %v8102_v49 = vld [vmem:[%s15694_s7 + $0x288] sm:$0xff] }
 0x8be   : > { %10239 = vmatpush3.msk.msra.mxu0 %vm16089_vm7, %v15862_v21  ;;  %10280 = vmatprep.subr.msk.mxu1 %vm16090_vm8, %v15862_v21  ;;  %vm16100_vm7 = vmmov %vm16098_vm5  ;;  %v8170_v22 = vld [vmem:[%s15694_s7 + $0x368] sm:$0xff] }
 0x8bf   : > { %10240 = vmatprep.subr.msk.mxu0 %vm16091_vm9, %v15862_v21  ;;  %10281 = vmatpush3.msk.msra.mxu1 %vm16092_vm11, %v15862_v21  ;;  %vm16101_vm8 = vmmov %vm16099_vm6  ;;  %vm16102_vm9 = vcmp.eq.s32.totalorder %v15955_v20, 2  ;;  %vm16103_vm11 = vcmp.eq.s32.totalorder %v15988_v62, 1 }
 0x8c0   : > { %4642 = vmatmul.mubr.f32.gmra.mxu0 %v8091_v52  ;;  %5087 = vmatmul.mubr.f32.gmra.mxu1 %v8159_v35  ;;  %v8101_v52 = vld [vmem:[%s15694_s7 + $0x280] sm:$0xff] }
 0x8c1   : > { %8129 = vmatprep.mubr.msk.f32.mxu0 %vm3721_vm10, %v8094_v9  ;;  %8207 = vmatprep.mubr.msk.f32.mxu1 %vm3721_vm10, %v8162_v12  ;;  %v8169_v35 = vld [vmem:[%s15694_s7 + $0x360] sm:$0xff]  ;;  %v8104_v9 = vld [vmem:[%s15694_s7 + $0x298] sm:$0xff] }
 0x8c2   : > { %10241 = vmatpush3.msk.msra.mxu0 %vm16093_vm12, %v15862_v21  ;;  %10282 = vmatprep.subr.msk.mxu1 %vm16094_vm13, %v15862_v21  ;;  %vm16104_vm12 = vmmov %vm16102_vm9  ;;  %v8172_v12 = vld [vmem:[%s15694_s7 + $0x378] sm:$0xff] }
 0x8c3   : > { %10242 = vmatprep.subr.msk.mxu0 %vm16095_vm2, %v15862_v21  ;;  %10283 = vmatpush3.msk.msra.mxu1 %vm16096_vm3, %v15862_v21  ;;  %vm16105_vm13 = vmmov %vm16103_vm11  ;;  %vm16106_vm2 = vcmp.eq.s32.totalorder %v15958_v18, 2  ;;  %vm16107_vm3 = vcmp.eq.s32.totalorder %v15991_v25, 1 }
 0x8c4   : > { %4647 = vmatmul.mubr.f32.gmra.mxu0 %v8093_v8  ;;  %5092 = vmatmul.mubr.f32.gmra.mxu1 %v8161_v16  ;;  %v8103_v8 = vld [vmem:[%s15694_s7 + $0x290] sm:$0xff] }
 0x8c5   : > { %8130 = vmatprep.mubr.msk.f32.mxu0 %vm3721_vm10, %v8096_v39  ;;  %8208 = vmatprep.mubr.msk.f32.mxu1 %vm3721_vm10, %v8164_v7  ;;  %v8171_v16 = vld [vmem:[%s15694_s7 + $0x370] sm:$0xff]  ;;  %v8106_v39 = vld [vmem:[%s15694_s7 + $0x2a8] sm:$0xff] }
 0x8c6   : > { %10243 = vmatpush3.msk.msra.mxu0 %vm16097_vm4, %v15862_v21  ;;  %10284 = vmatprep.subr.msk.mxu1 %vm16098_vm5, %v15862_v21  ;;  %vm16108_vm4 = vmmov %vm16106_vm2  ;;  %v8174_v7 = vld [vmem:[%s15694_s7 + $0x388] sm:$0xff] }
 0x8c7   : > { %10244 = vmatprep.subr.msk.mxu0 %vm16099_vm6, %v15862_v21  ;;  %10285 = vmatpush3.msk.msra.mxu1 %vm16100_vm7, %v15862_v21  ;;  %vm16109_vm5 = vmmov %vm16107_vm3  ;;  %vm16110_vm6 = vcmp.eq.s32.totalorder %v15961_v23, 2 }
 0x8c8   : > { %4652 = vmatmul.mubr.f32.gmra.mxu0 %v8095_v42  ;;  %5097 = vmatmul.mubr.f32.gmra.mxu1 %v8163_v61  ;;  %vm16111_vm7 = vmmov %vm16110_vm6  ;;  %v8105_v42 = vld [vmem:[%s15694_s7 + $0x2a0] sm:$0xff] }
 0x8c9   : > { %8131 = vmatprep.mubr.msk.f32.mxu0 %vm3721_vm10, %v8098_v36  ;;  %8209 = vmatprep.mubr.msk.f32.mxu1 %vm3721_vm10, %v8166_v11  ;;  %v8173_v61 = vld [vmem:[%s15694_s7 + $0x380] sm:$0xff]  ;;  %v8108_v36 = vld [vmem:[%s15694_s7 + $0x2b8] sm:$0xff] }
 0x8ca   : > { %10245 = vmatpush3.msk.msra.mxu0 %vm16101_vm8, %v15862_v21  ;;  %10286 = vmatprep.subr.msk.mxu1 %vm16102_vm9, %v15862_v21  ;;  %vm16112_vm8 = vcmp.eq.s32.totalorder %v15964_v54, 2  ;;  %v8176_v11 = vld [vmem:[%s15694_s7 + $0x398] sm:$0xff] }
 0x8cb   : > { %10246 = vmatprep.subr.msk.mxu0 %vm16103_vm11, %v15862_v21  ;;  %10287 = vmatpush3.msk.msra.mxu1 %vm16104_vm12, %v15862_v21  ;;  %vm16113_vm9 = vmmov %vm16112_vm8  ;;  %vm16114_vm11 = vcmp.eq.s32.totalorder %v15967_v55, 2 }
 0x8cc   : > { %4657 = vmatmul.mubr.f32.gmra.mxu0 %v8097_v10  ;;  %5102 = vmatmul.mubr.f32.gmra.mxu1 %v8165_v56  ;;  %vm16115_vm12 = vmmov %vm16114_vm11  ;;  %v8107_v10 = vld [vmem:[%s15694_s7 + $0x2b0] sm:$0xff] }
 0x8cd   : > { %8132 = vmatprep.mubr.msk.f32.mxu0 %vm3721_vm10, %v8100_v46  ;;  %8210 = vmatprep.mubr.msk.f32.mxu1 %vm3721_vm10, %v8168_v58  ;;  %v8175_v56 = vld [vmem:[%s15694_s7 + $0x390] sm:$0xff]  ;;  %v8110_v46 = vld [vmem:[%s15694_s7 + $0x2c8] sm:$0xff] }
 0x8ce   : > { %10247 = vmatpush3.msk.msra.mxu0 %vm16105_vm13, %v15862_v21  ;;  %10288 = vmatprep.subr.msk.mxu1 %vm16106_vm2, %v15862_v21  ;;  %v8178_v58 = vld [vmem:[%s15694_s7 + $0x3a8] sm:$0xff]  ;;  %vm16116_vm13 = vcmp.eq.s32.totalorder %v15970_v40, 2 }
 0x8cf   : > { %10248 = vmatprep.subr.msk.mxu0 %vm16107_vm3, %v15862_v21  ;;  %10289 = vmatpush3.msk.msra.mxu1 %vm16108_vm4, %v15862_v21  ;;  %vm16117_vm2 = vmmov %vm16116_vm13  ;;  %vm16118_vm3 = vcmp.eq.s32.totalorder %v15973_v31, 2 }
 0x8d0   : > { %4662 = vmatmul.mubr.f32.gmra.mxu0 %v8099_v47  ;;  %5107 = vmatmul.mubr.f32.gmra.mxu1 %v8167_v0  ;;  %v8109_v47 = vld [vmem:[%s15694_s7 + $0x2c0] sm:$0xff]  ;;  %vm16119_vm4 = vmmov %vm16118_vm3 }
 0x8d1   : > { %8133 = vmatprep.mubr.msk.f32.mxu0 %vm3721_vm10, %v8102_v49  ;;  %8211 = vmatprep.mubr.msk.f32.mxu1 %vm3721_vm10, %v8170_v22  ;;  %v8177_v0 = vld [vmem:[%s15694_s7 + $0x3a0] sm:$0xff]  ;;  %v8112_v49 = vld [vmem:[%s15694_s7 + $0x2d8] sm:$0xff] }
 0x8d2   : > { %10249 = vmatpush3.msk.msra.mxu0 %vm16109_vm5, %v15862_v21  ;;  %10290 = vmatprep.subr.msk.mxu1 %vm16110_vm6, %v15862_v21  ;;  %v8180_v22 = vld [vmem:[%s15694_s7 + $0x3b8] sm:$0xff]  ;;  %vm16120_vm5 = vcmp.eq.s32.totalorder %v15976_v33, 2 }
 0x8d3   : > { %10291 = vmatpush3.msk.msra.mxu1 %vm16111_vm7, %v15862_v21  ;;  %5512 = vmatprep.subr.mxu0 %v15901_v13  ;;  %vm16121_vm6 = vmmov %vm16120_vm5  ;;  %vm16122_vm7 = vcmp.eq.s32.totalorder %v15979_v38, 2 }
 0x8d4   : > { %4667 = vmatmul.mubr.f32.gmra.mxu0 %v8101_v52  ;;  %5112 = vmatmul.mubr.f32.gmra.mxu1 %v8169_v35  ;;  %v8111_v52 = vld [vmem:[%s15694_s7 + $0x2d0] sm:$0xff] }
 0x8d5   : > { %8134 = vmatprep.mubr.msk.f32.mxu0 %vm3721_vm10, %v8104_v9  ;;  %8212 = vmatprep.mubr.msk.f32.mxu1 %vm3721_vm10, %v8172_v12  ;;  %v8179_v35 = vld [vmem:[%s15694_s7 + $0x3b0] sm:$0xff]  ;;  %v8114_v9 = vld [vmem:[%s15694_s7 + $0x2e8] sm:$0xff] }
 0x8d6   : > { %10292 = vmatprep.subr.msk.mxu1 %vm16112_vm8, %v15862_v21  ;;  %v8182_v12 = vld [vmem:[%s15694_s7 + $0x3c8] sm:$0xff]  ;;  %vm16123_vm8 = vmmov %vm16122_vm7 }
 0x8d7   : > { %10293 = vmatpush3.msk.msra.mxu1 %vm16113_vm9, %v15862_v21  ;;  %vm16124_vm9 = vcmp.eq.s32.totalorder %v15982_v19, 2  ;;  %v8276_v19 = vld [vmem:[%s15694_s7 + $0x6f8] sm:$0xff] }
 0x8d8   : > { %4672 = vmatmul.mubr.f32.gmra.mxu0 %v8103_v8  ;;  %5117 = vmatmul.mubr.f32.gmra.mxu1 %v8171_v16  ;;  %v8113_v8 = vld [vmem:[%s15694_s7 + $0x2e0] sm:$0xff] }
 0x8d9   : > { %8135 = vmatprep.mubr.msk.f32.mxu0 %vm3721_vm10, %v8106_v39  ;;  %8213 = vmatprep.mubr.msk.f32.mxu1 %vm3721_vm10, %v8174_v7  ;;  %v8181_v16 = vld [vmem:[%s15694_s7 + $0x3c0] sm:$0xff]  ;;  %v8116_v39 = vld [vmem:[%s15694_s7 + $0x2f8] sm:$0xff] }
 0x8da   : > { %10294 = vmatprep.subr.msk.mxu1 %vm16114_vm11, %v15862_v21  ;;  %v8184_v7 = vld [vmem:[%s15694_s7 + $0x3d8] sm:$0xff]  ;;  %vm16125_vm11 = vmmov %vm16124_vm9 }
 0x8db   : > { %10295 = vmatpush3.msk.msra.mxu1 %vm16115_vm12, %v15862_v21  ;;  %vm16126_vm12 = vcmp.eq.s32.totalorder %v15985_v28, 2  ;;  %v8278_v28 = vld [vmem:[%s15694_s7 + $0x708] sm:$0xff] }
 0x8dc   : > { %4677 = vmatmul.mubr.f32.gmra.mxu0 %v8105_v42  ;;  %5122 = vmatmul.mubr.f32.gmra.mxu1 %v8173_v61  ;;  %v8115_v42 = vld [vmem:[%s15694_s7 + $0x2f0] sm:$0xff] }
 0x8dd   : > { %8136 = vmatprep.mubr.msk.f32.mxu0 %vm3721_vm10, %v8108_v36  ;;  %8214 = vmatprep.mubr.msk.f32.mxu1 %vm3721_vm10, %v8176_v11  ;;  %v8183_v61 = vld [vmem:[%s15694_s7 + $0x3d0] sm:$0xff]  ;;  %v8186_v36 = vld [vmem:[%s15694_s7 + $0x3e8] sm:$0xff]  ;;  %v8185_v11 = vld [vmem:[%s15694_s7 + $0x3e0] sm:$0xff] }
 0x8de   : > { %10296 = vmatprep.subr.msk.mxu1 %vm16116_vm13, %v15862_v21  ;;  %vm16127_vm13 = vmmov %vm16126_vm12 }
 0x8df   : > { %10297 = vmatpush3.msk.msra.mxu1 %vm16117_vm2, %v15862_v21  ;;  %vm16128_vm2 = vcmp.eq.s32.totalorder %v15988_v62, 2  ;;  %v8280_v62 = vld [vmem:[%s15694_s7 + $0x718] sm:$0xff] }
 0x8e0   : > { %4682 = vmatmul.mubr.f32.gmra.mxu0 %v8107_v10  ;;  %5127 = vmatmul.mubr.f32.gmra.mxu1 %v8175_v56  ;;  %v8188_v10 = vld [vmem:[%s15694_s7 + $0x3f8] sm:$0xff]  ;;  %v8187_v56 = vld [vmem:[%s15694_s7 + $0x3f0] sm:$0xff] }
 0x8e1   : > { %8137 = vmatprep.mubr.msk.f32.mxu0 %vm3721_vm10, %v8110_v46  ;;  %8215 = vmatprep.mubr.msk.f32.mxu1 %vm3721_vm10, %v8178_v58  ;;  %v8190_v46 = vld [vmem:[%s15694_s7 + $0x408] sm:$0xff]  ;;  %v8189_v58 = vld [vmem:[%s15694_s7 + $0x400] sm:$0xff] }
 0x8e2   : > { %10298 = vmatprep.subr.msk.mxu1 %vm16118_vm3, %v15862_v21  ;;  %vm16129_vm3 = vmmov %vm16128_vm2 }
 0x8e3   : > { %10299 = vmatpush3.msk.msra.mxu1 %vm16119_vm4, %v15862_v21  ;;  %vm16130_vm4 = vcmp.eq.s32.totalorder %v15991_v25, 2  ;;  %v8350_v25 = vld [vmem:[%s15694_s7 + $0x808] sm:$0xff] }
 0x8e4   : > { %4687 = vmatmul.mubr.f32.gmra.mxu0 %v8109_v47  ;;  %5132 = vmatmul.mubr.f32.gmra.mxu1 %v8177_v0  ;;  %v8192_v47 = vld [vmem:[%s15694_s7 + $0x418] sm:$0xff]  ;;  %v8191_v0 = vld [vmem:[%s15694_s7 + $0x410] sm:$0xff] }
 0x8e5   : > { %8138 = vmatprep.mubr.msk.f32.mxu0 %vm3721_vm10, %v8112_v49  ;;  %8216 = vmatprep.mubr.msk.f32.mxu1 %vm3721_vm10, %v8180_v22  ;;  %v8194_v49 = vld [vmem:[%s15694_s7 + $0x428] sm:$0xff]  ;;  %v8193_v22 = vld [vmem:[%s15694_s7 + $0x420] sm:$0xff] }
 0x8e6   : > { %10300 = vmatprep.subr.msk.mxu1 %vm16120_vm5, %v15862_v21  ;;  %vm16131_vm5 = vmmov %vm16130_vm4 }
 0x8e7   : > { %10301 = vmatpush3.msk.msra.mxu1 %vm16121_vm6, %v15862_v21  ;;  %vm16192_vm6 = vcmp.eq.s32.totalorder %v10839_v48, 3  ;;  %v8252_v48 = vld [vmem:[%s15694_s7 + $0x638] sm:$0xff] }
 0x8e8   : > { %4692 = vmatmul.mubr.f32.gmra.mxu0 %v8111_v52  ;;  %5137 = vmatmul.mubr.f32.gmra.mxu1 %v8179_v35  ;;  %v8196_v52 = vld [vmem:[%s15694_s7 + $0x438] sm:$0xff]  ;;  %v8195_v35 = vld [vmem:[%s15694_s7 + $0x430] sm:$0xff] }
 0x8e9   : > { %8139 = vmatprep.mubr.msk.f32.mxu0 %vm3721_vm10, %v8114_v9  ;;  %8217 = vmatprep.mubr.msk.f32.mxu1 %vm3721_vm10, %v8182_v12  ;;  %v8198_v9 = vld [vmem:[%s15694_s7 + $0x448] sm:$0xff]  ;;  %v8197_v12 = vld [vmem:[%s15694_s7 + $0x440] sm:$0xff] }
 0x8ea   : > { %10302 = vmatprep.subr.msk.mxu1 %vm16122_vm7, %v15862_v21  ;;  %vm16193_vm7 = vmmov %vm16192_vm6 }
 0x8eb   : > { %10303 = vmatpush3.msk.msra.mxu1 %vm16123_vm8, %v15862_v21  ;;  %vm16194_vm8 = vcmp.eq.s32.totalorder %v15949_v57, 3  ;;  %v8254_v57 = vld [vmem:[%s15694_s7 + $0x648] sm:$0xff] }
 0x8ec   : > { %4697 = vmatmul.mubr.f32.gmra.mxu0 %v8113_v8  ;;  %5142 = vmatmul.mubr.f32.gmra.mxu1 %v8181_v16  ;;  %v8200_v8 = vld [vmem:[%s15694_s7 + $0x458] sm:$0xff]  ;;  %v8199_v16 = vld [vmem:[%s15694_s7 + $0x450] sm:$0xff] }
 0x8ed   : > { %8140 = vmatprep.mubr.msk.f32.mxu0 %vm3721_vm10, %v8116_v39  ;;  %8218 = vmatprep.mubr.msk.f32.mxu1 %vm3721_vm10, %v8184_v7  ;;  %v8202_v39 = vld [vmem:[%s15694_s7 + $0x468] sm:$0xff]  ;;  %v8201_v7 = vld [vmem:[%s15694_s7 + $0x460] sm:$0xff] }
 0x8ee   : > { %10304 = vmatprep.subr.msk.mxu1 %vm16124_vm9, %v15862_v21  ;;  %vm16195_vm9 = vmmov %vm16194_vm8 }
 0x8ef   : > { %10305 = vmatpush3.msk.msra.mxu1 %vm16125_vm11, %v15862_v21  ;;  %vm16196_vm11 = vcmp.eq.s32.totalorder %v15952_v15, 3  ;;  %v8256_v15 = vld [vmem:[%s15694_s7 + $0x658] sm:$0xff] }
 0x8f0   : > { %4702 = vmatmul.mubr.f32.gmra.mxu0 %v8115_v42  ;;  %5147 = vmatmul.mubr.f32.gmra.mxu1 %v8183_v61  ;;  %v8204_v42 = vld [vmem:[%s15694_s7 + $0x478] sm:$0xff]  ;;  %v8203_v61 = vld [vmem:[%s15694_s7 + $0x470] sm:$0xff] }
 0x8f1   : > { %10250 = vmatprep.mubr.f32.mxu0 %v12756_v1  ;;  %8219 = vmatprep.mubr.msk.f32.mxu1 %vm3721_vm10, %v8186_v36  ;;  %v4118_v36 = vadd.f32 %v13347_v34, %v13575_v14 }
 0x8f2   : > { %10306 = vmatprep.subr.msk.mxu1 %vm16126_vm12, %v15862_v21  ;;  %vm16197_vm12 = vmmov %vm16196_vm11 }
 0x8f3   : > { %10307 = vmatpush3.msk.msra.mxu1 %vm16127_vm13, %v15862_v21  ;;  %vm16198_vm13 = vcmp.eq.s32.totalorder %v15955_v20, 3  ;;  %v8258_v20 = vld [vmem:[%s15694_s7 + $0x668] sm:$0xff] }
 0x8f4   : > { %5152 = vmatmul.mubr.f32.gmra.mxu1 %v8185_v11  ;;  %10251 = vmatmul.mubr.f32.vlgmr.msra.gmra.mxu0 %v12763_v4 }
 0x8f5   : > { %10253 = vmatprep.mubr.f32.mxu0 %v12773_v45  ;;  %8220 = vmatprep.mubr.msk.f32.mxu1 %vm3721_vm10, %v8188_v10 }
 0x8f6   : > { %10308 = vmatprep.subr.msk.mxu1 %vm16128_vm2, %v15862_v21  ;;  %vm16199_vm2 = vmmov %vm16198_vm13 }
 0x8f7   : > { %10309 = vmatpush3.msk.msra.mxu1 %vm16129_vm3, %v15862_v21  ;;  %vm16200_vm3 = vcmp.eq.s32.totalorder %v15958_v18, 3  ;;  %v8260_v18 = vld [vmem:[%s15694_s7 + $0x678] sm:$0xff] }
 0x8f8   : > { %5157 = vmatmul.mubr.f32.gmra.mxu1 %v8187_v56  ;;  %10254 = vmatmul.mubr.f32.gmra.mxu0 %v12781_v29 }
 0x8f9   : > { %10256 = vmatprep.mubr.f32.mxu0 %v12793_v43  ;;  %8221 = vmatprep.mubr.msk.f32.mxu1 %vm3721_vm10, %v8190_v46  ;;  %v4123_v46 = vadd.f32 %v13356_v41, %v13577_v63 }
 0x8fa   : > { %10310 = vmatprep.subr.msk.mxu1 %vm16130_vm4, %v15862_v21  ;;  %vm16201_vm4 = vmmov %vm16200_vm3 }
 0x8fb   : > { %10311 = vmatpush3.msk.msra.mxu1 %vm16131_vm5, %v15862_v21  ;;  %vm16202_vm5 = vcmp.eq.s32.totalorder %v15961_v23, 3  ;;  %v8262_v23 = vld [vmem:[%s15694_s7 + $0x688] sm:$0xff] }
 0x8fc   : > { %5162 = vmatmul.mubr.f32.gmra.mxu1 %v8189_v58  ;;  %10257 = vmatmul.mubr.f32.gmra.mxu0 %v12799_v30 }
 0x8fd   : > { %10259 = vmatprep.mubr.f32.mxu0 %v12810_v51  ;;  %8222 = vmatprep.mubr.msk.f32.mxu1 %vm3721_vm10, %v8192_v47 }
 0x8fe   : > { %6007 = vmatprep.subr.mxu1 %v15901_v13 }
 0x900   : > { %5167 = vmatmul.mubr.f32.gmra.mxu1 %v8191_v0  ;;  %10260 = vmatmul.mubr.f32.gmra.mxu0 %v12816_v6 }
 0x901   : > { %10262 = vmatprep.mubr.f32.mxu0 %v12827_v5  ;;  %8223 = vmatprep.mubr.msk.f32.mxu1 %vm3721_vm10, %v8194_v49  ;;  %v4128_v49 = vadd.f32 %v13365_v3, %v13579_v50 }
 0x904   : > { %5172 = vmatmul.mubr.f32.gmra.mxu1 %v8193_v22  ;;  %10263 = vmatmul.mubr.f32.gmra.mxu0 %v12832_v44 }
 0x905   : > { %10265 = vmatprep.mubr.f32.mxu0 %v12842_v37  ;;  %8224 = vmatprep.mubr.msk.f32.mxu1 %vm3721_vm10, %v8196_v52 }
 0x908   : > { %5177 = vmatmul.mubr.f32.gmra.mxu1 %v8195_v35  ;;  %10266 = vmatmul.mubr.f32.gmra.mxu0 %v12847_v53 }
 0x909   : > { %10268 = vmatprep.mubr.f32.mxu0 %v12854_v32  ;;  %8225 = vmatprep.mubr.msk.f32.mxu1 %vm3721_vm10, %v8198_v9  ;;  %v16132_v9 = vld [vmem:[#allocation31_spill] sm:$0xff] }
 0x90c   : > { %5182 = vmatmul.mubr.f32.gmra.mxu1 %v8197_v12  ;;  %10269 = vmatmul.mubr.f32.gmra.mxu0 %v12859_v27  ;;  %v16133_v12 = vld [vmem:[#allocation26_spill] sm:$0xff] }
 0x90d   : > { %10271 = vmatprep.mubr.f32.mxu0 %v12867_v17  ;;  %8226 = vmatprep.mubr.msk.f32.mxu1 %vm3721_vm10, %v8200_v8  ;;  %v4133_v8 = vadd.f32 %v16133_v12, %v16132_v9  ;;  %v16140_v12 = vld [vmem:[#allocation32_spill] sm:$0xff] }
 0x910   : > { %5187 = vmatmul.mubr.f32.gmra.mxu1 %v8199_v16  ;;  %10272 = vmatmul.mubr.f32.gmra.mxu0 %v12862_v60 }
 0x911   : > { %10274 = vmatprep.mubr.f32.mxu0 %v12876_v26  ;;  %8227 = vmatprep.mubr.msk.f32.mxu1 %vm3721_vm10, %v8202_v39  ;;  %v16134_v39 = vld [vmem:[#allocation41_spill] sm:$0xff] }
 0x914   : > { %5192 = vmatmul.mubr.f32.gmra.mxu1 %v8201_v7  ;;  %10275 = vmatmul.mubr.f32.gmra.mxu0 %v12880_v59  ;;  %v16135_v7 = vld [vmem:[#allocation36_spill] sm:$0xff] }
 0x915   : > { %10277 = vmatprep.mubr.f32.mxu0 %v12888_v2  ;;  %8228 = vmatprep.mubr.msk.f32.mxu1 %vm3721_vm10, %v8204_v42  ;;  %v4138_v42 = vadd.f32 %v16135_v7, %v16134_v39 }
 0x918   : > { %5197 = vmatmul.mubr.f32.gmra.mxu1 %v8203_v61  ;;  %10278 = vmatmul.mubr.f32.gmra.mxu0 %v12892_v24 }
 0x919   : > { %10312 = vmatprep.mubr.f32.mxu1 %v12756_v1 }
 0x91c   : > { %10313 = vmatmul.mubr.f32.vlgmr.msra.gmra.mxu1 %v12763_v4 }
 0x91d   : > { %10315 = vmatprep.mubr.f32.mxu1 %v12773_v45 }
 0x920   : > { %10316 = vmatmul.mubr.f32.gmra.mxu1 %v12781_v29 }
 0x921   : > { %10318 = vmatprep.mubr.f32.mxu1 %v12793_v43 }
 0x924   : > { %10319 = vmatmul.mubr.f32.gmra.mxu1 %v12799_v30 }
 0x925   : > { %10321 = vmatprep.mubr.f32.mxu1 %v12810_v51 }
 0x928   : > { %10322 = vmatmul.mubr.f32.gmra.mxu1 %v12816_v6 }
 0x929   : > { %10324 = vmatprep.mubr.f32.mxu1 %v12827_v5 }
 0x92c   : > { %10325 = vmatmul.mubr.f32.gmra.mxu1 %v12832_v44 }
 0x92d   : > { %10327 = vmatprep.mubr.f32.mxu1 %v12842_v37 }
 0x930   : > { %10328 = vmatmul.mubr.f32.gmra.mxu1 %v12847_v53 }
 0x931   : > { %10330 = vmatprep.mubr.f32.mxu1 %v12854_v32 }
 0x934   : > { %10331 = vmatmul.mubr.f32.gmra.mxu1 %v12859_v27 }
 0x935   : > { %10333 = vmatprep.mubr.f32.mxu1 %v12867_v17 }
 0x938   : > { %10334 = vmatmul.mubr.f32.gmra.mxu1 %v12862_v60 }
 0x939   : > { %10336 = vmatprep.mubr.f32.mxu1 %v12876_v26 }
 0x93c   : > { %10337 = vmatmul.mubr.f32.gmra.mxu1 %v12880_v59 }
 0x93d   : > { %10339 = vmatprep.mubr.f32.mxu1 %v12888_v2 }
 0x940   : > { %10340 = vmatmul.mubr.f32.gmra.mxu1 %v12892_v24  ;;  %v16150_v24 = vld [vmem:[#allocation28_spill] sm:$0xff] }
 0x954   : > { %v4588_v11 = vpop.f32.mrf.mxu0 }
 0x955   : > { %v4707_v10 = vadd.f32 %v4588_v11, %v4118_v36  ;;  %v16136_v36 = vld [vmem:[#allocation60_spill] sm:$0xff]  ;;  %v16137_v11 = vld [vmem:[#allocation54_spill] sm:$0xff] }
 0x956   : > { %v4590_v56 = vpop.f32.mrf.mxu0 }
 0x957   : > { %v4143_v56 = vadd.f32 %v16137_v11, %v16136_v36 }
 0x958   : > { %v4593_v58 = vpop.f32.mrf.mxu0 }
 0x959   : > { %v4708_v47 = vadd.f32 %v4593_v58, %v4123_v46  ;;  %v16138_v58 = vld [vmem:[#allocation51_spill] sm:$0xff] }
 0x95a   : > { %v4595_v0 = vpop.f32.mrf.mxu0 }
 0x95b   : > { %v16139_v0 = vld [vmem:[#allocation46_spill] sm:$0xff] }
 0x95c   : > { %v4598_v22 = vpop.f32.mrf.mxu0 }
 0x95d   : > { %v4709_v52 = vadd.f32 %v4598_v22, %v4128_v49  ;;  %v4148_v49 = vadd.f32 %v16139_v0, %v16138_v58  ;;  %v16145_v58 = vld [vmem:[#allocation55_spill] sm:$0xff] }
 0x95e   : > { %v4600_v35 = vpop.f32.mrf.mxu0 }
 0x960   : > { %v4603_v16 = vpop.f32.mrf.mxu0 }
 0x961   : > { %v4710_v34 = vadd.f32 %v4603_v16, %v4133_v8  ;;  %v16141_v8 = vld [vmem:[#allocation27_spill] sm:$0xff] }
 0x962   : > { %v4605_v14 = vpop.f32.mrf.mxu0  ;;  %v4153_v16 = vadd.f32 %v16141_v8, %v16140_v12  ;;  %v16146_v12 = vld [vmem:[#allocation52_spill] sm:$0xff]  ;;  %v16147_v8 = vld [vmem:[#allocation47_spill] sm:$0xff] }
 0x964   : > { %v4608_v61 = vpop.f32.mrf.mxu0 }
 0x965   : > { %v4711_v41 = vadd.f32 %v4608_v61, %v4138_v42  ;;  %v16142_v42 = vld [vmem:[#allocation42_spill] sm:$0xff]  ;;  %v16143_v61 = vld [vmem:[#allocation37_spill] sm:$0xff] }
 0x966   : > { %v4610_v63 = vpop.f32.mrf.mxu0 }
 0x967   : > { %v4158_v63 = vadd.f32 %v16143_v61, %v16142_v42 }
 0x968   : > { %v4613_v46 = vpop.f32.mrf.mxu0 }
 0x969   : > { %v4712_v3 = vadd.f32 %v4613_v46, %v4143_v56  ;;  %v8246_v46 = vld [vmem:[%s15694_s7 + $0x608] sm:$0xff] }
 0x96a   : > { %v4615_v50 = vpop.f32.mrf.mxu0  ;;  %8293 = vmatprep.mubr.msk.f32.mxu0 %vm3721_vm10, %v8246_v46 }
 0x96b   : > { %v16144_v50 = vld [vmem:[#allocation62_spill] sm:$0xff] }
 0x96c   : > { %v4618_v22 = vpop.f32.mrf.mxu0  ;;  %v4163_v0 = vadd.f32 %v16145_v58, %v16144_v50 }
 0x96d   : > { %v4713_v35 = vadd.f32 %v4618_v22, %v4148_v49 }
 0x96e   : > { %v4620_v9 = vpop.f32.mrf.mxu0 }
 0x970   : > { %v4623_v14 = vpop.f32.mrf.mxu0 }
 0x971   : > { %v14271_v39 = vadd.f32 %v4623_v14, %v4153_v16  ;;  %v4168_v16 = vadd.f32 %v16147_v8, %v16146_v12  ;;  %v16152_v12 = vld [vmem:[#allocation43_spill] sm:$0xff]  ;;  %v16153_v8 = vld [vmem:[#allocation38_spill] sm:$0xff] }
 0x972   : > { %v4625_v7 = vpop.f32.mrf.mxu0  ;;  %v4178_v59 = vadd.f32 %v16153_v8, %v16152_v12  ;;  %v16158_v12 = vld [vmem:[#allocation34_spill] sm:$0xff]  ;;  %v16159_v8 = vld [vmem:[#allocation48_spill] sm:$0xff] }
 0x974   : > { %v4628_v36 = vpop.f32.mrf.mxu0 }
 0x975   : > { %v14275_v11 = vadd.f32 %v4628_v36, %v4158_v63 }
 0x976   : > { %v4630_v56 = vpop.f32.mrf.mxu0 }
 0x977   : > { %v16149_v56 = vld [vmem:[#allocation33_spill] sm:$0xff] }
 0x978   : > { %v4633_v49 = vpop.f32.mrf.mxu0  ;;  %v4173_v50 = vadd.f32 %v16150_v24, %v16149_v56  ;;  %v16155_v24 = vld [vmem:[#allocation53_spill] sm:$0xff] }
 0x979   : > { %v14283_v22 = vadd.f32 %v4633_v49, %v4163_v0  ;;  %v16156_v56 = vld [vmem:[#allocation57_spill] sm:$0xff] }
 0x97a   : > { %v4635_v9 = vpop.f32.mrf.mxu0 }
 0x97c   : > { %v4638_v14 = vpop.f32.mrf.mxu0  ;;  %v5083_v7 = vpop.f32.mrf.mxu1 }
 0x97d   : > { %v14287_v42 = vadd.f32 %v4638_v14, %v4168_v16  ;;  %v14289_v61 = vadd.f32 %v5083_v7, %v4707_v10 }
 0x97e   : > { %v4640_v63 = vpop.f32.mrf.mxu0  ;;  %v5085_v36 = vpop.f32.mrf.mxu1 }
 0x97f   : > { %16148 = vst [vmem:[#allocation14_spill] sm:$0xff] %v14289_v61  ;;  %v4183_v61 = vadd.f32 %v16156_v56, %v16155_v24  ;;  %v16161_v24 = vld [vmem:[#allocation44_spill] sm:$0xff]  ;;  %v16162_v56 = vld [vmem:[#allocation29_spill] sm:$0xff] }
 0x980   : > { %v4643_v58 = vpop.f32.mrf.mxu0  ;;  %v5088_v46 = vpop.f32.mrf.mxu1 }
 0x981   : > { %v14293_v2 = vadd.f32 %v4643_v58, %v4173_v50  ;;  %v14295_v0 = vadd.f32 %v5088_v46, %v4708_v47 }
 0x982   : > { %v4645_v49 = vpop.f32.mrf.mxu0  ;;  %v5090_v9 = vpop.f32.mrf.mxu1 }
 0x983   : > { %16151 = vst [vmem:[#allocation15_spill] sm:$0xff] %v14295_v0  ;;  %v4188_v0 = vadd.f32 %v16159_v8, %v16158_v12  ;;  %v16164_v12 = vld [vmem:[#allocation56_spill] sm:$0xff]  ;;  %v16165_v8 = vld [vmem:[#allocation39_spill] sm:$0xff] }
 0x984   : > { %v4648_v16 = vpop.f32.mrf.mxu0  ;;  %v5093_v14 = vpop.f32.mrf.mxu1 }
 0x985   : > { %v14299_v10 = vadd.f32 %v4648_v16, %v4178_v59  ;;  %v14301_v7 = vadd.f32 %v5093_v14, %v4709_v52 }
 0x986   : > { %v4650_v63 = vpop.f32.mrf.mxu0  ;;  %v5095_v36 = vpop.f32.mrf.mxu1 }
 0x987   : > { %16154 = vst [vmem:[#allocation16_spill] sm:$0xff] %v14301_v7  ;;  %v4193_v7 = vadd.f32 %v16162_v56, %v16161_v24  ;;  %v16167_v24 = vld [vmem:[#allocation7_spill] sm:$0xff]  ;;  %v16168_v56 = vld [vmem:[#allocation58_spill] sm:$0xff] }
 0x988   : > { %v4653_v50 = vpop.f32.mrf.mxu0  ;;  %v5098_v58 = vpop.f32.mrf.mxu1 }
 0x989   : > { %v14305_v47 = vadd.f32 %v4653_v50, %v4183_v61  ;;  %v14307_v46 = vadd.f32 %v5098_v58, %v4710_v34 }
 0x98a   : > { %v4655_v49 = vpop.f32.mrf.mxu0  ;;  %v5100_v9 = vpop.f32.mrf.mxu1 }
 0x98b   : > { %16157 = vst [vmem:[#allocation17_spill] sm:$0xff] %v14307_v46  ;;  %v4198_v46 = vadd.f32 %v16165_v8, %v16164_v12  ;;  %v16170_v12 = vld [vmem:[#allocation8_spill] sm:$0xff]  ;;  %v16171_v8 = vld [vmem:[#allocation22_spill] sm:$0xff] }
 0x98c   : > { %v4658_v59 = vpop.f32.mrf.mxu0  ;;  %v5103_v16 = vpop.f32.mrf.mxu1 }
 0x98d   : > { %v14311_v52 = vadd.f32 %v4658_v59, %v4188_v0  ;;  %v14313_v14 = vadd.f32 %v5103_v16, %v4711_v41 }
 0x98e   : > { %v4660_v63 = vpop.f32.mrf.mxu0  ;;  %v5105_v36 = vpop.f32.mrf.mxu1 }
 0x98f   : > { %16160 = vst [vmem:[#allocation18_spill] sm:$0xff] %v14313_v14  ;;  %v4203_v14 = vadd.f32 %v16168_v56, %v16167_v24  ;;  %v16174_v56 = vld [vmem:[#allocation49_spill] sm:$0xff] }
 0x990   : > { %v4663_v61 = vpop.f32.mrf.mxu0  ;;  %v5108_v50 = vpop.f32.mrf.mxu1 }
 0x991   : > { %v14317_v34 = vadd.f32 %v4663_v61, %v4193_v7  ;;  %v14319_v58 = vadd.f32 %v5108_v50, %v4712_v3 }
 0x992   : > { %v4665_v49 = vpop.f32.mrf.mxu0  ;;  %v5110_v9 = vpop.f32.mrf.mxu1 }
 0x993   : > { %16163 = vst [vmem:[#allocation19_spill] sm:$0xff] %v14319_v58 }
 0x994   : > { %v4668_v0 = vpop.f32.mrf.mxu0  ;;  %v5113_v59 = vpop.f32.mrf.mxu1 }
 0x995   : > { %v14323_v41 = vadd.f32 %v4668_v0, %v4198_v46  ;;  %v14325_v16 = vadd.f32 %v5113_v59, %v4713_v35  ;;  %v4208_v46 = vadd.f32 %v16171_v8, %v16170_v12 }
 0x996   : > { %v4670_v63 = vpop.f32.mrf.mxu0  ;;  %v5115_v36 = vpop.f32.mrf.mxu1 }
 0x997   : > { %16166 = vst [vmem:[#allocation20_spill] sm:$0xff] %v14325_v16  ;;  %v16180_v16 = vld [vmem:[#allocation40_spill] sm:$0xff] }
 0x998   : > { %v4673_v7 = vpop.f32.mrf.mxu0  ;;  %v5118_v61 = vpop.f32.mrf.mxu1 }
 0x999   : > { %v14329_v3 = vadd.f32 %v4673_v7, %v4203_v14  ;;  %v14332_v50 = vadd.f32 %v5118_v61, %v14271_v39  ;;  %v8334_v14 = vld [vmem:[%s15694_s7 + $0x788] sm:$0xff]  ;;  %v16173_v39 = vld [vmem:[#allocation9_spill] sm:$0xff] }
 0x99a   : > { %v4675_v49 = vpop.f32.mrf.mxu0  ;;  %v5120_v9 = vpop.f32.mrf.mxu1  ;;  %v4213_v7 = vadd.f32 %v16174_v56, %v16173_v39  ;;  %8381 = vmatprep.mubr.msk.f32.mxu1 %vm3721_vm10, %v8334_v14  ;;  %v16179_v14 = vld [vmem:[#allocation11_spill] sm:$0xff] }
 0x99b   : > { %16169 = vst [vmem:[#allocation21_spill] sm:$0xff] %v14332_v50  ;;  %v4223_v58 = vadd.f32 %v16180_v16, %v16179_v14  ;;  %v16185_v16 = vld [vmem:[#allocation13_spill] sm:$0xff]  ;;  %v16186_v14 = vld [vmem:[#allocation50_spill] sm:$0xff] }
 0x99c   : > { %v4678_v0 = vpop.f32.mrf.mxu0  ;;  %v5123_v35 = vpop.f32.mrf.mxu1 }
 0x99d   : > { %v14336_v59 = vadd.f32 %v4678_v0, %v4208_v46  ;;  %v14339_v63 = vadd.f32 %v5123_v35, %v14275_v11  ;;  %v16176_v46 = vld [vmem:[#allocation10_spill] sm:$0xff] }
 0x99e   : > { %v4680_v36 = vpop.f32.mrf.mxu0  ;;  %v5125_v24 = vpop.f32.mrf.mxu1  ;;  %v16177_v0 = vld [vmem:[#allocation30_spill] sm:$0xff] }
 0x99f   : > { %16172 = vst [vmem:[#allocation31_spill] sm:$0xff] %v14339_v63  ;;  %v4218_v35 = vadd.f32 %v16177_v0, %v16176_v46  ;;  %v16182_v46 = vld [vmem:[#allocation12_spill] sm:$0xff]  ;;  %v16183_v0 = vld [vmem:[#allocation59_spill] sm:$0xff] }
 0x9a0   : > { %v4683_v61 = vpop.f32.mrf.mxu0  ;;  %v5128_v49 = vpop.f32.mrf.mxu1 }
 0x9a1   : > { %v4726_v9 = vadd.f32 %v4683_v61, %v4213_v7  ;;  %v14348_v12 = vadd.f32 %v5128_v49, %v14283_v22 }
 0x9a2   : > { %v4685_v8 = vpop.f32.mrf.mxu0  ;;  %v5130_v11 = vpop.f32.mrf.mxu1 }
 0x9a3   : > { %16175 = vst [vmem:[#allocation26_spill] sm:$0xff] %v14348_v12  ;;  %v4228_v12 = vadd.f32 %v16183_v0, %v16182_v46 }
 0x9a4   : > { %v4688_v36 = vpop.f32.mrf.mxu0  ;;  %v5133_v24 = vpop.f32.mrf.mxu1 }
 0x9a5   : > { %v4727_v63 = vadd.f32 %v4688_v36, %v4218_v35  ;;  %v14353_v50 = vadd.f32 %v5133_v24, %v14287_v42 }
 0x9a6   : > { %v4690_v39 = vpop.f32.mrf.mxu0  ;;  %v5135_v56 = vpop.f32.mrf.mxu1 }
 0x9a7   : > { %16178 = vst [vmem:[#allocation41_spill] sm:$0xff] %v14353_v50  ;;  %v4233_v50 = vadd.f32 %v16186_v14, %v16185_v16 }
 0x9a8   : > { %v4693_v7 = vpop.f32.mrf.mxu0  ;;  %v5138_v61 = vpop.f32.mrf.mxu1 }
 0x9a9   : > { %v4728_v22 = vadd.f32 %v4693_v7, %v4223_v58  ;;  %v14358_v49 = vadd.f32 %v5138_v61, %v14293_v2 }
 0x9aa   : > { %v4695_v8 = vpop.f32.mrf.mxu0  ;;  %v5140_v11 = vpop.f32.mrf.mxu1 }
 0x9ab   : > { %16181 = vst [vmem:[#allocation36_spill] sm:$0xff] %v14358_v49 }
 0x9ac   : > { %v4698_v35 = vpop.f32.mrf.mxu0  ;;  %v5143_v36 = vpop.f32.mrf.mxu1 }
 0x9ad   : > { %v4729_v42 = vadd.f32 %v4698_v35, %v4228_v12  ;;  %v14363_v24 = vadd.f32 %v5143_v36, %v14299_v10 }
 0x9ae   : > { %v4700_v39 = vpop.f32.mrf.mxu0  ;;  %v5145_v56 = vpop.f32.mrf.mxu1 }
 0x9af   : > { %16184 = vst [vmem:[#allocation60_spill] sm:$0xff] %v14363_v24 }
 0x9b0   : > { %v4703_v58 = vpop.f32.mrf.mxu0  ;;  %v5148_v7 = vpop.f32.mrf.mxu1 }
 0x9b1   : > { %v4730_v2 = vadd.f32 %v4703_v58, %v4233_v50  ;;  %v14368_v61 = vadd.f32 %v5148_v7, %v14305_v47 }
 0x9b2   : > { %v4705_v8 = vpop.f32.mrf.mxu0  ;;  %v5150_v11 = vpop.f32.mrf.mxu1 }
 0x9b3   : > { %16187 = vst [vmem:[#allocation54_spill] sm:$0xff] %v14368_v61 }
 0x9b4   : > { %v5153_v46 = vpop.f32.mrf.mxu1  ;;  %v14370_v0 = vpop.f32.mrf.mxu0 }
 0x9b5   : > { %v14373_v12 = vadd.f32 %v5153_v46, %v14311_v52 }
 0x9b6   : > { %v5155_v10 = vpop.f32.mrf.mxu1  ;;  %v14375_v35 = vpop.f32.mrf.mxu0 }
 0x9b7   : > { %16188 = vst [vmem:[#allocation51_spill] sm:$0xff] %v14373_v12 }
 0x9b8   : > { %v5158_v36 = vpop.f32.mrf.mxu1  ;;  %v14377_v39 = vpop.f32.mrf.mxu0 }
 0x9b9   : > { %v14380_v56 = vadd.f32 %v5158_v36, %v14317_v34 }
 0x9ba   : > { %v5160_v50 = vpop.f32.mrf.mxu1  ;;  %v14382_v47 = vpop.f32.mrf.mxu0 }
 0x9bb   : > { %16189 = vst [vmem:[#allocation46_spill] sm:$0xff] %v14380_v56 }
 0x9bc   : > { %v5163_v16 = vpop.f32.mrf.mxu1  ;;  %v10258_v14 = vpop.f32.mrf.mxu0 }
 0x9bd   : > { %v14385_v58 = vadd.f32 %v5163_v16, %v14323_v41 }
 0x9be   : > { %v5165_v7 = vpop.f32.mrf.mxu1  ;;  %v5312_v52 = vpop.f32.mrf.mxu0 }
 0x9bf   : > { %16190 = vst [vmem:[#allocation32_spill] sm:$0xff] %v14385_v58 }
 0x9c0   : > { %v5168_v8 = vpop.f32.mrf.mxu1  ;;  %v10261_v11 = vpop.f32.mrf.mxu0 }
 0x9c1   : > { %v14388_v46 = vadd.f32 %v5168_v8, %v14329_v3 }
 0x9c2   : > { %v5170_v10 = vpop.f32.mrf.mxu1  ;;  %v5322_v12 = vpop.f32.mrf.mxu0 }
 0x9c3   : > { %16191 = vst [vmem:[#allocation27_spill] sm:$0xff] %v14388_v46 }
 0x9c4   : > { %v5173_v61 = vpop.f32.mrf.mxu1  ;;  %v10264_v34 = vpop.f32.mrf.mxu0 }
 0x9c5   : > { %v14391_v36 = vadd.f32 %v5173_v61, %v14336_v59 }
 0x9c6   : > { %v5175_v50 = vpop.f32.mrf.mxu1  ;;  %v5332_v56 = vpop.f32.mrf.mxu0 }
 0x9c8   : > { %v5178_v24 = vpop.f32.mrf.mxu1  ;;  %v10267_v49 = vpop.f32.mrf.mxu0 }
 0x9c9   : > { %v14393_v41 = vadd.f32 %v5178_v24, %v4726_v9 }
 0x9ca   : > { %v5180_v16 = vpop.f32.mrf.mxu1  ;;  %v5342_v7 = vpop.f32.mrf.mxu0 }
 0x9cc   : > { %v5183_v58 = vpop.f32.mrf.mxu1  ;;  %v10270_v26 = vpop.f32.mrf.mxu0 }
 0x9cd   : > { %v14395_v60 = vadd.f32 %v5183_v58, %v4727_v63 }
 0x9ce   : > { %v5185_v3 = vpop.f32.mrf.mxu1  ;;  %v5352_v8 = vpop.f32.mrf.mxu0 }
 0x9d0   : > { %v5188_v10 = vpop.f32.mrf.mxu1  ;;  %v10273_v46 = vpop.f32.mrf.mxu0 }
 0x9d1   : > { %v14397_v17 = vadd.f32 %v5188_v10, %v4728_v22  ;;  %5513 = vmatpush1.msra.mxu0 %v10273_v46  ;;  %v8248_v10 = vld [vmem:[%s15694_s7 + $0x618] sm:$0xff] }
 0x9d2   : > { %v5190_v59 = vpop.f32.mrf.mxu1  ;;  %v5362_v61 = vpop.f32.mrf.mxu0  ;;  %5514 = vmatprep.subr.mxu0 %v15901_v13 }
 0x9d3   : > { %5515 = vmatpush1.msra.mxu0 %v5362_v61  ;;  %v8247_v61 = vld [vmem:[%s15694_s7 + $0x610] sm:$0xff] }
 0x9d4   : > { %v5193_v9 = vpop.f32.mrf.mxu1  ;;  %5516 = vmatprep.subr.mxu0 %v15901_v13 }
 0x9d5   : > { %v14401_v24 = vadd.f32 %v5193_v9, %v4729_v42  ;;  %5517 = vmatpush1.msra.mxu0 %v10270_v26 }
 0x9d6   : > { %v5195_v63 = vpop.f32.mrf.mxu1  ;;  %5518 = vmatprep.subr.mxu0 %v15901_v13 }
 0x9d7   : > { %5519 = vmatpush1.msra.mxu0 %v5352_v8  ;;  %v8250_v63 = vld [vmem:[%s15694_s7 + $0x628] sm:$0xff] }
 0x9d8   : > { %v5198_v58 = vpop.f32.mrf.mxu1  ;;  %5520 = vmatprep.subr.mxu0 %v15901_v13 }
 0x9d9   : > { %v14405_v22 = vadd.f32 %v5198_v58, %v4730_v2  ;;  %5521 = vmatpush1.msra.mxu0 %v10267_v49  ;;  %v8249_v58 = vld [vmem:[%s15694_s7 + $0x620] sm:$0xff] }
 0x9da   : > { %v5200_v46 = vpop.f32.mrf.mxu1  ;;  %5522 = vmatprep.subr.mxu0 %v15901_v13 }
 0x9db   : > { %5523 = vmatpush1.msra.mxu0 %v5342_v7  ;;  %v8251_v46 = vld [vmem:[%s15694_s7 + $0x630] sm:$0xff] }
 0x9dc   : > { %5524 = vmatprep.subr.mxu0 %v15901_v13  ;;  %v14409_v50 = vpop.f32.mrf.mxu1 }
 0x9dd   : > { %5525 = vmatpush1.msra.mxu0 %v10264_v34  ;;  %v10276_v34 = vpop.f32.mrf.mxu0 }
 0x9de   : > { %5526 = vmatprep.subr.mxu0 %v15901_v13  ;;  %v14412_v26 = vpop.f32.mrf.mxu1 }
 0x9df   : > { %5527 = vmatpush1.msra.mxu0 %v5332_v56 }
 0x9e0   : > { %5528 = vmatprep.subr.mxu0 %v15901_v13  ;;  %v14415_v42 = vpop.f32.mrf.mxu1 }
 0x9e1   : > { %5529 = vmatpush1.msra.mxu0 %v10261_v11  ;;  %v5372_v11 = vpop.f32.mrf.mxu0 }
 0x9e2   : > { %5530 = vmatprep.subr.mxu0 %v15901_v13  ;;  %v14418_v49 = vpop.f32.mrf.mxu1 }
 0x9e3   : > { %5531 = vmatpush1.msra.mxu0 %v5322_v12  ;;  %v10279_v7 = vpop.f32.mrf.mxu0 }
 0x9e4   : > { %5532 = vmatprep.subr.mxu0 %v15901_v13  ;;  %v14421_v2 = vpop.f32.mrf.mxu1 }
 0x9e5   : > { %5533 = vmatpush1.msra.mxu0 %v10258_v14  ;;  %v5382_v3 = vpop.f32.mrf.mxu0 }
 0x9e6   : > { %5534 = vmatprep.subr.mxu0 %v15901_v13  ;;  %v14424_v16 = vpop.f32.mrf.mxu1 }
 0x9e7   : > { %5535 = vmatpush1.msra.mxu0 %v5312_v52 }
 0x9e8   : > { %5536 = vmatprep.subr.mxu0 %v15901_v13  ;;  %v14427_v56 = vpop.f32.mrf.mxu1 }
 0x9e9   : > { %5537 = vmatpush1.msra.mxu0 %v14377_v39 }
 0x9ea   : > { %5538 = vmatprep.subr.mxu0 %v15901_v13  ;;  %v14431_v12 = vpop.f32.mrf.mxu1 }
 0x9eb   : > { %5539 = vmatpush1.msra.mxu0 %v14382_v47 }
 0x9ec   : > { %5540 = vmatprep.subr.mxu0 %v15901_v13  ;;  %v10326_v14 = vpop.f32.mrf.mxu1 }
 0x9ed   : > { %5541 = vmatpush1.msra.mxu0 %v14370_v0  ;;  %v8245_v0 = vld [vmem:[%s15694_s7 + $0x600] sm:$0xff] }
 0x9ee   : > { %5542 = vmatprep.subr.mxu0 %v15901_v13  ;;  %v5827_v52 = vpop.f32.mrf.mxu1 }
 0x9ef   : > { %5543 = vmatpush1.msra.mxu0 %v14375_v35 }
 0x9f0   : > { %5568 = vmatprep.subr.mxu0 %v15901_v13  ;;  %v10329_v39 = vpop.f32.mrf.mxu1 }
 0x9f1   : > { %5569 = vmatpush2.msra.mxu0 %v10279_v7  ;;  %v8268_v7 = vld [vmem:[%s15694_s7 + $0x6b8] sm:$0xff] }
 0x9f2   : > { %5570 = vmatprep.subr.mxu0 %v15901_v13  ;;  %v5837_v8 = vpop.f32.mrf.mxu1 }
 0x9f3   : > { %5571 = vmatpush2.msra.mxu0 %v5382_v3  ;;  %v8270_v3 = vld [vmem:[%s15694_s7 + $0x6c8] sm:$0xff] }
 0x9f4   : > { %5572 = vmatprep.subr.mxu0 %v15901_v13  ;;  %v10332_v47 = vpop.f32.mrf.mxu1 }
 0x9f5   : > { %5573 = vmatpush2.msra.mxu0 %v10276_v34  ;;  %v8253_v34 = vld [vmem:[%s15694_s7 + $0x640] sm:$0xff] }
 0x9f6   : > { %5574 = vmatprep.subr.mxu0 %v15901_v13  ;;  %v5847_v35 = vpop.f32.mrf.mxu1 }
 0x9f7   : > { %5575 = vmatpush2.msra.mxu0 %v5372_v11  ;;  %v8255_v11 = vld [vmem:[%s15694_s7 + $0x650] sm:$0xff] }
 0x9f8   : > { %5577 = vmatmul.mubr.f32.vlgmr.msra.gmra.mxu0 %v8245_v0  ;;  %v10335_v59 = vpop.f32.mrf.mxu1  ;;  %10342 = vmatprep.subr.msk.mxu0 %vm16192_vm6, %v15862_v21  ;;  %vm16203_vm6 = vmmov %vm16202_vm5  ;;  %v8337_v0 = vld [vmem:[%s15694_s7 + $0x7a0] sm:$0xff] }
 0x9f9   : > { %6008 = vmatpush1.msra.mxu1 %v10335_v59  ;;  %8294 = vmatprep.mubr.msk.f32.mxu0 %vm3721_vm10, %v8248_v10  ;;  %v8340_v10 = vld [vmem:[%s15694_s7 + $0x7b8] sm:$0xff]  ;;  %v8271_v59 = vld [vmem:[%s15694_s7 + $0x6d0] sm:$0xff] }
 0x9fa   : > { %v5857_v9 = vpop.f32.mrf.mxu1  ;;  %6009 = vmatprep.subr.mxu1 %v15901_v13  ;;  %10343 = vmatpush3.msk.msra.mxu0 %vm16193_vm7, %v15862_v21  ;;  %vm16204_vm7 = vcmp.eq.s32.totalorder %v15964_v54, 3  ;;  %v8264_v54 = vld [vmem:[%s15694_s7 + $0x698] sm:$0xff] }
 0x9fb   : > { %6010 = vmatpush1.msra.mxu1 %v5857_v9  ;;  %10344 = vmatprep.subr.msk.mxu0 %vm16194_vm8, %v15862_v21  ;;  %vm16205_vm8 = vmmov %vm16204_vm7  ;;  %v8342_v9 = vld [vmem:[%s15694_s7 + $0x7c8] sm:$0xff] }
 0x9fc   : > { %5582 = vmatmul.mubr.f32.gmra.mxu0 %v8247_v61  ;;  %6011 = vmatprep.subr.mxu1 %v15901_v13  ;;  %v8274_v61 = vld [vmem:[%s15694_s7 + $0x6e8] sm:$0xff] }
 0x9fd   : > { %6012 = vmatpush1.msra.mxu1 %v10332_v47  ;;  %8295 = vmatprep.mubr.msk.f32.mxu0 %vm3721_vm10, %v8250_v63  ;;  %v10493_v47 = vld [vmem:[%s10702_s24] sm:$0xf] }
 0x9fe   : > { %6013 = vmatprep.subr.mxu1 %v15901_v13  ;;  %10345 = vmatpush3.msk.msra.mxu0 %vm16195_vm9, %v15862_v21  ;;  %vm16206_vm9 = vcmp.eq.s32.totalorder %v15967_v55, 3  ;;  %v8266_v55 = vld [vmem:[%s15694_s7 + $0x6a8] sm:$0xff]  ;;  %v8273_v63 = vld [vmem:[%s15694_s7 + $0x6e0] sm:$0xff] }
 0x9ff   : > { %6014 = vmatpush1.msra.mxu1 %v5847_v35  ;;  %10346 = vmatprep.subr.msk.mxu0 %vm16196_vm11, %v15862_v21  ;;  %vm16207_vm11 = vmmov %vm16206_vm9  ;;  %v8272_v35 = vld [vmem:[%s15694_s7 + $0x6d8] sm:$0xff] }
 0xa00   : > { %5587 = vmatmul.mubr.f32.gmra.mxu0 %v8249_v58  ;;  %6015 = vmatprep.subr.mxu1 %v15901_v13  ;;  %v8341_v58 = vld [vmem:[%s15694_s7 + $0x7c0] sm:$0xff] }
 0xa01   : > { %6016 = vmatpush1.msra.mxu1 %v10329_v39  ;;  %8296 = vmatprep.mubr.msk.f32.mxu0 %vm3721_vm10, %v8252_v48  ;;  %v8267_v39 = vld [vmem:[%s15694_s7 + $0x6b0] sm:$0xff]  ;;  %v8344_v48 = vld [vmem:[%s15694_s7 + $0x7d8] sm:$0xff] }
 0xa02   : > { %6017 = vmatprep.subr.mxu1 %v15901_v13  ;;  %10347 = vmatpush3.msk.msra.mxu0 %vm16197_vm12, %v15862_v21  ;;  %vm16208_vm12 = vcmp.eq.s32.totalorder %v15970_v40, 3  ;;  %v8333_v40 = vld [vmem:[%s15694_s7 + $0x780] sm:$0xff] }
 0xa03   : > { %6018 = vmatpush1.msra.mxu1 %v5837_v8  ;;  %10348 = vmatprep.subr.msk.mxu0 %vm16198_vm13, %v15862_v21  ;;  %vm16209_vm13 = vmmov %vm16208_vm12  ;;  %v8338_v8 = vld [vmem:[%s15694_s7 + $0x7a8] sm:$0xff] }
 0xa04   : > { %5592 = vmatmul.mubr.f32.gmra.mxu0 %v8251_v46  ;;  %6019 = vmatprep.subr.mxu1 %v15901_v13  ;;  %v8275_v46 = vld [vmem:[%s15694_s7 + $0x6f0] sm:$0xff] }
 0xa05   : > { %6020 = vmatpush1.msra.mxu1 %v10326_v14  ;;  %8297 = vmatprep.mubr.msk.f32.mxu0 %vm3721_vm10, %v8254_v57  ;;  %v10338_v14 = vpop.f32.mrf.mxu1  ;;  %v8343_v57 = vld [vmem:[%s15694_s7 + $0x7d0] sm:$0xff] }
 0xa06   : > { %6021 = vmatprep.subr.mxu1 %v15901_v13  ;;  %10349 = vmatpush3.msk.msra.mxu0 %vm16199_vm2, %v15862_v21  ;;  %vm16210_vm2 = vcmp.eq.s32.totalorder %v15973_v31, 3  ;;  %v8335_v31 = vld [vmem:[%s15694_s7 + $0x790] sm:$0xff] }
 0xa07   : > { %6022 = vmatpush1.msra.mxu1 %v5827_v52  ;;  %10350 = vmatprep.subr.msk.mxu0 %vm16200_vm3, %v15862_v21  ;;  %v8336_v52 = vld [vmem:[%s15694_s7 + $0x798] sm:$0xff]  ;;  %vm16211_vm3 = vmmov %vm16210_vm2 }
 0xa08   : > { %5597 = vmatmul.mubr.f32.gmra.mxu0 %v8253_v34  ;;  %6023 = vmatprep.subr.mxu1 %v15901_v13  ;;  %v8346_v34 = vld [vmem:[%s15694_s7 + $0x7e8] sm:$0xff] }
 0xa09   : > { %6024 = vmatpush1.msra.mxu1 %v14427_v56  ;;  %8298 = vmatprep.mubr.msk.f32.mxu0 %vm3721_vm10, %v8256_v15  ;;  %v8257_v56 = vld [vmem:[%s15694_s7 + $0x660] sm:$0xff] }
 0xa0a   : > { %6025 = vmatprep.subr.mxu1 %v15901_v13  ;;  %10351 = vmatpush3.msk.msra.mxu0 %vm16201_vm4, %v15862_v21  ;;  %vm16212_vm4 = vcmp.eq.s32.totalorder %v15976_v33, 3  ;;  %v8269_v33 = vld [vmem:[%s15694_s7 + $0x6c0] sm:$0xff] }
 0xa0b   : > { %6026 = vmatpush1.msra.mxu1 %v14431_v12  ;;  %10352 = vmatprep.subr.msk.mxu0 %vm16202_vm5, %v15862_v21  ;;  %v5867_v12 = vpop.f32.mrf.mxu1  ;;  %vm16213_vm5 = vmmov %vm16212_vm4  ;;  %v8277_v15 = vld [vmem:[%s15694_s7 + $0x700] sm:$0xff] }
 0xa0c   : > { %5602 = vmatmul.mubr.f32.gmra.mxu0 %v8255_v11  ;;  %6027 = vmatprep.subr.mxu1 %v15901_v13  ;;  %v8345_v11 = vld [vmem:[%s15694_s7 + $0x7e0] sm:$0xff] }
 0xa0d   : > { %6028 = vmatpush1.msra.mxu1 %v14421_v2  ;;  %8299 = vmatprep.mubr.msk.f32.mxu0 %vm3721_vm10, %v8258_v20  ;;  %v8259_v2 = vld [vmem:[%s15694_s7 + $0x670] sm:$0xff]  ;;  %v8348_v20 = vld [vmem:[%s15694_s7 + $0x7f8] sm:$0xff] }
 0xa0e   : > { %6029 = vmatprep.subr.mxu1 %v15901_v13  ;;  %10353 = vmatpush3.msk.msra.mxu0 %vm16203_vm6, %v15862_v21  ;;  %vm16214_vm6 = vcmask 1043456  }
 0xa0f   : > { %6030 = vmatpush1.msra.mxu1 %v14424_v16  ;;  %10354 = vmatprep.subr.msk.mxu0 %vm16204_vm7, %v15862_v21  ;;  %v10341_v16 = vpop.f32.mrf.mxu1  ;;  %vm16215_vm7 = vcmp.eq.s32.totalorder %v15979_v38, 3  ;;  %v8339_v38 = vld [vmem:[%s15694_s7 + $0x7b0] sm:$0xff] }
 0xa10   : > { %5607 = vmatmul.mubr.f32.gmra.mxu0 %v8257_v56  ;;  %6031 = vmatprep.subr.mxu1 %v15901_v13  ;;  %v8279_v56 = vld [vmem:[%s15694_s7 + $0x710] sm:$0xff] }
 0xa11   : > { %6032 = vmatpush1.msra.mxu1 %v14415_v42  ;;  %8300 = vmatprep.mubr.msk.f32.mxu0 %vm3721_vm10, %v8260_v18  ;;  %v8261_v42 = vld [vmem:[%s15694_s7 + $0x680] sm:$0xff] }
 0xa12   : > { %6033 = vmatprep.subr.mxu1 %v15901_v13  ;;  %10355 = vmatpush3.msk.msra.mxu0 %vm16205_vm8, %v15862_v21  ;;  %vm16216_vm8 = vmmov %vm16214_vm6  ;;  %v8281_v18 = vld [vmem:[%s15694_s7 + $0x720] sm:$0xff] }
 0xa13   : > { %6034 = vmatpush1.msra.mxu1 %v14418_v49  ;;  %10356 = vmatprep.subr.msk.mxu0 %vm16206_vm9, %v15862_v21  ;;  %v5877_v49 = vpop.f32.mrf.mxu1  ;;  %vm16217_vm9 = vmmov %vm16215_vm7 }
 0xa14   : > { %5612 = vmatmul.mubr.f32.gmra.mxu0 %v8259_v2  ;;  %6035 = vmatprep.subr.mxu1 %v15901_v13  ;;  %v8349_v2 = vld [vmem:[%s15694_s7 + $0x800] sm:$0xff] }
 0xa15   : > { %6036 = vmatpush1.msra.mxu1 %v14409_v50  ;;  %8301 = vmatprep.mubr.msk.f32.mxu0 %vm3721_vm10, %v8262_v23  ;;  %v8263_v50 = vld [vmem:[%s15694_s7 + $0x690] sm:$0xff]  ;;  %v8352_v23 = vld [vmem:[%s15694_s7 + $0x818] sm:$0xff] }
 0xa16   : > { %6037 = vmatprep.subr.mxu1 %v15901_v13  ;;  %10357 = vmatpush3.msk.msra.mxu0 %vm16207_vm11, %v15862_v21 }
 0xa17   : > { %6038 = vmatpush1.msra.mxu1 %v14412_v26  ;;  %10358 = vmatprep.subr.msk.mxu0 %vm16208_vm12, %v15862_v21  ;;  %v8265_v26 = vld [vmem:[%s15694_s7 + $0x6a0] sm:$0xff] }
 0xa18   : > { %5617 = vmatmul.mubr.f32.gmra.mxu0 %v8261_v42  ;;  %6063 = vmatprep.subr.mxu1 %v15901_v13  ;;  %v8283_v42 = vld [vmem:[%s15694_s7 + $0x730] sm:$0xff] }
 0xa19   : > { %6064 = vmatpush2.msra.mxu1 %v10341_v16  ;;  %8302 = vmatprep.mubr.msk.f32.mxu0 %vm3721_vm10, %v8264_v54  ;;  %v8351_v16 = vld [vmem:[%s15694_s7 + $0x810] sm:$0xff]  ;;  %v8286_v54 = vld [vmem:[%s15694_s7 + $0x748] sm:$0xff] }
 0xa1a   : > { %6065 = vmatprep.subr.mxu1 %v15901_v13  ;;  %10359 = vmatpush3.msk.msra.mxu0 %vm16209_vm13, %v15862_v21 }
 0xa1b   : > { %6066 = vmatpush2.msra.mxu1 %v5877_v49  ;;  %10360 = vmatprep.subr.msk.mxu0 %vm16210_vm2, %v15862_v21  ;;  %v8285_v49 = vld [vmem:[%s15694_s7 + $0x740] sm:$0xff] }
 0xa1c   : > { %5622 = vmatmul.mubr.f32.gmra.mxu0 %v8263_v50  ;;  %6067 = vmatprep.subr.mxu1 %v15901_v13  ;;  %v8354_v50 = vld [vmem:[%s15694_s7 + $0x828] sm:$0xff] }
 0xa1d   : > { %6068 = vmatpush2.msra.mxu1 %v10338_v14  ;;  %8303 = vmatprep.mubr.msk.f32.mxu0 %vm3721_vm10, %v8266_v55  ;;  %v8347_v14 = vld [vmem:[%s15694_s7 + $0x7f0] sm:$0xff]  ;;  %v8353_v55 = vld [vmem:[%s15694_s7 + $0x820] sm:$0xff] }
 0xa1e   : > { %6069 = vmatprep.subr.mxu1 %v15901_v13  ;;  %10361 = vmatpush3.msk.msra.mxu0 %vm16211_vm3, %v15862_v21 }
 0xa1f   : > { %6070 = vmatpush2.msra.mxu1 %v5867_v12  ;;  %10362 = vmatprep.subr.msk.mxu0 %vm16212_vm4, %v15862_v21  ;;  %v8284_v12 = vld [vmem:[%s15694_s7 + $0x738] sm:$0xff] }
 0xa20   : > { %5627 = vmatmul.mubr.f32.gmra.mxu0 %v8265_v26  ;;  %6072 = vmatmul.mubr.f32.vlgmr.msra.gmra.mxu1 %v8333_v40  ;;  %v8288_v26 = vld [vmem:[%s15694_s7 + $0x758] sm:$0xff] }
 0xa21   : > { %8304 = vmatprep.mubr.msk.f32.mxu0 %vm3721_vm10, %v8268_v7  ;;  %8382 = vmatprep.mubr.msk.f32.mxu1 %vm3721_vm10, %v8336_v52  ;;  %v8356_v40 = vld [vmem:[%s15694_s7 + $0x838] sm:$0xff]  ;;  %v8287_v7 = vld [vmem:[%s15694_s7 + $0x750] sm:$0xff] }
 0xa22   : > { %10363 = vmatpush3.msk.msra.mxu0 %vm16213_vm5, %v15862_v21  ;;  %10404 = vmatprep.subr.msk.mxu1 %vm16214_vm6, %v10493_v47  ;;  %v8355_v52 = vld [vmem:[%s15694_s7 + $0x830] sm:$0xff] }
 0xa23   : > { %10364 = vmatprep.subr.msk.mxu0 %vm16215_vm7, %v15862_v21  ;;  %10405 = vmatpush3.msk.msra.mxu1 %vm16216_vm8, %v10493_v47  ;;  %v8292_v47 = vld [vmem:[%s15694_s7 + $0x778] sm:$0xff] }
 0xa24   : > { %5632 = vmatmul.mubr.f32.gmra.mxu0 %v8267_v39  ;;  %6077 = vmatmul.mubr.f32.gmra.mxu1 %v8335_v31  ;;  %v8290_v39 = vld [vmem:[%s15694_s7 + $0x768] sm:$0xff] }
 0xa25   : > { %8305 = vmatprep.mubr.msk.f32.mxu0 %vm3721_vm10, %v8270_v3  ;;  %8383 = vmatprep.mubr.msk.f32.mxu1 %vm3721_vm10, %v8338_v8  ;;  %v8358_v31 = vld [vmem:[%s15694_s7 + $0x848] sm:$0xff]  ;;  %v8289_v3 = vld [vmem:[%s15694_s7 + $0x760] sm:$0xff] }
 0xa26   : > { %10365 = vmatpush3.msk.msra.mxu0 %vm16217_vm9, %v15862_v21  ;;  %7367 = vmatprep.subr.mxu1 %v15901_v13  ;;  %v8357_v8 = vld [vmem:[%s15694_s7 + $0x840] sm:$0xff] }
 0xa27   : > { %10366 = vmatprep.subr.msk.mxu0 %vm2899_vm1, %v15862_v21 }
 0xa28   : > { %5637 = vmatmul.mubr.f32.gmra.mxu0 %v8269_v33  ;;  %6082 = vmatmul.mubr.f32.gmra.mxu1 %v8337_v0  ;;  %v8360_v33 = vld [vmem:[%s15694_s7 + $0x858] sm:$0xff]  ;;  %v8291_v0 = vld [vmem:[%s15694_s7 + $0x770] sm:$0xff] }
 0xa29   : > { %8306 = vmatprep.mubr.msk.f32.mxu0 %vm3721_vm10, %v8272_v35  ;;  %8384 = vmatprep.mubr.msk.f32.mxu1 %vm3721_vm10, %v8340_v10  ;;  %v8359_v35 = vld [vmem:[%s15694_s7 + $0x850] sm:$0xff]  ;;  %v8362_v10 = vld [vmem:[%s15694_s7 + $0x868] sm:$0xff] }
 0xa2a   : > { %10367 = vmatpush3.msk.msra.mxu0 %vm2899_vm1, %v15862_v21 }
 0xa2b   : > { %10368 = vmatprep.subr.msk.mxu0 %vm2898_vm15, %v15862_v21 }
 0xa2c   : > { %5642 = vmatmul.mubr.f32.gmra.mxu0 %v8271_v59  ;;  %6087 = vmatmul.mubr.f32.gmra.mxu1 %v8339_v38  ;;  %v8361_v59 = vld [vmem:[%s15694_s7 + $0x860] sm:$0xff]  ;;  %v8364_v38 = vld [vmem:[%s15694_s7 + $0x878] sm:$0xff] }
 0xa2d   : > { %8307 = vmatprep.mubr.msk.f32.mxu0 %vm3721_vm10, %v8274_v61  ;;  %8385 = vmatprep.mubr.msk.f32.mxu1 %vm3721_vm10, %v8342_v9  ;;  %v8366_v61 = vld [vmem:[%s15694_s7 + $0x888] sm:$0xff]  ;;  %v16218_v9 = vld [vmem:[#allocation23_spill] sm:$0xff] }
 0xa2e   : > { %10369 = vmatpush3.msk.msra.mxu0 %vm2898_vm15, %v15862_v21 }
 0xa2f   : > { %10370 = vmatprep.subr.msk.mxu0 %vm2897_vm0, %v15862_v21 }
 0xa30   : > { %5647 = vmatmul.mubr.f32.gmra.mxu0 %v8273_v63  ;;  %6092 = vmatmul.mubr.f32.gmra.mxu1 %v8341_v58  ;;  %v16219_v63 = vld [vmem:[#allocation24_spill] sm:$0xff]  ;;  %v16220_v58 = vld [vmem:[#allocation61_spill] sm:$0xff] }
 0xa31   : > { %8308 = vmatprep.mubr.msk.f32.mxu0 %vm3721_vm10, %v8276_v19  ;;  %8386 = vmatprep.mubr.msk.f32.mxu1 %vm3721_vm10, %v8344_v48  ;;  %v8380_v19 = vld [vmem:[%s15694_s7 + $0x8f8] sm:$0xff]  ;;  %v16221_v48 = vld [vmem:[#allocation25_spill] sm:$0xff] }
 0xa32   : > { %10371 = vmatpush3.msk.msra.mxu0 %vm2897_vm0, %v15862_v21  ;;  %vm16224_vm0 = vcmask 31744  }
 0xa33   : > { %10372 = vmatprep.subr.msk.mxu0 %vm2896_vm14, %v15862_v21  ;;  %vm16226_vm15 = vmmov %vm16224_vm0 }
 0xa34   : > { %5652 = vmatmul.mubr.f32.gmra.mxu0 %v8275_v46  ;;  %6097 = vmatmul.mubr.f32.gmra.mxu1 %v8343_v57  ;;  %v16222_v46 = vld [vmem:[#allocation35_spill] sm:$0xff]  ;;  %v8379_v57 = vld [vmem:[%s15694_s7 + $0x8f0] sm:$0xff]  ;;  %vm16227_vm1 = vmmov %vm16224_vm0 }
 0xa35   : > { %8309 = vmatprep.mubr.msk.f32.mxu0 %vm3721_vm10, %v8278_v28  ;;  %8387 = vmatprep.mubr.msk.f32.mxu1 %vm3721_vm10, %v8346_v34  ;;  %v6903_v28 = vld [vmem:[%s15688_s1] sm:$0xff]  ;;  %v16223_v34 = vld [vmem:[#allocation45_spill] sm:$0xff]  ;;  %vm16228_vm11 = vmmov %vm16224_vm0 }
 0xa36   : > { %10373 = vmatpush3.msk.msra.mxu0 %vm2896_vm14, %v15862_v21  ;;  %v8282_v21 = vld [vmem:[%s15694_s7 + $0x728] sm:$0xff]  ;;  %vm16225_vm14 = vmmov %vm16224_vm0 }
 0xa37   : > { %6502 = vmatprep.subr.mxu0 %v15901_v13  ;;  %vm16229_vm12 = vmmov %vm16224_vm0 }
 0xa38   : > { %5657 = vmatmul.mubr.f32.gmra.mxu0 %v8277_v15  ;;  %6102 = vmatmul.mubr.f32.gmra.mxu1 %v8345_v11  ;;  %v6904_v15 = vld [vmem:[%s15688_s1 + $0x8] sm:$0xff]  ;;  %v6905_v11 = vld [vmem:[%s15688_s1 + $0x10] sm:$0xff]  ;;  %vm16230_vm13 = vmmov %vm16224_vm0 }
 0xa39   : > { %8310 = vmatprep.mubr.msk.f32.mxu0 %vm3721_vm10, %v8280_v62  ;;  %8388 = vmatprep.mubr.msk.f32.mxu1 %vm3721_vm10, %v8348_v20  ;;  %v6906_v62 = vld [vmem:[%s15688_s1 + $0x18] sm:$0xff]  ;;  %v6907_v20 = vld [vmem:[%s15688_s1 + $0x20] sm:$0xff]  ;;  %vm16231_vm2 = vmmov %vm16224_vm0 }
 0xa3a   : > { %vm16232_vm3 = vmmov %vm16224_vm0 }
 0xa3b   : > { %vm16233_vm4 = vmmov %vm16224_vm0 }
 0xa3c   : > { %5662 = vmatmul.mubr.f32.gmra.mxu0 %v8279_v56  ;;  %6107 = vmatmul.mubr.f32.gmra.mxu1 %v8347_v14  ;;  %v6908_v56 = vld [vmem:[%s15688_s1 + $0x28] sm:$0xff]  ;;  %v6909_v14 = vld [vmem:[%s15688_s1 + $0x30] sm:$0xff]  ;;  %vm16234_vm5 = vmmov %vm16224_vm0 }
 0xa3d   : > { %8311 = vmatprep.mubr.msk.f32.mxu0 %vm3721_vm10, %v8282_v21  ;;  %8389 = vmatprep.mubr.msk.f32.mxu1 %vm3721_vm10, %v8350_v25  ;;  %v6910_v21 = vld [vmem:[%s15688_s1 + $0x38] sm:$0xff]  ;;  %v6911_v25 = vld [vmem:[%s15688_s1 + $0x40] sm:$0xff]  ;;  %vm16235_vm6 = vmmov %vm16224_vm0 }
 0xa3e   : > { %vm16236_vm7 = vmmov %vm16224_vm0 }
 0xa3f   : > { %vm16237_vm8 = vmmov %vm16224_vm0 }
 0xa40   : > { %5667 = vmatmul.mubr.f32.gmra.mxu0 %v8281_v18  ;;  %6112 = vmatmul.mubr.f32.gmra.mxu1 %v8349_v2  ;;  %v6912_v18 = vld [vmem:[%s15688_s1 + $0x48] sm:$0xff]  ;;  %v6913_v2 = vld [vmem:[%s15688_s1 + $0x50] sm:$0xff]  ;;  %vm16238_vm9 = vmmov %vm16224_vm0 }
 0xa41   : > { %8312 = vmatprep.mubr.msk.f32.mxu0 %vm3721_vm10, %v8284_v12  ;;  %8390 = vmatprep.mubr.msk.f32.mxu1 %vm3721_vm10, %v8352_v23  ;;  %v6914_v12 = vld [vmem:[%s15688_s1 + $0x58] sm:$0xff]  ;;  %v6915_v23 = vld [vmem:[%s15688_s1 + $0x60] sm:$0xff] }
 0xa44   : > { %5672 = vmatmul.mubr.f32.gmra.mxu0 %v8283_v42  ;;  %6117 = vmatmul.mubr.f32.gmra.mxu1 %v8351_v16  ;;  %v6916_v42 = vld [vmem:[%s15688_s1 + $0x68] sm:$0xff]  ;;  %v6917_v16 = vld [vmem:[%s15688_s1 + $0x70] sm:$0xff] }
 0xa45   : > { %8313 = vmatprep.mubr.msk.f32.mxu0 %vm3721_vm10, %v8286_v54  ;;  %8391 = vmatprep.mubr.msk.f32.mxu1 %vm3721_vm10, %v8354_v50  ;;  %v6918_v54 = vld [vmem:[%s15688_s1 + $0x78] sm:$0xff]  ;;  %v6919_v50 = vld [vmem:[%s15688_s1 + $0x80] sm:$0xff] }
 0xa48   : > { %5677 = vmatmul.mubr.f32.gmra.mxu0 %v8285_v49  ;;  %6122 = vmatmul.mubr.f32.gmra.mxu1 %v8353_v55  ;;  %v6920_v49 = vld [vmem:[%s15688_s1 + $0x88] sm:$0xff]  ;;  %v6921_v55 = vld [vmem:[%s15688_s1 + $0x90] sm:$0xff] }
 0xa49   : > { %8314 = vmatprep.mubr.msk.f32.mxu0 %vm3721_vm10, %v8288_v26  ;;  %8392 = vmatprep.mubr.msk.f32.mxu1 %vm3721_vm10, %v8356_v40  ;;  %v6922_v26 = vld [vmem:[%s15688_s1 + $0x98] sm:$0xff]  ;;  %v6923_v40 = vld [vmem:[%s15688_s1 + $0xa0] sm:$0xff] }
 0xa4c   : > { %5682 = vmatmul.mubr.f32.gmra.mxu0 %v8287_v7  ;;  %6127 = vmatmul.mubr.f32.gmra.mxu1 %v8355_v52  ;;  %v6924_v7 = vld [vmem:[%s15688_s1 + $0xa8] sm:$0xff]  ;;  %v6925_v52 = vld [vmem:[%s15688_s1 + $0xb0] sm:$0xff] }
 0xa4d   : > { %8315 = vmatprep.mubr.msk.f32.mxu0 %vm3721_vm10, %v8290_v39  ;;  %8393 = vmatprep.mubr.msk.f32.mxu1 %vm3721_vm10, %v8358_v31  ;;  %v6926_v39 = vld [vmem:[%s15688_s1 + $0xb8] sm:$0xff] }
 0xa50   : > { %5687 = vmatmul.mubr.f32.gmra.mxu0 %v8289_v3  ;;  %6132 = vmatmul.mubr.f32.gmra.mxu1 %v8357_v8  ;;  %v16247_v3 = vld [vmem:[#allocation14_spill] sm:$0xff] }
 0xa51   : > { %8316 = vmatprep.mubr.msk.f32.mxu0 %vm3721_vm10, %v8292_v47  ;;  %8394 = vmatprep.mubr.msk.f32.mxu1 %vm3721_vm10, %v8360_v33 }
 0xa54   : > { %5692 = vmatmul.mubr.f32.gmra.mxu0 %v8291_v0  ;;  %6137 = vmatmul.mubr.f32.gmra.mxu1 %v8359_v35  ;;  %v16248_v0 = vld [vmem:[#allocation15_spill] sm:$0xff] }
 0xa55   : > { %10374 = vmatprep.mubr.f32.mxu0 %v12756_v1  ;;  %8395 = vmatprep.mubr.msk.f32.mxu1 %vm3721_vm10, %v8362_v10  ;;  %v8363_v1 = vld [vmem:[%s15694_s7 + $0x870] sm:$0xff] }
 0xa58   : > { %6142 = vmatmul.mubr.f32.gmra.mxu1 %v8361_v59  ;;  %10375 = vmatmul.mubr.f32.vlgmr.msra.gmra.mxu0 %v12763_v4  ;;  %v8365_v4 = vld [vmem:[%s15694_s7 + $0x880] sm:$0xff] }
 0xa59   : > { %10377 = vmatprep.mubr.f32.mxu0 %v12773_v45  ;;  %8396 = vmatprep.mubr.msk.f32.mxu1 %vm3721_vm10, %v8364_v38  ;;  %v8368_v45 = vld [vmem:[%s15694_s7 + $0x898] sm:$0xff]  ;;  %v16249_v38 = vld [vmem:[#allocation16_spill] sm:$0xff] }
 0xa5c   : > { %6147 = vmatmul.mubr.f32.gmra.mxu1 %v8363_v1  ;;  %10378 = vmatmul.mubr.f32.gmra.mxu0 %v12781_v29  ;;  %v8367_v29 = vld [vmem:[%s15694_s7 + $0x890] sm:$0xff] }
 0xa5d   : > { %10380 = vmatprep.mubr.f32.mxu0 %v12793_v43  ;;  %8397 = vmatprep.mubr.msk.f32.mxu1 %vm3721_vm10, %v8366_v61  ;;  %v8370_v43 = vld [vmem:[%s15694_s7 + $0x8a8] sm:$0xff] }
 0xa60   : > { %6152 = vmatmul.mubr.f32.gmra.mxu1 %v8365_v4  ;;  %10381 = vmatmul.mubr.f32.gmra.mxu0 %v12799_v30  ;;  %v8369_v30 = vld [vmem:[%s15694_s7 + $0x8a0] sm:$0xff] }
 0xa61   : > { %10383 = vmatprep.mubr.f32.mxu0 %v12810_v51  ;;  %8398 = vmatprep.mubr.msk.f32.mxu1 %vm3721_vm10, %v8368_v45  ;;  %v8372_v51 = vld [vmem:[%s15694_s7 + $0x8b8] sm:$0xff]  ;;  %v16250_v45 = vld [vmem:[#allocation17_spill] sm:$0xff] }
 0xa64   : > { %6157 = vmatmul.mubr.f32.gmra.mxu1 %v8367_v29  ;;  %10384 = vmatmul.mubr.f32.gmra.mxu0 %v12816_v6  ;;  %v8371_v6 = vld [vmem:[%s15694_s7 + $0x8b0] sm:$0xff] }
 0xa65   : > { %10386 = vmatprep.mubr.f32.mxu0 %v12827_v5  ;;  %8399 = vmatprep.mubr.msk.f32.mxu1 %vm3721_vm10, %v8370_v43  ;;  %v8374_v5 = vld [vmem:[%s15694_s7 + $0x8c8] sm:$0xff] }
 0xa68   : > { %6162 = vmatmul.mubr.f32.gmra.mxu1 %v8369_v30  ;;  %10387 = vmatmul.mubr.f32.gmra.mxu0 %v12832_v44  ;;  %v8373_v44 = vld [vmem:[%s15694_s7 + $0x8c0] sm:$0xff] }
 0xa69   : > { %10389 = vmatprep.mubr.f32.mxu0 %v12842_v37  ;;  %8400 = vmatprep.mubr.msk.f32.mxu1 %vm3721_vm10, %v8372_v51  ;;  %v8376_v37 = vld [vmem:[%s15694_s7 + $0x8d8] sm:$0xff] }
 0xa6a   : > { %v16251_v51 = vld [vmem:[#allocation18_spill] sm:$0xff] }
 0xa6c   : > { %6167 = vmatmul.mubr.f32.gmra.mxu1 %v8371_v6  ;;  %10390 = vmatmul.mubr.f32.gmra.mxu0 %v12847_v53  ;;  %v8375_v53 = vld [vmem:[%s15694_s7 + $0x8d0] sm:$0xff] }
 0xa6d   : > { %10392 = vmatprep.mubr.f32.mxu0 %v12854_v32  ;;  %8401 = vmatprep.mubr.msk.f32.mxu1 %vm3721_vm10, %v8374_v5  ;;  %v8378_v32 = vld [vmem:[%s15694_s7 + $0x8e8] sm:$0xff] }
 0xa70   : > { %6172 = vmatmul.mubr.f32.gmra.mxu1 %v8373_v44  ;;  %10393 = vmatmul.mubr.f32.gmra.mxu0 %v12859_v27  ;;  %v8377_v27 = vld [vmem:[%s15694_s7 + $0x8e0] sm:$0xff] }
 0xa71   : > { %10395 = vmatprep.mubr.f32.mxu0 %v16218_v9  ;;  %8402 = vmatprep.mubr.msk.f32.mxu1 %vm3721_vm10, %v8376_v37  ;;  %v16252_v37 = vld [vmem:[#allocation19_spill] sm:$0xff] }
 0xa74   : > { %6177 = vmatmul.mubr.f32.gmra.mxu1 %v8375_v53  ;;  %10396 = vmatmul.mubr.f32.gmra.mxu0 %v16219_v63  ;;  %v16253_v63 = vld [vmem:[#allocation20_spill] sm:$0xff] }
 0xa75   : > { %10398 = vmatprep.mubr.f32.mxu0 %v16220_v58  ;;  %8403 = vmatprep.mubr.msk.f32.mxu1 %vm3721_vm10, %v8378_v32 }
 0xa78   : > { %6182 = vmatmul.mubr.f32.gmra.mxu1 %v8377_v27  ;;  %10399 = vmatmul.mubr.f32.gmra.mxu0 %v16221_v48  ;;  %v16254_v48 = vld [vmem:[#allocation21_spill] sm:$0xff] }
 0xa79   : > { %10401 = vmatprep.mubr.f32.mxu0 %v16222_v46  ;;  %8404 = vmatprep.mubr.msk.f32.mxu1 %vm3721_vm10, %v8380_v19 }
 0xa7c   : > { %6187 = vmatmul.mubr.f32.gmra.mxu1 %v8379_v57  ;;  %10402 = vmatmul.mubr.f32.gmra.mxu0 %v16223_v34  ;;  %v16255_v34 = vld [vmem:[#allocation31_spill] sm:$0xff] }
 0xa7d   : > { %10406 = vmatprep.mubr.msk.f32.mxu1 %vm16224_vm0, %v6903_v28 }
 0xa80   : > { %10407 = vmatmul.mubr.msk.f32.vlgmr.msra.gmra.mxu1 %vm16225_vm14, %v6904_v15  ;;  %vm16239_vm14 = vmmov %vm16224_vm0 }
 0xa81   : > { %10409 = vmatprep.mubr.msk.f32.mxu1 %vm16226_vm15, %v6905_v11  ;;  %vm16240_vm15 = vmmov %vm16224_vm0 }
 0xa84   : > { %10410 = vmatmul.mubr.msk.f32.gmra.mxu1 %vm16227_vm1, %v6906_v62  ;;  %vm16241_vm1 = vmmov %vm16224_vm0  ;;  %v8422_v62 = vld [vmem:[%s15694_s7 + $0x908] sm:$0xff] }
 0xa85   : > { %10412 = vmatprep.mubr.msk.f32.mxu1 %vm16228_vm11, %v6907_v20  ;;  %vm16242_vm11 = vmmov %vm16224_vm0  ;;  %8469 = vmatprep.mubr.msk.f32.mxu0 %vm3721_vm10, %v8422_v62 }
 0xa88   : > { %10413 = vmatmul.mubr.msk.f32.gmra.mxu1 %vm16229_vm12, %v6908_v56  ;;  %vm16243_vm12 = vmmov %vm16224_vm0  ;;  %v16256_v56 = vld [vmem:[#allocation26_spill] sm:$0xff] }
 0xa89   : > { %10415 = vmatprep.mubr.msk.f32.mxu1 %vm16230_vm13, %v6909_v14  ;;  %vm16244_vm13 = vmmov %vm16224_vm0 }
 0xa8c   : > { %10416 = vmatmul.mubr.msk.f32.gmra.mxu1 %vm16231_vm2, %v6910_v21  ;;  %vm16245_vm2 = vmmov %vm16224_vm0 }
 0xa8d   : > { %10418 = vmatprep.mubr.msk.f32.mxu1 %vm16232_vm3, %v6911_v25  ;;  %vm16246_vm3 = vmmov %vm16224_vm0 }
 0xa90   : > { %10419 = vmatmul.mubr.msk.f32.gmra.mxu1 %vm16233_vm4, %v6912_v18  ;;  %vm7360_vm4 = vcmask 523264  }
 0xa91   : > { %10421 = vmatprep.mubr.msk.f32.mxu1 %vm16234_vm5, %v6913_v2  ;;  %v16257_v2 = vld [vmem:[#allocation41_spill] sm:$0xff] }
 0xa94   : > { %10422 = vmatmul.mubr.msk.f32.gmra.mxu1 %vm16235_vm6, %v6914_v12  ;;  %vm16309_vm6 = vmmov %vm16224_vm0 }
 0xa95   : > { %10424 = vmatprep.mubr.msk.f32.mxu1 %vm16236_vm7, %v6915_v23  ;;  %vm16310_vm7 = vmmov %vm16224_vm0 }
 0xa98   : > { %10425 = vmatmul.mubr.msk.f32.gmra.mxu1 %vm16237_vm8, %v6916_v42 }
 0xa99   : > { %10427 = vmatprep.mubr.msk.f32.mxu1 %vm16238_vm9, %v6917_v16 }
 0xa9c   : > { %10428 = vmatmul.mubr.msk.f32.gmra.mxu1 %vm16224_vm0, %v6918_v54 }
 0xa9d   : > { %10430 = vmatprep.mubr.msk.f32.mxu1 %vm16239_vm14, %v6919_v50 }
 0xaa0   : > { %10431 = vmatmul.mubr.msk.f32.gmra.mxu1 %vm16240_vm15, %v6920_v49  ;;  %v16258_v49 = vld [vmem:[#allocation36_spill] sm:$0xff] }
 0xaa1   : > { %10433 = vmatprep.mubr.msk.f32.mxu1 %vm16241_vm1, %v6921_v55 }
 0xaa4   : > { %10434 = vmatmul.mubr.msk.f32.gmra.mxu1 %vm16242_vm11, %v6922_v26 }
 0xaa5   : > { %10436 = vmatprep.mubr.msk.f32.mxu1 %vm16243_vm12, %v6923_v40 }
 0xaa8   : > { %10437 = vmatmul.mubr.msk.f32.gmra.mxu1 %vm16244_vm13, %v6924_v7 }
 0xaa9   : > { %10439 = vmatprep.mubr.msk.f32.mxu1 %vm16245_vm2, %v6925_v52 }
 0xaac   : > { %10440 = vmatmul.mubr.msk.f32.gmra.mxu1 %vm16246_vm3, %v6926_v39 }
 0xab8   : > { %v5578_v31 = vpop.f32.mrf.mxu0 }
 0xab9   : > { %v5697_v8 = vadd.f32 %v5578_v31, %v16247_v3  ;;  %v16259_v31 = vld [vmem:[#allocation60_spill] sm:$0xff] }
 0xaba   : > { %v5580_v47 = vpop.f32.mrf.mxu0 }
 0xabc   : > { %v5583_v33 = vpop.f32.mrf.mxu0 }
 0xabd   : > { %v5698_v35 = vadd.f32 %v5583_v33, %v16248_v0 }
 0xabe   : > { %v5585_v10 = vpop.f32.mrf.mxu0 }
 0xac0   : > { %v5588_v59 = vpop.f32.mrf.mxu0 }
 0xac1   : > { %v5699_v1 = vadd.f32 %v5588_v59, %v16249_v38  ;;  %v16260_v59 = vld [vmem:[#allocation54_spill] sm:$0xff] }
 0xac2   : > { %v5590_v61 = vpop.f32.mrf.mxu0 }
 0xac4   : > { %v5593_v4 = vpop.f32.mrf.mxu0 }
 0xac5   : > { %v5700_v29 = vadd.f32 %v5593_v4, %v16250_v45 }
 0xac6   : > { %v5595_v43 = vpop.f32.mrf.mxu0 }
 0xac8   : > { %v5598_v30 = vpop.f32.mrf.mxu0 }
 0xac9   : > { %v5701_v6 = vadd.f32 %v5598_v30, %v16251_v51  ;;  %v16261_v30 = vld [vmem:[#allocation51_spill] sm:$0xff] }
 0xaca   : > { %v5600_v5 = vpop.f32.mrf.mxu0 }
 0xacc   : > { %v5603_v44 = vpop.f32.mrf.mxu0 }
 0xacd   : > { %v5702_v9 = vadd.f32 %v5603_v44, %v16252_v37 }
 0xace   : > { %v5605_v53 = vpop.f32.mrf.mxu0 }
 0xad0   : > { %v5608_v32 = vpop.f32.mrf.mxu0 }
 0xad1   : > { %v5703_v58 = vadd.f32 %v5608_v32, %v16253_v63  ;;  %v16262_v32 = vld [vmem:[#allocation46_spill] sm:$0xff] }
 0xad2   : > { %v5610_v27 = vpop.f32.mrf.mxu0 }
 0xad4   : > { %v5613_v19 = vpop.f32.mrf.mxu0 }
 0xad5   : > { %v5704_v46 = vadd.f32 %v5613_v19, %v16254_v48 }
 0xad6   : > { %v5615_v57 = vpop.f32.mrf.mxu0 }
 0xad8   : > { %v5618_v28 = vpop.f32.mrf.mxu0 }
 0xad9   : > { %v5705_v15 = vadd.f32 %v5618_v28, %v16255_v34  ;;  %v16264_v28 = vld [vmem:[#allocation32_spill] sm:$0xff] }
 0xada   : > { %v5620_v11 = vpop.f32.mrf.mxu0 }
 0xadc   : > { %v5623_v20 = vpop.f32.mrf.mxu0 }
 0xadd   : > { %v15028_v14 = vadd.f32 %v5623_v20, %v16256_v56  ;;  %v15065_v20 = vpop.permute.xlu0 %6812 }
 0xade   : > { %v5625_v21 = vpop.f32.mrf.mxu0 }
 0xae0   : > { %v5628_v25 = vpop.f32.mrf.mxu0  ;;  %v6073_v18 = vpop.f32.mrf.mxu1 }
 0xae1   : > { %v15031_v12 = vadd.f32 %v5628_v25, %v16257_v2  ;;  %v15033_v23 = vadd.f32 %v6073_v18, %v5697_v8  ;;  %v15067_v25 = vpop.permute.xlu1 %6807  ;;  %v16266_v18 = vld [vmem:[#allocation27_spill] sm:$0xff] }
 0xae2   : > { %v5630_v42 = vpop.f32.mrf.mxu0  ;;  %v6075_v16 = vpop.f32.mrf.mxu1 }
 0xae4   : > { %v5633_v54 = vpop.f32.mrf.mxu0  ;;  %v6078_v50 = vpop.f32.mrf.mxu1 }
 0xae5   : > { %v15036_v55 = vadd.f32 %v5633_v54, %v16258_v49  ;;  %v15038_v26 = vadd.f32 %v6078_v50, %v5698_v35  ;;  %v15074_v49 = vpop.permute.xlu0 %6802 }
 0xae6   : > { %v5635_v40 = vpop.f32.mrf.mxu0  ;;  %v6080_v7 = vpop.f32.mrf.mxu1 }
 0xae8   : > { %v5638_v52 = vpop.f32.mrf.mxu0  ;;  %v6083_v39 = vpop.f32.mrf.mxu1 }
 0xae9   : > { %v15041_v3 = vadd.f32 %v5638_v52, %v16259_v31  ;;  %v15043_v47 = vadd.f32 %v6083_v39, %v5699_v1  ;;  %v15081_v39 = vpop.permute.xlu1 %7028 }
 0xaea   : > { %v5640_v8 = vpop.f32.mrf.mxu0  ;;  %v6085_v33 = vpop.f32.mrf.mxu1 }
 0xaec   : > { %v5643_v0 = vpop.f32.mrf.mxu0  ;;  %v6088_v10 = vpop.f32.mrf.mxu1 }
 0xaed   : > { %v15046_v38 = vadd.f32 %v5643_v0, %v16260_v59  ;;  %v15048_v61 = vadd.f32 %v6088_v10, %v5700_v29  ;;  %v15089_v59 = vpop.permute.xlu0 %6797 }
 0xaee   : > { %v5645_v35 = vpop.f32.mrf.mxu0  ;;  %v6090_v4 = vpop.f32.mrf.mxu1 }
 0xaf0   : > { %v5648_v45 = vpop.f32.mrf.mxu0  ;;  %v6093_v43 = vpop.f32.mrf.mxu1 }
 0xaf1   : > { %v15051_v51 = vadd.f32 %v5648_v45, %v16261_v30  ;;  %v15053_v5 = vadd.f32 %v6093_v43, %v5701_v6 }
 0xaf2   : > { %v5650_v1 = vpop.f32.mrf.mxu0  ;;  %v6095_v44 = vpop.f32.mrf.mxu1 }
 0xaf4   : > { %v5653_v37 = vpop.f32.mrf.mxu0  ;;  %v6098_v53 = vpop.f32.mrf.mxu1 }
 0xaf5   : > { %v15056_v63 = vadd.f32 %v5653_v37, %v16262_v32  ;;  %v15058_v27 = vadd.f32 %v6098_v53, %v5702_v9 }
 0xaf6   : > { %v5655_v29 = vpop.f32.mrf.mxu0  ;;  %v6100_v19 = vpop.f32.mrf.mxu1 }
 0xaf7   : > { %16263 = vst [vmem:[#allocation42_spill] sm:$0xff] %v15058_v27  ;;  %v8425_v27 = vld [vmem:[%s15694_s7 + $0x920] sm:$0xff] }
 0xaf8   : > { %v5658_v48 = vpop.f32.mrf.mxu0  ;;  %v6103_v57 = vpop.f32.mrf.mxu1 }
 0xaf9   : > { %v15061_v34 = vadd.f32 %v5658_v48, %v16264_v28  ;;  %v15063_v11 = vadd.f32 %v6103_v57, %v5703_v58 }
 0xafa   : > { %v5660_v6 = vpop.f32.mrf.mxu0  ;;  %v6105_v62 = vpop.f32.mrf.mxu1 }
 0xafb   : > { %16265 = vst [vmem:[#allocation37_spill] sm:$0xff] %v15063_v11 }
 0xafc   : > { %v5663_v56 = vpop.f32.mrf.mxu0  ;;  %v6108_v21 = vpop.f32.mrf.mxu1 }
 0xafd   : > { %v15070_v9 = vadd.f32 %v5663_v56, %v16266_v18  ;;  %v15072_v2 = vadd.f32 %v6108_v21, %v5704_v46 }
 0xafe   : > { %v5665_v42 = vpop.f32.mrf.mxu0  ;;  %v6110_v16 = vpop.f32.mrf.mxu1 }
 0xb00   : > { %v5668_v54 = vpop.f32.mrf.mxu0  ;;  %v6113_v50 = vpop.f32.mrf.mxu1 }
 0xb01   : > { %v15077_v58 = vadd.f32 %v5668_v54, %v14391_v36  ;;  %v15079_v40 = vadd.f32 %v6113_v50, %v5705_v15  ;;  %v15091_v15 = vpop.permute.xlu1 %7023 }
 0xb02   : > { %v5670_v7 = vpop.f32.mrf.mxu0  ;;  %v6115_v52 = vpop.f32.mrf.mxu1 }
 0xb04   : > { %v5673_v31 = vpop.f32.mrf.mxu0  ;;  %v6118_v8 = vpop.f32.mrf.mxu1 }
 0xb05   : > { %v15084_v46 = vadd.f32 %v5673_v31, %v14393_v41  ;;  %v15087_v33 = vadd.f32 %v6118_v8, %v15028_v14  ;;  %v15099_v14 = vpop.permute.xlu0 %6792  ;;  %v15107_v29 = vpop.permute.xlu1 %7018 }
 0xb06   : > { %v5675_v0 = vpop.f32.mrf.mxu0  ;;  %v6120_v10 = vpop.f32.mrf.mxu1 }
 0xb08   : > { %v5678_v36 = vpop.f32.mrf.mxu0  ;;  %v6123_v35 = vpop.f32.mrf.mxu1 }
 0xb09   : > { %v15094_v4 = vadd.f32 %v5678_v36, %v14395_v60  ;;  %v15097_v45 = vadd.f32 %v6123_v35, %v15031_v12  ;;  %v15115_v6 = vpop.permute.xlu0 %6787 }
 0xb0a   : > { %v5680_v43 = vpop.f32.mrf.mxu0  ;;  %v6125_v41 = vpop.f32.mrf.mxu1 }
 0xb0c   : > { %v5683_v30 = vpop.f32.mrf.mxu0  ;;  %v6128_v1 = vpop.f32.mrf.mxu1 }
 0xb0d   : > { %v15102_v44 = vadd.f32 %v5683_v30, %v14397_v17  ;;  %v15105_v37 = vadd.f32 %v6128_v1, %v15036_v55  ;;  %v15117_v55 = vpop.permute.xlu1 %7013 }
 0xb0e   : > { %v5685_v53 = vpop.f32.mrf.mxu0  ;;  %v6130_v32 = vpop.f32.mrf.mxu1 }
 0xb10   : > { %v5688_v60 = vpop.f32.mrf.mxu0  ;;  %v6133_v19 = vpop.f32.mrf.mxu1 }
 0xb11   : > { %v15110_v12 = vadd.f32 %v5688_v60, %v14401_v24  ;;  %v15113_v48 = vadd.f32 %v6133_v19, %v15041_v3  ;;  %v15127_v3 = vpop.permute.xlu0 %6782  ;;  %v15134_v52 = vpop.permute.xlu1 %7008 }
 0xb12   : > { %v5690_v57 = vpop.f32.mrf.mxu0  ;;  %v6135_v28 = vpop.f32.mrf.mxu1 }
 0xb14   : > { %v5693_v17 = vpop.f32.mrf.mxu0  ;;  %v6138_v62 = vpop.f32.mrf.mxu1 }
 0xb15   : > { %v15120_v56 = vadd.f32 %v5693_v17, %v14405_v22  ;;  %v15123_v21 = vadd.f32 %v6138_v62, %v15046_v38  ;;  %v15143_v10 = vpop.permute.xlu0 %6777 }
 0xb16   : > { %v5695_v18 = vpop.f32.mrf.mxu0  ;;  %v6140_v24 = vpop.f32.mrf.mxu1  ;;  %16267 = vst [vmem:[#allocation62_spill] sm:$0xff] %v15143_v10 }
 0xb18   : > { %v6143_v42 = vpop.f32.mrf.mxu1  ;;  %v15125_v16 = vpop.f32.mrf.mxu0 }
 0xb19   : > { %v15130_v54 = vadd.f32 %v6143_v42, %v15051_v51  ;;  %v15147_v51 = vpop.permute.xlu1 %7003 }
 0xb1a   : > { %v6145_v50 = vpop.f32.mrf.mxu1  ;;  %v15132_v7 = vpop.f32.mrf.mxu0 }
 0xb1c   : > { %v6148_v22 = vpop.f32.mrf.mxu1  ;;  %v15136_v31 = vpop.f32.mrf.mxu0 }
 0xb1d   : > { %v15139_v38 = vadd.f32 %v6148_v22, %v15056_v63  ;;  %v15154_v63 = vpop.permute.xlu0 %6772  ;;  %v15159_v57 = vpop.permute.xlu1 %6998 }
 0xb1e   : > { %v6150_v8 = vpop.f32.mrf.mxu1  ;;  %v15141_v0 = vpop.f32.mrf.mxu0  ;;  %16269 = vst [vmem:[#allocation52_spill] sm:$0xff] %v15154_v63 }
 0xb20   : > { %v6153_v36 = vpop.f32.mrf.mxu1  ;;  %v15145_v35 = vpop.f32.mrf.mxu0 }
 0xb21   : > { %v15150_v43 = vadd.f32 %v6153_v36, %v15061_v34  ;;  %v15164_v24 = vpop.permute.xlu0 %6767  ;;  %v15166_v22 = vpop.permute.xlu1 %6993 }
 0xb22   : > { %v6155_v41 = vpop.f32.mrf.mxu1  ;;  %v15152_v30 = vpop.f32.mrf.mxu0  ;;  %16272 = vst [vmem:[#allocation28_spill] sm:$0xff] %v15164_v24 }
 0xb23   : > { %16268 = vst [vmem:[#allocation55_spill] sm:$0xff] %v15150_v43 }
 0xb24   : > { %v6158_v1 = vpop.f32.mrf.mxu1  ;;  %v10385_v53 = vpop.f32.mrf.mxu0 }
 0xb25   : > { %v15157_v32 = vadd.f32 %v6158_v1, %v15070_v9  ;;  %v15176_v43 = vpop.permute.xlu1 %6988 }
 0xb26   : > { %v6160_v60 = vpop.f32.mrf.mxu1  ;;  %v6312_v19 = vpop.f32.mrf.mxu0 }
 0xb27   : > { %16270 = vst [vmem:[#allocation47_spill] sm:$0xff] %v15157_v32  ;;  %v15171_v60 = vpop.permute.xlu0 %6762 }
 0xb28   : > { %v6163_v28 = vpop.f32.mrf.mxu1  ;;  %v10388_v17 = vpop.f32.mrf.mxu0  ;;  %16274 = vst [vmem:[#allocation38_spill] sm:$0xff] %v15171_v60 }
 0xb29   : > { %v15162_v62 = vadd.f32 %v6163_v28, %v15077_v58 }
 0xb2a   : > { %v6165_v34 = vpop.f32.mrf.mxu1  ;;  %v6322_v18 = vpop.f32.mrf.mxu0 }
 0xb2b   : > { %16271 = vst [vmem:[#allocation33_spill] sm:$0xff] %v15162_v62 }
 0xb2c   : > { %v6168_v42 = vpop.f32.mrf.mxu1  ;;  %v10391_v50 = vpop.f32.mrf.mxu0 }
 0xb2d   : > { %v15169_v9 = vadd.f32 %v6168_v42, %v15084_v46 }
 0xb2e   : > { %v6170_v8 = vpop.f32.mrf.mxu1  ;;  %v6332_v36 = vpop.f32.mrf.mxu0 }
 0xb2f   : > { %16273 = vst [vmem:[#allocation43_spill] sm:$0xff] %v15169_v9  ;;  %v15182_v8 = vpop.permute.xlu0 %6757 }
 0xb30   : > { %v6173_v41 = vpop.f32.mrf.mxu1  ;;  %v10394_v1 = vpop.f32.mrf.mxu0  ;;  %16277 = vst [vmem:[#allocation34_spill] sm:$0xff] %v15182_v8 }
 0xb31   : > { %v15174_v58 = vadd.f32 %v6173_v41, %v15094_v4  ;;  %v15185_v4 = vpop.permute.xlu1 %6983 }
 0xb32   : > { %v6175_v28 = vpop.f32.mrf.mxu1  ;;  %v6342_v34 = vpop.f32.mrf.mxu0 }
 0xb33   : > { %16275 = vst [vmem:[#allocation53_spill] sm:$0xff] %v15174_v58 }
 0xb34   : > { %v6178_v32 = vpop.f32.mrf.mxu1  ;;  %v10397_v62 = vpop.f32.mrf.mxu0 }
 0xb35   : > { %v15179_v24 = vadd.f32 %v6178_v32, %v15102_v44  ;;  %6503 = vmatpush1.msra.mxu0 %v10397_v62  ;;  %v15192_v32 = vpop.permute.xlu0 %6752 }
 0xb36   : > { %v6180_v46 = vpop.f32.mrf.mxu1  ;;  %v6352_v42 = vpop.f32.mrf.mxu0  ;;  %6504 = vmatprep.subr.mxu0 %v15901_v13  ;;  %16279 = vst [vmem:[#allocation44_spill] sm:$0xff] %v15192_v32  ;;  %v8423_v32 = vld [vmem:[%s15694_s7 + $0x910] sm:$0xff] }
 0xb37   : > { %16276 = vst [vmem:[#allocation57_spill] sm:$0xff] %v15179_v24  ;;  %6505 = vmatpush1.msra.mxu0 %v6352_v42  ;;  %v15198_v42 = vpop.permute.xlu1 %6978 }
 0xb38   : > { %v6183_v9 = vpop.f32.mrf.mxu1  ;;  %6506 = vmatprep.subr.mxu0 %v15901_v13 }
 0xb39   : > { %v15188_v41 = vadd.f32 %v6183_v9, %v15110_v12  ;;  %6507 = vmatpush1.msra.mxu0 %v10394_v1  ;;  %v15206_v1 = vpop.permute.xlu0 %6747 }
 0xb3a   : > { %v6185_v28 = vpop.f32.mrf.mxu1  ;;  %6508 = vmatprep.subr.mxu0 %v15901_v13  ;;  %16281 = vst [vmem:[#allocation56_spill] sm:$0xff] %v15206_v1 }
 0xb3b   : > { %16278 = vst [vmem:[#allocation48_spill] sm:$0xff] %v15188_v41  ;;  %6509 = vmatpush1.msra.mxu0 %v6342_v34 }
 0xb3c   : > { %v6188_v44 = vpop.f32.mrf.mxu1  ;;  %6510 = vmatprep.subr.mxu0 %v15901_v13 }
 0xb3d   : > { %v15195_v62 = vadd.f32 %v6188_v44, %v15120_v56  ;;  %6511 = vmatpush1.msra.mxu0 %v10391_v50  ;;  %v15211_v50 = vpop.permute.xlu1 %6973  ;;  %v15219_v34 = vpop.permute.xlu0 %6742 }
 0xb3e   : > { %v6190_v46 = vpop.f32.mrf.mxu1  ;;  %6512 = vmatprep.subr.mxu0 %v15901_v13  ;;  %16282 = vst [vmem:[#allocation39_spill] sm:$0xff] %v15219_v34 }
 0xb3f   : > { %16280 = vst [vmem:[#allocation29_spill] sm:$0xff] %v15195_v62  ;;  %6513 = vmatpush1.msra.mxu0 %v6332_v36 }
 0xb40   : > { %6514 = vmatprep.subr.mxu0 %v15901_v13  ;;  %v15201_v12 = vpop.f32.mrf.mxu1 }
 0xb41   : > { %6515 = vmatpush1.msra.mxu0 %v10388_v17  ;;  %v15225_v44 = vpop.permute.xlu1 %6968 }
 0xb42   : > { %6516 = vmatprep.subr.mxu0 %v15901_v13  ;;  %v15204_v9 = vpop.f32.mrf.mxu1 }
 0xb43   : > { %6517 = vmatpush1.msra.mxu0 %v6322_v18  ;;  %v10400_v18 = vpop.f32.mrf.mxu0 }
 0xb44   : > { %6518 = vmatprep.subr.mxu0 %v15901_v13  ;;  %v15209_v56 = vpop.f32.mrf.mxu1 }
 0xb45   : > { %6519 = vmatpush1.msra.mxu0 %v10385_v53  ;;  %v15239_v62 = vpop.permute.xlu1 %6963 }
 0xb46   : > { %6520 = vmatprep.subr.mxu0 %v15901_v13  ;;  %v15214_v36 = vpop.f32.mrf.mxu1 }
 0xb47   : > { %6521 = vmatpush1.msra.mxu0 %v6312_v19  ;;  %v6362_v19 = vpop.f32.mrf.mxu0 }
 0xb48   : > { %6522 = vmatprep.subr.mxu0 %v15901_v13  ;;  %v15217_v17 = vpop.f32.mrf.mxu1 }
 0xb49   : > { %6523 = vmatpush1.msra.mxu0 %v15145_v35  ;;  %v15235_v35 = vpop.permute.xlu0 %6737  ;;  %v15250_v34 = vpop.permute.xlu1 %6958 }
 0xb4a   : > { %6524 = vmatprep.subr.mxu0 %v15901_v13  ;;  %v15223_v28 = vpop.f32.mrf.mxu1  ;;  %16283 = vst [vmem:[#allocation7_spill] sm:$0xff] %v15235_v35 }
 0xb4b   : > { %6525 = vmatpush1.msra.mxu0 %v15152_v30  ;;  %v10403_v30 = vpop.f32.mrf.mxu0 }
 0xb4c   : > { %6526 = vmatprep.subr.mxu0 %v15901_v13  ;;  %v15229_v53 = vpop.f32.mrf.mxu1 }
 0xb4d   : > { %6527 = vmatpush1.msra.mxu0 %v15136_v31  ;;  %v15247_v41 = vpop.permute.xlu0 %6852  ;;  %v15268_v8 = vpop.permute.xlu1 %6953 }
 0xb4e   : > { %6528 = vmatprep.subr.mxu0 %v15901_v13  ;;  %v15233_v46 = vpop.f32.mrf.mxu1  ;;  %16284 = vst [vmem:[#allocation58_spill] sm:$0xff] %v15247_v41 }
 0xb4f   : > { %6529 = vmatpush1.msra.mxu0 %v15141_v0  ;;  %v6372_v0 = vpop.f32.mrf.mxu0 }
 0xb50   : > { %6530 = vmatprep.subr.mxu0 %v15901_v13  ;;  %v10420_v58 = vpop.f32.mrf.mxu1 }
 0xb51   : > { %6531 = vmatpush1.msra.mxu0 %v15125_v16  ;;  %v15260_v41 = vpop.permute.xlu0 %6847 }
 0xb52   : > { %6532 = vmatprep.subr.mxu0 %v15901_v13  ;;  %v15243_v31 = vpop.f32.mrf.mxu1  ;;  %16285 = vst [vmem:[#allocation8_spill] sm:$0xff] %v15260_v41 }
 0xb53   : > { %6533 = vmatpush1.msra.mxu0 %v15132_v7  ;;  %v8421_v7 = vld [vmem:[%s15694_s7 + $0x900] sm:$0xff] }
 0xb54   : > { %6558 = vmatprep.subr.mxu0 %v15901_v13  ;;  %v10423_v24 = vpop.f32.mrf.mxu1 }
 0xb55   : > { %6559 = vmatpush2.msra.mxu0 %v10403_v30  ;;  %v8424_v30 = vld [vmem:[%s15694_s7 + $0x918] sm:$0xff]  ;;  %v15282_v10 = vpop.permute.xlu0 %6842 }
 0xb56   : > { %6560 = vmatprep.subr.mxu0 %v15901_v13  ;;  %v7259_v35 = vpop.f32.mrf.mxu1 }
 0xb57   : > { %6561 = vmatpush2.msra.mxu0 %v6372_v0 }
 0xb58   : > { %6562 = vmatprep.subr.mxu0 %v15901_v13  ;;  %v10426_v16 = vpop.f32.mrf.mxu1 }
 0xb59   : > { %6563 = vmatpush2.msra.mxu0 %v10400_v18 }
 0xb5a   : > { %6564 = vmatprep.subr.mxu0 %v15901_v13  ;;  %v7269_v1 = vpop.f32.mrf.mxu1 }
 0xb5b   : > { %6565 = vmatpush2.msra.mxu0 %v6362_v19  ;;  %v8426_v19 = vld [vmem:[%s15694_s7 + $0x928] sm:$0xff] }
 0xb5c   : > { %6567 = vmatmul.mubr.f32.vlgmr.msra.gmra.mxu0 %v8421_v7  ;;  %v10429_v0 = vpop.f32.mrf.mxu1  ;;  %7448 = vmatprep.subr.mxu0 %v15901_v13  ;;  %v7275_v7 = vadd.f32 %v10426_v16, %v15107_v29  ;;  %v7265_v29 = vadd.f32 %v10423_v24, %v15134_v52  ;;  %v7255_v52 = vadd.f32 %v10420_v58, %v15159_v57  ;;  %v8432_v58 = vld [vmem:[%s15694_s7 + $0x958] sm:$0xff] }
 0xb5d   : > { %v7285_v18 = vadd.f32 %v10429_v0, %v15081_v39  ;;  %8470 = vmatprep.mubr.msk.f32.mxu0 %vm3721_vm10, %v8424_v30  ;;  %v7270_v30 = vadd.f32 %v7269_v1, %v15117_v55 }
 0xb5e   : > { %v7279_v60 = vpop.f32.mrf.mxu1  ;;  %v7341_v55 = vmax.f32 %v7275_v7, 0.0  ;;  %v7339_v24 = vmax.f32 %v7265_v29, 0.0  ;;  %v7240_v7 = vadd.f32 %v15233_v46, %v15185_v4  ;;  %v7235_v4 = vadd.f32 %v15217_v17, %v15198_v42  ;;  %v8436_v42 = vld [vmem:[%s15694_s7 + $0x978] sm:$0xff] }
 0xb5f   : > { %v7343_v41 = vmax.f32 %v7285_v18, 0.0  ;;  %v7280_v63 = vadd.f32 %v7279_v60, %v15091_v15  ;;  %v8428_v15 = vld [vmem:[%s15694_s7 + $0x938] sm:$0xff]  ;;  %v7260_v60 = vadd.f32 %v7259_v35, %v15147_v51  ;;  %v15306_v51 = vpop.permute.xlu0 %6837  ;;  %v7250_v35 = vadd.f32 %v15243_v31, %v15166_v22  ;;  %v8429_v18 = vld [vmem:[%s15694_s7 + $0x940] sm:$0xff] }
 0xb60   : > { %6572 = vmatmul.mubr.f32.gmra.mxu0 %v8423_v32  ;;  %v15275_v39 = vpop.f32.mrf.mxu1  ;;  %v8427_v32 = vld [vmem:[%s15694_s7 + $0x930] sm:$0xff]  ;;  %v7245_v22 = vadd.f32 %v15229_v53, %v15176_v43  ;;  %v7337_v31 = vmax.f32 %v7255_v52, 0.0  ;;  %v8434_v43 = vld [vmem:[%s15694_s7 + $0x968] sm:$0xff]  ;;  %v7225_v17 = vadd.f32 %v15209_v56, %v15225_v44 }
 0xb61   : > { %v7342_v0 = vmax.f32 %v7280_v63, 0.0  ;;  %7449 = vmatpush1.msra.mxu0 %v7343_v41  ;;  %8471 = vmatprep.mubr.msk.f32.mxu0 %vm3721_vm10, %v8426_v19  ;;  %v15291_v63 = vpop.permute.xlu1 %7068  ;;  %v7340_v41 = vmax.f32 %v7270_v30, 0.0  ;;  %v7338_v16 = vmax.f32 %v7260_v60, 0.0  ;;  %v7336_v30 = vmax.f32 %v7250_v35, 0.0  ;;  %v8438_v44 = vld [vmem:[%s15694_s7 + $0x988] sm:$0xff] }
 0xb62   : > { %v15284_v11 = vpop.f32.mrf.mxu1  ;;  %7450 = vmatprep.subr.mxu0 %v15901_v13  ;;  %v7335_v53 = vmax.f32 %v7245_v22, 0.0  ;;  %v7334_v60 = vmax.f32 %v7240_v7, 0.0 }
 0xb63   : > { %7451 = vmatpush1.msra.mxu0 %v7342_v0  ;;  %v8431_v0 = vld [vmem:[%s15694_s7 + $0x950] sm:$0xff] }
 0xb64   : > { %6577 = vmatmul.mubr.f32.gmra.mxu0 %v8425_v27  ;;  %7452 = vmatprep.subr.mxu0 %v15901_v13  ;;  %v15299_v1 = vpop.f32.mrf.mxu1  ;;  %v8430_v27 = vld [vmem:[%s15694_s7 + $0x948] sm:$0xff] }
 0xb65   : > { %7453 = vmatpush1.msra.mxu0 %v7341_v55  ;;  %8472 = vmatprep.mubr.msk.f32.mxu0 %vm3721_vm10, %v8428_v15  ;;  %v15315_v19 = vpop.permute.xlu1 %7063  ;;  %v15332_v15 = vpop.permute.xlu0 %6832  ;;  %v7230_v55 = vadd.f32 %v15223_v28, %v15211_v50  ;;  %v7220_v28 = vadd.f32 %v15214_v36, %v15239_v62  ;;  %v7331_v62 = vmax.f32 %v7225_v17, 0.0  ;;  %v7210_v36 = vadd.f32 %v15204_v9, %v15268_v8 }
 0xb66   : > { %7454 = vmatprep.subr.mxu0 %v15901_v13  ;;  %v15317_v57 = vpop.f32.mrf.mxu1 }
 0xb67   : > { %7455 = vmatpush1.msra.mxu0 %v7340_v41  ;;  %v8433_v41 = vld [vmem:[%s15694_s7 + $0x960] sm:$0xff]  ;;  %v7332_v52 = vmax.f32 %v7230_v55, 0.0  ;;  %v7328_v7 = vmax.f32 %v7210_v36, 0.0  ;;  %v8450_v36 = vld [vmem:[%s15694_s7 + $0x9e8] sm:$0xff] }
 0xb68   : > { %6582 = vmatmul.mubr.f32.gmra.mxu0 %v8427_v32  ;;  %7456 = vmatprep.subr.mxu0 %v15901_v13  ;;  %v10438_v29 = vpop.f32.mrf.mxu1 }
 0xb69   : > { %7457 = vmatpush1.msra.mxu0 %v7339_v24  ;;  %8473 = vmatprep.mubr.msk.f32.mxu0 %vm3721_vm10, %v8430_v27  ;;  %v7059_v46 = vpop.permute.xlu1 %7058  ;;  %v7333_v27 = vmax.f32 %v7235_v4, 0.0  ;;  %v15353_v50 = vpop.permute.xlu0 %6827  ;;  %v8435_v24 = vld [vmem:[%s15694_s7 + $0x970] sm:$0xff] }
 0xb6a   : > { %7458 = vmatprep.subr.mxu0 %v15901_v13  ;;  %v7309_v32 = vpop.f32.mrf.mxu1 }
 0xb6b   : > { %7459 = vmatpush1.msra.mxu0 %v7338_v16  ;;  %v7215_v16 = vadd.f32 %v15201_v12, %v15250_v34  ;;  %v8440_v12 = vld [vmem:[%s15694_s7 + $0x998] sm:$0xff] }
 0xb6c   : > { %6587 = vmatmul.mubr.f32.gmra.mxu0 %v8429_v18  ;;  %7460 = vmatprep.subr.mxu0 %v15901_v13  ;;  %v10441_v56 = vpop.f32.mrf.mxu1  ;;  %v7330_v18 = vmax.f32 %v7220_v28, 0.0 }
 0xb6d   : > { %7461 = vmatpush1.msra.mxu0 %v7337_v31  ;;  %8474 = vmatprep.mubr.msk.f32.mxu0 %vm3721_vm10, %v8432_v58  ;;  %v7054_v35 = vpop.permute.xlu1 %7053  ;;  %v8437_v58 = vld [vmem:[%s15694_s7 + $0x980] sm:$0xff]  ;;  %v15375_v22 = vpop.permute.xlu0 %6822  ;;  %v7329_v34 = vmax.f32 %v7215_v16, 0.0  ;;  %v7325_v8 = vadd.f32 %v10441_v56, %v15291_v63  ;;  %v8442_v63 = vld [vmem:[%s15694_s7 + $0x9a8] sm:$0xff] }
 0xb6e   : > { %7462 = vmatprep.subr.mxu0 %v15901_v13  ;;  %v7319_v31 = vpop.f32.mrf.mxu1 }
 0xb6f   : > { %7463 = vmatpush1.msra.mxu0 %v7336_v30  ;;  %v7320_v30 = vadd.f32 %v7319_v31, %v15315_v19  ;;  %v7351_v4 = vmax.f32 %v7325_v8, 0.0  ;;  %v7310_v19 = vadd.f32 %v7309_v32, %v7054_v35  ;;  %v8451_v31 = vld [vmem:[%s15694_s7 + $0x9f0] sm:$0xff]  ;;  %v8456_v8 = vld [vmem:[%s15694_s7 + $0xa18] sm:$0xff] }
 0xb70   : > { %6592 = vmatmul.mubr.f32.gmra.mxu0 %v8431_v0  ;;  %7464 = vmatprep.subr.mxu0 %v15901_v13  ;;  %v8439_v0 = vld [vmem:[%s15694_s7 + $0x990] sm:$0xff] }
 0xb71   : > { %7465 = vmatpush1.msra.mxu0 %v7335_v53  ;;  %8475 = vmatprep.mubr.msk.f32.mxu0 %vm3721_vm10, %v8434_v43  ;;  %v7049_v9 = vpop.permute.xlu1 %7048  ;;  %v7315_v43 = vadd.f32 %v10438_v29, %v7059_v46  ;;  %v15392_v53 = vpop.permute.xlu0 %6817  ;;  %v7350_v55 = vmax.f32 %v7320_v30, 0.0  ;;  %v8444_v29 = vld [vmem:[%s15694_s7 + $0x9b8] sm:$0xff]  ;;  %v7348_v17 = vmax.f32 %v7310_v19, 0.0  ;;  %v8457_v30 = vld [vmem:[%s15694_s7 + $0xa20] sm:$0xff] }
 0xb72   : > { %7466 = vmatprep.subr.mxu0 %v15901_v13  ;;  %v7305_v46 = vadd.f32 %v15299_v1, %v7049_v9  ;;  %v8446_v1 = vld [vmem:[%s15694_s7 + $0x9c8] sm:$0xff]  ;;  %v8455_v9 = vld [vmem:[%s15694_s7 + $0xa10] sm:$0xff]  ;;  %v8464_v19 = vld [vmem:[%s15694_s7 + $0xa58] sm:$0xff] }
 0xb73   : > { %7467 = vmatpush1.msra.mxu0 %v7334_v60  ;;  %v8441_v60 = vld [vmem:[%s15694_s7 + $0x9a0] sm:$0xff] }
 0xb74   : > { %6597 = vmatmul.mubr.f32.gmra.mxu0 %v8433_v41  ;;  %7468 = vmatprep.subr.mxu0 %v15901_v13 }
 0xb75   : > { %7469 = vmatpush1.msra.mxu0 %v7333_v27  ;;  %8476 = vmatprep.mubr.msk.f32.mxu0 %vm3721_vm10, %v8436_v42  ;;  %v7044_v41 = vpop.permute.xlu1 %7043  ;;  %v7349_v42 = vmax.f32 %v7315_v43, 0.0  ;;  %v8443_v27 = vld [vmem:[%s15694_s7 + $0x9b0] sm:$0xff]  ;;  %v7039_v28 = vpop.permute.xlu0 %7038  ;;  %v8462_v43 = vld [vmem:[%s15694_s7 + $0xa48] sm:$0xff] }
 0xb76   : > { %7470 = vmatprep.subr.mxu0 %v15901_v13  ;;  %v7300_v32 = vadd.f32 %v15317_v57, %v7044_v41  ;;  %v8465_v41 = vld [vmem:[%s15694_s7 + $0xa60] sm:$0xff] }
 0xb77   : > { %7471 = vmatpush1.msra.mxu0 %v7332_v52  ;;  %v7295_v52 = vadd.f32 %v15275_v39, %v7039_v28  ;;  %v8448_v39 = vld [vmem:[%s15694_s7 + $0x9d8] sm:$0xff]  ;;  %v7354_v28 = vld [vmem:[%s15696_s9 + $0x10] sm:$0xff] }
 0xb78   : > { %6602 = vmatmul.mubr.f32.gmra.mxu0 %v8435_v24  ;;  %7472 = vmatprep.subr.mxu0 %v15901_v13  ;;  %v7347_v24 = vmax.f32 %v7305_v46, 0.0  ;;  %v7346_v56 = vmax.f32 %v7300_v32, 0.0  ;;  %v8467_v46 = vld [vmem:[%s15694_s7 + $0xa70] sm:$0xff]  ;;  %v7353_v32 = vld [vmem:[%s15696_s9 + $0x8] sm:$0xff] }
 0xb79   : > { %7473 = vmatpush1.msra.mxu0 %v7331_v62  ;;  %8477 = vmatprep.mubr.msk.f32.mxu0 %vm3721_vm10, %v8438_v44  ;;  %v7034_v57 = vpop.permute.xlu1 %7033  ;;  %v8445_v44 = vld [vmem:[%s15694_s7 + $0x9c0] sm:$0xff]  ;;  %v7345_v16 = vmax.f32 %v7295_v52, 0.0  ;;  %v8447_v62 = vld [vmem:[%s15694_s7 + $0x9d0] sm:$0xff] }
 0xb7a   : > { %7474 = vmatprep.subr.mxu0 %v15901_v13  ;;  %v7290_v35 = vadd.f32 %v15284_v11, %v7034_v57 }
 0xb7b   : > { %7475 = vmatpush1.msra.mxu0 %v7330_v18  ;;  %v8449_v18 = vld [vmem:[%s15694_s7 + $0x9e0] sm:$0xff] }
 0xb7c   : > { %6607 = vmatmul.mubr.f32.gmra.mxu0 %v8437_v58  ;;  %7476 = vmatprep.subr.mxu0 %v15901_v13  ;;  %v7344_v11 = vmax.f32 %v7290_v35, 0.0  ;;  %v8452_v58 = vld [vmem:[%s15694_s7 + $0x9f8] sm:$0xff] }
 0xb7d   : > { %7477 = vmatpush1.msra.mxu0 %v7329_v34  ;;  %8478 = vmatprep.mubr.msk.f32.mxu0 %vm3721_vm10, %v8440_v12  ;;  %v8454_v12 = vld [vmem:[%s15694_s7 + $0xa08] sm:$0xff]  ;;  %v8453_v34 = vld [vmem:[%s15694_s7 + $0xa00] sm:$0xff] }
 0xb7e   : > { %7478 = vmatprep.subr.mxu0 %v15901_v13 }
 0xb7f   : > { %7479 = vmatpush1.msra.mxu0 %v7328_v7  ;;  %v8458_v7 = vld [vmem:[%s15694_s7 + $0xa28] sm:$0xff] }
 0xb80   : > { %6612 = vmatmul.mubr.f32.gmra.mxu0 %v8439_v0  ;;  %7496 = vmatprep.subr.mxu0 %v15901_v13  ;;  %v8460_v0 = vld [vmem:[%s15694_s7 + $0xa38] sm:$0xff] }
 0xb81   : > { %7497 = vmatpush2.msra.mxu0 %v7351_v4  ;;  %8479 = vmatprep.mubr.msk.f32.mxu0 %vm3721_vm10, %v8442_v63  ;;  %v8459_v63 = vld [vmem:[%s15694_s7 + $0xa30] sm:$0xff]  ;;  %v8461_v4 = vld [vmem:[%s15694_s7 + $0xa40] sm:$0xff] }
 0xb82   : > { %7498 = vmatprep.subr.mxu0 %v15901_v13 }
 0xb83   : > { %7499 = vmatpush2.msra.mxu0 %v7350_v55  ;;  %v8463_v55 = vld [vmem:[%s15694_s7 + $0xa50] sm:$0xff] }
 0xb84   : > { %6617 = vmatmul.mubr.f32.gmra.mxu0 %v8441_v60  ;;  %7500 = vmatprep.subr.mxu0 %v15901_v13  ;;  %v8466_v60 = vld [vmem:[%s15694_s7 + $0xa68] sm:$0xff] }
 0xb85   : > { %7501 = vmatpush2.msra.mxu0 %v7349_v42  ;;  %8480 = vmatprep.mubr.msk.f32.mxu0 %vm3721_vm10, %v8444_v29  ;;  %v8468_v29 = vld [vmem:[%s15694_s7 + $0xa78] sm:$0xff]  ;;  %v7357_v42 = vld [vmem:[%s15697_s10 + $0x8] sm:$0xff] }
 0xb86   : > { %7502 = vmatprep.subr.mxu0 %v15901_v13  ;;  %8518 = vmatprep.mubr.msk.f32.mxu1 %vm7360_vm4, %v7357_v42 }
 0xb87   : > { %7503 = vmatpush2.msra.mxu0 %v7348_v17  ;;  %v7352_v17 = vld [vmem:[%s15696_s9] sm:$0xff] }
 0xb88   : > { %6622 = vmatmul.mubr.f32.gmra.mxu0 %v8443_v27  ;;  %7504 = vmatprep.subr.mxu0 %v15901_v13  ;;  %v7355_v27 = vld [vmem:[%s15696_s9 + $0x18] sm:$0xff] }
 0xb89   : > { %7505 = vmatpush2.msra.mxu0 %v7347_v24  ;;  %8481 = vmatprep.mubr.msk.f32.mxu0 %vm3721_vm10, %v8446_v1 }
 0xb8a   : > { %7506 = vmatprep.subr.mxu0 %v15901_v13 }
 0xb8b   : > { %7507 = vmatpush2.msra.mxu0 %v7346_v56 }
 0xb8c   : > { %6627 = vmatmul.mubr.f32.gmra.mxu0 %v8445_v44  ;;  %7508 = vmatprep.subr.mxu0 %v15901_v13 }
 0xb8d   : > { %7509 = vmatpush2.msra.mxu0 %v7345_v16  ;;  %8482 = vmatprep.mubr.msk.f32.mxu0 %vm3721_vm10, %v8448_v39 }
 0xb8e   : > { %7510 = vmatprep.subr.mxu0 %v15901_v13 }
 0xb8f   : > { %7511 = vmatpush2.msra.mxu0 %v7344_v11 }
 0xb90   : > { %6632 = vmatmul.mubr.f32.gmra.mxu0 %v8447_v62 }
 0xb91   : > { %8483 = vmatprep.mubr.msk.f32.mxu0 %vm3721_vm10, %v8450_v36 }
 0xb94   : > { %6637 = vmatmul.mubr.f32.gmra.mxu0 %v8449_v18 }
 0xb95   : > { %8484 = vmatprep.mubr.msk.f32.mxu0 %vm3721_vm10, %v8452_v58 }
 0xb98   : > { %6642 = vmatmul.mubr.f32.gmra.mxu0 %v8451_v31 }
 0xb99   : > { %8485 = vmatprep.mubr.msk.f32.mxu0 %vm3721_vm10, %v8454_v12 }
 0xb9c   : > { %6647 = vmatmul.mubr.f32.gmra.mxu0 %v8453_v34 }
 0xb9d   : > { %8486 = vmatprep.mubr.msk.f32.mxu0 %vm3721_vm10, %v8456_v8 }
 0xba0   : > { %6652 = vmatmul.mubr.f32.gmra.mxu0 %v8455_v9 }
 0xba1   : > { %8487 = vmatprep.mubr.msk.f32.mxu0 %vm3721_vm10, %v8458_v7 }
 0xba4   : > { %6657 = vmatmul.mubr.f32.gmra.mxu0 %v8457_v30 }
 0xba5   : > { %8488 = vmatprep.mubr.msk.f32.mxu0 %vm3721_vm10, %v8460_v0 }
 0xba8   : > { %6662 = vmatmul.mubr.f32.gmra.mxu0 %v8459_v63 }
 0xba9   : > { %8489 = vmatprep.mubr.msk.f32.mxu0 %vm3721_vm10, %v8462_v43 }
 0xbac   : > { %6667 = vmatmul.mubr.f32.gmra.mxu0 %v8461_v4 }
 0xbad   : > { %8490 = vmatprep.mubr.msk.f32.mxu0 %vm3721_vm10, %v8464_v19 }
 0xbb0   : > { %6672 = vmatmul.mubr.f32.gmra.mxu0 %v8463_v55 }
 0xbb1   : > { %8491 = vmatprep.mubr.msk.f32.mxu0 %vm3721_vm10, %v8466_v60 }
 0xbb4   : > { %6677 = vmatmul.mubr.f32.gmra.mxu0 %v8465_v41 }
 0xbb5   : > { %8492 = vmatprep.mubr.msk.f32.mxu0 %vm3721_vm10, %v8468_v29  ;;  %vm16307_vm10 = vcmask 1043456  }
 0xbb6   : > { %vm16308_vm5 = vmmov %vm16307_vm10 }
 0xbb8   : > { %6682 = vmatmul.mubr.f32.gmra.mxu0 %v8467_v46 }
 0xbb9   : > { %8520 = vmatprep.mubr.msk.f32.mxu0 %vm7360_vm4, %v7353_v32 }
 0xbbc   : > { %7513 = vmatmul.mubr.f32.vlgmr.msra.gmra.mxu0 %v7352_v17 }
 0xbbd   : > { %8521 = vmatprep.mubr.msk.f32.mxu0 %vm7360_vm4, %v7355_v27 }
 0xbc0   : > { %7518 = vmatmul.mubr.f32.gmra.mxu0 %v7354_v28 }
 0xc1c   : > { %v6568_v1 = vpop.f32.mrf.mxu0 }
 0xc1d   : > { %v15520_v52 = vadd.f32 %v6568_v1, %v15033_v23 }
 0xc1e   : > { %v6570_v24 = vpop.f32.mrf.mxu0 }
 0xc20   : > { %v6573_v57 = vpop.f32.mrf.mxu0 }
 0xc21   : > { %v15523_v35 = vadd.f32 %v6573_v57, %v15038_v26 }
 0xc22   : > { %v6575_v56 = vpop.f32.mrf.mxu0 }
 0xc24   : > { %v6578_v44 = vpop.f32.mrf.mxu0 }
 0xc25   : > { %v15526_v39 = vadd.f32 %v6578_v44, %v15043_v47 }
 0xc26   : > { %v6580_v16 = vpop.f32.mrf.mxu0 }
 0xc28   : > { %v6583_v11 = vpop.f32.mrf.mxu0 }
 0xc29   : > { %v15529_v62 = vadd.f32 %v6583_v11, %v15048_v61 }
 0xc2a   : > { %v6585_v36 = vpop.f32.mrf.mxu0 }
 0xc2c   : > { %v6588_v18 = vpop.f32.mrf.mxu0 }
 0xc2d   : > { %v15532_v23 = vadd.f32 %v6588_v18, %v15053_v5 }
 0xc2e   : > { %v6590_v58 = vpop.f32.mrf.mxu0 }
 0xc30   : > { %v15534_v31 = vpop.f32.mrf.mxu0 }
 0xc32   : > { %v6595_v26 = vpop.f32.mrf.mxu0 }
 0xc34   : > { %v6598_v12 = vpop.f32.mrf.mxu0 }
 0xc36   : > { %v6600_v34 = vpop.f32.mrf.mxu0 }
 0xc37   : > { %v16286_v34 = vld [vmem:[#allocation37_spill] sm:$0xff] }
 0xc38   : > { %v6603_v8 = vpop.f32.mrf.mxu0 }
 0xc39   : > { %v6694_v58 = vadd.f32 %v6603_v8, %v15072_v2  ;;  %v16289_v2 = vld [vmem:[#allocation52_spill] sm:$0xff] }
 0xc3a   : > { %v6605_v9 = vpop.f32.mrf.mxu0 }
 0xc3b   : > { %v6693_v9 = vadd.f32 %v6598_v12, %v16286_v34  ;;  %v6862_v8 = vadd.f32 %v16289_v2, %v6694_v58  ;;  %v16300_v58 = vld [vmem:[#allocation53_spill] sm:$0xff] }
 0xc3c   : > { %v6608_v47 = vpop.f32.mrf.mxu0 }
 0xc3e   : > { %v6610_v7 = vpop.f32.mrf.mxu0 }
 0xc40   : > { %v6613_v30 = vpop.f32.mrf.mxu0 }
 0xc42   : > { %v6615_v0 = vpop.f32.mrf.mxu0 }
 0xc44   : > { %v6618_v63 = vpop.f32.mrf.mxu0 }
 0xc45   : > { %v6697_v11 = vadd.f32 %v6618_v63, %v15097_v45 }
 0xc46   : > { %v6620_v61 = vpop.f32.mrf.mxu0 }
 0xc47   : > { %v6865_v45 = vadd.f32 %v15115_v6, %v6697_v11  ;;  %v16290_v61 = vld [vmem:[#allocation28_spill] sm:$0xff] }
 0xc48   : > { %v6623_v43 = vpop.f32.mrf.mxu0 }
 0xc49   : > { %v6698_v56 = vadd.f32 %v6623_v43, %v15105_v37  ;;  %v6889_v6 = vmax.f32 %v6865_v45, 0.0  ;;  %v6861_v43 = vadd.f32 %v16290_v61, %v6693_v9  ;;  %v16303_v9 = vld [vmem:[#allocation43_spill] sm:$0xff] }
 0xc4a   : > { %v6625_v4 = vpop.f32.mrf.mxu0 }
 0xc4c   : > { %v6628_v19 = vpop.f32.mrf.mxu0 }
 0xc4d   : > { %v6699_v28 = vadd.f32 %v6628_v19, %v15113_v48  ;;  %v16291_v19 = vld [vmem:[#allocation38_spill] sm:$0xff] }
 0xc4e   : > { %v6630_v55 = vpop.f32.mrf.mxu0 }
 0xc50   : > { %v6633_v5 = vpop.f32.mrf.mxu0 }
 0xc51   : > { %v6700_v32 = vadd.f32 %v6633_v5, %v15123_v21  ;;  %v6867_v21 = vadd.f32 %v15089_v59, %v6699_v28  ;;  %v6886_v5 = vmax.f32 %v6862_v8, 0.0  ;;  %v16294_v28 = vld [vmem:[#allocation56_spill] sm:$0xff] }
 0xc52   : > { %v6635_v60 = vpop.f32.mrf.mxu0 }
 0xc53   : > { %v6868_v44 = vadd.f32 %v15074_v49, %v6700_v32  ;;  %v6695_v49 = vadd.f32 %v6608_v47, %v15079_v40  ;;  %v6891_v59 = vmax.f32 %v6867_v21, 0.0  ;;  %v16287_v40 = vld [vmem:[#allocation62_spill] sm:$0xff] }
 0xc54   : > { %v6638_v41 = vpop.f32.mrf.mxu0 }
 0xc55   : > { %v6701_v46 = vadd.f32 %v6638_v41, %v15130_v54  ;;  %v6892_v48 = vmax.f32 %v6868_v44, 0.0  ;;  %v6863_v47 = vadd.f32 %v16287_v40, %v6695_v49  ;;  %v16299_v49 = vld [vmem:[#allocation29_spill] sm:$0xff] }
 0xc56   : > { %v6640_v29 = vpop.f32.mrf.mxu0 }
 0xc57   : > { %v6869_v1 = vadd.f32 %v15067_v25, %v6701_v46  ;;  %v6866_v25 = vadd.f32 %v15099_v14, %v6698_v56  ;;  %v6887_v12 = vmax.f32 %v6863_v47, 0.0  ;;  %v6885_v29 = vmax.f32 %v6861_v43, 0.0 }
 0xc58   : > { %v6643_v42 = vpop.f32.mrf.mxu0 }
 0xc59   : > { %v6702_v17 = vadd.f32 %v6643_v42, %v15139_v38  ;;  %v6893_v38 = vmax.f32 %v6869_v1, 0.0  ;;  %v6890_v14 = vmax.f32 %v6866_v25, 0.0  ;;  %v16293_v42 = vld [vmem:[#allocation44_spill] sm:$0xff]  ;;  %v6857_v1 = vadd.f32 %v16294_v28, %v15526_v39 }
 0xc5a   : > { %v6645_v27 = vpop.f32.mrf.mxu0  ;;  %v6858_v32 = vadd.f32 %v16293_v42, %v15529_v62  ;;  %v16296_v62 = vld [vmem:[#allocation7_spill] sm:$0xff] }
 0xc5b   : > { %v6870_v24 = vadd.f32 %v15065_v20, %v6702_v17  ;;  %v6696_v20 = vadd.f32 %v6613_v30, %v15087_v33  ;;  %v16288_v30 = vld [vmem:[#allocation42_spill] sm:$0xff]  ;;  %v6855_v11 = vadd.f32 %v16296_v62, %v15520_v52  ;;  %v6881_v21 = vmax.f32 %v6857_v1, 0.0  ;;  %v16301_v52 = vld [vmem:[#allocation8_spill] sm:$0xff] }
 0xc5c   : > { %v15542_v57 = vpop.f32.mrf.mxu0  ;;  %v6692_v0 = vadd.f32 %v15534_v31, %v16288_v30  ;;  %v16292_v31 = vld [vmem:[#allocation34_spill] sm:$0xff]  ;;  %v16304_v30 = vld [vmem:[#allocation33_spill] sm:$0xff] }
 0xc5d   : > { %v6894_v16 = vmax.f32 %v6870_v24, 0.0  ;;  %v6864_v33 = vadd.f32 %v15127_v3, %v6696_v20  ;;  %v6859_v41 = vadd.f32 %v16292_v31, %v15532_v23  ;;  %v16295_v23 = vld [vmem:[#allocation39_spill] sm:$0xff] }
 0xc5e   : > { %v6650_v54 = vpop.f32.mrf.mxu0  ;;  %v6860_v55 = vadd.f32 %v16291_v19, %v6692_v0  ;;  %v6856_v44 = vadd.f32 %v16295_v23, %v15523_v35  ;;  %v10494_v19 = vld [vmem:[%s10702_s24] sm:$0xf]  ;;  %s10499_s24 = sshll.u32 %s10560_s29, 4  ;;  %s10500_s24 = int_to_ptr.vmem [resolvable:$false] %s10499_s24 }
 0xc5f   : > { %7368 = vmatpush1.msra.mxu1 %v6894_v16  ;;  %v6888_v3 = vmax.f32 %v6864_v33, 0.0  ;;  %v6883_v24 = vmax.f32 %v6859_v41, 0.0  ;;  %v6882_v16 = vmax.f32 %v6858_v32, 0.0  ;;  %s10501_s22 = scalar_lea.vmem %s10500_s24, 512  ;;  %p10502_p0 = scmp.lt.s32.totalorder %s15640_s0, %s10500_s24 }
 0xc60   : > { %v15548_v36 = vpop.f32.mrf.mxu0  ;;  %7369 = vmatprep.subr.mxu1 %v15901_v13  ;;  %v6884_v17 = vmax.f32 %v6860_v55, 0.0  ;;  %v6880_v25 = vmax.f32 %v6856_v44, 0.0  ;;  %v7358_v55 = vld [vmem:[%s15697_s10 + $0x10] sm:$0xff]  ;;  %p10503_p1 = scmp.lt.s32.totalorder %s10501_s22, %s10495_s21 }
 0xc61   : > { %7370 = vmatpush1.msra.mxu1 %v6893_v38  ;;  %v16297_v38 = vld [vmem:[#allocation48_spill] sm:$0xff] }
 0xc62   : > { %v6655_v37 = vpop.f32.mrf.mxu0  ;;  %7371 = vmatprep.subr.mxu1 %v15901_v13  ;;  %p10504_p2 = por %p10503_p1, %p10502_p0 }
 0xc63   : > { %7372 = vmatpush1.msra.mxu1 %v6892_v48  ;;  %v16298_v48 = vld [vmem:[#allocation57_spill] sm:$0xff] }
 0xc64   : > { %v15556_v18 = vpop.f32.mrf.mxu0  ;;  %7373 = vmatprep.subr.mxu1 %v15901_v13  ;;  %p10505_p3 = pnand %p10504_p2, %p10498_p13 }
 0xc65   : > { %7374 = vmatpush1.msra.mxu1 %v6891_v59  ;;  %v6879_v59 = vmax.f32 %v6855_v11, 0.0  ;;  %v6705_v0 = vadd.f32 %v15556_v18, %v16304_v30 }
 0xc66   : > { %v6660_v26 = vpop.f32.mrf.mxu0  ;;  %7375 = vmatprep.subr.mxu1 %v15901_v13 }
 0xc67   : > { %7376 = vmatpush1.msra.mxu1 %v6890_v14  ;;  %v16302_v26 = vld [vmem:[#allocation58_spill] sm:$0xff]  ;;  %v6873_v18 = vadd.f32 %v15353_v50, %v6705_v0 }
 0xc68   : > { %v6663_v7 = vpop.f32.mrf.mxu0  ;;  %7377 = vmatprep.subr.mxu1 %v15901_v13 }
 0xc69   : > { %7378 = vmatpush1.msra.mxu1 %v6889_v6  ;;  %v6706_v40 = vadd.f32 %v6663_v7, %v16303_v9 }
 0xc6a   : > { %v6665_v63 = vpop.f32.mrf.mxu0  ;;  %7379 = vmatprep.subr.mxu1 %v15901_v13 }
 0xc6b   : > { %7380 = vmatpush1.msra.mxu1 %v6888_v3  ;;  %v16305_v3 = vld [vmem:[#allocation47_spill] sm:$0xff]  ;;  %v6874_v7 = vadd.f32 %v15332_v15, %v6706_v40 }
 0xc6c   : > { %v6668_v4 = vpop.f32.mrf.mxu0  ;;  %7381 = vmatprep.subr.mxu1 %v15901_v13  ;;  %v6704_v63 = vadd.f32 %v15548_v36, %v16305_v3  ;;  %v6897_v36 = vmax.f32 %v6873_v18, 0.0 }
 0xc6d   : > { %7382 = vmatpush1.msra.mxu1 %v6887_v12  ;;  %v6707_v33 = vadd.f32 %v6668_v4, %v16300_v58  ;;  %v6898_v4 = vmax.f32 %v6874_v7, 0.0 }
 0xc6e   : > { %v6670_v60 = vpop.f32.mrf.mxu0  ;;  %7383 = vmatprep.subr.mxu1 %v15901_v13 }
 0xc6f   : > { %7384 = vmatpush1.msra.mxu1 %v6886_v5  ;;  %v6875_v2 = vadd.f32 %v15306_v51, %v6707_v33  ;;  %v6872_v51 = vadd.f32 %v15375_v22, %v6704_v63  ;;  %v7356_v22 = vld [vmem:[%s15697_s10] sm:$0xff]  ;;  %v7524_v5 = vld [vmem:[%s15698_s11 + $0x8] sm:$0xff] }
 0xc70   : > { %v6673_v46 = vpop.f32.mrf.mxu0  ;;  %7385 = vmatprep.subr.mxu1 %v15901_v13 }
 0xc71   : > { %7386 = vmatpush1.msra.mxu1 %v6885_v29  ;;  %v6708_v37 = vadd.f32 %v6673_v46, %v16298_v48  ;;  %v6899_v12 = vmax.f32 %v6875_v2, 0.0 }
 0xc72   : > { %v6675_v27 = vpop.f32.mrf.mxu0  ;;  %7387 = vmatprep.subr.mxu1 %v15901_v13 }
 0xc73   : > { %7388 = vmatpush1.msra.mxu1 %v6884_v17  ;;  %v6876_v47 = vadd.f32 %v15282_v10, %v6708_v37  ;;  %v16306_v10 = vld [vmem:[#allocation55_spill] sm:$0xff] }
 0xc74   : > { %v6678_v56 = vpop.f32.mrf.mxu0  ;;  %7389 = vmatprep.subr.mxu1 %v15901_v13  ;;  %v6703_v43 = vadd.f32 %v15542_v57, %v16306_v10  ;;  %v6896_v57 = vmax.f32 %v6872_v51, 0.0 }
 0xc75   : > { %7390 = vmatpush1.msra.mxu1 %v6883_v24  ;;  %v6709_v20 = vadd.f32 %v6678_v56, %v16297_v38  ;;  %v6900_v61 = vmax.f32 %v6876_v47, 0.0  ;;  %v7618_v56 = vpop.permute.xlu1 %7617 }
 0xc76   : > { %v6680_v54 = vpop.f32.mrf.mxu0  ;;  %7391 = vmatprep.subr.mxu1 %v15901_v13  ;;  %v6871_v15 = vadd.f32 %v15392_v53, %v6703_v43  ;;  %v7359_v53 = vld [vmem:[%s15697_s10 + $0x18] sm:$0xff] }
 0xc77   : > { %7392 = vmatpush1.msra.mxu1 %v6882_v16  ;;  %v6877_v14 = vadd.f32 %v16301_v52, %v6709_v20  ;;  %v7613_v54 = vpop.permute.xlu0 %7612 }
 0xc78   : > { %v6683_v39 = vpop.f32.mrf.mxu0  ;;  %7393 = vmatprep.subr.mxu1 %v15901_v13  ;;  %v6895_v50 = vmax.f32 %v6871_v15, 0.0 }
 0xc79   : > { %v6710_v35 = vadd.f32 %v6683_v39, %v16299_v49  ;;  %7394 = vmatpush1.msra.mxu1 %v6881_v21  ;;  %v6901_v8 = vmax.f32 %v6877_v14, 0.0 }
 0xc7a   : > { %7395 = vmatprep.subr.mxu1 %v15901_v13  ;;  %v6685_v45 = vpop.f32.mrf.mxu0 }
 0xc7b   : > { %v6878_v34 = vadd.f32 %v16302_v26, %v6710_v35  ;;  %7396 = vmatpush1.msra.mxu1 %v6880_v25 }
 0xc7c   : > { %7397 = vmatprep.subr.mxu1 %v15901_v13  ;;  %v7514_v60 = vpop.f32.mrf.mxu0 }
 0xc7d   : > { %v6902_v6 = vmax.f32 %v6878_v34, 0.0  ;;  %7398 = vmatpush1.msra.mxu1 %v6879_v59 }
 0xc7e   : > { %7415 = vmatprep.subr.mxu1 %v15901_v13  ;;  %v7516_v31 = vpop.f32.mrf.mxu0 }
 0xc7f   : > { %7416 = vmatpush2.msra.mxu1 %v6902_v6 }
 0xc80   : > { %7417 = vmatprep.subr.mxu1 %v15901_v13  ;;  %v7519_v41 = vpop.f32.mrf.mxu0 }
 0xc81   : > { %7418 = vmatpush2.msra.mxu1 %v6901_v8 }
 0xc82   : > { %7419 = vmatprep.subr.mxu1 %v15901_v13  ;;  %v7521_v29 = vpop.f32.mrf.mxu0 }
 0xc83   : > { %7420 = vmatpush2.msra.mxu1 %v6900_v61 }
 0xc84   : > { %7421 = vmatprep.subr.mxu1 %v15901_v13 }
 0xc85   : > { %7422 = vmatpush2.msra.mxu1 %v6899_v12 }
 0xc86   : > { %7423 = vmatprep.subr.mxu1 %v15901_v13 }
 0xc87   : > { %7424 = vmatpush2.msra.mxu1 %v6898_v4 }
 0xc88   : > { %7425 = vmatprep.subr.mxu1 %v15901_v13 }
 0xc89   : > { %7426 = vmatpush2.msra.mxu1 %v6897_v36 }
 0xc8a   : > { %7427 = vmatprep.subr.mxu1 %v15901_v13 }
 0xc8b   : > { %7428 = vmatpush2.msra.mxu1 %v6896_v57 }
 0xc8c   : > { %7429 = vmatprep.subr.mxu1 %v15901_v13  ;;  %v7523_v13 = vld [vmem:[%s15698_s11] sm:$0xff] }
 0xc8d   : > { %7430 = vmatpush2.msra.mxu1 %v6895_v50 }
 0xc8e   : > { %7432 = vmatmul.mubr.f32.vlgmr.msra.gmra.mxu1 %v7356_v22  ;;  %10442 = vmatprep.subr.msk.mxu1 %vm16307_vm10, %v10494_v19 }
 0xc8f   : > { %8519 = vmatprep.mubr.msk.f32.mxu1 %vm7360_vm4, %v7359_v53  ;;  %10443 = vmatpush3.msk.msra.mxu1 %vm16308_vm5, %v10494_v19 }
 0xc92   : > { %7437 = vmatmul.mubr.f32.gmra.mxu1 %v7358_v55 }
 0xc93   : > { %10444 = vmatprep.mubr.msk.f32.mxu1 %vm16309_vm6, %v7523_v13 }
 0xc96   : > { %10445 = vmatmul.mubr.msk.f32.vlgmr.msra.gmra.mxu1 %vm16310_vm7, %v7524_v5 }
 0xd4e   : > { %v7433_v46 = vpop.f32.mrf.mxu1 }
 0xd4f   : > { %v7515_v1 = vadd.f32 %v7514_v60, %v7433_v46 }
 0xd50   : > { %v7435_v42 = vpop.f32.mrf.mxu1 }
 0xd52   : > { %v7438_v32 = vpop.f32.mrf.mxu1 }
 0xd53   : > { %v7520_v27 = vadd.f32 %v7519_v41, %v7438_v32 }
 0xd54   : > { %v7440_v17 = vpop.f32.mrf.mxu1 }
 0xd56   : > { %v10446_v28 = vpop.f32.mrf.mxu1 }
 0xd57   : > { %v7607_v24 = vadd.f32 %v10446_v28, %v7520_v27 }
 0xd58   : > { %v7597_v23 = vpop.f32.mrf.mxu1 }
 0xd59   : > { %v7621_v44 = vadd.f32 %v7618_v56, %v7607_v24  ;;  %v7606_v16 = vadd.f32 %v7597_v23, %v7515_v1 }
 0xd5b   : > { %v7623_v62 = vmax.f32 %v7621_v44, 0.0  ;;  %v7620_v11 = vadd.f32 %v7613_v54, %v7606_v16 }
 0xd5d   : > { %7625 = vst [vmem:[%s431_s23 + $0x8] sm:$0xff] %v7623_v62  ;;  %v7622_v21 = vmax.f32 %v7620_v11, 0.0 }
 0xd5f   : > { %7624 = vst [vmem:[%s431_s23] sm:$0xff] %v7622_v21 }
 0xd60   : > { %10508 = shalt.err (!%p10505_p3)
}
 0xd61   : > { %s10509_s27 = scalar_lea.hbm %s15645_s20, 256  ;;  %s10513_s16 = scalar_lea.hbm %s15700_s13, 512 }
 0xd62   : > { %p10510_p4 = scmp.ne.s32.totalorder %s15645_s20, %s10509_s27  ;;  %p10514_p9 = scmp.lt.s32.totalorder %s15645_s20, %s15700_s13 }
 0xd63   : > { %p10515_p10 = scmp.lt.s32.totalorder %s10513_s16, %s10509_s27 }
 0xd64   : > { %p10511_p7 = pnand %p10510_p4, %p10671_p5 }
 0xd65   : > { %p10516_p11 = por %p10515_p10, %p10514_p9 }
 0xd66   : > { %p10512_p8 = pneg %p10511_p7 }
 0xd68   : > { %p10517_p12 = pnand %p10516_p11, %p10512_p8 }
 0xd6a   : > { %10520 = shalt.err (!%p10517_p12)
}
 0xd6b   : > { %s10561_s21 = smov 128   ;;  %s10562_s24 = smov 8  }
 0xd6c   : > { %10447 = dma.vmem_to_hbm [thread:$0]  (%p10671_p5), %s15640_s0, 256, %s15645_s20, %s15647_s15, %s10561_s21, %s10561_s21, %s10562_s24  }
 0xd6d PF: > { %p10453_p13 = scmp.ge.s32.totalorder %s10555_s28, 2  ;;  %s7655_s22 = sand.u32 1, %s10543_s25  }
 0xd6e   : > { %s7656_s27 = scalar_lea.sflag [#allocation3], %s7655_s22 }
 0xd6f   : > { %p10450_p0 = pnand %p10453_p13, %p10675_p6 }
 0xd71   : > { %p10451_p1 = pneg %p10450_p0 }
 0xd73   : > { %10538 = dma.done.wait (%p10451_p1), %s7656_s27, 256  }
 0xd74   : > { %10540 = vsyncadd (%p10451_p1), %s7656_s27, 4294967040  ;;  %s16311_s23 = sld [smem:[#allocation5_spill]]  ;;  %p23_p2 = scmp.ge.s32.totalorder %s10658_s14, 4  }
 0xd75   : > { %s16312_s27 = sld [smem:[#allocation6_spill]]  ;;  %s16313_s25 = smov %s10547_s26 }
 0xd76   : > { %s16315_s28 = smov %s10658_s14  ;;  %25 = sbr.rel (!%p23_p2) target bundleno = 5 (0x5), region = 119 }
 0xd7a   : > { %s16314_s26 = smov %s16311_s23 }
 0xd7b   :  { %7661 = vsyncpa [#allocation3], 1 }
 0xd7c   :  { %7663 = vsyncpa [#allocation3 + $0x1], 1 }

</bundles_post_ra>
